<compile_context>
chip_gen: v7x
topology: tpu7x:2x2x1
jax: 0.10.0
libtpu: 0.0.40
codegen_flags: <defaults>
</compile_context>

<pallas_src>
import jax
import jax.numpy as jnp
from jax import lax
from jax.experimental import pallas as pl
from jax.experimental.pallas import tpu as pltpu

_PAD = 8  # flat-tail slack so dilated-tap slab slices never index past a scratch buffer


def _make_kernel(cin, cf, ccls, H, W):
    H0 = H - 2                 # rows after conv0 (3x3, dil=1, valid); buffer width stays W
    H1, W1 = H - 6, W - 6      # after conv1 (3x3, dil=2, valid); valid width W-6, buffer width W
    HP, WP = H1 // 2, W1 // 2  # after 2x2/2 avgpool; buffer width becomes exactly WP
    H2, W2 = HP - 6, WP - 6    # after conv2 (3x3, dil=3, valid); valid width W2, buffer width WP
    f32 = jnp.float32

    def conv3x3_flat(src_ref, w_ref, b_ref, dil, wbuf, hout):
        # src_ref: (Cin, rows*wbuf + pad) flat activation with row stride = wbuf.
        # Returns (Cout, hout*wbuf); columns beyond the valid width are garbage
        # that downstream stages never read into valid positions.
        L = hout * wbuf
        acc = None
        for dy in range(3):
            for dx in range(3):
                sl = src_ref[:, pl.ds(dy * dil * wbuf + dx * dil, L)]       # (Cin, L)
                t = jnp.dot(w_ref[dy, dx], sl, preferred_element_type=f32)  # (Cout, L)
                acc = t if acc is None else acc + t
        return acc + b_ref[...]   # bias (Cout, 1) broadcasts over lanes

    def kernel(x_ref, w0_ref, b0_ref, w1_ref, b1_ref, w2_ref, b2_ref,
               wc_ref, bc_ref, pool_ref, rh_ref, rwt_ref, out_ref,
               xf, a0, a1, ap, a2, cls3):
        # ---- import the NCHW sample into a lane-dense flat (Cin, H*W) scratch ----
        for y in range(H):
            xf[:, pl.ds(y * W, W)] = x_ref[:, y, :].astype(f32)
        xf[:, pl.ds(H * W, _PAD)] = jnp.zeros((cin, _PAD), f32)

        # ---- conv0 (3x3, dil=1, valid) + ReLU ----
        a0[:, pl.ds(0, H0 * W)] = jnp.maximum(
            conv3x3_flat(xf, w0_ref, b0_ref, 1, W, H0), 0.0)
        a0[:, pl.ds(H0 * W, _PAD)] = jnp.zeros((cf, _PAD), f32)

        # ---- conv1 (3x3, dil=2, valid) + ReLU ----
        a1[:, pl.ds(0, H1 * W)] = jnp.maximum(
            conv3x3_flat(a0, w1_ref, b1_ref, 2, W, H1), 0.0)

        # ---- avgpool 2x2 stride 2: add the two rows, then matmul with a 0.25
        #      column-pairing matrix (W1, WP) ----
        for yp in range(HP):
            r = (a1[:, pl.ds((2 * yp) * W, W1)] +
                 a1[:, pl.ds((2 * yp + 1) * W, W1)])                        # (Cf, W1)
            ap[:, pl.ds(yp * WP, WP)] = jnp.dot(
                r, pool_ref[...], preferred_element_type=f32)               # (Cf, WP)
        ap[:, pl.ds(HP * WP, _PAD)] = jnp.zeros((cf, _PAD), f32)

        # ---- conv2 (3x3, dil=3, valid) + ReLU ----
        a2[:, pl.ds(0, H2 * WP)] = jnp.maximum(
            conv3x3_flat(ap, w2_ref, b2_ref, 3, WP, H2), 0.0)

        # ---- conv_cls (1x1) ----
        clsf = jnp.dot(wc_ref[...], a2[:, pl.ds(0, H2 * WP)],
                       preferred_element_type=f32) + bc_ref[...]            # (Ccls, H2*WP)
        for ys in range(H2):
            cls3[:, ys, :] = clsf[:, ys * WP:ys * WP + W2]                  # keep valid cols

        # ---- bilinear upsample (align_corners=True) back to (H, W) ----
        rh = rh_ref[...]       # (H, H2)
        rwt = rwt_ref[...]     # (W2, W)
        for c in range(ccls):
            t = jnp.dot(rh, cls3[c], preferred_element_type=f32)            # (H, W2)
            out_ref[c] = jnp.dot(t, rwt,
                                 preferred_element_type=f32).astype(out_ref.dtype)

    return kernel, (H0, H1, W1, HP, WP, H2, W2)


def _interp_matrix(out_size, src_size):
    """Bilinear interpolation matrix (out_size, src_size), align_corners=True."""
    if src_size == 1:
        return jnp.ones((out_size, 1), jnp.float32)
    if out_size == 1:
        t = jnp.zeros((1,), jnp.float32)
    else:
        t = jnp.arange(out_size, dtype=jnp.float32) * ((src_size - 1) / (out_size - 1))
    i0 = jnp.clip(jnp.floor(t).astype(jnp.int32), 0, src_size - 1)
    i1 = jnp.minimum(i0 + 1, src_size - 1)
    w = t - i0.astype(jnp.float32)
    eye = jnp.eye(src_size, dtype=jnp.float32)
    return (1.0 - w)[:, None] * eye[i0] + w[:, None] * eye[i1]


def _full_spec(arr):
    nd = arr.ndim

    def idx(i):
        return (0,) * nd

    return pl.BlockSpec(arr.shape, idx)


def dilated_fcn_forward(x, params):
    """Forward of DilatedFCN.  x: (N, Cin, H, W).  Returns (N, num_classes, H, W)."""
    w0, b0, w1, b1, w2, b2, wc, bc = params
    n, cin, H, W = x.shape
    cf = w0.shape[0]
    ccls = wc.shape[0]

    kernel, dims = _make_kernel(cin, cf, ccls, H, W)
    H0, H1, W1, HP, WP, H2, W2 = dims
    assert H2 >= 1 and W2 >= 1, "input spatial size too small for this network"

    # Kernel-friendly parameter layouts (tiny host-side reshapes, negligible traffic).
    w0r = jnp.transpose(w0, (2, 3, 0, 1)).astype(jnp.float32)   # (3,3,Cf,Cin)
    w1r = jnp.transpose(w1, (2, 3, 0, 1)).astype(jnp.float32)
    w2r = jnp.transpose(w2, (2, 3, 0, 1)).astype(jnp.float32)
    wcr = wc.reshape(ccls, cf).astype(jnp.float32)              # (Ccls, Cf)
    b0c = b0.reshape(cf, 1).astype(jnp.float32)
    b1c = b1.reshape(cf, 1).astype(jnp.float32)
    b2c = b2.reshape(cf, 1).astype(jnp.float32)
    bcc = bc.reshape(ccls, 1).astype(jnp.float32)

    # avgpool-as-matmul: (W1, WP) with 0.25 at (2*xp, xp) and (2*xp+1, xp).
    cols = jnp.arange(W1) // 2
    pool_mat = ((cols[:, None] == jnp.arange(WP)[None, :]) &
                (jnp.arange(W1)[:, None] < 2 * WP)).astype(jnp.float32) * 0.25

    rh = _interp_matrix(H, H2)           # (H, H2)
    rwt = _interp_matrix(W, W2).T        # (W2, W)

    grid_spec = pltpu.PrefetchScalarGridSpec(
        num_scalar_prefetch=0,
        grid=(n,),
        in_specs=[
            pl.BlockSpec((None, cin, H, W), lambda i: (i, 0, 0, 0)),
            _full_spec(w0r), _full_spec(b0c),
            _full_spec(w1r), _full_spec(b1c),
            _full_spec(w2r), _full_spec(b2c),
            _full_spec(wcr), _full_spec(bcc),
            _full_spec(pool_mat), _full_spec(rh), _full_spec(rwt),
        ],
        out_specs=pl.BlockSpec((None, ccls, H, W), lambda i: (i, 0, 0, 0)),
        scratch_shapes=[
            pltpu.VMEM((cin, H * W + _PAD), jnp.float32),      # flat input
            pltpu.VMEM((cf, H0 * W + _PAD), jnp.float32),      # conv0 out
            pltpu.VMEM((cf, H1 * W + _PAD), jnp.float32),      # conv1 out
            pltpu.VMEM((cf, HP * WP + _PAD), jnp.float32),     # pooled
            pltpu.VMEM((cf, H2 * WP + _PAD), jnp.float32),     # conv2 out
            pltpu.VMEM((ccls, H2, W2), jnp.float32),           # conv_cls valid region
        ],
    )

    return pl.pallas_call(
        kernel,
        out_shape=jax.ShapeDtypeStruct((n, ccls, H, W), x.dtype),
        grid_spec=grid_spec,
        compiler_params=pltpu.CompilerParams(dimension_semantics=("parallel",)),
    )(x, w0r, b0c, w1r, b1c, w2r, b2c, wcr, bcc, pool_mat, rh, rwt)


def _reference_forward(x, params):
    """Pure-JAX reference (lax convs + reduce_window + explicit bilinear gather)."""
    w0, b0, w1, b1, w2, b2, wc, bc = params
    dn = lax.conv_dimension_numbers(x.shape, w0.shape, ("NCHW", "OIHW", "NCHW"))

    def conv(v, w, b, dil):
        y = lax.conv_general_dilated(
            v, w, window_strides=(1, 1), padding="VALID",
            rhs_dilation=(dil, dil), dimension_numbers=dn,
            precision=lax.Precision.HIGHEST)
        return y + b[None, :, None, None]

    y = jax.nn.relu(conv(x, w0, b0, 1))
    y = jax.nn.relu(conv(y, w1, b1, 2))
    y = lax.reduce_window(y, 0.0, lax.add, (1, 1, 2, 2), (1, 1, 2, 2), "VALID") / 4.0
    y = jax.nn.relu(conv(y, w2, b2, 3))
    y = conv(y, wc, bc, 1)

    _, _, hs, ws = y.shape
    H, W = x.shape[2], x.shape[3]

    def coords(out_size, src_size):
        if src_size == 1 or out_size == 1:
            t = jnp.zeros((out_size,), jnp.float32)
        else:
            t = jnp.arange(out_size, dtype=jnp.float32) * ((src_size - 1) / (out_size - 1))
        i0 = jnp.clip(jnp.floor(t).astype(jnp.int32), 0, src_size - 1)
        i1 = jnp.minimum(i0 + 1, src_size - 1)
        return i0, i1, t - i0.astype(jnp.float32)

    y0, y1, wy = coords(H, hs)
    x0, x1, wx = coords(W, ws)
    rows = (y[:, :, y0, :] * (1 - wy)[None, None, :, None] +
            y[:, :, y1, :] * wy[None, None, :, None])
    out = (rows[:, :, :, x0] * (1 - wx)[None, None, None, :] +
           rows[:, :, :, x1] * wx[None, None, None, :])
    return out


if __name__ == "__main__":
    key = jax.random.PRNGKey(0)
    ks = jax.random.split(key, 9)

    # Small shapes consistent with the module (num_features / conv_features shrunk).
    n, cin, H, W = 2, 16, 24, 24
    cf, ccls = 32, 9

    def winit(k, shape, fan_in):
        return jax.random.normal(k, shape, dtype=jnp.float32) / jnp.sqrt(float(fan_in))

    x = jax.random.normal(ks[0], (n, cin, H, W), dtype=jnp.float32)
    w0 = winit(ks[1], (cf, cin, 3, 3), cin * 9)
    b0 = 0.1 * jax.random.normal(ks[2], (cf,), dtype=jnp.float32)
    w1 = winit(ks[3], (cf, cf, 3, 3), cf * 9)
    b1 = 0.1 * jax.random.normal(ks[4], (cf,), dtype=jnp.float32)
    w2 = winit(ks[5], (cf, cf, 3, 3), cf * 9)
    b2 = 0.1 * jax.random.normal(ks[6], (cf,), dtype=jnp.float32)
    wc = winit(ks[7], (ccls, cf, 1, 1), cf)
    bc = 0.1 * jax.random.normal(ks[8], (ccls,), dtype=jnp.float32)
    params = (w0, b0, w1, b1, w2, b2, wc, bc)

    out = jax.jit(dilated_fcn_forward)(x, params)
    out = jax.block_until_ready(out)

    ref = _reference_forward(x, params)
    assert out.shape == ref.shape, (out.shape, ref.shape)
    max_err = float(jnp.max(jnp.abs(out - ref)))
    assert jnp.allclose(out, ref, rtol=2e-3, atol=2e-3), max_err

    print("KERNEL_OK")
</pallas_src>

<mosaic_0001>
module attributes {stable_mosaic.version = 11 : i64} {
  func.func @kernel(%arg0: i32, %arg1: memref<1x16x24x24xf32, #tpu.memory_space<vmem>>, %arg2: memref<3x3x32x16xf32, #tpu.memory_space<vmem>>, %arg3: memref<32x1xf32, #tpu.memory_space<vmem>>, %arg4: memref<3x3x32x32xf32, #tpu.memory_space<vmem>>, %arg5: memref<32x1xf32, #tpu.memory_space<vmem>>, %arg6: memref<3x3x32x32xf32, #tpu.memory_space<vmem>>, %arg7: memref<32x1xf32, #tpu.memory_space<vmem>>, %arg8: memref<9x32xf32, #tpu.memory_space<vmem>>, %arg9: memref<9x1xf32, #tpu.memory_space<vmem>>, %arg10: memref<18x9xf32, #tpu.memory_space<vmem>>, %arg11: memref<24x3xf32, #tpu.memory_space<vmem>>, %arg12: memref<3x24xf32, #tpu.memory_space<vmem>>, %arg13: memref<1x9x24x24xf32, #tpu.memory_space<vmem>>, %arg14: memref<16x584xf32, #tpu.memory_space<vmem>>, %arg15: memref<32x536xf32, #tpu.memory_space<vmem>>, %arg16: memref<32x440xf32, #tpu.memory_space<vmem>>, %arg17: memref<32x89xf32, #tpu.memory_space<vmem>>, %arg18: memref<32x35xf32, #tpu.memory_space<vmem>>, %arg19: memref<9x3x3xf32, #tpu.memory_space<vmem>>) attributes {dimension_semantics = [#tpu.dimension_semantics<parallel>], iteration_bounds = array<i64: 2>, scalar_prefetch = 0 : i64, scratch_operands = 6 : i64, tpu.core_type = #tpu.core_type<tc>, window_params = [{transform_indices = @transform_0, window_bounds = array<i64: 1, 16, 24, 24>}, {pipeline_mode = #tpu.pipeline_mode<synchronous>, transform_indices = @transform_1, window_bounds = array<i64: 3, 3, 32, 16>}, {pipeline_mode = #tpu.pipeline_mode<synchronous>, transform_indices = @transform_2, window_bounds = array<i64: 32, 1>}, {pipeline_mode = #tpu.pipeline_mode<synchronous>, transform_indices = @transform_3, window_bounds = array<i64: 3, 3, 32, 32>}, {pipeline_mode = #tpu.pipeline_mode<synchronous>, transform_indices = @transform_4, window_bounds = array<i64: 32, 1>}, {pipeline_mode = #tpu.pipeline_mode<synchronous>, transform_indices = @transform_5, window_bounds = array<i64: 3, 3, 32, 32>}, {pipeline_mode = #tpu.pipeline_mode<synchronous>, transform_indices = @transform_6, window_bounds = array<i64: 32, 1>}, {pipeline_mode = #tpu.pipeline_mode<synchronous>, transform_indices = @transform_7, window_bounds = array<i64: 9, 32>}, {pipeline_mode = #tpu.pipeline_mode<synchronous>, transform_indices = @transform_8, window_bounds = array<i64: 9, 1>}, {pipeline_mode = #tpu.pipeline_mode<synchronous>, transform_indices = @transform_9, window_bounds = array<i64: 18, 9>}, {pipeline_mode = #tpu.pipeline_mode<synchronous>, transform_indices = @transform_10, window_bounds = array<i64: 24, 3>}, {pipeline_mode = #tpu.pipeline_mode<synchronous>, transform_indices = @transform_11, window_bounds = array<i64: 3, 24>}, {transform_indices = @transform_12, window_bounds = array<i64: 1, 9, 24, 24>}]} {
    %c0 = arith.constant 0 : index
    %c0_0 = arith.constant 0 : index
    %c0_1 = arith.constant 0 : index
    %c0_2 = arith.constant 0 : index
    %0 = vector.load %arg1[%c0, %c0_0, %c0_1, %c0_2] : memref<1x16x24x24xf32, #tpu.memory_space<vmem>>, vector<1x16x1x24xf32>
    %1 = vector.shape_cast %0 : vector<1x16x1x24xf32> to vector<16x24xf32>
    %c0_3 = arith.constant 0 : index
    %c0_4 = arith.constant 0 : index
    %2 = vector.load %arg14[%c0_3, %c0_4] : memref<16x584xf32, #tpu.memory_space<vmem>>, vector<16x24xf32>
    tpu.vector_store %arg14[%c0_3, %c0_4], %1 {strides = array<i32>} : memref<16x584xf32, #tpu.memory_space<vmem>>, vector<16x24xf32>,
    %c0_5 = arith.constant 0 : index
    %c0_6 = arith.constant 0 : index
    %c1 = arith.constant 1 : index
    %c0_7 = arith.constant 0 : index
    %3 = vector.load %arg1[%c0_5, %c0_6, %c1, %c0_7] : memref<1x16x24x24xf32, #tpu.memory_space<vmem>>, vector<1x16x1x24xf32>
    %4 = vector.shape_cast %3 : vector<1x16x1x24xf32> to vector<16x24xf32>
    %c0_8 = arith.constant 0 : index
    %c24 = arith.constant 24 : index
    %5 = vector.load %arg14[%c0_8, %c24] : memref<16x584xf32, #tpu.memory_space<vmem>>, vector<16x24xf32>
    tpu.vector_store %arg14[%c0_8, %c24], %4 {strides = array<i32>} : memref<16x584xf32, #tpu.memory_space<vmem>>, vector<16x24xf32>,
    %c0_9 = arith.constant 0 : index
    %c0_10 = arith.constant 0 : index
    %c2 = arith.constant 2 : index
    %c0_11 = arith.constant 0 : index
    %6 = vector.load %arg1[%c0_9, %c0_10, %c2, %c0_11] : memref<1x16x24x24xf32, #tpu.memory_space<vmem>>, vector<1x16x1x24xf32>
    %7 = vector.shape_cast %6 : vector<1x16x1x24xf32> to vector<16x24xf32>
    %c0_12 = arith.constant 0 : index
    %c48 = arith.constant 48 : index
    %8 = vector.load %arg14[%c0_12, %c48] : memref<16x584xf32, #tpu.memory_space<vmem>>, vector<16x24xf32>
    tpu.vector_store %arg14[%c0_12, %c48], %7 {strides = array<i32>} : memref<16x584xf32, #tpu.memory_space<vmem>>, vector<16x24xf32>,
    %c0_13 = arith.constant 0 : index
    %c0_14 = arith.constant 0 : index
    %c3 = arith.constant 3 : index
    %c0_15 = arith.constant 0 : index
    %9 = vector.load %arg1[%c0_13, %c0_14, %c3, %c0_15] : memref<1x16x24x24xf32, #tpu.memory_space<vmem>>, vector<1x16x1x24xf32>
    %10 = vector.shape_cast %9 : vector<1x16x1x24xf32> to vector<16x24xf32>
    %c0_16 = arith.constant 0 : index
    %c72 = arith.constant 72 : index
    %11 = vector.load %arg14[%c0_16, %c72] : memref<16x584xf32, #tpu.memory_space<vmem>>, vector<16x24xf32>
    tpu.vector_store %arg14[%c0_16, %c72], %10 {strides = array<i32>} : memref<16x584xf32, #tpu.memory_space<vmem>>, vector<16x24xf32>,
    %c0_17 = arith.constant 0 : index
    %c0_18 = arith.constant 0 : index
    %c4 = arith.constant 4 : index
    %c0_19 = arith.constant 0 : index
    %12 = vector.load %arg1[%c0_17, %c0_18, %c4, %c0_19] : memref<1x16x24x24xf32, #tpu.memory_space<vmem>>, vector<1x16x1x24xf32>
    %13 = vector.shape_cast %12 : vector<1x16x1x24xf32> to vector<16x24xf32>
    %c0_20 = arith.constant 0 : index
    %c96 = arith.constant 96 : index
    %14 = vector.load %arg14[%c0_20, %c96] : memref<16x584xf32, #tpu.memory_space<vmem>>, vector<16x24xf32>
    tpu.vector_store %arg14[%c0_20, %c96], %13 {strides = array<i32>} : memref<16x584xf32, #tpu.memory_space<vmem>>, vector<16x24xf32>,
    %c0_21 = arith.constant 0 : index
    %c0_22 = arith.constant 0 : index
    %c5 = arith.constant 5 : index
    %c0_23 = arith.constant 0 : index
    %15 = vector.load %arg1[%c0_21, %c0_22, %c5, %c0_23] : memref<1x16x24x24xf32, #tpu.memory_space<vmem>>, vector<1x16x1x24xf32>
    %16 = vector.shape_cast %15 : vector<1x16x1x24xf32> to vector<16x24xf32>
    %c0_24 = arith.constant 0 : index
    %c120 = arith.constant 120 : index
    %17 = vector.load %arg14[%c0_24, %c120] : memref<16x584xf32, #tpu.memory_space<vmem>>, vector<16x24xf32>
    tpu.vector_store %arg14[%c0_24, %c120], %16 {strides = array<i32>} : memref<16x584xf32, #tpu.memory_space<vmem>>, vector<16x24xf32>,
    %c0_25 = arith.constant 0 : index
    %c0_26 = arith.constant 0 : index
    %c6 = arith.constant 6 : index
    %c0_27 = arith.constant 0 : index
    %18 = vector.load %arg1[%c0_25, %c0_26, %c6, %c0_27] : memref<1x16x24x24xf32, #tpu.memory_space<vmem>>, vector<1x16x1x24xf32>
    %19 = vector.shape_cast %18 : vector<1x16x1x24xf32> to vector<16x24xf32>
    %c0_28 = arith.constant 0 : index
    %c144 = arith.constant 144 : index
    %20 = vector.load %arg14[%c0_28, %c144] : memref<16x584xf32, #tpu.memory_space<vmem>>, vector<16x24xf32>
    tpu.vector_store %arg14[%c0_28, %c144], %19 {strides = array<i32>} : memref<16x584xf32, #tpu.memory_space<vmem>>, vector<16x24xf32>,
    %c0_29 = arith.constant 0 : index
    %c0_30 = arith.constant 0 : index
    %c7 = arith.constant 7 : index
    %c0_31 = arith.constant 0 : index
    %21 = vector.load %arg1[%c0_29, %c0_30, %c7, %c0_31] : memref<1x16x24x24xf32, #tpu.memory_space<vmem>>, vector<1x16x1x24xf32>
    %22 = vector.shape_cast %21 : vector<1x16x1x24xf32> to vector<16x24xf32>
    %c0_32 = arith.constant 0 : index
    %c168 = arith.constant 168 : index
    %23 = vector.load %arg14[%c0_32, %c168] : memref<16x584xf32, #tpu.memory_space<vmem>>, vector<16x24xf32>
    tpu.vector_store %arg14[%c0_32, %c168], %22 {strides = array<i32>} : memref<16x584xf32, #tpu.memory_space<vmem>>, vector<16x24xf32>,
    %c0_33 = arith.constant 0 : index
    %c0_34 = arith.constant 0 : index
    %c8 = arith.constant 8 : index
    %c0_35 = arith.constant 0 : index
    %24 = vector.load %arg1[%c0_33, %c0_34, %c8, %c0_35] : memref<1x16x24x24xf32, #tpu.memory_space<vmem>>, vector<1x16x1x24xf32>
    %25 = vector.shape_cast %24 : vector<1x16x1x24xf32> to vector<16x24xf32>
    %c0_36 = arith.constant 0 : index
    %c192 = arith.constant 192 : index
    %26 = vector.load %arg14[%c0_36, %c192] : memref<16x584xf32, #tpu.memory_space<vmem>>, vector<16x24xf32>
    tpu.vector_store %arg14[%c0_36, %c192], %25 {strides = array<i32>} : memref<16x584xf32, #tpu.memory_space<vmem>>, vector<16x24xf32>,
    %c0_37 = arith.constant 0 : index
    %c0_38 = arith.constant 0 : index
    %c9 = arith.constant 9 : index
    %c0_39 = arith.constant 0 : index
    %27 = vector.load %arg1[%c0_37, %c0_38, %c9, %c0_39] : memref<1x16x24x24xf32, #tpu.memory_space<vmem>>, vector<1x16x1x24xf32>
    %28 = vector.shape_cast %27 : vector<1x16x1x24xf32> to vector<16x24xf32>
    %c0_40 = arith.constant 0 : index
    %c216 = arith.constant 216 : index
    %29 = vector.load %arg14[%c0_40, %c216] : memref<16x584xf32, #tpu.memory_space<vmem>>, vector<16x24xf32>
    tpu.vector_store %arg14[%c0_40, %c216], %28 {strides = array<i32>} : memref<16x584xf32, #tpu.memory_space<vmem>>, vector<16x24xf32>,
    %c0_41 = arith.constant 0 : index
    %c0_42 = arith.constant 0 : index
    %c10 = arith.constant 10 : index
    %c0_43 = arith.constant 0 : index
    %30 = vector.load %arg1[%c0_41, %c0_42, %c10, %c0_43] : memref<1x16x24x24xf32, #tpu.memory_space<vmem>>, vector<1x16x1x24xf32>
    %31 = vector.shape_cast %30 : vector<1x16x1x24xf32> to vector<16x24xf32>
    %c0_44 = arith.constant 0 : index
    %c240 = arith.constant 240 : index
    %32 = vector.load %arg14[%c0_44, %c240] : memref<16x584xf32, #tpu.memory_space<vmem>>, vector<16x24xf32>
    tpu.vector_store %arg14[%c0_44, %c240], %31 {strides = array<i32>} : memref<16x584xf32, #tpu.memory_space<vmem>>, vector<16x24xf32>,
    %c0_45 = arith.constant 0 : index
    %c0_46 = arith.constant 0 : index
    %c11 = arith.constant 11 : index
    %c0_47 = arith.constant 0 : index
    %33 = vector.load %arg1[%c0_45, %c0_46, %c11, %c0_47] : memref<1x16x24x24xf32, #tpu.memory_space<vmem>>, vector<1x16x1x24xf32>
    %34 = vector.shape_cast %33 : vector<1x16x1x24xf32> to vector<16x24xf32>
    %c0_48 = arith.constant 0 : index
    %c264 = arith.constant 264 : index
    %35 = vector.load %arg14[%c0_48, %c264] : memref<16x584xf32, #tpu.memory_space<vmem>>, vector<16x24xf32>
    tpu.vector_store %arg14[%c0_48, %c264], %34 {strides = array<i32>} : memref<16x584xf32, #tpu.memory_space<vmem>>, vector<16x24xf32>,
    %c0_49 = arith.constant 0 : index
    %c0_50 = arith.constant 0 : index
    %c12 = arith.constant 12 : index
    %c0_51 = arith.constant 0 : index
    %36 = vector.load %arg1[%c0_49, %c0_50, %c12, %c0_51] : memref<1x16x24x24xf32, #tpu.memory_space<vmem>>, vector<1x16x1x24xf32>
    %37 = vector.shape_cast %36 : vector<1x16x1x24xf32> to vector<16x24xf32>
    %c0_52 = arith.constant 0 : index
    %c288 = arith.constant 288 : index
    %38 = vector.load %arg14[%c0_52, %c288] : memref<16x584xf32, #tpu.memory_space<vmem>>, vector<16x24xf32>
    tpu.vector_store %arg14[%c0_52, %c288], %37 {strides = array<i32>} : memref<16x584xf32, #tpu.memory_space<vmem>>, vector<16x24xf32>,
    %c0_53 = arith.constant 0 : index
    %c0_54 = arith.constant 0 : index
    %c13 = arith.constant 13 : index
    %c0_55 = arith.constant 0 : index
    %39 = vector.load %arg1[%c0_53, %c0_54, %c13, %c0_55] : memref<1x16x24x24xf32, #tpu.memory_space<vmem>>, vector<1x16x1x24xf32>
    %40 = vector.shape_cast %39 : vector<1x16x1x24xf32> to vector<16x24xf32>
    %c0_56 = arith.constant 0 : index
    %c312 = arith.constant 312 : index
    %41 = vector.load %arg14[%c0_56, %c312] : memref<16x584xf32, #tpu.memory_space<vmem>>, vector<16x24xf32>
    tpu.vector_store %arg14[%c0_56, %c312], %40 {strides = array<i32>} : memref<16x584xf32, #tpu.memory_space<vmem>>, vector<16x24xf32>,
    %c0_57 = arith.constant 0 : index
    %c0_58 = arith.constant 0 : index
    %c14 = arith.constant 14 : index
    %c0_59 = arith.constant 0 : index
    %42 = vector.load %arg1[%c0_57, %c0_58, %c14, %c0_59] : memref<1x16x24x24xf32, #tpu.memory_space<vmem>>, vector<1x16x1x24xf32>
    %43 = vector.shape_cast %42 : vector<1x16x1x24xf32> to vector<16x24xf32>
    %c0_60 = arith.constant 0 : index
    %c336 = arith.constant 336 : index
    %44 = vector.load %arg14[%c0_60, %c336] : memref<16x584xf32, #tpu.memory_space<vmem>>, vector<16x24xf32>
    tpu.vector_store %arg14[%c0_60, %c336], %43 {strides = array<i32>} : memref<16x584xf32, #tpu.memory_space<vmem>>, vector<16x24xf32>,
    %c0_61 = arith.constant 0 : index
    %c0_62 = arith.constant 0 : index
    %c15 = arith.constant 15 : index
    %c0_63 = arith.constant 0 : index
    %45 = vector.load %arg1[%c0_61, %c0_62, %c15, %c0_63] : memref<1x16x24x24xf32, #tpu.memory_space<vmem>>, vector<1x16x1x24xf32>
    %46 = vector.shape_cast %45 : vector<1x16x1x24xf32> to vector<16x24xf32>
    %c0_64 = arith.constant 0 : index
    %c360 = arith.constant 360 : index
    %47 = vector.load %arg14[%c0_64, %c360] : memref<16x584xf32, #tpu.memory_space<vmem>>, vector<16x24xf32>
    tpu.vector_store %arg14[%c0_64, %c360], %46 {strides = array<i32>} : memref<16x584xf32, #tpu.memory_space<vmem>>, vector<16x24xf32>,
    %c0_65 = arith.constant 0 : index
    %c0_66 = arith.constant 0 : index
    %c16 = arith.constant 16 : index
    %c0_67 = arith.constant 0 : index
    %48 = vector.load %arg1[%c0_65, %c0_66, %c16, %c0_67] : memref<1x16x24x24xf32, #tpu.memory_space<vmem>>, vector<1x16x1x24xf32>
    %49 = vector.shape_cast %48 : vector<1x16x1x24xf32> to vector<16x24xf32>
    %c0_68 = arith.constant 0 : index
    %c384 = arith.constant 384 : index
    %50 = vector.load %arg14[%c0_68, %c384] : memref<16x584xf32, #tpu.memory_space<vmem>>, vector<16x24xf32>
    tpu.vector_store %arg14[%c0_68, %c384], %49 {strides = array<i32>} : memref<16x584xf32, #tpu.memory_space<vmem>>, vector<16x24xf32>,
    %c0_69 = arith.constant 0 : index
    %c0_70 = arith.constant 0 : index
    %c17 = arith.constant 17 : index
    %c0_71 = arith.constant 0 : index
    %51 = vector.load %arg1[%c0_69, %c0_70, %c17, %c0_71] : memref<1x16x24x24xf32, #tpu.memory_space<vmem>>, vector<1x16x1x24xf32>
    %52 = vector.shape_cast %51 : vector<1x16x1x24xf32> to vector<16x24xf32>
    %c0_72 = arith.constant 0 : index
    %c408 = arith.constant 408 : index
    %53 = vector.load %arg14[%c0_72, %c408] : memref<16x584xf32, #tpu.memory_space<vmem>>, vector<16x24xf32>
    tpu.vector_store %arg14[%c0_72, %c408], %52 {strides = array<i32>} : memref<16x584xf32, #tpu.memory_space<vmem>>, vector<16x24xf32>,
    %c0_73 = arith.constant 0 : index
    %c0_74 = arith.constant 0 : index
    %c18 = arith.constant 18 : index
    %c0_75 = arith.constant 0 : index
    %54 = vector.load %arg1[%c0_73, %c0_74, %c18, %c0_75] : memref<1x16x24x24xf32, #tpu.memory_space<vmem>>, vector<1x16x1x24xf32>
    %55 = vector.shape_cast %54 : vector<1x16x1x24xf32> to vector<16x24xf32>
    %c0_76 = arith.constant 0 : index
    %c432 = arith.constant 432 : index
    %56 = vector.load %arg14[%c0_76, %c432] : memref<16x584xf32, #tpu.memory_space<vmem>>, vector<16x24xf32>
    tpu.vector_store %arg14[%c0_76, %c432], %55 {strides = array<i32>} : memref<16x584xf32, #tpu.memory_space<vmem>>, vector<16x24xf32>,
    %c0_77 = arith.constant 0 : index
    %c0_78 = arith.constant 0 : index
    %c19 = arith.constant 19 : index
    %c0_79 = arith.constant 0 : index
    %57 = vector.load %arg1[%c0_77, %c0_78, %c19, %c0_79] : memref<1x16x24x24xf32, #tpu.memory_space<vmem>>, vector<1x16x1x24xf32>
    %58 = vector.shape_cast %57 : vector<1x16x1x24xf32> to vector<16x24xf32>
    %c0_80 = arith.constant 0 : index
    %c456 = arith.constant 456 : index
    %59 = vector.load %arg14[%c0_80, %c456] : memref<16x584xf32, #tpu.memory_space<vmem>>, vector<16x24xf32>
    tpu.vector_store %arg14[%c0_80, %c456], %58 {strides = array<i32>} : memref<16x584xf32, #tpu.memory_space<vmem>>, vector<16x24xf32>,
    %c0_81 = arith.constant 0 : index
    %c0_82 = arith.constant 0 : index
    %c20 = arith.constant 20 : index
    %c0_83 = arith.constant 0 : index
    %60 = vector.load %arg1[%c0_81, %c0_82, %c20, %c0_83] : memref<1x16x24x24xf32, #tpu.memory_space<vmem>>, vector<1x16x1x24xf32>
    %61 = vector.shape_cast %60 : vector<1x16x1x24xf32> to vector<16x24xf32>
    %c0_84 = arith.constant 0 : index
    %c480 = arith.constant 480 : index
    %62 = vector.load %arg14[%c0_84, %c480] : memref<16x584xf32, #tpu.memory_space<vmem>>, vector<16x24xf32>
    tpu.vector_store %arg14[%c0_84, %c480], %61 {strides = array<i32>} : memref<16x584xf32, #tpu.memory_space<vmem>>, vector<16x24xf32>,
    %c0_85 = arith.constant 0 : index
    %c0_86 = arith.constant 0 : index
    %c21 = arith.constant 21 : index
    %c0_87 = arith.constant 0 : index
    %63 = vector.load %arg1[%c0_85, %c0_86, %c21, %c0_87] : memref<1x16x24x24xf32, #tpu.memory_space<vmem>>, vector<1x16x1x24xf32>
    %64 = vector.shape_cast %63 : vector<1x16x1x24xf32> to vector<16x24xf32>
    %c0_88 = arith.constant 0 : index
    %c504 = arith.constant 504 : index
    %65 = vector.load %arg14[%c0_88, %c504] : memref<16x584xf32, #tpu.memory_space<vmem>>, vector<16x24xf32>
    tpu.vector_store %arg14[%c0_88, %c504], %64 {strides = array<i32>} : memref<16x584xf32, #tpu.memory_space<vmem>>, vector<16x24xf32>,
    %c0_89 = arith.constant 0 : index
    %c0_90 = arith.constant 0 : index
    %c22 = arith.constant 22 : index
    %c0_91 = arith.constant 0 : index
    %66 = vector.load %arg1[%c0_89, %c0_90, %c22, %c0_91] : memref<1x16x24x24xf32, #tpu.memory_space<vmem>>, vector<1x16x1x24xf32>
    %67 = vector.shape_cast %66 : vector<1x16x1x24xf32> to vector<16x24xf32>
    %c0_92 = arith.constant 0 : index
    %c528 = arith.constant 528 : index
    %68 = vector.load %arg14[%c0_92, %c528] : memref<16x584xf32, #tpu.memory_space<vmem>>, vector<16x24xf32>
    tpu.vector_store %arg14[%c0_92, %c528], %67 {strides = array<i32>} : memref<16x584xf32, #tpu.memory_space<vmem>>, vector<16x24xf32>,
    %c0_93 = arith.constant 0 : index
    %c0_94 = arith.constant 0 : index
    %c23 = arith.constant 23 : index
    %c0_95 = arith.constant 0 : index
    %69 = vector.load %arg1[%c0_93, %c0_94, %c23, %c0_95] : memref<1x16x24x24xf32, #tpu.memory_space<vmem>>, vector<1x16x1x24xf32>
    %70 = vector.shape_cast %69 : vector<1x16x1x24xf32> to vector<16x24xf32>
    %c0_96 = arith.constant 0 : index
    %c552 = arith.constant 552 : index
    %71 = vector.load %arg14[%c0_96, %c552] : memref<16x584xf32, #tpu.memory_space<vmem>>, vector<16x24xf32>
    tpu.vector_store %arg14[%c0_96, %c552], %70 {strides = array<i32>} : memref<16x584xf32, #tpu.memory_space<vmem>>, vector<16x24xf32>,
    %cst = arith.constant 0.000000e+00 : f32
    %72 = vector.broadcast %cst : f32 to vector<16x8xf32>
    %c0_97 = arith.constant 0 : index
    %c576 = arith.constant 576 : index
    %73 = vector.load %arg14[%c0_97, %c576] : memref<16x584xf32, #tpu.memory_space<vmem>>, vector<16x8xf32>
    tpu.vector_store %arg14[%c0_97, %c576], %72 {strides = array<i32>} : memref<16x584xf32, #tpu.memory_space<vmem>>, vector<16x8xf32>,
    %c0_98 = arith.constant 0 : index
    %c0_99 = arith.constant 0 : index
    %74 = vector.load %arg14[%c0_98, %c0_99] : memref<16x584xf32, #tpu.memory_space<vmem>>, vector<16x528xf32>
    %c0_100 = arith.constant 0 : index
    %c0_101 = arith.constant 0 : index
    %c0_102 = arith.constant 0 : index
    %c0_103 = arith.constant 0 : index
    %75 = vector.load %arg2[%c0_100, %c0_101, %c0_102, %c0_103] : memref<3x3x32x16xf32, #tpu.memory_space<vmem>>, vector<1x1x32x16xf32>
    %76 = vector.shape_cast %75 : vector<1x1x32x16xf32> to vector<32x16xf32>
    %cst_104 = arith.constant dense<0.000000e+00> : vector<32x528xf32>
    %77 = tpu.matmul %76, %74, %cst_104 {dimension_numbers = #tpu.dot_dimension_numbers<[1], [0], [0], [1], [0, 0, 1, 1], [], []>} : vector<32x16xf32>, vector<16x528xf32>, vector<32x528xf32> -> vector<32x528xf32>
    %c0_105 = arith.constant 0 : index
    %c1_106 = arith.constant 1 : index
    %78 = vector.load %arg14[%c0_105, %c1_106] : memref<16x584xf32, #tpu.memory_space<vmem>>, vector<16x528xf32>
    %c0_107 = arith.constant 0 : index
    %c1_108 = arith.constant 1 : index
    %c0_109 = arith.constant 0 : index
    %c0_110 = arith.constant 0 : index
    %79 = vector.load %arg2[%c0_107, %c1_108, %c0_109, %c0_110] : memref<3x3x32x16xf32, #tpu.memory_space<vmem>>, vector<1x1x32x16xf32>
    %80 = vector.shape_cast %79 : vector<1x1x32x16xf32> to vector<32x16xf32>
    %cst_111 = arith.constant dense<0.000000e+00> : vector<32x528xf32>
    %81 = tpu.matmul %80, %78, %cst_111 {dimension_numbers = #tpu.dot_dimension_numbers<[1], [0], [0], [1], [0, 0, 1, 1], [], []>} : vector<32x16xf32>, vector<16x528xf32>, vector<32x528xf32> -> vector<32x528xf32>
    %82 = arith.addf %77, %81 : vector<32x528xf32>
    %c0_112 = arith.constant 0 : index
    %c2_113 = arith.constant 2 : index
    %83 = vector.load %arg14[%c0_112, %c2_113] : memref<16x584xf32, #tpu.memory_space<vmem>>, vector<16x528xf32>
    %c0_114 = arith.constant 0 : index
    %c2_115 = arith.constant 2 : index
    %c0_116 = arith.constant 0 : index
    %c0_117 = arith.constant 0 : index
    %84 = vector.load %arg2[%c0_114, %c2_115, %c0_116, %c0_117] : memref<3x3x32x16xf32, #tpu.memory_space<vmem>>, vector<1x1x32x16xf32>
    %85 = vector.shape_cast %84 : vector<1x1x32x16xf32> to vector<32x16xf32>
    %cst_118 = arith.constant dense<0.000000e+00> : vector<32x528xf32>
    %86 = tpu.matmul %85, %83, %cst_118 {dimension_numbers = #tpu.dot_dimension_numbers<[1], [0], [0], [1], [0, 0, 1, 1], [], []>} : vector<32x16xf32>, vector<16x528xf32>, vector<32x528xf32> -> vector<32x528xf32>
    %87 = arith.addf %82, %86 : vector<32x528xf32>
    %c0_119 = arith.constant 0 : index
    %c24_120 = arith.constant 24 : index
    %88 = vector.load %arg14[%c0_119, %c24_120] : memref<16x584xf32, #tpu.memory_space<vmem>>, vector<16x528xf32>
    %c1_121 = arith.constant 1 : index
    %c0_122 = arith.constant 0 : index
    %c0_123 = arith.constant 0 : index
    %c0_124 = arith.constant 0 : index
    %89 = vector.load %arg2[%c1_121, %c0_122, %c0_123, %c0_124] : memref<3x3x32x16xf32, #tpu.memory_space<vmem>>, vector<1x1x32x16xf32>
    %90 = vector.shape_cast %89 : vector<1x1x32x16xf32> to vector<32x16xf32>
    %cst_125 = arith.constant dense<0.000000e+00> : vector<32x528xf32>
    %91 = tpu.matmul %90, %88, %cst_125 {dimension_numbers = #tpu.dot_dimension_numbers<[1], [0], [0], [1], [0, 0, 1, 1], [], []>} : vector<32x16xf32>, vector<16x528xf32>, vector<32x528xf32> -> vector<32x528xf32>
    %92 = arith.addf %87, %91 : vector<32x528xf32>
    %c0_126 = arith.constant 0 : index
    %c25 = arith.constant 25 : index
    %93 = vector.load %arg14[%c0_126, %c25] : memref<16x584xf32, #tpu.memory_space<vmem>>, vector<16x528xf32>
    %c1_127 = arith.constant 1 : index
    %c1_128 = arith.constant 1 : index
    %c0_129 = arith.constant 0 : index
    %c0_130 = arith.constant 0 : index
    %94 = vector.load %arg2[%c1_127, %c1_128, %c0_129, %c0_130] : memref<3x3x32x16xf32, #tpu.memory_space<vmem>>, vector<1x1x32x16xf32>
    %95 = vector.shape_cast %94 : vector<1x1x32x16xf32> to vector<32x16xf32>
    %cst_131 = arith.constant dense<0.000000e+00> : vector<32x528xf32>
    %96 = tpu.matmul %95, %93, %cst_131 {dimension_numbers = #tpu.dot_dimension_numbers<[1], [0], [0], [1], [0, 0, 1, 1], [], []>} : vector<32x16xf32>, vector<16x528xf32>, vector<32x528xf32> -> vector<32x528xf32>
    %97 = arith.addf %92, %96 : vector<32x528xf32>
    %c0_132 = arith.constant 0 : index
    %c26 = arith.constant 26 : index
    %98 = vector.load %arg14[%c0_132, %c26] : memref<16x584xf32, #tpu.memory_space<vmem>>, vector<16x528xf32>
    %c1_133 = arith.constant 1 : index
    %c2_134 = arith.constant 2 : index
    %c0_135 = arith.constant 0 : index
    %c0_136 = arith.constant 0 : index
    %99 = vector.load %arg2[%c1_133, %c2_134, %c0_135, %c0_136] : memref<3x3x32x16xf32, #tpu.memory_space<vmem>>, vector<1x1x32x16xf32>
    %100 = vector.shape_cast %99 : vector<1x1x32x16xf32> to vector<32x16xf32>
    %cst_137 = arith.constant dense<0.000000e+00> : vector<32x528xf32>
    %101 = tpu.matmul %100, %98, %cst_137 {dimension_numbers = #tpu.dot_dimension_numbers<[1], [0], [0], [1], [0, 0, 1, 1], [], []>} : vector<32x16xf32>, vector<16x528xf32>, vector<32x528xf32> -> vector<32x528xf32>
    %102 = arith.addf %97, %101 : vector<32x528xf32>
    %c0_138 = arith.constant 0 : index
    %c48_139 = arith.constant 48 : index
    %103 = vector.load %arg14[%c0_138, %c48_139] : memref<16x584xf32, #tpu.memory_space<vmem>>, vector<16x528xf32>
    %c2_140 = arith.constant 2 : index
    %c0_141 = arith.constant 0 : index
    %c0_142 = arith.constant 0 : index
    %c0_143 = arith.constant 0 : index
    %104 = vector.load %arg2[%c2_140, %c0_141, %c0_142, %c0_143] : memref<3x3x32x16xf32, #tpu.memory_space<vmem>>, vector<1x1x32x16xf32>
    %105 = vector.shape_cast %104 : vector<1x1x32x16xf32> to vector<32x16xf32>
    %cst_144 = arith.constant dense<0.000000e+00> : vector<32x528xf32>
    %106 = tpu.matmul %105, %103, %cst_144 {dimension_numbers = #tpu.dot_dimension_numbers<[1], [0], [0], [1], [0, 0, 1, 1], [], []>} : vector<32x16xf32>, vector<16x528xf32>, vector<32x528xf32> -> vector<32x528xf32>
    %107 = arith.addf %102, %106 : vector<32x528xf32>
    %c0_145 = arith.constant 0 : index
    %c49 = arith.constant 49 : index
    %108 = vector.load %arg14[%c0_145, %c49] : memref<16x584xf32, #tpu.memory_space<vmem>>, vector<16x528xf32>
    %c2_146 = arith.constant 2 : index
    %c1_147 = arith.constant 1 : index
    %c0_148 = arith.constant 0 : index
    %c0_149 = arith.constant 0 : index
    %109 = vector.load %arg2[%c2_146, %c1_147, %c0_148, %c0_149] : memref<3x3x32x16xf32, #tpu.memory_space<vmem>>, vector<1x1x32x16xf32>
    %110 = vector.shape_cast %109 : vector<1x1x32x16xf32> to vector<32x16xf32>
    %cst_150 = arith.constant dense<0.000000e+00> : vector<32x528xf32>
    %111 = tpu.matmul %110, %108, %cst_150 {dimension_numbers = #tpu.dot_dimension_numbers<[1], [0], [0], [1], [0, 0, 1, 1], [], []>} : vector<32x16xf32>, vector<16x528xf32>, vector<32x528xf32> -> vector<32x528xf32>
    %112 = arith.addf %107, %111 : vector<32x528xf32>
    %c0_151 = arith.constant 0 : index
    %c50 = arith.constant 50 : index
    %113 = vector.load %arg14[%c0_151, %c50] : memref<16x584xf32, #tpu.memory_space<vmem>>, vector<16x528xf32>
    %c2_152 = arith.constant 2 : index
    %c2_153 = arith.constant 2 : index
    %c0_154 = arith.constant 0 : index
    %c0_155 = arith.constant 0 : index
    %114 = vector.load %arg2[%c2_152, %c2_153, %c0_154, %c0_155] : memref<3x3x32x16xf32, #tpu.memory_space<vmem>>, vector<1x1x32x16xf32>
    %115 = vector.shape_cast %114 : vector<1x1x32x16xf32> to vector<32x16xf32>
    %cst_156 = arith.constant dense<0.000000e+00> : vector<32x528xf32>
    %116 = tpu.matmul %115, %113, %cst_156 {dimension_numbers = #tpu.dot_dimension_numbers<[1], [0], [0], [1], [0, 0, 1, 1], [], []>} : vector<32x16xf32>, vector<16x528xf32>, vector<32x528xf32> -> vector<32x528xf32>
    %117 = arith.addf %112, %116 : vector<32x528xf32>
    %c0_157 = arith.constant 0 : index
    %c0_158 = arith.constant 0 : index
    %118 = vector.load %arg3[%c0_157, %c0_158] : memref<32x1xf32, #tpu.memory_space<vmem>>, vector<32x1xf32>
    %119 = vector.broadcast %118 : vector<32x1xf32> to vector<32x528xf32>
    %120 = arith.addf %117, %119 : vector<32x528xf32>
    %cst_159 = arith.constant 0.000000e+00 : f32
    %121 = vector.broadcast %cst_159 : f32 to vector<32x528xf32>
    %122 = arith.maximumf %120, %121 : vector<32x528xf32>
    %c0_160 = arith.constant 0 : index
    %c0_161 = arith.constant 0 : index
    %123 = vector.load %arg15[%c0_160, %c0_161] : memref<32x536xf32, #tpu.memory_space<vmem>>, vector<32x528xf32>
    tpu.vector_store %arg15[%c0_160, %c0_161], %122 {strides = array<i32>} : memref<32x536xf32, #tpu.memory_space<vmem>>, vector<32x528xf32>,
    %cst_162 = arith.constant 0.000000e+00 : f32
    %124 = vector.broadcast %cst_162 : f32 to vector<32x8xf32>
    %c0_163 = arith.constant 0 : index
    %c528_164 = arith.constant 528 : index
    %125 = vector.load %arg15[%c0_163, %c528_164] : memref<32x536xf32, #tpu.memory_space<vmem>>, vector<32x8xf32>
    tpu.vector_store %arg15[%c0_163, %c528_164], %124 {strides = array<i32>} : memref<32x536xf32, #tpu.memory_space<vmem>>, vector<32x8xf32>,
    %c0_165 = arith.constant 0 : index
    %c0_166 = arith.constant 0 : index
    %126 = vector.load %arg15[%c0_165, %c0_166] : memref<32x536xf32, #tpu.memory_space<vmem>>, vector<32x432xf32>
    %c0_167 = arith.constant 0 : index
    %c0_168 = arith.constant 0 : index
    %c0_169 = arith.constant 0 : index
    %c0_170 = arith.constant 0 : index
    %127 = vector.load %arg4[%c0_167, %c0_168, %c0_169, %c0_170] : memref<3x3x32x32xf32, #tpu.memory_space<vmem>>, vector<1x1x32x32xf32>
    %128 = vector.shape_cast %127 : vector<1x1x32x32xf32> to vector<32x32xf32>
    %cst_171 = arith.constant dense<0.000000e+00> : vector<32x432xf32>
    %129 = tpu.matmul %128, %126, %cst_171 {dimension_numbers = #tpu.dot_dimension_numbers<[1], [0], [0], [1], [0, 0, 1, 1], [], []>} : vector<32x32xf32>, vector<32x432xf32>, vector<32x432xf32> -> vector<32x432xf32>
    %c0_172 = arith.constant 0 : index
    %c2_173 = arith.constant 2 : index
    %130 = vector.load %arg15[%c0_172, %c2_173] : memref<32x536xf32, #tpu.memory_space<vmem>>, vector<32x432xf32>
    %c0_174 = arith.constant 0 : index
    %c1_175 = arith.constant 1 : index
    %c0_176 = arith.constant 0 : index
    %c0_177 = arith.constant 0 : index
    %131 = vector.load %arg4[%c0_174, %c1_175, %c0_176, %c0_177] : memref<3x3x32x32xf32, #tpu.memory_space<vmem>>, vector<1x1x32x32xf32>
    %132 = vector.shape_cast %131 : vector<1x1x32x32xf32> to vector<32x32xf32>
    %cst_178 = arith.constant dense<0.000000e+00> : vector<32x432xf32>
    %133 = tpu.matmul %132, %130, %cst_178 {dimension_numbers = #tpu.dot_dimension_numbers<[1], [0], [0], [1], [0, 0, 1, 1], [], []>} : vector<32x32xf32>, vector<32x432xf32>, vector<32x432xf32> -> vector<32x432xf32>
    %134 = arith.addf %129, %133 : vector<32x432xf32>
    %c0_179 = arith.constant 0 : index
    %c4_180 = arith.constant 4 : index
    %135 = vector.load %arg15[%c0_179, %c4_180] : memref<32x536xf32, #tpu.memory_space<vmem>>, vector<32x432xf32>
    %c0_181 = arith.constant 0 : index
    %c2_182 = arith.constant 2 : index
    %c0_183 = arith.constant 0 : index
    %c0_184 = arith.constant 0 : index
    %136 = vector.load %arg4[%c0_181, %c2_182, %c0_183, %c0_184] : memref<3x3x32x32xf32, #tpu.memory_space<vmem>>, vector<1x1x32x32xf32>
    %137 = vector.shape_cast %136 : vector<1x1x32x32xf32> to vector<32x32xf32>
    %cst_185 = arith.constant dense<0.000000e+00> : vector<32x432xf32>
    %138 = tpu.matmul %137, %135, %cst_185 {dimension_numbers = #tpu.dot_dimension_numbers<[1], [0], [0], [1], [0, 0, 1, 1], [], []>} : vector<32x32xf32>, vector<32x432xf32>, vector<32x432xf32> -> vector<32x432xf32>
    %139 = arith.addf %134, %138 : vector<32x432xf32>
    %c0_186 = arith.constant 0 : index
    %c48_187 = arith.constant 48 : index
    %140 = vector.load %arg15[%c0_186, %c48_187] : memref<32x536xf32, #tpu.memory_space<vmem>>, vector<32x432xf32>
    %c1_188 = arith.constant 1 : index
    %c0_189 = arith.constant 0 : index
    %c0_190 = arith.constant 0 : index
    %c0_191 = arith.constant 0 : index
    %141 = vector.load %arg4[%c1_188, %c0_189, %c0_190, %c0_191] : memref<3x3x32x32xf32, #tpu.memory_space<vmem>>, vector<1x1x32x32xf32>
    %142 = vector.shape_cast %141 : vector<1x1x32x32xf32> to vector<32x32xf32>
    %cst_192 = arith.constant dense<0.000000e+00> : vector<32x432xf32>
    %143 = tpu.matmul %142, %140, %cst_192 {dimension_numbers = #tpu.dot_dimension_numbers<[1], [0], [0], [1], [0, 0, 1, 1], [], []>} : vector<32x32xf32>, vector<32x432xf32>, vector<32x432xf32> -> vector<32x432xf32>
    %144 = arith.addf %139, %143 : vector<32x432xf32>
    %c0_193 = arith.constant 0 : index
    %c50_194 = arith.constant 50 : index
    %145 = vector.load %arg15[%c0_193, %c50_194] : memref<32x536xf32, #tpu.memory_space<vmem>>, vector<32x432xf32>
    %c1_195 = arith.constant 1 : index
    %c1_196 = arith.constant 1 : index
    %c0_197 = arith.constant 0 : index
    %c0_198 = arith.constant 0 : index
    %146 = vector.load %arg4[%c1_195, %c1_196, %c0_197, %c0_198] : memref<3x3x32x32xf32, #tpu.memory_space<vmem>>, vector<1x1x32x32xf32>
    %147 = vector.shape_cast %146 : vector<1x1x32x32xf32> to vector<32x32xf32>
    %cst_199 = arith.constant dense<0.000000e+00> : vector<32x432xf32>
    %148 = tpu.matmul %147, %145, %cst_199 {dimension_numbers = #tpu.dot_dimension_numbers<[1], [0], [0], [1], [0, 0, 1, 1], [], []>} : vector<32x32xf32>, vector<32x432xf32>, vector<32x432xf32> -> vector<32x432xf32>
    %149 = arith.addf %144, %148 : vector<32x432xf32>
    %c0_200 = arith.constant 0 : index
    %c52 = arith.constant 52 : index
    %150 = vector.load %arg15[%c0_200, %c52] : memref<32x536xf32, #tpu.memory_space<vmem>>, vector<32x432xf32>
    %c1_201 = arith.constant 1 : index
    %c2_202 = arith.constant 2 : index
    %c0_203 = arith.constant 0 : index
    %c0_204 = arith.constant 0 : index
    %151 = vector.load %arg4[%c1_201, %c2_202, %c0_203, %c0_204] : memref<3x3x32x32xf32, #tpu.memory_space<vmem>>, vector<1x1x32x32xf32>
    %152 = vector.shape_cast %151 : vector<1x1x32x32xf32> to vector<32x32xf32>
    %cst_205 = arith.constant dense<0.000000e+00> : vector<32x432xf32>
    %153 = tpu.matmul %152, %150, %cst_205 {dimension_numbers = #tpu.dot_dimension_numbers<[1], [0], [0], [1], [0, 0, 1, 1], [], []>} : vector<32x32xf32>, vector<32x432xf32>, vector<32x432xf32> -> vector<32x432xf32>
    %154 = arith.addf %149, %153 : vector<32x432xf32>
    %c0_206 = arith.constant 0 : index
    %c96_207 = arith.constant 96 : index
    %155 = vector.load %arg15[%c0_206, %c96_207] : memref<32x536xf32, #tpu.memory_space<vmem>>, vector<32x432xf32>
    %c2_208 = arith.constant 2 : index
    %c0_209 = arith.constant 0 : index
    %c0_210 = arith.constant 0 : index
    %c0_211 = arith.constant 0 : index
    %156 = vector.load %arg4[%c2_208, %c0_209, %c0_210, %c0_211] : memref<3x3x32x32xf32, #tpu.memory_space<vmem>>, vector<1x1x32x32xf32>
    %157 = vector.shape_cast %156 : vector<1x1x32x32xf32> to vector<32x32xf32>
    %cst_212 = arith.constant dense<0.000000e+00> : vector<32x432xf32>
    %158 = tpu.matmul %157, %155, %cst_212 {dimension_numbers = #tpu.dot_dimension_numbers<[1], [0], [0], [1], [0, 0, 1, 1], [], []>} : vector<32x32xf32>, vector<32x432xf32>, vector<32x432xf32> -> vector<32x432xf32>
    %159 = arith.addf %154, %158 : vector<32x432xf32>
    %c0_213 = arith.constant 0 : index
    %c98 = arith.constant 98 : index
    %160 = vector.load %arg15[%c0_213, %c98] : memref<32x536xf32, #tpu.memory_space<vmem>>, vector<32x432xf32>
    %c2_214 = arith.constant 2 : index
    %c1_215 = arith.constant 1 : index
    %c0_216 = arith.constant 0 : index
    %c0_217 = arith.constant 0 : index
    %161 = vector.load %arg4[%c2_214, %c1_215, %c0_216, %c0_217] : memref<3x3x32x32xf32, #tpu.memory_space<vmem>>, vector<1x1x32x32xf32>
    %162 = vector.shape_cast %161 : vector<1x1x32x32xf32> to vector<32x32xf32>
    %cst_218 = arith.constant dense<0.000000e+00> : vector<32x432xf32>
    %163 = tpu.matmul %162, %160, %cst_218 {dimension_numbers = #tpu.dot_dimension_numbers<[1], [0], [0], [1], [0, 0, 1, 1], [], []>} : vector<32x32xf32>, vector<32x432xf32>, vector<32x432xf32> -> vector<32x432xf32>
    %164 = arith.addf %159, %163 : vector<32x432xf32>
    %c0_219 = arith.constant 0 : index
    %c100 = arith.constant 100 : index
    %165 = vector.load %arg15[%c0_219, %c100] : memref<32x536xf32, #tpu.memory_space<vmem>>, vector<32x432xf32>
    %c2_220 = arith.constant 2 : index
    %c2_221 = arith.constant 2 : index
    %c0_222 = arith.constant 0 : index
    %c0_223 = arith.constant 0 : index
    %166 = vector.load %arg4[%c2_220, %c2_221, %c0_222, %c0_223] : memref<3x3x32x32xf32, #tpu.memory_space<vmem>>, vector<1x1x32x32xf32>
    %167 = vector.shape_cast %166 : vector<1x1x32x32xf32> to vector<32x32xf32>
    %cst_224 = arith.constant dense<0.000000e+00> : vector<32x432xf32>
    %168 = tpu.matmul %167, %165, %cst_224 {dimension_numbers = #tpu.dot_dimension_numbers<[1], [0], [0], [1], [0, 0, 1, 1], [], []>} : vector<32x32xf32>, vector<32x432xf32>, vector<32x432xf32> -> vector<32x432xf32>
    %169 = arith.addf %164, %168 : vector<32x432xf32>
    %c0_225 = arith.constant 0 : index
    %c0_226 = arith.constant 0 : index
    %170 = vector.load %arg5[%c0_225, %c0_226] : memref<32x1xf32, #tpu.memory_space<vmem>>, vector<32x1xf32>
    %171 = vector.broadcast %170 : vector<32x1xf32> to vector<32x432xf32>
    %172 = arith.addf %169, %171 : vector<32x432xf32>
    %cst_227 = arith.constant 0.000000e+00 : f32
    %173 = vector.broadcast %cst_227 : f32 to vector<32x432xf32>
    %174 = arith.maximumf %172, %173 : vector<32x432xf32>
    %c0_228 = arith.constant 0 : index
    %c0_229 = arith.constant 0 : index
    %175 = vector.load %arg16[%c0_228, %c0_229] : memref<32x440xf32, #tpu.memory_space<vmem>>, vector<32x432xf32>
    tpu.vector_store %arg16[%c0_228, %c0_229], %174 {strides = array<i32>} : memref<32x440xf32, #tpu.memory_space<vmem>>, vector<32x432xf32>,
    %c0_230 = arith.constant 0 : index
    %c0_231 = arith.constant 0 : index
    %176 = vector.load %arg16[%c0_230, %c0_231] : memref<32x440xf32, #tpu.memory_space<vmem>>, vector<32x18xf32>
    %c0_232 = arith.constant 0 : index
    %c24_233 = arith.constant 24 : index
    %177 = vector.load %arg16[%c0_232, %c24_233] : memref<32x440xf32, #tpu.memory_space<vmem>>, vector<32x18xf32>
    %178 = arith.addf %176, %177 : vector<32x18xf32>
    %c0_234 = arith.constant 0 : index
    %c0_235 = arith.constant 0 : index
    %179 = vector.load %arg10[%c0_234, %c0_235] : memref<18x9xf32, #tpu.memory_space<vmem>>, vector<18x9xf32>
    %cst_236 = arith.constant dense<0.000000e+00> : vector<32x9xf32>
    %180 = tpu.matmul %178, %179, %cst_236 {dimension_numbers = #tpu.dot_dimension_numbers<[1], [0], [0], [1], [0, 0, 1, 1], [], []>} : vector<32x18xf32>, vector<18x9xf32>, vector<32x9xf32> -> vector<32x9xf32>
    %c0_237 = arith.constant 0 : index
    %c0_238 = arith.constant 0 : index
    %181 = vector.load %arg17[%c0_237, %c0_238] : memref<32x89xf32, #tpu.memory_space<vmem>>, vector<32x9xf32>
    tpu.vector_store %arg17[%c0_237, %c0_238], %180 {strides = array<i32>} : memref<32x89xf32, #tpu.memory_space<vmem>>, vector<32x9xf32>,
    %c0_239 = arith.constant 0 : index
    %c48_240 = arith.constant 48 : index
    %182 = vector.load %arg16[%c0_239, %c48_240] : memref<32x440xf32, #tpu.memory_space<vmem>>, vector<32x18xf32>
    %c0_241 = arith.constant 0 : index
    %c72_242 = arith.constant 72 : index
    %183 = vector.load %arg16[%c0_241, %c72_242] : memref<32x440xf32, #tpu.memory_space<vmem>>, vector<32x18xf32>
    %184 = arith.addf %182, %183 : vector<32x18xf32>
    %c0_243 = arith.constant 0 : index
    %c0_244 = arith.constant 0 : index
    %185 = vector.load %arg10[%c0_243, %c0_244] : memref<18x9xf32, #tpu.memory_space<vmem>>, vector<18x9xf32>
    %cst_245 = arith.constant dense<0.000000e+00> : vector<32x9xf32>
    %186 = tpu.matmul %184, %185, %cst_245 {dimension_numbers = #tpu.dot_dimension_numbers<[1], [0], [0], [1], [0, 0, 1, 1], [], []>} : vector<32x18xf32>, vector<18x9xf32>, vector<32x9xf32> -> vector<32x9xf32>
    %c0_246 = arith.constant 0 : index
    %c9_247 = arith.constant 9 : index
    %187 = vector.load %arg17[%c0_246, %c9_247] : memref<32x89xf32, #tpu.memory_space<vmem>>, vector<32x9xf32>
    tpu.vector_store %arg17[%c0_246, %c9_247], %186 {strides = array<i32>} : memref<32x89xf32, #tpu.memory_space<vmem>>, vector<32x9xf32>,
    %c0_248 = arith.constant 0 : index
    %c96_249 = arith.constant 96 : index
    %188 = vector.load %arg16[%c0_248, %c96_249] : memref<32x440xf32, #tpu.memory_space<vmem>>, vector<32x18xf32>
    %c0_250 = arith.constant 0 : index
    %c120_251 = arith.constant 120 : index
    %189 = vector.load %arg16[%c0_250, %c120_251] : memref<32x440xf32, #tpu.memory_space<vmem>>, vector<32x18xf32>
    %190 = arith.addf %188, %189 : vector<32x18xf32>
    %c0_252 = arith.constant 0 : index
    %c0_253 = arith.constant 0 : index
    %191 = vector.load %arg10[%c0_252, %c0_253] : memref<18x9xf32, #tpu.memory_space<vmem>>, vector<18x9xf32>
    %cst_254 = arith.constant dense<0.000000e+00> : vector<32x9xf32>
    %192 = tpu.matmul %190, %191, %cst_254 {dimension_numbers = #tpu.dot_dimension_numbers<[1], [0], [0], [1], [0, 0, 1, 1], [], []>} : vector<32x18xf32>, vector<18x9xf32>, vector<32x9xf32> -> vector<32x9xf32>
    %c0_255 = arith.constant 0 : index
    %c18_256 = arith.constant 18 : index
    %193 = vector.load %arg17[%c0_255, %c18_256] : memref<32x89xf32, #tpu.memory_space<vmem>>, vector<32x9xf32>
    tpu.vector_store %arg17[%c0_255, %c18_256], %192 {strides = array<i32>} : memref<32x89xf32, #tpu.memory_space<vmem>>, vector<32x9xf32>,
    %c0_257 = arith.constant 0 : index
    %c144_258 = arith.constant 144 : index
    %194 = vector.load %arg16[%c0_257, %c144_258] : memref<32x440xf32, #tpu.memory_space<vmem>>, vector<32x18xf32>
    %c0_259 = arith.constant 0 : index
    %c168_260 = arith.constant 168 : index
    %195 = vector.load %arg16[%c0_259, %c168_260] : memref<32x440xf32, #tpu.memory_space<vmem>>, vector<32x18xf32>
    %196 = arith.addf %194, %195 : vector<32x18xf32>
    %c0_261 = arith.constant 0 : index
    %c0_262 = arith.constant 0 : index
    %197 = vector.load %arg10[%c0_261, %c0_262] : memref<18x9xf32, #tpu.memory_space<vmem>>, vector<18x9xf32>
    %cst_263 = arith.constant dense<0.000000e+00> : vector<32x9xf32>
    %198 = tpu.matmul %196, %197, %cst_263 {dimension_numbers = #tpu.dot_dimension_numbers<[1], [0], [0], [1], [0, 0, 1, 1], [], []>} : vector<32x18xf32>, vector<18x9xf32>, vector<32x9xf32> -> vector<32x9xf32>
    %c0_264 = arith.constant 0 : index
    %c27 = arith.constant 27 : index
    %199 = vector.load %arg17[%c0_264, %c27] : memref<32x89xf32, #tpu.memory_space<vmem>>, vector<32x9xf32>
    tpu.vector_store %arg17[%c0_264, %c27], %198 {strides = array<i32>} : memref<32x89xf32, #tpu.memory_space<vmem>>, vector<32x9xf32>,
    %c0_265 = arith.constant 0 : index
    %c192_266 = arith.constant 192 : index
    %200 = vector.load %arg16[%c0_265, %c192_266] : memref<32x440xf32, #tpu.memory_space<vmem>>, vector<32x18xf32>
    %c0_267 = arith.constant 0 : index
    %c216_268 = arith.constant 216 : index
    %201 = vector.load %arg16[%c0_267, %c216_268] : memref<32x440xf32, #tpu.memory_space<vmem>>, vector<32x18xf32>
    %202 = arith.addf %200, %201 : vector<32x18xf32>
    %c0_269 = arith.constant 0 : index
    %c0_270 = arith.constant 0 : index
    %203 = vector.load %arg10[%c0_269, %c0_270] : memref<18x9xf32, #tpu.memory_space<vmem>>, vector<18x9xf32>
    %cst_271 = arith.constant dense<0.000000e+00> : vector<32x9xf32>
    %204 = tpu.matmul %202, %203, %cst_271 {dimension_numbers = #tpu.dot_dimension_numbers<[1], [0], [0], [1], [0, 0, 1, 1], [], []>} : vector<32x18xf32>, vector<18x9xf32>, vector<32x9xf32> -> vector<32x9xf32>
    %c0_272 = arith.constant 0 : index
    %c36 = arith.constant 36 : index
    %205 = vector.load %arg17[%c0_272, %c36] : memref<32x89xf32, #tpu.memory_space<vmem>>, vector<32x9xf32>
    tpu.vector_store %arg17[%c0_272, %c36], %204 {strides = array<i32>} : memref<32x89xf32, #tpu.memory_space<vmem>>, vector<32x9xf32>,
    %c0_273 = arith.constant 0 : index
    %c240_274 = arith.constant 240 : index
    %206 = vector.load %arg16[%c0_273, %c240_274] : memref<32x440xf32, #tpu.memory_space<vmem>>, vector<32x18xf32>
    %c0_275 = arith.constant 0 : index
    %c264_276 = arith.constant 264 : index
    %207 = vector.load %arg16[%c0_275, %c264_276] : memref<32x440xf32, #tpu.memory_space<vmem>>, vector<32x18xf32>
    %208 = arith.addf %206, %207 : vector<32x18xf32>
    %c0_277 = arith.constant 0 : index
    %c0_278 = arith.constant 0 : index
    %209 = vector.load %arg10[%c0_277, %c0_278] : memref<18x9xf32, #tpu.memory_space<vmem>>, vector<18x9xf32>
    %cst_279 = arith.constant dense<0.000000e+00> : vector<32x9xf32>
    %210 = tpu.matmul %208, %209, %cst_279 {dimension_numbers = #tpu.dot_dimension_numbers<[1], [0], [0], [1], [0, 0, 1, 1], [], []>} : vector<32x18xf32>, vector<18x9xf32>, vector<32x9xf32> -> vector<32x9xf32>
    %c0_280 = arith.constant 0 : index
    %c45 = arith.constant 45 : index
    %211 = vector.load %arg17[%c0_280, %c45] : memref<32x89xf32, #tpu.memory_space<vmem>>, vector<32x9xf32>
    tpu.vector_store %arg17[%c0_280, %c45], %210 {strides = array<i32>} : memref<32x89xf32, #tpu.memory_space<vmem>>, vector<32x9xf32>,
    %c0_281 = arith.constant 0 : index
    %c288_282 = arith.constant 288 : index
    %212 = vector.load %arg16[%c0_281, %c288_282] : memref<32x440xf32, #tpu.memory_space<vmem>>, vector<32x18xf32>
    %c0_283 = arith.constant 0 : index
    %c312_284 = arith.constant 312 : index
    %213 = vector.load %arg16[%c0_283, %c312_284] : memref<32x440xf32, #tpu.memory_space<vmem>>, vector<32x18xf32>
    %214 = arith.addf %212, %213 : vector<32x18xf32>
    %c0_285 = arith.constant 0 : index
    %c0_286 = arith.constant 0 : index
    %215 = vector.load %arg10[%c0_285, %c0_286] : memref<18x9xf32, #tpu.memory_space<vmem>>, vector<18x9xf32>
    %cst_287 = arith.constant dense<0.000000e+00> : vector<32x9xf32>
    %216 = tpu.matmul %214, %215, %cst_287 {dimension_numbers = #tpu.dot_dimension_numbers<[1], [0], [0], [1], [0, 0, 1, 1], [], []>} : vector<32x18xf32>, vector<18x9xf32>, vector<32x9xf32> -> vector<32x9xf32>
    %c0_288 = arith.constant 0 : index
    %c54 = arith.constant 54 : index
    %217 = vector.load %arg17[%c0_288, %c54] : memref<32x89xf32, #tpu.memory_space<vmem>>, vector<32x9xf32>
    tpu.vector_store %arg17[%c0_288, %c54], %216 {strides = array<i32>} : memref<32x89xf32, #tpu.memory_space<vmem>>, vector<32x9xf32>,
    %c0_289 = arith.constant 0 : index
    %c336_290 = arith.constant 336 : index
    %218 = vector.load %arg16[%c0_289, %c336_290] : memref<32x440xf32, #tpu.memory_space<vmem>>, vector<32x18xf32>
    %c0_291 = arith.constant 0 : index
    %c360_292 = arith.constant 360 : index
    %219 = vector.load %arg16[%c0_291, %c360_292] : memref<32x440xf32, #tpu.memory_space<vmem>>, vector<32x18xf32>
    %220 = arith.addf %218, %219 : vector<32x18xf32>
    %c0_293 = arith.constant 0 : index
    %c0_294 = arith.constant 0 : index
    %221 = vector.load %arg10[%c0_293, %c0_294] : memref<18x9xf32, #tpu.memory_space<vmem>>, vector<18x9xf32>
    %cst_295 = arith.constant dense<0.000000e+00> : vector<32x9xf32>
    %222 = tpu.matmul %220, %221, %cst_295 {dimension_numbers = #tpu.dot_dimension_numbers<[1], [0], [0], [1], [0, 0, 1, 1], [], []>} : vector<32x18xf32>, vector<18x9xf32>, vector<32x9xf32> -> vector<32x9xf32>
    %c0_296 = arith.constant 0 : index
    %c63 = arith.constant 63 : index
    %223 = vector.load %arg17[%c0_296, %c63] : memref<32x89xf32, #tpu.memory_space<vmem>>, vector<32x9xf32>
    tpu.vector_store %arg17[%c0_296, %c63], %222 {strides = array<i32>} : memref<32x89xf32, #tpu.memory_space<vmem>>, vector<32x9xf32>,
    %c0_297 = arith.constant 0 : index
    %c384_298 = arith.constant 384 : index
    %224 = vector.load %arg16[%c0_297, %c384_298] : memref<32x440xf32, #tpu.memory_space<vmem>>, vector<32x18xf32>
    %c0_299 = arith.constant 0 : index
    %c408_300 = arith.constant 408 : index
    %225 = vector.load %arg16[%c0_299, %c408_300] : memref<32x440xf32, #tpu.memory_space<vmem>>, vector<32x18xf32>
    %226 = arith.addf %224, %225 : vector<32x18xf32>
    %c0_301 = arith.constant 0 : index
    %c0_302 = arith.constant 0 : index
    %227 = vector.load %arg10[%c0_301, %c0_302] : memref<18x9xf32, #tpu.memory_space<vmem>>, vector<18x9xf32>
    %cst_303 = arith.constant dense<0.000000e+00> : vector<32x9xf32>
    %228 = tpu.matmul %226, %227, %cst_303 {dimension_numbers = #tpu.dot_dimension_numbers<[1], [0], [0], [1], [0, 0, 1, 1], [], []>} : vector<32x18xf32>, vector<18x9xf32>, vector<32x9xf32> -> vector<32x9xf32>
    %c0_304 = arith.constant 0 : index
    %c72_305 = arith.constant 72 : index
    %229 = vector.load %arg17[%c0_304, %c72_305] : memref<32x89xf32, #tpu.memory_space<vmem>>, vector<32x9xf32>
    tpu.vector_store %arg17[%c0_304, %c72_305], %228 {strides = array<i32>} : memref<32x89xf32, #tpu.memory_space<vmem>>, vector<32x9xf32>,
    %cst_306 = arith.constant 0.000000e+00 : f32
    %230 = vector.broadcast %cst_306 : f32 to vector<32x8xf32>
    %c0_307 = arith.constant 0 : index
    %c81 = arith.constant 81 : index
    %231 = vector.load %arg17[%c0_307, %c81] : memref<32x89xf32, #tpu.memory_space<vmem>>, vector<32x8xf32>
    tpu.vector_store %arg17[%c0_307, %c81], %230 {strides = array<i32>} : memref<32x89xf32, #tpu.memory_space<vmem>>, vector<32x8xf32>,
    %c0_308 = arith.constant 0 : index
    %c0_309 = arith.constant 0 : index
    %232 = vector.load %arg17[%c0_308, %c0_309] : memref<32x89xf32, #tpu.memory_space<vmem>>, vector<32x27xf32>
    %c0_310 = arith.constant 0 : index
    %c0_311 = arith.constant 0 : index
    %c0_312 = arith.constant 0 : index
    %c0_313 = arith.constant 0 : index
    %233 = vector.load %arg6[%c0_310, %c0_311, %c0_312, %c0_313] : memref<3x3x32x32xf32, #tpu.memory_space<vmem>>, vector<1x1x32x32xf32>
    %234 = vector.shape_cast %233 : vector<1x1x32x32xf32> to vector<32x32xf32>
    %cst_314 = arith.constant dense<0.000000e+00> : vector<32x27xf32>
    %235 = tpu.matmul %234, %232, %cst_314 {dimension_numbers = #tpu.dot_dimension_numbers<[1], [0], [0], [1], [0, 0, 1, 1], [], []>} : vector<32x32xf32>, vector<32x27xf32>, vector<32x27xf32> -> vector<32x27xf32>
    %c0_315 = arith.constant 0 : index
    %c3_316 = arith.constant 3 : index
    %236 = vector.load %arg17[%c0_315, %c3_316] : memref<32x89xf32, #tpu.memory_space<vmem>>, vector<32x27xf32>
    %c0_317 = arith.constant 0 : index
    %c1_318 = arith.constant 1 : index
    %c0_319 = arith.constant 0 : index
    %c0_320 = arith.constant 0 : index
    %237 = vector.load %arg6[%c0_317, %c1_318, %c0_319, %c0_320] : memref<3x3x32x32xf32, #tpu.memory_space<vmem>>, vector<1x1x32x32xf32>
    %238 = vector.shape_cast %237 : vector<1x1x32x32xf32> to vector<32x32xf32>
    %cst_321 = arith.constant dense<0.000000e+00> : vector<32x27xf32>
    %239 = tpu.matmul %238, %236, %cst_321 {dimension_numbers = #tpu.dot_dimension_numbers<[1], [0], [0], [1], [0, 0, 1, 1], [], []>} : vector<32x32xf32>, vector<32x27xf32>, vector<32x27xf32> -> vector<32x27xf32>
    %240 = arith.addf %235, %239 : vector<32x27xf32>
    %c0_322 = arith.constant 0 : index
    %c6_323 = arith.constant 6 : index
    %241 = vector.load %arg17[%c0_322, %c6_323] : memref<32x89xf32, #tpu.memory_space<vmem>>, vector<32x27xf32>
    %c0_324 = arith.constant 0 : index
    %c2_325 = arith.constant 2 : index
    %c0_326 = arith.constant 0 : index
    %c0_327 = arith.constant 0 : index
    %242 = vector.load %arg6[%c0_324, %c2_325, %c0_326, %c0_327] : memref<3x3x32x32xf32, #tpu.memory_space<vmem>>, vector<1x1x32x32xf32>
    %243 = vector.shape_cast %242 : vector<1x1x32x32xf32> to vector<32x32xf32>
    %cst_328 = arith.constant dense<0.000000e+00> : vector<32x27xf32>
    %244 = tpu.matmul %243, %241, %cst_328 {dimension_numbers = #tpu.dot_dimension_numbers<[1], [0], [0], [1], [0, 0, 1, 1], [], []>} : vector<32x32xf32>, vector<32x27xf32>, vector<32x27xf32> -> vector<32x27xf32>
    %245 = arith.addf %240, %244 : vector<32x27xf32>
    %c0_329 = arith.constant 0 : index
    %c27_330 = arith.constant 27 : index
    %246 = vector.load %arg17[%c0_329, %c27_330] : memref<32x89xf32, #tpu.memory_space<vmem>>, vector<32x27xf32>
    %c1_331 = arith.constant 1 : index
    %c0_332 = arith.constant 0 : index
    %c0_333 = arith.constant 0 : index
    %c0_334 = arith.constant 0 : index
    %247 = vector.load %arg6[%c1_331, %c0_332, %c0_333, %c0_334] : memref<3x3x32x32xf32, #tpu.memory_space<vmem>>, vector<1x1x32x32xf32>
    %248 = vector.shape_cast %247 : vector<1x1x32x32xf32> to vector<32x32xf32>
    %cst_335 = arith.constant dense<0.000000e+00> : vector<32x27xf32>
    %249 = tpu.matmul %248, %246, %cst_335 {dimension_numbers = #tpu.dot_dimension_numbers<[1], [0], [0], [1], [0, 0, 1, 1], [], []>} : vector<32x32xf32>, vector<32x27xf32>, vector<32x27xf32> -> vector<32x27xf32>
    %250 = arith.addf %245, %249 : vector<32x27xf32>
    %c0_336 = arith.constant 0 : index
    %c30 = arith.constant 30 : index
    %251 = vector.load %arg17[%c0_336, %c30] : memref<32x89xf32, #tpu.memory_space<vmem>>, vector<32x27xf32>
    %c1_337 = arith.constant 1 : index
    %c1_338 = arith.constant 1 : index
    %c0_339 = arith.constant 0 : index
    %c0_340 = arith.constant 0 : index
    %252 = vector.load %arg6[%c1_337, %c1_338, %c0_339, %c0_340] : memref<3x3x32x32xf32, #tpu.memory_space<vmem>>, vector<1x1x32x32xf32>
    %253 = vector.shape_cast %252 : vector<1x1x32x32xf32> to vector<32x32xf32>
    %cst_341 = arith.constant dense<0.000000e+00> : vector<32x27xf32>
    %254 = tpu.matmul %253, %251, %cst_341 {dimension_numbers = #tpu.dot_dimension_numbers<[1], [0], [0], [1], [0, 0, 1, 1], [], []>} : vector<32x32xf32>, vector<32x27xf32>, vector<32x27xf32> -> vector<32x27xf32>
    %255 = arith.addf %250, %254 : vector<32x27xf32>
    %c0_342 = arith.constant 0 : index
    %c33 = arith.constant 33 : index
    %256 = vector.load %arg17[%c0_342, %c33] : memref<32x89xf32, #tpu.memory_space<vmem>>, vector<32x27xf32>
    %c1_343 = arith.constant 1 : index
    %c2_344 = arith.constant 2 : index
    %c0_345 = arith.constant 0 : index
    %c0_346 = arith.constant 0 : index
    %257 = vector.load %arg6[%c1_343, %c2_344, %c0_345, %c0_346] : memref<3x3x32x32xf32, #tpu.memory_space<vmem>>, vector<1x1x32x32xf32>
    %258 = vector.shape_cast %257 : vector<1x1x32x32xf32> to vector<32x32xf32>
    %cst_347 = arith.constant dense<0.000000e+00> : vector<32x27xf32>
    %259 = tpu.matmul %258, %256, %cst_347 {dimension_numbers = #tpu.dot_dimension_numbers<[1], [0], [0], [1], [0, 0, 1, 1], [], []>} : vector<32x32xf32>, vector<32x27xf32>, vector<32x27xf32> -> vector<32x27xf32>
    %260 = arith.addf %255, %259 : vector<32x27xf32>
    %c0_348 = arith.constant 0 : index
    %c54_349 = arith.constant 54 : index
    %261 = vector.load %arg17[%c0_348, %c54_349] : memref<32x89xf32, #tpu.memory_space<vmem>>, vector<32x27xf32>
    %c2_350 = arith.constant 2 : index
    %c0_351 = arith.constant 0 : index
    %c0_352 = arith.constant 0 : index
    %c0_353 = arith.constant 0 : index
    %262 = vector.load %arg6[%c2_350, %c0_351, %c0_352, %c0_353] : memref<3x3x32x32xf32, #tpu.memory_space<vmem>>, vector<1x1x32x32xf32>
    %263 = vector.shape_cast %262 : vector<1x1x32x32xf32> to vector<32x32xf32>
    %cst_354 = arith.constant dense<0.000000e+00> : vector<32x27xf32>
    %264 = tpu.matmul %263, %261, %cst_354 {dimension_numbers = #tpu.dot_dimension_numbers<[1], [0], [0], [1], [0, 0, 1, 1], [], []>} : vector<32x32xf32>, vector<32x27xf32>, vector<32x27xf32> -> vector<32x27xf32>
    %265 = arith.addf %260, %264 : vector<32x27xf32>
    %c0_355 = arith.constant 0 : index
    %c57 = arith.constant 57 : index
    %266 = vector.load %arg17[%c0_355, %c57] : memref<32x89xf32, #tpu.memory_space<vmem>>, vector<32x27xf32>
    %c2_356 = arith.constant 2 : index
    %c1_357 = arith.constant 1 : index
    %c0_358 = arith.constant 0 : index
    %c0_359 = arith.constant 0 : index
    %267 = vector.load %arg6[%c2_356, %c1_357, %c0_358, %c0_359] : memref<3x3x32x32xf32, #tpu.memory_space<vmem>>, vector<1x1x32x32xf32>
    %268 = vector.shape_cast %267 : vector<1x1x32x32xf32> to vector<32x32xf32>
    %cst_360 = arith.constant dense<0.000000e+00> : vector<32x27xf32>
    %269 = tpu.matmul %268, %266, %cst_360 {dimension_numbers = #tpu.dot_dimension_numbers<[1], [0], [0], [1], [0, 0, 1, 1], [], []>} : vector<32x32xf32>, vector<32x27xf32>, vector<32x27xf32> -> vector<32x27xf32>
    %270 = arith.addf %265, %269 : vector<32x27xf32>
    %c0_361 = arith.constant 0 : index
    %c60 = arith.constant 60 : index
    %271 = vector.load %arg17[%c0_361, %c60] : memref<32x89xf32, #tpu.memory_space<vmem>>, vector<32x27xf32>
    %c2_362 = arith.constant 2 : index
    %c2_363 = arith.constant 2 : index
    %c0_364 = arith.constant 0 : index
    %c0_365 = arith.constant 0 : index
    %272 = vector.load %arg6[%c2_362, %c2_363, %c0_364, %c0_365] : memref<3x3x32x32xf32, #tpu.memory_space<vmem>>, vector<1x1x32x32xf32>
    %273 = vector.shape_cast %272 : vector<1x1x32x32xf32> to vector<32x32xf32>
    %cst_366 = arith.constant dense<0.000000e+00> : vector<32x27xf32>
    %274 = tpu.matmul %273, %271, %cst_366 {dimension_numbers = #tpu.dot_dimension_numbers<[1], [0], [0], [1], [0, 0, 1, 1], [], []>} : vector<32x32xf32>, vector<32x27xf32>, vector<32x27xf32> -> vector<32x27xf32>
    %275 = arith.addf %270, %274 : vector<32x27xf32>
    %c0_367 = arith.constant 0 : index
    %c0_368 = arith.constant 0 : index
    %276 = vector.load %arg7[%c0_367, %c0_368] : memref<32x1xf32, #tpu.memory_space<vmem>>, vector<32x1xf32>
    %277 = vector.broadcast %276 : vector<32x1xf32> to vector<32x27xf32>
    %278 = arith.addf %275, %277 : vector<32x27xf32>
    %cst_369 = arith.constant 0.000000e+00 : f32
    %279 = vector.broadcast %cst_369 : f32 to vector<32x27xf32>
    %280 = arith.maximumf %278, %279 : vector<32x27xf32>
    %c0_370 = arith.constant 0 : index
    %c0_371 = arith.constant 0 : index
    %281 = vector.load %arg18[%c0_370, %c0_371] : memref<32x35xf32, #tpu.memory_space<vmem>>, vector<32x27xf32>
    tpu.vector_store %arg18[%c0_370, %c0_371], %280 {strides = array<i32>} : memref<32x35xf32, #tpu.memory_space<vmem>>, vector<32x27xf32>,
    %c0_372 = arith.constant 0 : index
    %c0_373 = arith.constant 0 : index
    %282 = vector.load %arg8[%c0_372, %c0_373] : memref<9x32xf32, #tpu.memory_space<vmem>>, vector<9x32xf32>
    %c0_374 = arith.constant 0 : index
    %c0_375 = arith.constant 0 : index
    %283 = vector.load %arg18[%c0_374, %c0_375] : memref<32x35xf32, #tpu.memory_space<vmem>>, vector<32x27xf32>
    %cst_376 = arith.constant dense<0.000000e+00> : vector<9x27xf32>
    %284 = tpu.matmul %282, %283, %cst_376 {dimension_numbers = #tpu.dot_dimension_numbers<[1], [0], [0], [1], [0, 0, 1, 1], [], []>} : vector<9x32xf32>, vector<32x27xf32>, vector<9x27xf32> -> vector<9x27xf32>
    %c0_377 = arith.constant 0 : index
    %c0_378 = arith.constant 0 : index
    %285 = vector.load %arg9[%c0_377, %c0_378] : memref<9x1xf32, #tpu.memory_space<vmem>>, vector<9x1xf32>
    %286 = vector.broadcast %285 : vector<9x1xf32> to vector<9x27xf32>
    %287 = arith.addf %284, %286 : vector<9x27xf32>
    %288 = vector.extract_strided_slice %287 {offsets = [0, 0], sizes = [9, 3], strides = [1, 1]} : vector<9x27xf32> to vector<9x3xf32>
    %c0_379 = arith.constant 0 : index
    %c0_380 = arith.constant 0 : index
    %c0_381 = arith.constant 0 : index
    %289 = vector.load %arg19[%c0_379, %c0_380, %c0_381] : memref<9x3x3xf32, #tpu.memory_space<vmem>>, vector<9x1x3xf32>
    %290 = vector.shape_cast %289 : vector<9x1x3xf32> to vector<9x3xf32>
    %291 = vector.shape_cast %288 : vector<9x3xf32> to vector<9x1x3xf32>
    tpu.vector_store %arg19[%c0_379, %c0_380, %c0_381], %291 {strides = array<i32>} : memref<9x3x3xf32, #tpu.memory_space<vmem>>, vector<9x1x3xf32>,
    %292 = vector.extract_strided_slice %287 {offsets = [0, 9], sizes = [9, 3], strides = [1, 1]} : vector<9x27xf32> to vector<9x3xf32>
    %c0_382 = arith.constant 0 : index
    %c1_383 = arith.constant 1 : index
    %c0_384 = arith.constant 0 : index
    %293 = vector.load %arg19[%c0_382, %c1_383, %c0_384] : memref<9x3x3xf32, #tpu.memory_space<vmem>>, vector<9x1x3xf32>
    %294 = vector.shape_cast %293 : vector<9x1x3xf32> to vector<9x3xf32>
    %295 = vector.shape_cast %292 : vector<9x3xf32> to vector<9x1x3xf32>
    tpu.vector_store %arg19[%c0_382, %c1_383, %c0_384], %295 {strides = array<i32>} : memref<9x3x3xf32, #tpu.memory_space<vmem>>, vector<9x1x3xf32>,
    %296 = vector.extract_strided_slice %287 {offsets = [0, 18], sizes = [9, 3], strides = [1, 1]} : vector<9x27xf32> to vector<9x3xf32>
    %c0_385 = arith.constant 0 : index
    %c2_386 = arith.constant 2 : index
    %c0_387 = arith.constant 0 : index
    %297 = vector.load %arg19[%c0_385, %c2_386, %c0_387] : memref<9x3x3xf32, #tpu.memory_space<vmem>>, vector<9x1x3xf32>
    %298 = vector.shape_cast %297 : vector<9x1x3xf32> to vector<9x3xf32>
    %299 = vector.shape_cast %296 : vector<9x3xf32> to vector<9x1x3xf32>
    tpu.vector_store %arg19[%c0_385, %c2_386, %c0_387], %299 {strides = array<i32>} : memref<9x3x3xf32, #tpu.memory_space<vmem>>, vector<9x1x3xf32>,
    %c0_388 = arith.constant 0 : index
    %c0_389 = arith.constant 0 : index
    %300 = vector.load %arg11[%c0_388, %c0_389] : memref<24x3xf32, #tpu.memory_space<vmem>>, vector<24x3xf32>
    %c0_390 = arith.constant 0 : index
    %c0_391 = arith.constant 0 : index
    %301 = vector.load %arg12[%c0_390, %c0_391] : memref<3x24xf32, #tpu.memory_space<vmem>>, vector<3x24xf32>
    %c0_392 = arith.constant 0 : index
    %c0_393 = arith.constant 0 : index
    %c0_394 = arith.constant 0 : index
    %302 = vector.load %arg19[%c0_392, %c0_393, %c0_394] : memref<9x3x3xf32, #tpu.memory_space<vmem>>, vector<1x3x3xf32>
    %303 = vector.shape_cast %302 : vector<1x3x3xf32> to vector<3x3xf32>
    %cst_395 = arith.constant dense<0.000000e+00> : vector<24x3xf32>
    %304 = tpu.matmul %300, %303, %cst_395 {dimension_numbers = #tpu.dot_dimension_numbers<[1], [0], [0], [1], [0, 0, 1, 1], [], []>} : vector<24x3xf32>, vector<3x3xf32>, vector<24x3xf32> -> vector<24x3xf32>
    %cst_396 = arith.constant dense<0.000000e+00> : vector<24x24xf32>
    %305 = tpu.matmul %304, %301, %cst_396 {dimension_numbers = #tpu.dot_dimension_numbers<[1], [0], [0], [1], [0, 0, 1, 1], [], []>} : vector<24x3xf32>, vector<3x24xf32>, vector<24x24xf32> -> vector<24x24xf32>
    %c0_397 = arith.constant 0 : index
    %c0_398 = arith.constant 0 : index
    %c0_399 = arith.constant 0 : index
    %c0_400 = arith.constant 0 : index
    %306 = vector.load %arg13[%c0_397, %c0_398, %c0_399, %c0_400] : memref<1x9x24x24xf32, #tpu.memory_space<vmem>>, vector<1x1x24x24xf32>
    %307 = vector.shape_cast %306 : vector<1x1x24x24xf32> to vector<24x24xf32>
    %308 = vector.shape_cast %305 : vector<24x24xf32> to vector<1x1x24x24xf32>
    tpu.vector_store %arg13[%c0_397, %c0_398, %c0_399, %c0_400], %308 {strides = array<i32>} : memref<1x9x24x24xf32, #tpu.memory_space<vmem>>, vector<1x1x24x24xf32>,
    %c1_401 = arith.constant 1 : index
    %c0_402 = arith.constant 0 : index
    %c0_403 = arith.constant 0 : index
    %309 = vector.load %arg19[%c1_401, %c0_402, %c0_403] : memref<9x3x3xf32, #tpu.memory_space<vmem>>, vector<1x3x3xf32>
    %310 = vector.shape_cast %309 : vector<1x3x3xf32> to vector<3x3xf32>
    %cst_404 = arith.constant dense<0.000000e+00> : vector<24x3xf32>
    %311 = tpu.matmul %300, %310, %cst_404 {dimension_numbers = #tpu.dot_dimension_numbers<[1], [0], [0], [1], [0, 0, 1, 1], [], []>} : vector<24x3xf32>, vector<3x3xf32>, vector<24x3xf32> -> vector<24x3xf32>
    %cst_405 = arith.constant dense<0.000000e+00> : vector<24x24xf32>
    %312 = tpu.matmul %311, %301, %cst_405 {dimension_numbers = #tpu.dot_dimension_numbers<[1], [0], [0], [1], [0, 0, 1, 1], [], []>} : vector<24x3xf32>, vector<3x24xf32>, vector<24x24xf32> -> vector<24x24xf32>
    %c0_406 = arith.constant 0 : index
    %c1_407 = arith.constant 1 : index
    %c0_408 = arith.constant 0 : index
    %c0_409 = arith.constant 0 : index
    %313 = vector.load %arg13[%c0_406, %c1_407, %c0_408, %c0_409] : memref<1x9x24x24xf32, #tpu.memory_space<vmem>>, vector<1x1x24x24xf32>
    %314 = vector.shape_cast %313 : vector<1x1x24x24xf32> to vector<24x24xf32>
    %315 = vector.shape_cast %312 : vector<24x24xf32> to vector<1x1x24x24xf32>
    tpu.vector_store %arg13[%c0_406, %c1_407, %c0_408, %c0_409], %315 {strides = array<i32>} : memref<1x9x24x24xf32, #tpu.memory_space<vmem>>, vector<1x1x24x24xf32>,
    %c2_410 = arith.constant 2 : index
    %c0_411 = arith.constant 0 : index
    %c0_412 = arith.constant 0 : index
    %316 = vector.load %arg19[%c2_410, %c0_411, %c0_412] : memref<9x3x3xf32, #tpu.memory_space<vmem>>, vector<1x3x3xf32>
    %317 = vector.shape_cast %316 : vector<1x3x3xf32> to vector<3x3xf32>
    %cst_413 = arith.constant dense<0.000000e+00> : vector<24x3xf32>
    %318 = tpu.matmul %300, %317, %cst_413 {dimension_numbers = #tpu.dot_dimension_numbers<[1], [0], [0], [1], [0, 0, 1, 1], [], []>} : vector<24x3xf32>, vector<3x3xf32>, vector<24x3xf32> -> vector<24x3xf32>
    %cst_414 = arith.constant dense<0.000000e+00> : vector<24x24xf32>
    %319 = tpu.matmul %318, %301, %cst_414 {dimension_numbers = #tpu.dot_dimension_numbers<[1], [0], [0], [1], [0, 0, 1, 1], [], []>} : vector<24x3xf32>, vector<3x24xf32>, vector<24x24xf32> -> vector<24x24xf32>
    %c0_415 = arith.constant 0 : index
    %c2_416 = arith.constant 2 : index
    %c0_417 = arith.constant 0 : index
    %c0_418 = arith.constant 0 : index
    %320 = vector.load %arg13[%c0_415, %c2_416, %c0_417, %c0_418] : memref<1x9x24x24xf32, #tpu.memory_space<vmem>>, vector<1x1x24x24xf32>
    %321 = vector.shape_cast %320 : vector<1x1x24x24xf32> to vector<24x24xf32>
    %322 = vector.shape_cast %319 : vector<24x24xf32> to vector<1x1x24x24xf32>
    tpu.vector_store %arg13[%c0_415, %c2_416, %c0_417, %c0_418], %322 {strides = array<i32>} : memref<1x9x24x24xf32, #tpu.memory_space<vmem>>, vector<1x1x24x24xf32>,
    %c3_419 = arith.constant 3 : index
    %c0_420 = arith.constant 0 : index
    %c0_421 = arith.constant 0 : index
    %323 = vector.load %arg19[%c3_419, %c0_420, %c0_421] : memref<9x3x3xf32, #tpu.memory_space<vmem>>, vector<1x3x3xf32>
    %324 = vector.shape_cast %323 : vector<1x3x3xf32> to vector<3x3xf32>
    %cst_422 = arith.constant dense<0.000000e+00> : vector<24x3xf32>
    %325 = tpu.matmul %300, %324, %cst_422 {dimension_numbers = #tpu.dot_dimension_numbers<[1], [0], [0], [1], [0, 0, 1, 1], [], []>} : vector<24x3xf32>, vector<3x3xf32>, vector<24x3xf32> -> vector<24x3xf32>
    %cst_423 = arith.constant dense<0.000000e+00> : vector<24x24xf32>
    %326 = tpu.matmul %325, %301, %cst_423 {dimension_numbers = #tpu.dot_dimension_numbers<[1], [0], [0], [1], [0, 0, 1, 1], [], []>} : vector<24x3xf32>, vector<3x24xf32>, vector<24x24xf32> -> vector<24x24xf32>
    %c0_424 = arith.constant 0 : index
    %c3_425 = arith.constant 3 : index
    %c0_426 = arith.constant 0 : index
    %c0_427 = arith.constant 0 : index
    %327 = vector.load %arg13[%c0_424, %c3_425, %c0_426, %c0_427] : memref<1x9x24x24xf32, #tpu.memory_space<vmem>>, vector<1x1x24x24xf32>
    %328 = vector.shape_cast %327 : vector<1x1x24x24xf32> to vector<24x24xf32>
    %329 = vector.shape_cast %326 : vector<24x24xf32> to vector<1x1x24x24xf32>
    tpu.vector_store %arg13[%c0_424, %c3_425, %c0_426, %c0_427], %329 {strides = array<i32>} : memref<1x9x24x24xf32, #tpu.memory_space<vmem>>, vector<1x1x24x24xf32>,
    %c4_428 = arith.constant 4 : index
    %c0_429 = arith.constant 0 : index
    %c0_430 = arith.constant 0 : index
    %330 = vector.load %arg19[%c4_428, %c0_429, %c0_430] : memref<9x3x3xf32, #tpu.memory_space<vmem>>, vector<1x3x3xf32>
    %331 = vector.shape_cast %330 : vector<1x3x3xf32> to vector<3x3xf32>
    %cst_431 = arith.constant dense<0.000000e+00> : vector<24x3xf32>
    %332 = tpu.matmul %300, %331, %cst_431 {dimension_numbers = #tpu.dot_dimension_numbers<[1], [0], [0], [1], [0, 0, 1, 1], [], []>} : vector<24x3xf32>, vector<3x3xf32>, vector<24x3xf32> -> vector<24x3xf32>
    %cst_432 = arith.constant dense<0.000000e+00> : vector<24x24xf32>
    %333 = tpu.matmul %332, %301, %cst_432 {dimension_numbers = #tpu.dot_dimension_numbers<[1], [0], [0], [1], [0, 0, 1, 1], [], []>} : vector<24x3xf32>, vector<3x24xf32>, vector<24x24xf32> -> vector<24x24xf32>
    %c0_433 = arith.constant 0 : index
    %c4_434 = arith.constant 4 : index
    %c0_435 = arith.constant 0 : index
    %c0_436 = arith.constant 0 : index
    %334 = vector.load %arg13[%c0_433, %c4_434, %c0_435, %c0_436] : memref<1x9x24x24xf32, #tpu.memory_space<vmem>>, vector<1x1x24x24xf32>
    %335 = vector.shape_cast %334 : vector<1x1x24x24xf32> to vector<24x24xf32>
    %336 = vector.shape_cast %333 : vector<24x24xf32> to vector<1x1x24x24xf32>
    tpu.vector_store %arg13[%c0_433, %c4_434, %c0_435, %c0_436], %336 {strides = array<i32>} : memref<1x9x24x24xf32, #tpu.memory_space<vmem>>, vector<1x1x24x24xf32>,
    %c5_437 = arith.constant 5 : index
    %c0_438 = arith.constant 0 : index
    %c0_439 = arith.constant 0 : index
    %337 = vector.load %arg19[%c5_437, %c0_438, %c0_439] : memref<9x3x3xf32, #tpu.memory_space<vmem>>, vector<1x3x3xf32>
    %338 = vector.shape_cast %337 : vector<1x3x3xf32> to vector<3x3xf32>
    %cst_440 = arith.constant dense<0.000000e+00> : vector<24x3xf32>
    %339 = tpu.matmul %300, %338, %cst_440 {dimension_numbers = #tpu.dot_dimension_numbers<[1], [0], [0], [1], [0, 0, 1, 1], [], []>} : vector<24x3xf32>, vector<3x3xf32>, vector<24x3xf32> -> vector<24x3xf32>
    %cst_441 = arith.constant dense<0.000000e+00> : vector<24x24xf32>
    %340 = tpu.matmul %339, %301, %cst_441 {dimension_numbers = #tpu.dot_dimension_numbers<[1], [0], [0], [1], [0, 0, 1, 1], [], []>} : vector<24x3xf32>, vector<3x24xf32>, vector<24x24xf32> -> vector<24x24xf32>
    %c0_442 = arith.constant 0 : index
    %c5_443 = arith.constant 5 : index
    %c0_444 = arith.constant 0 : index
    %c0_445 = arith.constant 0 : index
    %341 = vector.load %arg13[%c0_442, %c5_443, %c0_444, %c0_445] : memref<1x9x24x24xf32, #tpu.memory_space<vmem>>, vector<1x1x24x24xf32>
    %342 = vector.shape_cast %341 : vector<1x1x24x24xf32> to vector<24x24xf32>
    %343 = vector.shape_cast %340 : vector<24x24xf32> to vector<1x1x24x24xf32>
    tpu.vector_store %arg13[%c0_442, %c5_443, %c0_444, %c0_445], %343 {strides = array<i32>} : memref<1x9x24x24xf32, #tpu.memory_space<vmem>>, vector<1x1x24x24xf32>,
    %c6_446 = arith.constant 6 : index
    %c0_447 = arith.constant 0 : index
    %c0_448 = arith.constant 0 : index
    %344 = vector.load %arg19[%c6_446, %c0_447, %c0_448] : memref<9x3x3xf32, #tpu.memory_space<vmem>>, vector<1x3x3xf32>
    %345 = vector.shape_cast %344 : vector<1x3x3xf32> to vector<3x3xf32>
    %cst_449 = arith.constant dense<0.000000e+00> : vector<24x3xf32>
    %346 = tpu.matmul %300, %345, %cst_449 {dimension_numbers = #tpu.dot_dimension_numbers<[1], [0], [0], [1], [0, 0, 1, 1], [], []>} : vector<24x3xf32>, vector<3x3xf32>, vector<24x3xf32> -> vector<24x3xf32>
    %cst_450 = arith.constant dense<0.000000e+00> : vector<24x24xf32>
    %347 = tpu.matmul %346, %301, %cst_450 {dimension_numbers = #tpu.dot_dimension_numbers<[1], [0], [0], [1], [0, 0, 1, 1], [], []>} : vector<24x3xf32>, vector<3x24xf32>, vector<24x24xf32> -> vector<24x24xf32>
    %c0_451 = arith.constant 0 : index
    %c6_452 = arith.constant 6 : index
    %c0_453 = arith.constant 0 : index
    %c0_454 = arith.constant 0 : index
    %348 = vector.load %arg13[%c0_451, %c6_452, %c0_453, %c0_454] : memref<1x9x24x24xf32, #tpu.memory_space<vmem>>, vector<1x1x24x24xf32>
    %349 = vector.shape_cast %348 : vector<1x1x24x24xf32> to vector<24x24xf32>
    %350 = vector.shape_cast %347 : vector<24x24xf32> to vector<1x1x24x24xf32>
    tpu.vector_store %arg13[%c0_451, %c6_452, %c0_453, %c0_454], %350 {strides = array<i32>} : memref<1x9x24x24xf32, #tpu.memory_space<vmem>>, vector<1x1x24x24xf32>,
    %c7_455 = arith.constant 7 : index
    %c0_456 = arith.constant 0 : index
    %c0_457 = arith.constant 0 : index
    %351 = vector.load %arg19[%c7_455, %c0_456, %c0_457] : memref<9x3x3xf32, #tpu.memory_space<vmem>>, vector<1x3x3xf32>
    %352 = vector.shape_cast %351 : vector<1x3x3xf32> to vector<3x3xf32>
    %cst_458 = arith.constant dense<0.000000e+00> : vector<24x3xf32>
    %353 = tpu.matmul %300, %352, %cst_458 {dimension_numbers = #tpu.dot_dimension_numbers<[1], [0], [0], [1], [0, 0, 1, 1], [], []>} : vector<24x3xf32>, vector<3x3xf32>, vector<24x3xf32> -> vector<24x3xf32>
    %cst_459 = arith.constant dense<0.000000e+00> : vector<24x24xf32>
    %354 = tpu.matmul %353, %301, %cst_459 {dimension_numbers = #tpu.dot_dimension_numbers<[1], [0], [0], [1], [0, 0, 1, 1], [], []>} : vector<24x3xf32>, vector<3x24xf32>, vector<24x24xf32> -> vector<24x24xf32>
    %c0_460 = arith.constant 0 : index
    %c7_461 = arith.constant 7 : index
    %c0_462 = arith.constant 0 : index
    %c0_463 = arith.constant 0 : index
    %355 = vector.load %arg13[%c0_460, %c7_461, %c0_462, %c0_463] : memref<1x9x24x24xf32, #tpu.memory_space<vmem>>, vector<1x1x24x24xf32>
    %356 = vector.shape_cast %355 : vector<1x1x24x24xf32> to vector<24x24xf32>
    %357 = vector.shape_cast %354 : vector<24x24xf32> to vector<1x1x24x24xf32>
    tpu.vector_store %arg13[%c0_460, %c7_461, %c0_462, %c0_463], %357 {strides = array<i32>} : memref<1x9x24x24xf32, #tpu.memory_space<vmem>>, vector<1x1x24x24xf32>,
    %c8_464 = arith.constant 8 : index
    %c0_465 = arith.constant 0 : index
    %c0_466 = arith.constant 0 : index
    %358 = vector.load %arg19[%c8_464, %c0_465, %c0_466] : memref<9x3x3xf32, #tpu.memory_space<vmem>>, vector<1x3x3xf32>
    %359 = vector.shape_cast %358 : vector<1x3x3xf32> to vector<3x3xf32>
    %cst_467 = arith.constant dense<0.000000e+00> : vector<24x3xf32>
    %360 = tpu.matmul %300, %359, %cst_467 {dimension_numbers = #tpu.dot_dimension_numbers<[1], [0], [0], [1], [0, 0, 1, 1], [], []>} : vector<24x3xf32>, vector<3x3xf32>, vector<24x3xf32> -> vector<24x3xf32>
    %cst_468 = arith.constant dense<0.000000e+00> : vector<24x24xf32>
    %361 = tpu.matmul %360, %301, %cst_468 {dimension_numbers = #tpu.dot_dimension_numbers<[1], [0], [0], [1], [0, 0, 1, 1], [], []>} : vector<24x3xf32>, vector<3x24xf32>, vector<24x24xf32> -> vector<24x24xf32>
    %c0_469 = arith.constant 0 : index
    %c8_470 = arith.constant 8 : index
    %c0_471 = arith.constant 0 : index
    %c0_472 = arith.constant 0 : index
    %362 = vector.load %arg13[%c0_469, %c8_470, %c0_471, %c0_472] : memref<1x9x24x24xf32, #tpu.memory_space<vmem>>, vector<1x1x24x24xf32>
    %363 = vector.shape_cast %362 : vector<1x1x24x24xf32> to vector<24x24xf32>
    %364 = vector.shape_cast %361 : vector<24x24xf32> to vector<1x1x24x24xf32>
    tpu.vector_store %arg13[%c0_469, %c8_470, %c0_471, %c0_472], %364 {strides = array<i32>} : memref<1x9x24x24xf32, #tpu.memory_space<vmem>>, vector<1x1x24x24xf32>,
    return
  }
  func.func @transform_0(%arg0: i32) -> (i32, i32, i32, i32) {
    %c0_i32 = arith.constant 0 : i32
    %c0_i32_0 = arith.constant 0 : i32
    %c0_i32_1 = arith.constant 0 : i32
    %c0_i32_2 = arith.constant 0 : i32
    return %arg0, %c0_i32, %c0_i32_0, %c0_i32_1 : i32, i32, i32, i32
  }
  func.func @transform_1(%arg0: i32) -> (i32, i32, i32, i32) {
    %c0_i32 = arith.constant 0 : i32
    %c0_i32_0 = arith.constant 0 : i32
    %c0_i32_1 = arith.constant 0 : i32
    %c0_i32_2 = arith.constant 0 : i32
    %c0_i32_3 = arith.constant 0 : i32
    return %c0_i32, %c0_i32_0, %c0_i32_1, %c0_i32_2 : i32, i32, i32, i32
  }
  func.func @transform_2(%arg0: i32) -> (i32, i32) {
    %c0_i32 = arith.constant 0 : i32
    %c0_i32_0 = arith.constant 0 : i32
    %c0_i32_1 = arith.constant 0 : i32
    return %c0_i32, %c0_i32_0 : i32, i32
  }
  func.func @transform_3(%arg0: i32) -> (i32, i32, i32, i32) {
    %c0_i32 = arith.constant 0 : i32
    %c0_i32_0 = arith.constant 0 : i32
    %c0_i32_1 = arith.constant 0 : i32
    %c0_i32_2 = arith.constant 0 : i32
    %c0_i32_3 = arith.constant 0 : i32
    return %c0_i32, %c0_i32_0, %c0_i32_1, %c0_i32_2 : i32, i32, i32, i32
  }
  func.func @transform_4(%arg0: i32) -> (i32, i32) {
    %c0_i32 = arith.constant 0 : i32
    %c0_i32_0 = arith.constant 0 : i32
    %c0_i32_1 = arith.constant 0 : i32
    return %c0_i32, %c0_i32_0 : i32, i32
  }
  func.func @transform_5(%arg0: i32) -> (i32, i32, i32, i32) {
    %c0_i32 = arith.constant 0 : i32
    %c0_i32_0 = arith.constant 0 : i32
    %c0_i32_1 = arith.constant 0 : i32
    %c0_i32_2 = arith.constant 0 : i32
    %c0_i32_3 = arith.constant 0 : i32
    return %c0_i32, %c0_i32_0, %c0_i32_1, %c0_i32_2 : i32, i32, i32, i32
  }
  func.func @transform_6(%arg0: i32) -> (i32, i32) {
    %c0_i32 = arith.constant 0 : i32
    %c0_i32_0 = arith.constant 0 : i32
    %c0_i32_1 = arith.constant 0 : i32
    return %c0_i32, %c0_i32_0 : i32, i32
  }
  func.func @transform_7(%arg0: i32) -> (i32, i32) {
    %c0_i32 = arith.constant 0 : i32
    %c0_i32_0 = arith.constant 0 : i32
    %c0_i32_1 = arith.constant 0 : i32
    return %c0_i32, %c0_i32_0 : i32, i32
  }
  func.func @transform_8(%arg0: i32) -> (i32, i32) {
    %c0_i32 = arith.constant 0 : i32
    %c0_i32_0 = arith.constant 0 : i32
    %c0_i32_1 = arith.constant 0 : i32
    return %c0_i32, %c0_i32_0 : i32, i32
  }
  func.func @transform_9(%arg0: i32) -> (i32, i32) {
    %c0_i32 = arith.constant 0 : i32
    %c0_i32_0 = arith.constant 0 : i32
    %c0_i32_1 = arith.constant 0 : i32
    return %c0_i32, %c0_i32_0 : i32, i32
  }
  func.func @transform_10(%arg0: i32) -> (i32, i32) {
    %c0_i32 = arith.constant 0 : i32
    %c0_i32_0 = arith.constant 0 : i32
    %c0_i32_1 = arith.constant 0 : i32
    return %c0_i32, %c0_i32_0 : i32, i32
  }
  func.func @transform_11(%arg0: i32) -> (i32, i32) {
    %c0_i32 = arith.constant 0 : i32
    %c0_i32_0 = arith.constant 0 : i32
    %c0_i32_1 = arith.constant 0 : i32
    return %c0_i32, %c0_i32_0 : i32, i32
  }
  func.func @transform_12(%arg0: i32) -> (i32, i32, i32, i32) {
    %c0_i32 = arith.constant 0 : i32
    %c0_i32_0 = arith.constant 0 : i32
    %c0_i32_1 = arith.constant 0 : i32
    %c0_i32_2 = arith.constant 0 : i32
    return %arg0, %c0_i32, %c0_i32_0, %c0_i32_1 : i32, i32, i32, i32
  }
}

</mosaic_0001>

<bundles_post_ra>
// kernel: dilated_fcn_forward.1
= control target key start
LH: loop header
LB: loop body
LE: loop exit
PB: predicated region body
PF: predicated region fallthrough
CT: control target
= control target key end

     0   :  { %17 = vsyncpa [#allocation9], 0  ;;  %s18371_s0 = inlined_call_operand.vmem [shape: f32[2,16,24,24], index: 0, kind: input, shape index: {}]   ;;  %s18372_s1 = inlined_call_operand.vmem [shape: f32[3,3,32,16], index: 1, kind: input, shape index: {}]   ;;  %s18373_s2 = inlined_call_operand.vmem [shape: f32[32,1], index: 2, kind: input, shape index: {}]   ;;  %s18374_s3 = inlined_call_operand.vmem [shape: f32[3,3,32,32], index: 3, kind: input, shape index: {}]   ;;  %s18375_s4 = inlined_call_operand.vmem [shape: f32[32,1], index: 4, kind: input, shape index: {}]   ;;  %s18376_s5 = inlined_call_operand.hbm [shape: f32[3,3,32,32], index: 5, kind: input, shape index: {}]   ;;  %s18377_s6 = inlined_call_operand.vmem [shape: f32[32,1], index: 6, kind: input, shape index: {}]   ;;  %s18378_s7 = inlined_call_operand.vmem [shape: f32[9,32], index: 7, kind: input, shape index: {}]   ;;  %s18379_s8 = inlined_call_operand.vmem [shape: f32[9,1], index: 8, kind: input, shape index: {}]   ;;  %s18380_s9 = inlined_call_operand.vmem [shape: f32[18,9], index: 9, kind: input, shape index: {}]   ;;  %s18381_s10 = inlined_call_operand.vmem [shape: f32[24,3], index: 10, kind: input, shape index: {}]   ;;  %s18382_s11 = inlined_call_operand.vmem [shape: f32[3,24], index: 11, kind: input, shape index: {}]   ;;  %s18383_s12 = inlined_call_operand.hbm [shape: f32[2,9,24,24], index: 12, kind: output, shape index: {}]  }
   0x1   :  { %18 = vsyncpa [#allocation10], 0 }
   0x2   :  { %20 = vsyncpa [#allocation10 + $0x1], 0  ;;  %s15070_s21 = smov 0   ;;  %s15072_s22 = smov 0  }
   0x3   :  { %s15074_s23 = smov 0   ;;  %s15076_s24 = smov 0  }
   0x4 LB: > { %18401 = sst [smem:[#allocation14_spill]] %s14948_s23  ;;  %s15091_s25 = sadd.s32 4294967295, %s14952_s24   ;;  %s14952_s24 = sphi %s15076_s24, %s18423_s24   ;;  %s14948_s23 = sphi %s15074_s23, %s18420_s23   ;;  %s14944_s22 = sphi %s15072_s22, %s18422_s22   ;;  %s14940_s21 = sphi %s15070_s21, %s18421_s21  }
   0x5   : > { %s12203_s26 = sadd.s32 4294967294, %s14952_s24   ;;  %s15095_s27 = sadd.s32 1, %s14952_s24  }
   0x6   : > { %s290_s28 = sadd.s32 1, %s14948_s23  ;;  %s287_s29 = ssub.s32 %s14952_s24, %s15095_s27 }
   0x7   : > { %p300_p0 = scmp.ne.s32.totalorder %s14948_s23, %s14944_s22  ;;  %p288_p1 = scmp.eq.s32.totalorder %s287_s29, 0 }
   0x8   : > { %p301_p2 = scmp.eq.s32.totalorder %s15091_s25, 1  ;;  %p306_p3 = scmp.ne.s32.totalorder %s14944_s22, %s14940_s21 }
   0x9   : > { %p307_p4 = scmp.eq.s32.totalorder %s12203_s26, 1  ;;  %p12204_p7 = scmp.ge.s32.totalorder %s14952_s24, 1 }
   0xa   : > { %s15106_s30 = scalar_select %p288_p1, %s14948_s23, %s290_s28  }
   0xb   : > { %p15108_p5 = por %p301_p2, %p300_p0  ;;  %p15112_p6 = por %p307_p4, %p306_p3 }
   0xc   : > { %18402 = sst [smem:[#allocation15_spill]] %s15106_s30  ;;  %p314_p8 = scmp.lt.s32.totalorder %s14952_s24, 3 }
   0xd   : > { %s18403_s13 = scalar_select %p15108_p5, 1, 0 }
   0xe   : > { %s18404_s14 = scalar_select %p15112_p6, 1, 0 }
   0xf   : > { %p18385_p9 = scmp.eq.s32.totalorder %s15091_s25, 0  ;;  %p15119_p10 = pnand %p12204_p7, %p314_p8 }
  0x10   : > { %s14954_s16 = smov [#allocation8]   ;;  %s14858_s26 = scalar_lea.hbm %s18376_s5, 4608 }
  0x11   : > { %s18405_s15 = scalar_select %p15119_p10, 1, 0 }
  0x12   : > { %s338_s17 = sshll.u32 %s14954_s16, 4  ;;  %p14133_p11 = pneg %p15119_p10  ;;  %s339_s17 = int_to_ptr.vmem [resolvable:$true] %s338_s17 }
  0x13   : > { %p14859_p13 = scmp.ne.s32.totalorder %s18376_s5, %s14858_s26  ;;  %p14865_p3 = scmp.lt.u32.totalorder %s14858_s26, %s18376_s5 }
  0x14   : > { %p15127_p12 = pnand %p18385_p9, %p14133_p11 }
  0x16   : > { %p14860_p0 = pneg %p15127_p12 }
  0x18   : > { %p14861_p1 = pnand %p14860_p0, %p14859_p13 }
  0x1a   : > { %p14862_p2 = pneg %p14861_p1 }
  0x1c   : > { %p14867_p4 = pnand %p14865_p3, %p14862_p2 }
  0x1e   : > { %14870 = shalt.err (!%p14867_p4)
}
  0x1f   : > { %s14871_s23 = scalar_lea.vmem %s339_s17, 4608  ;;  %p14879_p9 = scmp.lt.s32.totalorder %s339_s17, %s339_s17 }
  0x20   : > { %p14872_p7 = scmp.ne.s32.totalorder %s339_s17, %s14871_s23  ;;  %p14880_p6 = scmp.lt.s32.totalorder %s14871_s23, %s14871_s23 }
  0x22   : > { %p14874_p8 = pnand %p14872_p7, %p14860_p0  ;;  %p14881_p5 = por %p14880_p6, %p14879_p9 }
  0x24   : > { %p14875_p11 = pneg %p14874_p8 }
  0x26   : > { %p14882_p10 = pnand %p14881_p5, %p14875_p11 }
  0x28   : > { %14885 = shalt.err (!%p14882_p10)
}
  0x29   : > { %s14955_s19 = smov 128   ;;  %s14956_s20 = smov 8  }
  0x2a   : > { %14136 = dma.hbm_to_vmem [thread:$0]  (!%p15127_p12), %s18376_s5, 4608, %s339_s17, [#allocation9], %s14955_s19, %s14955_s19, %s14956_s20  }
  0x2b   : > { %p18407_p13 = scmp.ne.s32.totalorder %s18405_s15, 0 }
  0x2c   : > { %p18408_p1 = scmp.eq.s32.totalorder (!%p18407_p13), %s15091_s25, 0 }
  0x2d   : > { %380 = sbr.rel (%p18407_p13) target bundleno = 3862 (0xf16), region = 68 }
  0x34   : > { %14931 = dma.done.wait (%p18408_p1), [#allocation9], 4608   ;;  %p18409_p0 = pmov %p18408_p1 }
  0x35   : > { %p422_p5 = scmp.lt.s32.totalorder %s15091_s25, 1  ;;  %vm460_vm0 = vcmask 1041409   ;;  %vm463_vm1 = vcmask 1042434   ;;  %vm466_vm2 = vcmask 1043459   ;;  %vm469_vm3 = vcmask 1044484   ;;  %s18391_s15 = smov 112  }
  0x36   : > { %14933 = vsyncadd (%p18409_p0), [#allocation9], 4294962688  ;;  %vm472_vm4 = vcmask 1045509   ;;  %vm475_vm5 = vcmask 1046534   ;;  %vm478_vm6 = vcmask 1047559   ;;  %s14958_s16 = smov 120  }
  0x37   : > { %s423_s23 = scalar_select %p422_p5, %s15091_s25, 1  ;;  %vm1191_vm7 = vcmask 64512   ;;  %vm843_vm8 = vcmask 130048   ;;  %vm913_vm9 = vcmask 326784   ;;  %vm1261_vm10 = vcmask 261184  }
  0x38   : > { %s18399_s19 = smov 16   ;;  %s18388_s20 = smov 8   ;;  %vm496_vm11 = vcmask 195584   ;;  %vm565_vm12 = vcmask 392384   ;;  %vm982_vm13 = vcmask 523584   ;;  %vm1330_vm14 = vcmask 457984  }
  0x39   : > { %s14125_s30 = smul.u32 384, %s423_s23  ;;  %s14961_s28 = smov 24   ;;  %vm634_vm15 = vcmask 589184  }
  0x3a   : > { %s14962_s29 = smov 40   ;;  %s14963_s23 = smov 32  }
  0x3b   : > { %s15158_s17 = scalar_lea.vmem %s18371_s0, %s14125_s30  ;;  %s18395_s30 = smov 48  }
  0x3c   : > { %v1123_v0 = vld [vmem:[%s15158_s17 + $0xa] sm:$0x1]  ;;  %v1124_v1 = vld [vmem:[%s15158_s17 + $0x22] sm:$0x1]  ;;  %v1125_v2 = vld [vmem:[%s15158_s17 + $0x3a] sm:$0x1] }
  0x3d   : > { %v1126_v3 = vld [vmem:[%s15158_s17 + $0x52] sm:$0x1]  ;;  %v1127_v4 = vld [vmem:[%s15158_s17 + $0x6a] sm:$0x1]  ;;  %v1128_v5 = vld [vmem:[%s15158_s17 + $0x82] sm:$0x1] }
  0x3e   : > { %v1129_v6 = vld [vmem:[%s15158_s17 + $0x9a] sm:$0x1]  ;;  %v1130_v7 = vld [vmem:[%s15158_s17 + $0xb2] sm:$0x1]  ;;  %v1155_v8 = vrot.slane %v1124_v1, 7  ;;  %v1157_v9 = vrot.slane %v1125_v2, 6 }
  0x3f   : > { %v1159_v10 = vrot.slane %v1126_v3, 5  ;;  %v1161_v11 = vrot.slane %v1127_v4, 4  ;;  %v1163_v12 = vrot.slane %v1128_v5, 3  ;;  %v775_v13 = vld [vmem:[%s15158_s17 + $0x5] sm:$0x1]  ;;  %v1165_v15 = vrot.slane %v1129_v6, 2 }
  0x40   : > { %v1156_v14 = vsel %vm460_vm0, %v1155_v8, %v1123_v0  ;;  %v1167_v16 = vrot.slane %v1130_v7, 1  ;;  %v776_v17 = vld [vmem:[%s15158_s17 + $0x1d] sm:$0x1]  ;;  %v777_v18 = vld [vmem:[%s15158_s17 + $0x35] sm:$0x1]  ;;  %s18389_s18 = smov 64  }
  0x41   : > { %v1158_v19 = vsel %vm463_vm1, %v1157_v9, %v1156_v14  ;;  %v778_v20 = vld [vmem:[%s15158_s17 + $0x4d] sm:$0x1]  ;;  %v779_v21 = vld [vmem:[%s15158_s17 + $0x65] sm:$0x1]  ;;  %v780_v22 = vld [vmem:[%s15158_s17 + $0x7d] sm:$0x1] }
  0x42   : > { %v1160_v23 = vsel %vm466_vm2, %v1159_v10, %v1158_v19  ;;  %v781_v24 = vld [vmem:[%s15158_s17 + $0x95] sm:$0x1]  ;;  %v782_v25 = vld [vmem:[%s15158_s17 + $0xad] sm:$0x1]  ;;  %v807_v26 = vrot.slane %v776_v17, 7  ;;  %v809_v27 = vrot.slane %v777_v18, 6 }
  0x43   : > { %v1162_v28 = vsel %vm469_vm3, %v1161_v11, %v1160_v23  ;;  %v811_v29 = vrot.slane %v778_v20, 5  ;;  %v813_v30 = vrot.slane %v779_v21, 4  ;;  %v815_v31 = vrot.slane %v780_v22, 3  ;;  %v1131_v32 = vld [vmem:[%s15158_s17 + $0xca] sm:$0x1]  ;;  %s14966_s26 = smov 56  }
  0x44   : > { %v1164_v33 = vsel %vm472_vm4, %v1163_v12, %v1162_v28  ;;  %v808_v34 = vsel %vm460_vm0, %v807_v26, %v775_v13  ;;  %v817_v35 = vrot.slane %v781_v24, 2  ;;  %v819_v36 = vrot.slane %v782_v25, 1  ;;  %v1132_v37 = vld [vmem:[%s15158_s17 + $0xe2] sm:$0x1]  ;;  %v1133_v38 = vld [vmem:[%s15158_s17 + $0xfa] sm:$0x1] }
  0x45   : > { %v1166_v39 = vsel %vm475_vm5, %v1165_v15, %v1164_v33  ;;  %v810_v40 = vsel %vm463_vm1, %v809_v27, %v808_v34  ;;  %v1134_v41 = vld [vmem:[%s15158_s17 + $0x112] sm:$0x1]  ;;  %v1135_v42 = vld [vmem:[%s15158_s17 + $0x12a] sm:$0x1]  ;;  %v1136_v43 = vld [vmem:[%s15158_s17 + $0x142] sm:$0x1] }
  0x46   : > { %v1168_v44 = vsel %vm478_vm6, %v1167_v16, %v1166_v39  ;;  %v812_v45 = vsel %vm466_vm2, %v811_v29, %v810_v40  ;;  %v1137_v46 = vld [vmem:[%s15158_s17 + $0x15a] sm:$0x1]  ;;  %v1138_v47 = vld [vmem:[%s15158_s17 + $0x172] sm:$0x1]  ;;  %v1169_v48 = vrot.slane %v1132_v37, 7  ;;  %v1171_v49 = vrot.slane %v1133_v38, 6 }
  0x47   : > { %1183 = vrot.lane.b32.xlu1 %v1168_v44, %s18391_s15  ;;  %v814_v50 = vsel %vm469_vm3, %v813_v30, %v812_v45  ;;  %v1173_v51 = vrot.slane %v1134_v41, 5  ;;  %v1175_v52 = vrot.slane %v1135_v42, 4  ;;  %v1177_v53 = vrot.slane %v1136_v43, 3  ;;  %v783_v54 = vld [vmem:[%s15158_s17 + $0xc5] sm:$0x1]  ;;  %p18416_p9 = scmp.ne.s32.totalorder %s18403_s13, 0 }
  0x48   : > { %v816_v55 = vsel %vm472_vm4, %v815_v31, %v814_v50  ;;  %v1170_v56 = vsel %vm460_vm0, %v1169_v48, %v1131_v32  ;;  %v1179_v57 = vrot.slane %v1137_v46, 2  ;;  %v1181_v58 = vrot.slane %v1138_v47, 1  ;;  %v784_v59 = vld [vmem:[%s15158_s17 + $0xdd] sm:$0x1]  ;;  %v785_v60 = vld [vmem:[%s15158_s17 + $0xf5] sm:$0x1] }
  0x49   : > { %v818_v61 = vsel %vm475_vm5, %v817_v35, %v816_v55  ;;  %v1172_v62 = vsel %vm463_vm1, %v1171_v49, %v1170_v56  ;;  %v786_v63 = vld [vmem:[%s15158_s17 + $0x10d] sm:$0x1]  ;;  %v787_v0 = vld [vmem:[%s15158_s17 + $0x125] sm:$0x1]  ;;  %v788_v1 = vld [vmem:[%s15158_s17 + $0x13d] sm:$0x1] }
  0x4a   : > { %v820_v2 = vsel %vm478_vm6, %v819_v36, %v818_v61  ;;  %v1174_v3 = vsel %vm466_vm2, %v1173_v51, %v1172_v62  ;;  %v789_v4 = vld [vmem:[%s15158_s17 + $0x155] sm:$0x1]  ;;  %v790_v5 = vld [vmem:[%s15158_s17 + $0x16d] sm:$0x1]  ;;  %v821_v6 = vrot.slane %v784_v59, 7  ;;  %v823_v7 = vrot.slane %v785_v60, 6 }
  0x4b   : > { %835 = vrot.lane.b32.xlu0 %v820_v2, %s14958_s16  ;;  %v1176_v8 = vsel %vm469_vm3, %v1175_v52, %v1174_v3  ;;  %v825_v9 = vrot.slane %v786_v63, 5  ;;  %v827_v10 = vrot.slane %v787_v0, 4  ;;  %v829_v11 = vrot.slane %v788_v1, 3  ;;  %v855_v12 = vld [vmem:[%s15158_s17 + $0xc6] sm:$0x1] }
  0x4c   : > { %v1178_v13 = vsel %vm472_vm4, %v1177_v53, %v1176_v8  ;;  %v822_v14 = vsel %vm460_vm0, %v821_v6, %v783_v54  ;;  %v831_v15 = vrot.slane %v789_v4, 2  ;;  %v833_v16 = vrot.slane %v790_v5, 1  ;;  %v856_v17 = vld [vmem:[%s15158_s17 + $0xde] sm:$0x1]  ;;  %v857_v18 = vld [vmem:[%s15158_s17 + $0xf6] sm:$0x1] }
  0x4d   : > { %v1180_v19 = vsel %vm475_vm5, %v1179_v57, %v1178_v13  ;;  %v824_v20 = vsel %vm463_vm1, %v823_v7, %v822_v14  ;;  %v858_v21 = vld [vmem:[%s15158_s17 + $0x10e] sm:$0x1]  ;;  %v859_v22 = vld [vmem:[%s15158_s17 + $0x126] sm:$0x1]  ;;  %v860_v23 = vld [vmem:[%s15158_s17 + $0x13e] sm:$0x1] }
  0x4e   : > { %v1182_v24 = vsel %vm478_vm6, %v1181_v58, %v1180_v19  ;;  %v826_v25 = vsel %vm466_vm2, %v825_v9, %v824_v20  ;;  %v861_v26 = vld [vmem:[%s15158_s17 + $0x156] sm:$0x1]  ;;  %v862_v27 = vld [vmem:[%s15158_s17 + $0x16e] sm:$0x1]  ;;  %v893_v28 = vrot.slane %v856_v17, 7  ;;  %v895_v29 = vrot.slane %v857_v18, 6 }
  0x4f   : > { %1185 = vrot.lane.b32.xlu1 %v1182_v24, %s18391_s15  ;;  %v828_v30 = vsel %vm469_vm3, %v827_v10, %v826_v25  ;;  %v897_v31 = vrot.slane %v858_v21, 5  ;;  %v899_v32 = vrot.slane %v859_v22, 4  ;;  %v901_v33 = vrot.slane %v860_v23, 3  ;;  %v847_v34 = vld [vmem:[%s15158_s17 + $0x6] sm:$0x1]  ;;  %s14971_s15 = smov 104  }
  0x50   : > { %v830_v35 = vsel %vm472_vm4, %v829_v11, %v828_v30  ;;  %v894_v36 = vsel %vm460_vm0, %v893_v28, %v855_v12  ;;  %v903_v37 = vrot.slane %v861_v26, 2  ;;  %v905_v38 = vrot.slane %v862_v27, 1  ;;  %v848_v39 = vld [vmem:[%s15158_s17 + $0x1e] sm:$0x1]  ;;  %v849_v40 = vld [vmem:[%s15158_s17 + $0x36] sm:$0x1] }
  0x51   : > { %v832_v41 = vsel %vm475_vm5, %v831_v15, %v830_v35  ;;  %v896_v42 = vsel %vm463_vm1, %v895_v29, %v894_v36  ;;  %v850_v43 = vld [vmem:[%s15158_s17 + $0x4e] sm:$0x1]  ;;  %v851_v44 = vld [vmem:[%s15158_s17 + $0x66] sm:$0x1]  ;;  %v852_v45 = vld [vmem:[%s15158_s17 + $0x7e] sm:$0x1] }
  0x52   : > { %v834_v46 = vsel %vm478_vm6, %v833_v16, %v832_v41  ;;  %v898_v47 = vsel %vm466_vm2, %v897_v31, %v896_v42  ;;  %v853_v48 = vld [vmem:[%s15158_s17 + $0x96] sm:$0x1]  ;;  %v854_v49 = vld [vmem:[%s15158_s17 + $0xae] sm:$0x1]  ;;  %v879_v50 = vrot.slane %v848_v39, 7  ;;  %v881_v51 = vrot.slane %v849_v40, 6 }
  0x53   : > { %837 = vrot.lane.b32.xlu0 %v834_v46, %s14958_s16  ;;  %v900_v52 = vsel %vm469_vm3, %v899_v32, %v898_v47  ;;  %v883_v53 = vrot.slane %v850_v43, 5  ;;  %v885_v54 = vrot.slane %v851_v44, 4  ;;  %v887_v55 = vrot.slane %v852_v45, 3  ;;  %v1203_v56 = vld [vmem:[%s15158_s17 + $0xcb] sm:$0x1] }
  0x54   : > { %v902_v57 = vsel %vm472_vm4, %v901_v33, %v900_v52  ;;  %v880_v58 = vsel %vm460_vm0, %v879_v50, %v847_v34  ;;  %v889_v59 = vrot.slane %v853_v48, 2  ;;  %v891_v60 = vrot.slane %v854_v49, 1  ;;  %v1204_v61 = vld [vmem:[%s15158_s17 + $0xe3] sm:$0x1]  ;;  %v1205_v62 = vld [vmem:[%s15158_s17 + $0xfb] sm:$0x1] }
  0x55   : > { %v904_v63 = vsel %vm475_vm5, %v903_v37, %v902_v57  ;;  %v882_v0 = vsel %vm463_vm1, %v881_v51, %v880_v58  ;;  %v1206_v1 = vld [vmem:[%s15158_s17 + $0x113] sm:$0x1]  ;;  %v1207_v2 = vld [vmem:[%s15158_s17 + $0x12b] sm:$0x1]  ;;  %v1208_v3 = vld [vmem:[%s15158_s17 + $0x143] sm:$0x1] }
  0x56   : > { %v906_v4 = vsel %vm478_vm6, %v905_v38, %v904_v63  ;;  %v884_v5 = vsel %vm466_vm2, %v883_v53, %v882_v0  ;;  %v1209_v6 = vld [vmem:[%s15158_s17 + $0x15b] sm:$0x1]  ;;  %v1210_v7 = vld [vmem:[%s15158_s17 + $0x173] sm:$0x1]  ;;  %v1241_v8 = vrot.slane %v1204_v61, 7  ;;  %v1243_v9 = vrot.slane %v1205_v62, 6 }
  0x57   : > { %909 = vrot.lane.b32.xlu1 %v906_v4, %s18399_s19  ;;  %v886_v10 = vsel %vm469_vm3, %v885_v54, %v884_v5  ;;  %v1245_v11 = vrot.slane %v1206_v1, 5  ;;  %v1247_v12 = vrot.slane %v1207_v2, 4  ;;  %v1249_v13 = vrot.slane %v1208_v3, 3  ;;  %v1195_v14 = vld [vmem:[%s15158_s17 + $0xb] sm:$0x1] }
  0x58   : > { %v888_v15 = vsel %vm472_vm4, %v887_v55, %v886_v10  ;;  %v1242_v16 = vsel %vm460_vm0, %v1241_v8, %v1203_v56  ;;  %v1251_v17 = vrot.slane %v1209_v6, 2  ;;  %v1253_v18 = vrot.slane %v1210_v7, 1  ;;  %v1196_v19 = vld [vmem:[%s15158_s17 + $0x23] sm:$0x1]  ;;  %v1197_v20 = vld [vmem:[%s15158_s17 + $0x3b] sm:$0x1] }
  0x59   : > { %v890_v21 = vsel %vm475_vm5, %v889_v59, %v888_v15  ;;  %v1244_v22 = vsel %vm463_vm1, %v1243_v9, %v1242_v16  ;;  %v1198_v23 = vld [vmem:[%s15158_s17 + $0x53] sm:$0x1]  ;;  %v1199_v24 = vld [vmem:[%s15158_s17 + $0x6b] sm:$0x1]  ;;  %v1200_v25 = vld [vmem:[%s15158_s17 + $0x83] sm:$0x1] }
  0x5a   : > { %v892_v26 = vsel %vm478_vm6, %v891_v60, %v890_v21  ;;  %v1246_v27 = vsel %vm466_vm2, %v1245_v11, %v1244_v22  ;;  %v1201_v28 = vld [vmem:[%s15158_s17 + $0x9b] sm:$0x1]  ;;  %v1202_v29 = vld [vmem:[%s15158_s17 + $0xb3] sm:$0x1]  ;;  %v1227_v30 = vrot.slane %v1196_v19, 7  ;;  %v1229_v31 = vrot.slane %v1197_v20, 6 }
  0x5b   : > { %907 = vrot.lane.b32.xlu0 %v892_v26, %s18399_s19  ;;  %v1248_v32 = vsel %vm469_vm3, %v1247_v12, %v1246_v27  ;;  %v1231_v33 = vrot.slane %v1198_v23, 5  ;;  %v1233_v34 = vrot.slane %v1199_v24, 4  ;;  %v1235_v35 = vrot.slane %v1200_v25, 3  ;;  %v507_v36 = vld [vmem:[%s15158_s17 + $0xc1] sm:$0x1] }
  0x5c   : > { %v1250_v37 = vsel %vm472_vm4, %v1249_v13, %v1248_v32  ;;  %v1228_v38 = vsel %vm460_vm0, %v1227_v30, %v1195_v14  ;;  %v1237_v39 = vrot.slane %v1201_v28, 2  ;;  %v1239_v40 = vrot.slane %v1202_v29, 1  ;;  %v508_v41 = vld [vmem:[%s15158_s17 + $0xd9] sm:$0x1]  ;;  %v509_v42 = vld [vmem:[%s15158_s17 + $0xf1] sm:$0x1] }
  0x5d   : > { %v1252_v43 = vsel %vm475_vm5, %v1251_v17, %v1250_v37  ;;  %v1230_v44 = vsel %vm463_vm1, %v1229_v31, %v1228_v38  ;;  %v510_v45 = vld [vmem:[%s15158_s17 + $0x109] sm:$0x1]  ;;  %v511_v46 = vld [vmem:[%s15158_s17 + $0x121] sm:$0x1]  ;;  %v512_v47 = vld [vmem:[%s15158_s17 + $0x139] sm:$0x1] }
  0x5e   : > { %v1254_v48 = vsel %vm478_vm6, %v1253_v18, %v1252_v43  ;;  %v1232_v49 = vsel %vm466_vm2, %v1231_v33, %v1230_v44  ;;  %v513_v50 = vld [vmem:[%s15158_s17 + $0x151] sm:$0x1]  ;;  %v514_v51 = vld [vmem:[%s15158_s17 + $0x169] sm:$0x1]  ;;  %v545_v52 = vrot.slane %v508_v41, 7  ;;  %v547_v53 = vrot.slane %v509_v42, 6 }
  0x5f   : > { %1257 = vrot.lane.b32.xlu1 %v1254_v48, %s18388_s20  ;;  %v1234_v54 = vsel %vm469_vm3, %v1233_v34, %v1232_v49  ;;  %v549_v55 = vrot.slane %v510_v45, 5  ;;  %v551_v56 = vrot.slane %v511_v46, 4  ;;  %v553_v57 = vrot.slane %v512_v47, 3  ;;  %v499_v58 = vld [vmem:[%s15158_s17 + $0x1] sm:$0x1] }
  0x60   : > { %v1236_v59 = vsel %vm472_vm4, %v1235_v35, %v1234_v54  ;;  %v546_v60 = vsel %vm460_vm0, %v545_v52, %v507_v36  ;;  %v555_v61 = vrot.slane %v513_v50, 2  ;;  %v557_v62 = vrot.slane %v514_v51, 1  ;;  %v500_v63 = vld [vmem:[%s15158_s17 + $0x19] sm:$0x1]  ;;  %v501_v0 = vld [vmem:[%s15158_s17 + $0x31] sm:$0x1] }
  0x61   : > { %v1238_v1 = vsel %vm475_vm5, %v1237_v39, %v1236_v59  ;;  %v548_v2 = vsel %vm463_vm1, %v547_v53, %v546_v60  ;;  %v502_v3 = vld [vmem:[%s15158_s17 + $0x49] sm:$0x1]  ;;  %v503_v4 = vld [vmem:[%s15158_s17 + $0x61] sm:$0x1]  ;;  %v504_v5 = vld [vmem:[%s15158_s17 + $0x79] sm:$0x1] }
  0x62   : > { %v1240_v6 = vsel %vm478_vm6, %v1239_v40, %v1238_v1  ;;  %v550_v7 = vsel %vm466_vm2, %v549_v55, %v548_v2  ;;  %v505_v8 = vld [vmem:[%s15158_s17 + $0x91] sm:$0x1]  ;;  %v506_v9 = vld [vmem:[%s15158_s17 + $0xa9] sm:$0x1]  ;;  %v531_v10 = vrot.slane %v500_v63, 7  ;;  %v533_v11 = vrot.slane %v501_v0, 6 }
  0x63   : > { %1255 = vrot.lane.b32.xlu0 %v1240_v6, %s18388_s20  ;;  %v552_v12 = vsel %vm469_vm3, %v551_v56, %v550_v7  ;;  %v535_v13 = vrot.slane %v502_v3, 5  ;;  %v537_v14 = vrot.slane %v503_v4, 4  ;;  %v539_v15 = vrot.slane %v504_v5, 3  ;;  %v924_v16 = vld [vmem:[%s15158_s17 + $0xc7] sm:$0x1]  ;;  %s14968_s20 = smov 88  }
  0x64   : > { %v554_v17 = vsel %vm472_vm4, %v553_v57, %v552_v12  ;;  %v532_v18 = vsel %vm460_vm0, %v531_v10, %v499_v58  ;;  %v541_v19 = vrot.slane %v505_v8, 2  ;;  %v543_v20 = vrot.slane %v506_v9, 1  ;;  %v925_v21 = vld [vmem:[%s15158_s17 + $0xdf] sm:$0x1]  ;;  %v926_v22 = vld [vmem:[%s15158_s17 + $0xf7] sm:$0x1] }
  0x65   : > { %v556_v23 = vsel %vm475_vm5, %v555_v61, %v554_v17  ;;  %v534_v24 = vsel %vm463_vm1, %v533_v11, %v532_v18  ;;  %v927_v25 = vld [vmem:[%s15158_s17 + $0x10f] sm:$0x1]  ;;  %v928_v26 = vld [vmem:[%s15158_s17 + $0x127] sm:$0x1]  ;;  %v929_v27 = vld [vmem:[%s15158_s17 + $0x13f] sm:$0x1] }
  0x66   : > { %v558_v28 = vsel %vm478_vm6, %v557_v62, %v556_v23  ;;  %v536_v29 = vsel %vm466_vm2, %v535_v13, %v534_v24  ;;  %v930_v30 = vld [vmem:[%s15158_s17 + $0x157] sm:$0x1]  ;;  %v931_v31 = vld [vmem:[%s15158_s17 + $0x16f] sm:$0x1]  ;;  %v962_v32 = vrot.slane %v925_v21, 7  ;;  %v964_v33 = vrot.slane %v926_v22, 6 }
  0x67   : > { %561 = vrot.lane.b32.xlu1 %v558_v28, %s14961_s28  ;;  %v538_v34 = vsel %vm469_vm3, %v537_v14, %v536_v29  ;;  %v966_v35 = vrot.slane %v927_v25, 5  ;;  %v968_v36 = vrot.slane %v928_v26, 4  ;;  %v970_v37 = vrot.slane %v929_v27, 3  ;;  %v916_v38 = vld [vmem:[%s15158_s17 + $0x7] sm:$0x1] }
  0x68   : > { %v540_v39 = vsel %vm472_vm4, %v539_v15, %v538_v34  ;;  %v963_v40 = vsel %vm460_vm0, %v962_v32, %v924_v16  ;;  %v972_v41 = vrot.slane %v930_v30, 2  ;;  %v974_v42 = vrot.slane %v931_v31, 1  ;;  %v917_v43 = vld [vmem:[%s15158_s17 + $0x1f] sm:$0x1]  ;;  %v918_v44 = vld [vmem:[%s15158_s17 + $0x37] sm:$0x1] }
  0x69   : > { %v542_v45 = vsel %vm475_vm5, %v541_v19, %v540_v39  ;;  %v965_v46 = vsel %vm463_vm1, %v964_v33, %v963_v40  ;;  %v919_v47 = vld [vmem:[%s15158_s17 + $0x4f] sm:$0x1]  ;;  %v920_v48 = vld [vmem:[%s15158_s17 + $0x67] sm:$0x1]  ;;  %v921_v49 = vld [vmem:[%s15158_s17 + $0x7f] sm:$0x1] }
  0x6a   : > { %v544_v50 = vsel %vm478_vm6, %v543_v20, %v542_v45  ;;  %v967_v51 = vsel %vm466_vm2, %v966_v35, %v965_v46  ;;  %v922_v52 = vld [vmem:[%s15158_s17 + $0x97] sm:$0x1]  ;;  %v923_v53 = vld [vmem:[%s15158_s17 + $0xaf] sm:$0x1]  ;;  %v948_v54 = vrot.slane %v917_v43, 7  ;;  %v950_v55 = vrot.slane %v918_v44, 6 }
  0x6b   : > { %559 = vrot.lane.b32.xlu0 %v544_v50, %s14961_s28  ;;  %v969_v56 = vsel %vm469_vm3, %v968_v36, %v967_v51  ;;  %v952_v57 = vrot.slane %v919_v47, 5  ;;  %v954_v58 = vrot.slane %v920_v48, 4  ;;  %v956_v59 = vrot.slane %v921_v49, 3  ;;  %v1272_v60 = vld [vmem:[%s15158_s17 + $0xcc] sm:$0x1] }
  0x6c   : > { %v971_v61 = vsel %vm472_vm4, %v970_v37, %v969_v56  ;;  %v949_v62 = vsel %vm460_vm0, %v948_v54, %v916_v38  ;;  %v958_v63 = vrot.slane %v922_v52, 2  ;;  %v960_v0 = vrot.slane %v923_v53, 1  ;;  %v1273_v1 = vld [vmem:[%s15158_s17 + $0xe4] sm:$0x1]  ;;  %v1274_v2 = vld [vmem:[%s15158_s17 + $0xfc] sm:$0x1] }
  0x6d   : > { %v973_v3 = vsel %vm475_vm5, %v972_v41, %v971_v61  ;;  %v951_v4 = vsel %vm463_vm1, %v950_v55, %v949_v62  ;;  %v1275_v5 = vld [vmem:[%s15158_s17 + $0x114] sm:$0x1]  ;;  %v1276_v6 = vld [vmem:[%s15158_s17 + $0x12c] sm:$0x1]  ;;  %v1277_v7 = vld [vmem:[%s15158_s17 + $0x144] sm:$0x1] }
  0x6e   : > { %v975_v8 = vsel %vm478_vm6, %v974_v42, %v973_v3  ;;  %v953_v9 = vsel %vm466_vm2, %v952_v57, %v951_v4  ;;  %v1278_v10 = vld [vmem:[%s15158_s17 + $0x15c] sm:$0x1]  ;;  %v1279_v11 = vld [vmem:[%s15158_s17 + $0x174] sm:$0x1]  ;;  %v1310_v12 = vrot.slane %v1273_v1, 7  ;;  %v1312_v13 = vrot.slane %v1274_v2, 6 }
  0x6f   : > { %978 = vrot.lane.b32.xlu1 %v975_v8, %s14962_s29  ;;  %v955_v14 = vsel %vm469_vm3, %v954_v58, %v953_v9  ;;  %v1314_v15 = vrot.slane %v1275_v5, 5  ;;  %v1316_v16 = vrot.slane %v1276_v6, 4  ;;  %v1318_v17 = vrot.slane %v1277_v7, 3  ;;  %v1264_v18 = vld [vmem:[%s15158_s17 + $0xc] sm:$0x1] }
  0x70   : > { %v957_v19 = vsel %vm472_vm4, %v956_v59, %v955_v14  ;;  %v1311_v20 = vsel %vm460_vm0, %v1310_v12, %v1272_v60  ;;  %v1320_v21 = vrot.slane %v1278_v10, 2  ;;  %v1322_v22 = vrot.slane %v1279_v11, 1  ;;  %v1265_v23 = vld [vmem:[%s15158_s17 + $0x24] sm:$0x1]  ;;  %v1266_v24 = vld [vmem:[%s15158_s17 + $0x3c] sm:$0x1] }
  0x71   : > { %v959_v25 = vsel %vm475_vm5, %v958_v63, %v957_v19  ;;  %v1313_v26 = vsel %vm463_vm1, %v1312_v13, %v1311_v20  ;;  %v1267_v27 = vld [vmem:[%s15158_s17 + $0x54] sm:$0x1]  ;;  %v1268_v28 = vld [vmem:[%s15158_s17 + $0x6c] sm:$0x1]  ;;  %v1269_v29 = vld [vmem:[%s15158_s17 + $0x84] sm:$0x1] }
  0x72   : > { %v961_v30 = vsel %vm478_vm6, %v960_v0, %v959_v25  ;;  %v1315_v31 = vsel %vm466_vm2, %v1314_v15, %v1313_v26  ;;  %v1270_v32 = vld [vmem:[%s15158_s17 + $0x9c] sm:$0x1]  ;;  %v1271_v33 = vld [vmem:[%s15158_s17 + $0xb4] sm:$0x1]  ;;  %v1296_v34 = vrot.slane %v1265_v23, 7  ;;  %v1298_v35 = vrot.slane %v1266_v24, 6 }
  0x73   : > { %976 = vrot.lane.b32.xlu0 %v961_v30, %s14962_s29  ;;  %v1317_v36 = vsel %vm469_vm3, %v1316_v16, %v1315_v31  ;;  %v1300_v37 = vrot.slane %v1267_v27, 5  ;;  %v1302_v38 = vrot.slane %v1268_v28, 4  ;;  %v1304_v39 = vrot.slane %v1269_v29, 3  ;;  %v576_v40 = vld [vmem:[%s15158_s17 + $0xc2] sm:$0x1] }
  0x74   : > { %v1319_v41 = vsel %vm472_vm4, %v1318_v17, %v1317_v36  ;;  %v1297_v42 = vsel %vm460_vm0, %v1296_v34, %v1264_v18  ;;  %v1306_v43 = vrot.slane %v1270_v32, 2  ;;  %v1308_v44 = vrot.slane %v1271_v33, 1  ;;  %v577_v45 = vld [vmem:[%s15158_s17 + $0xda] sm:$0x1]  ;;  %v578_v46 = vld [vmem:[%s15158_s17 + $0xf2] sm:$0x1] }
  0x75   : > { %v1321_v47 = vsel %vm475_vm5, %v1320_v21, %v1319_v41  ;;  %v1299_v48 = vsel %vm463_vm1, %v1298_v35, %v1297_v42  ;;  %v579_v49 = vld [vmem:[%s15158_s17 + $0x10a] sm:$0x1]  ;;  %v580_v50 = vld [vmem:[%s15158_s17 + $0x122] sm:$0x1]  ;;  %v581_v51 = vld [vmem:[%s15158_s17 + $0x13a] sm:$0x1] }
  0x76   : > { %v1323_v52 = vsel %vm478_vm6, %v1322_v22, %v1321_v47  ;;  %v1301_v53 = vsel %vm466_vm2, %v1300_v37, %v1299_v48  ;;  %v582_v54 = vld [vmem:[%s15158_s17 + $0x152] sm:$0x1]  ;;  %v583_v55 = vld [vmem:[%s15158_s17 + $0x16a] sm:$0x1]  ;;  %v614_v56 = vrot.slane %v577_v45, 7  ;;  %v616_v57 = vrot.slane %v578_v46, 6 }
  0x77   : > { %1326 = vrot.lane.b32.xlu1 %v1323_v52, %s14963_s23  ;;  %v1303_v58 = vsel %vm469_vm3, %v1302_v38, %v1301_v53  ;;  %v618_v59 = vrot.slane %v579_v49, 5  ;;  %v620_v60 = vrot.slane %v580_v50, 4  ;;  %v622_v61 = vrot.slane %v581_v51, 3  ;;  %v568_v62 = vld [vmem:[%s15158_s17 + $0x2] sm:$0x1] }
  0x78   : > { %v1305_v63 = vsel %vm472_vm4, %v1304_v39, %v1303_v58  ;;  %v615_v0 = vsel %vm460_vm0, %v614_v56, %v576_v40  ;;  %v624_v1 = vrot.slane %v582_v54, 2  ;;  %v626_v2 = vrot.slane %v583_v55, 1  ;;  %v569_v3 = vld [vmem:[%s15158_s17 + $0x1a] sm:$0x1]  ;;  %v570_v4 = vld [vmem:[%s15158_s17 + $0x32] sm:$0x1] }
  0x79   : > { %v1307_v5 = vsel %vm475_vm5, %v1306_v43, %v1305_v63  ;;  %v617_v6 = vsel %vm463_vm1, %v616_v57, %v615_v0  ;;  %v571_v7 = vld [vmem:[%s15158_s17 + $0x4a] sm:$0x1]  ;;  %v572_v8 = vld [vmem:[%s15158_s17 + $0x62] sm:$0x1]  ;;  %v573_v9 = vld [vmem:[%s15158_s17 + $0x7a] sm:$0x1] }
  0x7a   : > { %v1309_v10 = vsel %vm478_vm6, %v1308_v44, %v1307_v5  ;;  %v619_v11 = vsel %vm466_vm2, %v618_v59, %v617_v6  ;;  %v574_v12 = vld [vmem:[%s15158_s17 + $0x92] sm:$0x1]  ;;  %v575_v13 = vld [vmem:[%s15158_s17 + $0xaa] sm:$0x1]  ;;  %v600_v14 = vrot.slane %v569_v3, 7  ;;  %v602_v15 = vrot.slane %v570_v4, 6 }
  0x7b   : > { %1324 = vrot.lane.b32.xlu0 %v1309_v10, %s14963_s23  ;;  %v621_v16 = vsel %vm469_vm3, %v620_v60, %v619_v11  ;;  %v604_v17 = vrot.slane %v571_v7, 5  ;;  %v606_v18 = vrot.slane %v572_v8, 4  ;;  %v608_v19 = vrot.slane %v573_v9, 3  ;;  %v993_v20 = vld [vmem:[%s15158_s17 + $0xc8] sm:$0x1] }
  0x7c   : > { %v623_v21 = vsel %vm472_vm4, %v622_v61, %v621_v16  ;;  %v601_v22 = vsel %vm460_vm0, %v600_v14, %v568_v62  ;;  %v610_v23 = vrot.slane %v574_v12, 2  ;;  %v612_v24 = vrot.slane %v575_v13, 1  ;;  %v994_v25 = vld [vmem:[%s15158_s17 + $0xe0] sm:$0x1]  ;;  %v995_v26 = vld [vmem:[%s15158_s17 + $0xf8] sm:$0x1] }
  0x7d   : > { %v625_v27 = vsel %vm475_vm5, %v624_v1, %v623_v21  ;;  %v603_v28 = vsel %vm463_vm1, %v602_v15, %v601_v22  ;;  %v996_v29 = vld [vmem:[%s15158_s17 + $0x110] sm:$0x1]  ;;  %v997_v30 = vld [vmem:[%s15158_s17 + $0x128] sm:$0x1]  ;;  %v998_v31 = vld [vmem:[%s15158_s17 + $0x140] sm:$0x1] }
  0x7e   : > { %v627_v32 = vsel %vm478_vm6, %v626_v2, %v625_v27  ;;  %v605_v33 = vsel %vm466_vm2, %v604_v17, %v603_v28  ;;  %v999_v34 = vld [vmem:[%s15158_s17 + $0x158] sm:$0x1]  ;;  %v1000_v35 = vld [vmem:[%s15158_s17 + $0x170] sm:$0x1]  ;;  %v1031_v36 = vrot.slane %v994_v25, 7  ;;  %v1033_v37 = vrot.slane %v995_v26, 6 }
  0x7f   : > { %630 = vrot.lane.b32.xlu1 %v627_v32, %s18395_s30  ;;  %v607_v38 = vsel %vm469_vm3, %v606_v18, %v605_v33  ;;  %v1035_v39 = vrot.slane %v996_v29, 5  ;;  %v1037_v40 = vrot.slane %v997_v30, 4  ;;  %v1039_v41 = vrot.slane %v998_v31, 3  ;;  %v985_v42 = vld [vmem:[%s15158_s17 + $0x8] sm:$0x1] }
  0x80   : > { %v609_v43 = vsel %vm472_vm4, %v608_v19, %v607_v38  ;;  %v1032_v44 = vsel %vm460_vm0, %v1031_v36, %v993_v20  ;;  %v1041_v45 = vrot.slane %v999_v34, 2  ;;  %v1043_v46 = vrot.slane %v1000_v35, 1  ;;  %v986_v47 = vld [vmem:[%s15158_s17 + $0x20] sm:$0x1]  ;;  %v987_v48 = vld [vmem:[%s15158_s17 + $0x38] sm:$0x1] }
  0x81   : > { %v611_v49 = vsel %vm475_vm5, %v610_v23, %v609_v43  ;;  %v1034_v50 = vsel %vm463_vm1, %v1033_v37, %v1032_v44  ;;  %v988_v51 = vld [vmem:[%s15158_s17 + $0x50] sm:$0x1]  ;;  %v989_v52 = vld [vmem:[%s15158_s17 + $0x68] sm:$0x1]  ;;  %v990_v53 = vld [vmem:[%s15158_s17 + $0x80] sm:$0x1] }
  0x82   : > { %v613_v54 = vsel %vm478_vm6, %v612_v24, %v611_v49  ;;  %v1036_v55 = vsel %vm466_vm2, %v1035_v39, %v1034_v50  ;;  %v991_v56 = vld [vmem:[%s15158_s17 + $0x98] sm:$0x1]  ;;  %v992_v57 = vld [vmem:[%s15158_s17 + $0xb0] sm:$0x1]  ;;  %v1017_v58 = vrot.slane %v986_v47, 7  ;;  %v1019_v59 = vrot.slane %v987_v48, 6 }
  0x83   : > { %628 = vrot.lane.b32.xlu0 %v613_v54, %s18395_s30  ;;  %v1038_v60 = vsel %vm469_vm3, %v1037_v40, %v1036_v55  ;;  %v1021_v61 = vrot.slane %v988_v51, 5  ;;  %v1023_v62 = vrot.slane %v989_v52, 4  ;;  %v1025_v63 = vrot.slane %v990_v53, 3  ;;  %v1341_v0 = vld [vmem:[%s15158_s17 + $0xcd] sm:$0x1] }
  0x84   : > { %v1040_v1 = vsel %vm472_vm4, %v1039_v41, %v1038_v60  ;;  %v1018_v2 = vsel %vm460_vm0, %v1017_v58, %v985_v42  ;;  %v1027_v3 = vrot.slane %v991_v56, 2  ;;  %v1029_v4 = vrot.slane %v992_v57, 1  ;;  %v1342_v5 = vld [vmem:[%s15158_s17 + $0xe5] sm:$0x1]  ;;  %v1343_v6 = vld [vmem:[%s15158_s17 + $0xfd] sm:$0x1] }
  0x85   : > { %v1042_v7 = vsel %vm475_vm5, %v1041_v45, %v1040_v1  ;;  %v1020_v8 = vsel %vm463_vm1, %v1019_v59, %v1018_v2  ;;  %v1344_v9 = vld [vmem:[%s15158_s17 + $0x115] sm:$0x1]  ;;  %v1345_v10 = vld [vmem:[%s15158_s17 + $0x12d] sm:$0x1]  ;;  %v1346_v11 = vld [vmem:[%s15158_s17 + $0x145] sm:$0x1] }
  0x86   : > { %v1044_v12 = vsel %vm478_vm6, %v1043_v46, %v1042_v7  ;;  %v1022_v13 = vsel %vm466_vm2, %v1021_v61, %v1020_v8  ;;  %v1347_v14 = vld [vmem:[%s15158_s17 + $0x15d] sm:$0x1]  ;;  %v1348_v15 = vld [vmem:[%s15158_s17 + $0x175] sm:$0x1]  ;;  %v1379_v16 = vrot.slane %v1342_v5, 7  ;;  %v1381_v17 = vrot.slane %v1343_v6, 6 }
  0x87   : > { %1047 = vrot.lane.b32.xlu1 %v1044_v12, %s18389_s18  ;;  %v1024_v18 = vsel %vm469_vm3, %v1023_v62, %v1022_v13  ;;  %v1383_v19 = vrot.slane %v1344_v9, 5  ;;  %v1385_v20 = vrot.slane %v1345_v10, 4  ;;  %v1387_v21 = vrot.slane %v1346_v11, 3  ;;  %v1333_v22 = vld [vmem:[%s15158_s17 + $0xd] sm:$0x1] }
  0x88   : > { %v1026_v23 = vsel %vm472_vm4, %v1025_v63, %v1024_v18  ;;  %v1380_v24 = vsel %vm460_vm0, %v1379_v16, %v1341_v0  ;;  %v1389_v25 = vrot.slane %v1347_v14, 2  ;;  %v1391_v26 = vrot.slane %v1348_v15, 1  ;;  %v1334_v27 = vld [vmem:[%s15158_s17 + $0x25] sm:$0x1]  ;;  %v1335_v28 = vld [vmem:[%s15158_s17 + $0x3d] sm:$0x1] }
  0x89   : > { %v1028_v29 = vsel %vm475_vm5, %v1027_v3, %v1026_v23  ;;  %v1382_v30 = vsel %vm463_vm1, %v1381_v17, %v1380_v24  ;;  %v1336_v31 = vld [vmem:[%s15158_s17 + $0x55] sm:$0x1]  ;;  %v1337_v32 = vld [vmem:[%s15158_s17 + $0x6d] sm:$0x1]  ;;  %v1338_v33 = vld [vmem:[%s15158_s17 + $0x85] sm:$0x1] }
  0x8a   : > { %v1030_v34 = vsel %vm478_vm6, %v1029_v4, %v1028_v29  ;;  %v1384_v35 = vsel %vm466_vm2, %v1383_v19, %v1382_v30  ;;  %v1339_v36 = vld [vmem:[%s15158_s17 + $0x9d] sm:$0x1]  ;;  %v1340_v37 = vld [vmem:[%s15158_s17 + $0xb5] sm:$0x1]  ;;  %v1365_v38 = vrot.slane %v1334_v27, 7  ;;  %v1367_v39 = vrot.slane %v1335_v28, 6 }
  0x8b   : > { %1045 = vrot.lane.b32.xlu0 %v1030_v34, %s18389_s18  ;;  %v1386_v40 = vsel %vm469_vm3, %v1385_v20, %v1384_v35  ;;  %v1369_v41 = vrot.slane %v1336_v31, 5  ;;  %v1371_v42 = vrot.slane %v1337_v32, 4  ;;  %v1373_v43 = vrot.slane %v1338_v33, 3  ;;  %v645_v44 = vld [vmem:[%s15158_s17 + $0xc3] sm:$0x1]  ;;  %s18397_s18 = smov 96  }
  0x8c   : > { %v1388_v45 = vsel %vm472_vm4, %v1387_v21, %v1386_v40  ;;  %v1366_v46 = vsel %vm460_vm0, %v1365_v38, %v1333_v22  ;;  %v1375_v47 = vrot.slane %v1339_v36, 2  ;;  %v1377_v48 = vrot.slane %v1340_v37, 1  ;;  %v646_v49 = vld [vmem:[%s15158_s17 + $0xdb] sm:$0x1]  ;;  %v647_v50 = vld [vmem:[%s15158_s17 + $0xf3] sm:$0x1] }
  0x8d   : > { %v1390_v51 = vsel %vm475_vm5, %v1389_v25, %v1388_v45  ;;  %v1368_v52 = vsel %vm463_vm1, %v1367_v39, %v1366_v46  ;;  %v648_v53 = vld [vmem:[%s15158_s17 + $0x10b] sm:$0x1]  ;;  %v649_v54 = vld [vmem:[%s15158_s17 + $0x123] sm:$0x1]  ;;  %v650_v55 = vld [vmem:[%s15158_s17 + $0x13b] sm:$0x1] }
  0x8e   : > { %v1392_v56 = vsel %vm478_vm6, %v1391_v26, %v1390_v51  ;;  %v1370_v57 = vsel %vm466_vm2, %v1369_v41, %v1368_v52  ;;  %v651_v58 = vld [vmem:[%s15158_s17 + $0x153] sm:$0x1]  ;;  %v652_v59 = vld [vmem:[%s15158_s17 + $0x16b] sm:$0x1]  ;;  %v683_v60 = vrot.slane %v646_v49, 7  ;;  %v685_v61 = vrot.slane %v647_v50, 6 }
  0x8f   : > { %1395 = vrot.lane.b32.xlu1 %v1392_v56, %s14966_s26  ;;  %v1372_v62 = vsel %vm469_vm3, %v1371_v42, %v1370_v57  ;;  %v687_v63 = vrot.slane %v648_v53, 5  ;;  %v689_v0 = vrot.slane %v649_v54, 4  ;;  %v691_v1 = vrot.slane %v650_v55, 3  ;;  %v637_v2 = vld [vmem:[%s15158_s17 + $0x3] sm:$0x1] }
  0x90   : > { %v1374_v3 = vsel %vm472_vm4, %v1373_v43, %v1372_v62  ;;  %v684_v4 = vsel %vm460_vm0, %v683_v60, %v645_v44  ;;  %v693_v5 = vrot.slane %v651_v58, 2  ;;  %v695_v6 = vrot.slane %v652_v59, 1  ;;  %v638_v7 = vld [vmem:[%s15158_s17 + $0x1b] sm:$0x1]  ;;  %v639_v8 = vld [vmem:[%s15158_s17 + $0x33] sm:$0x1] }
  0x91   : > { %v1376_v9 = vsel %vm475_vm5, %v1375_v47, %v1374_v3  ;;  %v686_v10 = vsel %vm463_vm1, %v685_v61, %v684_v4  ;;  %v640_v11 = vld [vmem:[%s15158_s17 + $0x4b] sm:$0x1]  ;;  %v641_v12 = vld [vmem:[%s15158_s17 + $0x63] sm:$0x1]  ;;  %v642_v13 = vld [vmem:[%s15158_s17 + $0x7b] sm:$0x1] }
  0x92   : > { %v1378_v14 = vsel %vm478_vm6, %v1377_v48, %v1376_v9  ;;  %v688_v15 = vsel %vm466_vm2, %v687_v63, %v686_v10  ;;  %v643_v16 = vld [vmem:[%s15158_s17 + $0x93] sm:$0x1]  ;;  %v644_v17 = vld [vmem:[%s15158_s17 + $0xab] sm:$0x1]  ;;  %v669_v18 = vrot.slane %v638_v7, 7  ;;  %v671_v19 = vrot.slane %v639_v8, 6 }
  0x93   : > { %1393 = vrot.lane.b32.xlu0 %v1378_v14, %s14966_s26  ;;  %v690_v20 = vsel %vm469_vm3, %v689_v0, %v688_v15  ;;  %v673_v21 = vrot.slane %v640_v11, 5  ;;  %v675_v22 = vrot.slane %v641_v12, 4  ;;  %v677_v23 = vrot.slane %v642_v13, 3  ;;  %v1062_v24 = vld [vmem:[%s15158_s17 + $0xc9] sm:$0x1]  ;;  %s18393_s26 = smov 72  }
  0x94   : > { %v692_v25 = vsel %vm472_vm4, %v691_v1, %v690_v20  ;;  %v670_v26 = vsel %vm460_vm0, %v669_v18, %v637_v2  ;;  %v679_v27 = vrot.slane %v643_v16, 2  ;;  %v681_v28 = vrot.slane %v644_v17, 1  ;;  %v1063_v29 = vld [vmem:[%s15158_s17 + $0xe1] sm:$0x1]  ;;  %v1064_v30 = vld [vmem:[%s15158_s17 + $0xf9] sm:$0x1] }
  0x95   : > { %v694_v31 = vsel %vm475_vm5, %v693_v5, %v692_v25  ;;  %v672_v32 = vsel %vm463_vm1, %v671_v19, %v670_v26  ;;  %v1065_v33 = vld [vmem:[%s15158_s17 + $0x111] sm:$0x1]  ;;  %v1066_v34 = vld [vmem:[%s15158_s17 + $0x129] sm:$0x1]  ;;  %v1067_v35 = vld [vmem:[%s15158_s17 + $0x141] sm:$0x1] }
  0x96   : > { %v696_v36 = vsel %vm478_vm6, %v695_v6, %v694_v31  ;;  %v674_v37 = vsel %vm466_vm2, %v673_v21, %v672_v32  ;;  %v1068_v38 = vld [vmem:[%s15158_s17 + $0x159] sm:$0x1]  ;;  %v1069_v39 = vld [vmem:[%s15158_s17 + $0x171] sm:$0x1]  ;;  %v1100_v40 = vrot.slane %v1063_v29, 7  ;;  %v1102_v41 = vrot.slane %v1064_v30, 6 }
  0x97   : > { %699 = vrot.lane.b32.xlu1 %v696_v36, %s18393_s26  ;;  %v676_v42 = vsel %vm469_vm3, %v675_v22, %v674_v37  ;;  %v1104_v43 = vrot.slane %v1065_v33, 5  ;;  %v1106_v44 = vrot.slane %v1066_v34, 4  ;;  %v1108_v45 = vrot.slane %v1067_v35, 3  ;;  %v1054_v46 = vld [vmem:[%s15158_s17 + $0x9] sm:$0x1] }
  0x98   : > { %v678_v47 = vsel %vm472_vm4, %v677_v23, %v676_v42  ;;  %v1101_v48 = vsel %vm460_vm0, %v1100_v40, %v1062_v24  ;;  %v1110_v49 = vrot.slane %v1068_v38, 2  ;;  %v1112_v50 = vrot.slane %v1069_v39, 1  ;;  %v1055_v51 = vld [vmem:[%s15158_s17 + $0x21] sm:$0x1]  ;;  %v1056_v52 = vld [vmem:[%s15158_s17 + $0x39] sm:$0x1] }
  0x99   : > { %v680_v53 = vsel %vm475_vm5, %v679_v27, %v678_v47  ;;  %v1103_v54 = vsel %vm463_vm1, %v1102_v41, %v1101_v48  ;;  %v1057_v55 = vld [vmem:[%s15158_s17 + $0x51] sm:$0x1]  ;;  %v1058_v56 = vld [vmem:[%s15158_s17 + $0x69] sm:$0x1]  ;;  %v1059_v57 = vld [vmem:[%s15158_s17 + $0x81] sm:$0x1] }
  0x9a   : > { %v682_v58 = vsel %vm478_vm6, %v681_v28, %v680_v53  ;;  %v1105_v59 = vsel %vm466_vm2, %v1104_v43, %v1103_v54  ;;  %v1060_v60 = vld [vmem:[%s15158_s17 + $0x99] sm:$0x1]  ;;  %v1061_v61 = vld [vmem:[%s15158_s17 + $0xb1] sm:$0x1]  ;;  %v1086_v62 = vrot.slane %v1055_v51, 7  ;;  %v1088_v63 = vrot.slane %v1056_v52, 6 }
  0x9b   : > { %697 = vrot.lane.b32.xlu0 %v682_v58, %s18393_s26  ;;  %v1107_v0 = vsel %vm469_vm3, %v1106_v44, %v1105_v59  ;;  %v1090_v1 = vrot.slane %v1057_v55, 5  ;;  %v1092_v2 = vrot.slane %v1058_v56, 4  ;;  %v1094_v3 = vrot.slane %v1059_v57, 3  ;;  %v1410_v4 = vld [vmem:[%s15158_s17 + $0xce] sm:$0x1] }
  0x9c   : > { %v1109_v5 = vsel %vm472_vm4, %v1108_v45, %v1107_v0  ;;  %v1087_v6 = vsel %vm460_vm0, %v1086_v62, %v1054_v46  ;;  %v1096_v7 = vrot.slane %v1060_v60, 2  ;;  %v1098_v8 = vrot.slane %v1061_v61, 1  ;;  %v1411_v9 = vld [vmem:[%s15158_s17 + $0xe6] sm:$0x1]  ;;  %v1412_v10 = vld [vmem:[%s15158_s17 + $0xfe] sm:$0x1] }
  0x9d   : > { %v1111_v11 = vsel %vm475_vm5, %v1110_v49, %v1109_v5  ;;  %v1089_v12 = vsel %vm463_vm1, %v1088_v63, %v1087_v6  ;;  %v1413_v13 = vld [vmem:[%s15158_s17 + $0x116] sm:$0x1]  ;;  %v1414_v14 = vld [vmem:[%s15158_s17 + $0x12e] sm:$0x1]  ;;  %v1415_v15 = vld [vmem:[%s15158_s17 + $0x146] sm:$0x1] }
  0x9e   : > { %v1113_v16 = vsel %vm478_vm6, %v1112_v50, %v1111_v11  ;;  %v1091_v17 = vsel %vm466_vm2, %v1090_v1, %v1089_v12  ;;  %v1416_v18 = vld [vmem:[%s15158_s17 + $0x15e] sm:$0x1]  ;;  %v1417_v19 = vld [vmem:[%s15158_s17 + $0x176] sm:$0x1]  ;;  %v1448_v20 = vrot.slane %v1411_v9, 7  ;;  %v1450_v21 = vrot.slane %v1412_v10, 6 }
  0x9f   : > { %1116 = vrot.lane.b32.xlu1 %v1113_v16, %s14968_s20  ;;  %v1093_v22 = vsel %vm469_vm3, %v1092_v2, %v1091_v17  ;;  %v1452_v23 = vrot.slane %v1413_v13, 5  ;;  %v1454_v24 = vrot.slane %v1414_v14, 4  ;;  %v1456_v25 = vrot.slane %v1415_v15, 3  ;;  %v1402_v26 = vld [vmem:[%s15158_s17 + $0xe] sm:$0x1] }
  0xa0   : > { %v1095_v27 = vsel %vm472_vm4, %v1094_v3, %v1093_v22  ;;  %v1449_v28 = vsel %vm460_vm0, %v1448_v20, %v1410_v4  ;;  %v1458_v29 = vrot.slane %v1416_v18, 2  ;;  %v1460_v30 = vrot.slane %v1417_v19, 1  ;;  %v1403_v31 = vld [vmem:[%s15158_s17 + $0x26] sm:$0x1]  ;;  %v1404_v32 = vld [vmem:[%s15158_s17 + $0x3e] sm:$0x1] }
  0xa1   : > { %v1097_v33 = vsel %vm475_vm5, %v1096_v7, %v1095_v27  ;;  %v1451_v34 = vsel %vm463_vm1, %v1450_v21, %v1449_v28  ;;  %v1405_v35 = vld [vmem:[%s15158_s17 + $0x56] sm:$0x1]  ;;  %v1406_v36 = vld [vmem:[%s15158_s17 + $0x6e] sm:$0x1]  ;;  %v1407_v37 = vld [vmem:[%s15158_s17 + $0x86] sm:$0x1] }
  0xa2   : > { %v1099_v38 = vsel %vm478_vm6, %v1098_v8, %v1097_v33  ;;  %v1453_v39 = vsel %vm466_vm2, %v1452_v23, %v1451_v34  ;;  %v1408_v40 = vld [vmem:[%s15158_s17 + $0x9e] sm:$0x1]  ;;  %v1409_v41 = vld [vmem:[%s15158_s17 + $0xb6] sm:$0x1]  ;;  %v1434_v42 = vrot.slane %v1403_v31, 7  ;;  %v1436_v43 = vrot.slane %v1404_v32, 6 }
  0xa3   : > { %1114 = vrot.lane.b32.xlu0 %v1099_v38, %s14968_s20  ;;  %v1455_v44 = vsel %vm469_vm3, %v1454_v24, %v1453_v39  ;;  %v1438_v45 = vrot.slane %v1405_v35, 5  ;;  %v1440_v46 = vrot.slane %v1406_v36, 4  ;;  %v1442_v47 = vrot.slane %v1407_v37, 3  ;;  %v714_v48 = vld [vmem:[%s15158_s17 + $0xc4] sm:$0x1]  ;;  %s14969_s20 = smov 80  }
  0xa4   : > { %v1457_v49 = vsel %vm472_vm4, %v1456_v25, %v1455_v44  ;;  %v1435_v50 = vsel %vm460_vm0, %v1434_v42, %v1402_v26  ;;  %v1444_v51 = vrot.slane %v1408_v40, 2  ;;  %v1446_v52 = vrot.slane %v1409_v41, 1  ;;  %v715_v53 = vld [vmem:[%s15158_s17 + $0xdc] sm:$0x1]  ;;  %v716_v54 = vld [vmem:[%s15158_s17 + $0xf4] sm:$0x1] }
  0xa5   : > { %v1459_v55 = vsel %vm475_vm5, %v1458_v29, %v1457_v49  ;;  %v1437_v56 = vsel %vm463_vm1, %v1436_v43, %v1435_v50  ;;  %v717_v57 = vld [vmem:[%s15158_s17 + $0x10c] sm:$0x1]  ;;  %v718_v58 = vld [vmem:[%s15158_s17 + $0x124] sm:$0x1]  ;;  %v719_v59 = vld [vmem:[%s15158_s17 + $0x13c] sm:$0x1] }
  0xa6   : > { %v1461_v60 = vsel %vm478_vm6, %v1460_v30, %v1459_v55  ;;  %v1439_v61 = vsel %vm466_vm2, %v1438_v45, %v1437_v56  ;;  %v720_v62 = vld [vmem:[%s15158_s17 + $0x154] sm:$0x1]  ;;  %v721_v63 = vld [vmem:[%s15158_s17 + $0x16c] sm:$0x1]  ;;  %v752_v0 = vrot.slane %v715_v53, 7  ;;  %v754_v1 = vrot.slane %v716_v54, 6 }
  0xa7   : > { %1464 = vrot.lane.b32.xlu1 %v1461_v60, %s14969_s20  ;;  %v1441_v2 = vsel %vm469_vm3, %v1440_v46, %v1439_v61  ;;  %v756_v3 = vrot.slane %v717_v57, 5  ;;  %v758_v4 = vrot.slane %v718_v58, 4  ;;  %v760_v5 = vrot.slane %v719_v59, 3  ;;  %v706_v6 = vld [vmem:[%s15158_s17 + $0x4] sm:$0x1] }
  0xa8   : > { %v1443_v7 = vsel %vm472_vm4, %v1442_v47, %v1441_v2  ;;  %v753_v8 = vsel %vm460_vm0, %v752_v0, %v714_v48  ;;  %v762_v9 = vrot.slane %v720_v62, 2  ;;  %v764_v10 = vrot.slane %v721_v63, 1  ;;  %v707_v11 = vld [vmem:[%s15158_s17 + $0x1c] sm:$0x1]  ;;  %v708_v12 = vld [vmem:[%s15158_s17 + $0x34] sm:$0x1] }
  0xa9   : > { %v1445_v13 = vsel %vm475_vm5, %v1444_v51, %v1443_v7  ;;  %v755_v14 = vsel %vm463_vm1, %v754_v1, %v753_v8  ;;  %v709_v15 = vld [vmem:[%s15158_s17 + $0x4c] sm:$0x1]  ;;  %v710_v16 = vld [vmem:[%s15158_s17 + $0x64] sm:$0x1]  ;;  %v711_v17 = vld [vmem:[%s15158_s17 + $0x7c] sm:$0x1] }
  0xaa   : > { %v1447_v18 = vsel %vm478_vm6, %v1446_v52, %v1445_v13  ;;  %v757_v19 = vsel %vm466_vm2, %v756_v3, %v755_v14  ;;  %v712_v20 = vld [vmem:[%s15158_s17 + $0x94] sm:$0x1]  ;;  %v713_v21 = vld [vmem:[%s15158_s17 + $0xac] sm:$0x1]  ;;  %v738_v22 = vrot.slane %v707_v11, 7  ;;  %v740_v23 = vrot.slane %v708_v12, 6 }
  0xab   : > { %1462 = vrot.lane.b32.xlu0 %v1447_v18, %s14969_s20  ;;  %v759_v24 = vsel %vm469_vm3, %v758_v4, %v757_v19  ;;  %v742_v25 = vrot.slane %v709_v15, 5  ;;  %v744_v26 = vrot.slane %v710_v16, 4  ;;  %v746_v27 = vrot.slane %v711_v17, 3  ;;  %v1479_v28 = vld [vmem:[%s15158_s17 + $0xcf] sm:$0x1] }
  0xac   : > { %v761_v29 = vsel %vm472_vm4, %v760_v5, %v759_v24  ;;  %v739_v30 = vsel %vm460_vm0, %v738_v22, %v706_v6  ;;  %v748_v31 = vrot.slane %v712_v20, 2  ;;  %v750_v32 = vrot.slane %v713_v21, 1  ;;  %v1480_v33 = vld [vmem:[%s15158_s17 + $0xe7] sm:$0x1]  ;;  %v1481_v34 = vld [vmem:[%s15158_s17 + $0xff] sm:$0x1] }
  0xad   : > { %v763_v35 = vsel %vm475_vm5, %v762_v9, %v761_v29  ;;  %v741_v36 = vsel %vm463_vm1, %v740_v23, %v739_v30  ;;  %v1482_v37 = vld [vmem:[%s15158_s17 + $0x117] sm:$0x1]  ;;  %v1483_v38 = vld [vmem:[%s15158_s17 + $0x12f] sm:$0x1]  ;;  %v1484_v39 = vld [vmem:[%s15158_s17 + $0x147] sm:$0x1] }
  0xae   : > { %v765_v40 = vsel %vm478_vm6, %v764_v10, %v763_v35  ;;  %v743_v41 = vsel %vm466_vm2, %v742_v25, %v741_v36  ;;  %v1485_v42 = vld [vmem:[%s15158_s17 + $0x15f] sm:$0x1]  ;;  %v1486_v43 = vld [vmem:[%s15158_s17 + $0x177] sm:$0x1]  ;;  %v1517_v44 = vrot.slane %v1480_v33, 7  ;;  %v1519_v45 = vrot.slane %v1481_v34, 6 }
  0xaf   : > { %768 = vrot.lane.b32.xlu1 %v765_v40, %s18397_s18  ;;  %v745_v46 = vsel %vm469_vm3, %v744_v26, %v743_v41  ;;  %v1521_v47 = vrot.slane %v1482_v37, 5  ;;  %v1523_v48 = vrot.slane %v1483_v38, 4  ;;  %v1525_v49 = vrot.slane %v1484_v39, 3  ;;  %v1471_v50 = vld [vmem:[%s15158_s17 + $0xf] sm:$0x1] }
  0xb0   : > { %v747_v51 = vsel %vm472_vm4, %v746_v27, %v745_v46  ;;  %v1518_v52 = vsel %vm460_vm0, %v1517_v44, %v1479_v28  ;;  %v1527_v53 = vrot.slane %v1485_v42, 2  ;;  %v1529_v54 = vrot.slane %v1486_v43, 1  ;;  %v1472_v55 = vld [vmem:[%s15158_s17 + $0x27] sm:$0x1]  ;;  %v1473_v56 = vld [vmem:[%s15158_s17 + $0x3f] sm:$0x1] }
  0xb1   : > { %v749_v57 = vsel %vm475_vm5, %v748_v31, %v747_v51  ;;  %v1520_v58 = vsel %vm463_vm1, %v1519_v45, %v1518_v52  ;;  %v1474_v59 = vld [vmem:[%s15158_s17 + $0x57] sm:$0x1]  ;;  %v1475_v60 = vld [vmem:[%s15158_s17 + $0x6f] sm:$0x1]  ;;  %v1476_v61 = vld [vmem:[%s15158_s17 + $0x87] sm:$0x1] }
  0xb2   : > { %v751_v62 = vsel %vm478_vm6, %v750_v32, %v749_v57  ;;  %v1522_v63 = vsel %vm466_vm2, %v1521_v47, %v1520_v58  ;;  %v1477_v0 = vld [vmem:[%s15158_s17 + $0x9f] sm:$0x1]  ;;  %v1478_v1 = vld [vmem:[%s15158_s17 + $0xb7] sm:$0x1]  ;;  %v1503_v2 = vrot.slane %v1472_v55, 7  ;;  %v1505_v3 = vrot.slane %v1473_v56, 6 }
  0xb3   : > { %766 = vrot.lane.b32.xlu0 %v751_v62, %s18397_s18  ;;  %v1524_v4 = vsel %vm469_vm3, %v1523_v48, %v1522_v63  ;;  %v1507_v5 = vrot.slane %v1474_v59, 5  ;;  %v1509_v6 = vrot.slane %v1475_v60, 4  ;;  %v1511_v7 = vrot.slane %v1476_v61, 3  ;;  %v1884_v8 = vld [vmem:[%s15158_s17 + $0xd5] sm:$0x1] }
  0xb4   : > { %v1526_v9 = vsel %vm472_vm4, %v1525_v49, %v1524_v4  ;;  %v1504_v10 = vsel %vm460_vm0, %v1503_v2, %v1471_v50  ;;  %v1513_v11 = vrot.slane %v1477_v0, 2  ;;  %v1515_v12 = vrot.slane %v1478_v1, 1  ;;  %v1885_v13 = vld [vmem:[%s15158_s17 + $0xed] sm:$0x1]  ;;  %v1886_v14 = vld [vmem:[%s15158_s17 + $0x105] sm:$0x1] }
  0xb5   : > { %v1528_v15 = vsel %vm475_vm5, %v1527_v53, %v1526_v9  ;;  %v1506_v16 = vsel %vm463_vm1, %v1505_v3, %v1504_v10  ;;  %v1887_v17 = vld [vmem:[%s15158_s17 + $0x11d] sm:$0x1]  ;;  %v1888_v18 = vld [vmem:[%s15158_s17 + $0x135] sm:$0x1]  ;;  %v1889_v19 = vld [vmem:[%s15158_s17 + $0x14d] sm:$0x1] }
  0xb6   : > { %v1530_v20 = vsel %vm478_vm6, %v1529_v54, %v1528_v15  ;;  %v1508_v21 = vsel %vm466_vm2, %v1507_v5, %v1506_v16  ;;  %v1890_v22 = vld [vmem:[%s15158_s17 + $0x165] sm:$0x1]  ;;  %v1891_v23 = vld [vmem:[%s15158_s17 + $0x17d] sm:$0x1]  ;;  %v1922_v24 = vrot.slane %v1885_v13, 7  ;;  %v1924_v25 = vrot.slane %v1886_v14, 6 }
  0xb7   : > { %1533 = vrot.lane.b32.xlu1 %v1530_v20, %s14971_s15  ;;  %v1510_v26 = vsel %vm469_vm3, %v1509_v6, %v1508_v21  ;;  %v1926_v27 = vrot.slane %v1887_v17, 5  ;;  %v1928_v28 = vrot.slane %v1888_v18, 4  ;;  %v1930_v29 = vrot.slane %v1889_v19, 3  ;;  %v1876_v30 = vld [vmem:[%s15158_s17 + $0x15] sm:$0x1] }
  0xb8   : > { %v1512_v31 = vsel %vm472_vm4, %v1511_v7, %v1510_v26  ;;  %v1923_v32 = vsel %vm460_vm0, %v1922_v24, %v1884_v8  ;;  %v1932_v33 = vrot.slane %v1890_v22, 2  ;;  %v1934_v34 = vrot.slane %v1891_v23, 1  ;;  %v1877_v35 = vld [vmem:[%s15158_s17 + $0x2d] sm:$0x1]  ;;  %v1878_v36 = vld [vmem:[%s15158_s17 + $0x45] sm:$0x1] }
  0xb9   : > { %v1514_v37 = vsel %vm475_vm5, %v1513_v11, %v1512_v31  ;;  %v1925_v38 = vsel %vm463_vm1, %v1924_v25, %v1923_v32  ;;  %v1879_v39 = vld [vmem:[%s15158_s17 + $0x5d] sm:$0x1]  ;;  %v1880_v40 = vld [vmem:[%s15158_s17 + $0x75] sm:$0x1]  ;;  %v1881_v41 = vld [vmem:[%s15158_s17 + $0x8d] sm:$0x1] }
  0xba   : > { %v1516_v42 = vsel %vm478_vm6, %v1515_v12, %v1514_v37  ;;  %v1927_v43 = vsel %vm466_vm2, %v1926_v27, %v1925_v38  ;;  %v1882_v44 = vld [vmem:[%s15158_s17 + $0xa5] sm:$0x1]  ;;  %v1883_v45 = vld [vmem:[%s15158_s17 + $0xbd] sm:$0x1]  ;;  %v1908_v46 = vrot.slane %v1877_v35, 7  ;;  %v1910_v47 = vrot.slane %v1878_v36, 6 }
  0xbb   : > { %1531 = vrot.lane.b32.xlu0 %v1516_v42, %s14971_s15  ;;  %v1929_v48 = vsel %vm469_vm3, %v1928_v28, %v1927_v43  ;;  %v1912_v49 = vrot.slane %v1879_v39, 5  ;;  %v1914_v50 = vrot.slane %v1880_v40, 4  ;;  %v1916_v51 = vrot.slane %v1881_v41, 3  ;;  %v1954_v52 = vld [vmem:[%s15158_s17 + $0xd6] sm:$0x1] }
  0xbc   : > { %v1931_v53 = vsel %vm472_vm4, %v1930_v29, %v1929_v48  ;;  %v1909_v54 = vsel %vm460_vm0, %v1908_v46, %v1876_v30  ;;  %v1918_v55 = vrot.slane %v1882_v44, 2  ;;  %v1920_v56 = vrot.slane %v1883_v45, 1  ;;  %v1955_v57 = vld [vmem:[%s15158_s17 + $0xee] sm:$0x1]  ;;  %v1956_v58 = vld [vmem:[%s15158_s17 + $0x106] sm:$0x1] }
  0xbd   : > { %v1933_v59 = vsel %vm475_vm5, %v1932_v33, %v1931_v53  ;;  %v1911_v60 = vsel %vm463_vm1, %v1910_v47, %v1909_v54  ;;  %v1957_v61 = vld [vmem:[%s15158_s17 + $0x11e] sm:$0x1]  ;;  %v1958_v62 = vld [vmem:[%s15158_s17 + $0x136] sm:$0x1]  ;;  %v1959_v63 = vld [vmem:[%s15158_s17 + $0x14e] sm:$0x1] }
  0xbe   : > { %v1935_v0 = vsel %vm478_vm6, %v1934_v34, %v1933_v59  ;;  %v1913_v1 = vsel %vm466_vm2, %v1912_v49, %v1911_v60  ;;  %v1960_v2 = vld [vmem:[%s15158_s17 + $0x166] sm:$0x1]  ;;  %v1961_v3 = vld [vmem:[%s15158_s17 + $0x17e] sm:$0x1]  ;;  %v1992_v4 = vrot.slane %v1955_v57, 7  ;;  %v1994_v5 = vrot.slane %v1956_v58, 6 }
  0xbf   : > { %1938 = vrot.lane.b32.xlu1 %v1935_v0, %s14958_s16  ;;  %v1915_v6 = vsel %vm469_vm3, %v1914_v50, %v1913_v1  ;;  %v1996_v7 = vrot.slane %v1957_v61, 5  ;;  %v1998_v8 = vrot.slane %v1958_v62, 4  ;;  %v2000_v9 = vrot.slane %v1959_v63, 3  ;;  %v1946_v10 = vld [vmem:[%s15158_s17 + $0x16] sm:$0x1] }
  0xc0   : > { %v1917_v11 = vsel %vm472_vm4, %v1916_v51, %v1915_v6  ;;  %v1993_v12 = vsel %vm460_vm0, %v1992_v4, %v1954_v52  ;;  %v2002_v13 = vrot.slane %v1960_v2, 2  ;;  %v2004_v14 = vrot.slane %v1961_v3, 1  ;;  %v1947_v15 = vld [vmem:[%s15158_s17 + $0x2e] sm:$0x1]  ;;  %v1948_v16 = vld [vmem:[%s15158_s17 + $0x46] sm:$0x1]  ;;  %v15714_v2 = vpop.permute.xlu1 %1183 }
  0xc1   : > { %v1919_v17 = vsel %vm475_vm5, %v1918_v55, %v1917_v11  ;;  %v1995_v18 = vsel %vm463_vm1, %v1994_v5, %v1993_v12  ;;  %v1949_v19 = vld [vmem:[%s15158_s17 + $0x5e] sm:$0x1]  ;;  %v1950_v20 = vld [vmem:[%s15158_s17 + $0x76] sm:$0x1]  ;;  %v1951_v21 = vld [vmem:[%s15158_s17 + $0x8e] sm:$0x1] }
  0xc2   : > { %v1921_v22 = vsel %vm478_vm6, %v1920_v56, %v1919_v17  ;;  %v1997_v23 = vsel %vm466_vm2, %v1996_v7, %v1995_v18  ;;  %v1952_v24 = vld [vmem:[%s15158_s17 + $0xa6] sm:$0x1]  ;;  %v1953_v25 = vld [vmem:[%s15158_s17 + $0xbe] sm:$0x1]  ;;  %v1978_v26 = vrot.slane %v1947_v15, 7  ;;  %v1980_v27 = vrot.slane %v1948_v16, 6 }
  0xc3   : > { %1936 = vrot.lane.b32.xlu0 %v1921_v22, %s14958_s16  ;;  %v1999_v28 = vsel %vm469_vm3, %v1998_v8, %v1997_v23  ;;  %v1982_v29 = vrot.slane %v1949_v19, 5  ;;  %v1984_v30 = vrot.slane %v1950_v20, 4  ;;  %v1986_v31 = vrot.slane %v1951_v21, 3  ;;  %v2022_v32 = vld [vmem:[%s15158_s17 + $0xd7] sm:$0x1]  ;;  %1192 = vst.msk [vmem:[#allocation2 + $0x10] sm:$0xff] %vm1191_vm7, %v15714_v2 }
  0xc4   : > { %v2001_v33 = vsel %vm472_vm4, %v2000_v9, %v1999_v28  ;;  %v1979_v34 = vsel %vm460_vm0, %v1978_v26, %v1946_v10  ;;  %v1988_v35 = vrot.slane %v1952_v24, 2  ;;  %v1990_v36 = vrot.slane %v1953_v25, 1  ;;  %v2023_v37 = vld [vmem:[%s15158_s17 + $0xef] sm:$0x1]  ;;  %v2024_v38 = vld [vmem:[%s15158_s17 + $0x107] sm:$0x1]  ;;  %v15732_v25 = vpop.permute.xlu0 %835 }
  0xc5   : > { %v2003_v39 = vsel %vm475_vm5, %v2002_v13, %v2001_v33  ;;  %v1981_v40 = vsel %vm463_vm1, %v1980_v27, %v1979_v34  ;;  %v2025_v41 = vld [vmem:[%s15158_s17 + $0x11f] sm:$0x1]  ;;  %v2026_v42 = vld [vmem:[%s15158_s17 + $0x137] sm:$0x1]  ;;  %v2027_v43 = vld [vmem:[%s15158_s17 + $0x14f] sm:$0x1] }
  0xc6   : > { %v2005_v44 = vsel %vm478_vm6, %v2004_v14, %v2003_v39  ;;  %v1983_v45 = vsel %vm466_vm2, %v1982_v29, %v1981_v40  ;;  %v2028_v46 = vld [vmem:[%s15158_s17 + $0x167] sm:$0x1]  ;;  %v2029_v47 = vld [vmem:[%s15158_s17 + $0x17f] sm:$0x1]  ;;  %v2060_v48 = vrot.slane %v2023_v37, 7  ;;  %v2062_v49 = vrot.slane %v2024_v38, 6  ;;  %v15741_v37 = vpop.permute.xlu1 %1185 }
  0xc7   : > { %2008 = vrot.lane.b32.xlu1 %v2005_v44, %s18399_s19  ;;  %v1985_v50 = vsel %vm469_vm3, %v1984_v30, %v1983_v45  ;;  %v2064_v51 = vrot.slane %v2025_v41, 5  ;;  %v2066_v52 = vrot.slane %v2026_v42, 4  ;;  %v2068_v53 = vrot.slane %v2027_v43, 3  ;;  %v2014_v54 = vld [vmem:[%s15158_s17 + $0x17] sm:$0x1]  ;;  %844 = vst.msk [vmem:[#allocation2 + $0x8] sm:$0xff] %vm843_vm8, %v15732_v25 }
  0xc8   : > { %v1987_v55 = vsel %vm472_vm4, %v1986_v31, %v1985_v50  ;;  %v2061_v56 = vsel %vm460_vm0, %v2060_v48, %v2022_v32  ;;  %v2070_v57 = vrot.slane %v2028_v46, 2  ;;  %v2072_v58 = vrot.slane %v2029_v47, 1  ;;  %v2015_v59 = vld [vmem:[%s15158_s17 + $0x2f] sm:$0x1]  ;;  %v2016_v60 = vld [vmem:[%s15158_s17 + $0x47] sm:$0x1] }
  0xc9   : > { %v1989_v61 = vsel %vm475_vm5, %v1988_v35, %v1987_v55  ;;  %v2063_v62 = vsel %vm463_vm1, %v2062_v49, %v2061_v56  ;;  %v2017_v63 = vld [vmem:[%s15158_s17 + $0x5f] sm:$0x1]  ;;  %v2018_v0 = vld [vmem:[%s15158_s17 + $0x77] sm:$0x1]  ;;  %v2019_v1 = vld [vmem:[%s15158_s17 + $0x8f] sm:$0x1] }
  0xca   : > { %v1991_v3 = vsel %vm478_vm6, %v1990_v36, %v1989_v61  ;;  %v2065_v4 = vsel %vm466_vm2, %v2064_v51, %v2063_v62  ;;  %v2020_v5 = vld [vmem:[%s15158_s17 + $0xa7] sm:$0x1]  ;;  %v2021_v6 = vld [vmem:[%s15158_s17 + $0xbf] sm:$0x1]  ;;  %v2046_v7 = vrot.slane %v2015_v59, 7  ;;  %v2048_v8 = vrot.slane %v2016_v60, 6  ;;  %v15759_v60 = vpop.permute.xlu0 %837 }
  0xcb   : > { %2006 = vrot.lane.b32.xlu0 %v1991_v3, %s18399_s19  ;;  %v2067_v9 = vsel %vm469_vm3, %v2066_v52, %v2065_v4  ;;  %v2050_v10 = vrot.slane %v2017_v63, 5  ;;  %v2052_v11 = vrot.slane %v2018_v0, 4  ;;  %v2054_v12 = vrot.slane %v2019_v1, 3  ;;  %v1612_v13 = vld [vmem:[%s15158_s17 + $0xd1] sm:$0x1]  ;;  %1194 = vst.msk [vmem:[#allocation2 + $0x38] sm:$0xff] %vm1191_vm7, %v15741_v37 }
  0xcc   : > { %v2069_v14 = vsel %vm472_vm4, %v2068_v53, %v2067_v9  ;;  %v2047_v15 = vsel %vm460_vm0, %v2046_v7, %v2014_v54  ;;  %v2056_v16 = vrot.slane %v2020_v5, 2  ;;  %v2058_v17 = vrot.slane %v2021_v6, 1  ;;  %v1613_v18 = vld [vmem:[%s15158_s17 + $0xe9] sm:$0x1]  ;;  %v1614_v19 = vld [vmem:[%s15158_s17 + $0x101] sm:$0x1]  ;;  %v15770_v9 = vpop.permute.xlu1 %909 }
  0xcd   : > { %v2071_v20 = vsel %vm475_vm5, %v2070_v57, %v2069_v14  ;;  %v2049_v21 = vsel %vm463_vm1, %v2048_v8, %v2047_v15  ;;  %v1615_v22 = vld [vmem:[%s15158_s17 + $0x119] sm:$0x1]  ;;  %v1616_v23 = vld [vmem:[%s15158_s17 + $0x131] sm:$0x1]  ;;  %v1617_v24 = vld [vmem:[%s15158_s17 + $0x149] sm:$0x1] }
  0xce   : > { %v2073_v26 = vsel %vm478_vm6, %v2072_v58, %v2071_v20  ;;  %v2051_v27 = vsel %vm466_vm2, %v2050_v10, %v2049_v21  ;;  %v1618_v28 = vld [vmem:[%s15158_s17 + $0x161] sm:$0x1]  ;;  %v1619_v29 = vld [vmem:[%s15158_s17 + $0x179] sm:$0x1]  ;;  %v1650_v30 = vrot.slane %v1613_v18, 7  ;;  %v1652_v31 = vrot.slane %v1614_v19, 6 }
  0xcf   : > { %2076 = vrot.lane.b32.xlu1 %v2073_v26, %s14962_s29  ;;  %v2053_v32 = vsel %vm469_vm3, %v2052_v11, %v2051_v27  ;;  %v1654_v33 = vrot.slane %v1615_v22, 5  ;;  %v1656_v34 = vrot.slane %v1616_v23, 4  ;;  %v1658_v35 = vrot.slane %v1617_v24, 3  ;;  %v1604_v36 = vld [vmem:[%s15158_s17 + $0x11] sm:$0x1]  ;;  %846 = vst.msk [vmem:[#allocation2 + $0x30] sm:$0xff] %vm843_vm8, %v15759_v60 }
  0xd0   : > { %v2055_v38 = vsel %vm472_vm4, %v2054_v12, %v2053_v32  ;;  %v1651_v39 = vsel %vm460_vm0, %v1650_v30, %v1612_v13  ;;  %v1660_v40 = vrot.slane %v1618_v28, 2  ;;  %v1662_v41 = vrot.slane %v1619_v29, 1  ;;  %v1605_v42 = vld [vmem:[%s15158_s17 + $0x29] sm:$0x1]  ;;  %v1606_v43 = vld [vmem:[%s15158_s17 + $0x41] sm:$0x1] }
  0xd1   : > { %v2057_v44 = vsel %vm475_vm5, %v2056_v16, %v2055_v38  ;;  %v1653_v45 = vsel %vm463_vm1, %v1652_v31, %v1651_v39  ;;  %v1607_v46 = vld [vmem:[%s15158_s17 + $0x59] sm:$0x1]  ;;  %v1608_v47 = vld [vmem:[%s15158_s17 + $0x71] sm:$0x1]  ;;  %v1609_v48 = vld [vmem:[%s15158_s17 + $0x89] sm:$0x1] }
  0xd2   : > { %v2059_v49 = vsel %vm478_vm6, %v2058_v17, %v2057_v44  ;;  %v1655_v50 = vsel %vm466_vm2, %v1654_v33, %v1653_v45  ;;  %v1610_v51 = vld [vmem:[%s15158_s17 + $0xa1] sm:$0x1]  ;;  %v1611_v52 = vld [vmem:[%s15158_s17 + $0xb9] sm:$0x1]  ;;  %v1636_v53 = vrot.slane %v1605_v42, 7  ;;  %v1638_v54 = vrot.slane %v1606_v43, 6  ;;  %v15788_v33 = vpop.permute.xlu0 %907 }
  0xd3   : > { %2074 = vrot.lane.b32.xlu0 %v2059_v49, %s14962_s29  ;;  %v1657_v55 = vsel %vm469_vm3, %v1656_v34, %v1655_v50  ;;  %v1640_v56 = vrot.slane %v1607_v46, 5  ;;  %v1642_v57 = vrot.slane %v1608_v47, 4  ;;  %v1644_v58 = vrot.slane %v1609_v48, 3  ;;  %v1680_v59 = vld [vmem:[%s15158_s17 + $0xd2] sm:$0x1]  ;;  %v15797_v46 = vpop.permute.xlu1 %1257  ;;  %915 = vst.msk [vmem:[#allocation2 + $0x30] sm:$0xff] %vm913_vm9, %v15770_v9 }
  0xd4   : > { %v1659_v61 = vsel %vm472_vm4, %v1658_v35, %v1657_v55  ;;  %v1637_v62 = vsel %vm460_vm0, %v1636_v53, %v1604_v36  ;;  %v1646_v63 = vrot.slane %v1610_v51, 2  ;;  %v1648_v0 = vrot.slane %v1611_v52, 1  ;;  %v1681_v1 = vld [vmem:[%s15158_s17 + $0xea] sm:$0x1]  ;;  %v1682_v3 = vld [vmem:[%s15158_s17 + $0x102] sm:$0x1] }
  0xd5   : > { %v1661_v4 = vsel %vm475_vm5, %v1660_v40, %v1659_v61  ;;  %v1639_v5 = vsel %vm463_vm1, %v1638_v54, %v1637_v62  ;;  %v1683_v6 = vld [vmem:[%s15158_s17 + $0x11a] sm:$0x1]  ;;  %v1684_v7 = vld [vmem:[%s15158_s17 + $0x132] sm:$0x1]  ;;  %v1685_v8 = vld [vmem:[%s15158_s17 + $0x14a] sm:$0x1] }
  0xd6   : > { %v1663_v10 = vsel %vm478_vm6, %v1662_v41, %v1661_v4  ;;  %v1641_v11 = vsel %vm466_vm2, %v1640_v56, %v1639_v5  ;;  %v1686_v12 = vld [vmem:[%s15158_s17 + $0x162] sm:$0x1]  ;;  %v1687_v13 = vld [vmem:[%s15158_s17 + $0x17a] sm:$0x1]  ;;  %v1718_v14 = vrot.slane %v1681_v1, 7  ;;  %v1720_v15 = vrot.slane %v1682_v3, 6 }
  0xd7   : > { %1666 = vrot.lane.b32.xlu1 %v1663_v10, %s14961_s28  ;;  %v1643_v16 = vsel %vm469_vm3, %v1642_v57, %v1641_v11  ;;  %v1722_v17 = vrot.slane %v1683_v6, 5  ;;  %v1724_v18 = vrot.slane %v1684_v7, 4  ;;  %v1726_v19 = vrot.slane %v1685_v8, 3  ;;  %v1672_v20 = vld [vmem:[%s15158_s17 + $0x12] sm:$0x1]  ;;  %v15815_v7 = vpop.permute.xlu0 %1255  ;;  %914 = vst.msk [vmem:[#allocation2 + $0x8] sm:$0xff] %vm913_vm9, %v15788_v33 }
  0xd8   : > { %v1645_v21 = vsel %vm472_vm4, %v1644_v58, %v1643_v16  ;;  %v1719_v22 = vsel %vm460_vm0, %v1718_v14, %v1680_v59  ;;  %v1728_v23 = vrot.slane %v1686_v12, 2  ;;  %v1730_v24 = vrot.slane %v1687_v13, 1  ;;  %v1673_v26 = vld [vmem:[%s15158_s17 + $0x2a] sm:$0x1]  ;;  %v1674_v27 = vld [vmem:[%s15158_s17 + $0x42] sm:$0x1] }
  0xd9   : > { %v1647_v28 = vsel %vm475_vm5, %v1646_v63, %v1645_v21  ;;  %v1721_v29 = vsel %vm463_vm1, %v1720_v15, %v1719_v22  ;;  %v1675_v30 = vld [vmem:[%s15158_s17 + $0x5a] sm:$0x1]  ;;  %v1676_v31 = vld [vmem:[%s15158_s17 + $0x72] sm:$0x1]  ;;  %v1677_v32 = vld [vmem:[%s15158_s17 + $0x8a] sm:$0x1] }
  0xda   : > { %v1649_v34 = vsel %vm478_vm6, %v1648_v0, %v1647_v28  ;;  %v1723_v35 = vsel %vm466_vm2, %v1722_v17, %v1721_v29  ;;  %v1678_v36 = vld [vmem:[%s15158_s17 + $0xa2] sm:$0x1]  ;;  %v1679_v38 = vld [vmem:[%s15158_s17 + $0xba] sm:$0x1]  ;;  %v1704_v39 = vrot.slane %v1673_v26, 7  ;;  %v1706_v40 = vrot.slane %v1674_v27, 6 }
  0xdb   : > { %1664 = vrot.lane.b32.xlu0 %v1649_v34, %s14961_s28  ;;  %v1725_v41 = vsel %vm469_vm3, %v1724_v18, %v1723_v35  ;;  %v1708_v42 = vrot.slane %v1675_v30, 5  ;;  %v1710_v43 = vrot.slane %v1676_v31, 4  ;;  %v1712_v44 = vrot.slane %v1677_v32, 3  ;;  %v1748_v45 = vld [vmem:[%s15158_s17 + $0xd3] sm:$0x1]  ;;  %1263 = vst.msk [vmem:[#allocation2 + $0x38] sm:$0xff] %vm1261_vm10, %v15797_v46 }
  0xdc   : > { %v1727_v47 = vsel %vm472_vm4, %v1726_v19, %v1725_v41  ;;  %v1705_v48 = vsel %vm460_vm0, %v1704_v39, %v1672_v20  ;;  %v1714_v49 = vrot.slane %v1678_v36, 2  ;;  %v1716_v50 = vrot.slane %v1679_v38, 1  ;;  %v1749_v51 = vld [vmem:[%s15158_s17 + $0xeb] sm:$0x1]  ;;  %v1750_v52 = vld [vmem:[%s15158_s17 + $0x103] sm:$0x1]  ;;  %v15826_v20 = vpop.permute.xlu1 %561 }
  0xdd   : > { %v1729_v53 = vsel %vm475_vm5, %v1728_v23, %v1727_v47  ;;  %v1707_v54 = vsel %vm463_vm1, %v1706_v40, %v1705_v48  ;;  %v1751_v55 = vld [vmem:[%s15158_s17 + $0x11b] sm:$0x1]  ;;  %v1752_v56 = vld [vmem:[%s15158_s17 + $0x133] sm:$0x1]  ;;  %v1753_v57 = vld [vmem:[%s15158_s17 + $0x14b] sm:$0x1]  ;;  %v15844_v47 = vpop.permute.xlu0 %559 }
  0xde   : > { %v1731_v58 = vsel %vm478_vm6, %v1730_v24, %v1729_v53  ;;  %v1709_v59 = vsel %vm466_vm2, %v1708_v42, %v1707_v54  ;;  %v1754_v61 = vld [vmem:[%s15158_s17 + $0x163] sm:$0x1]  ;;  %v1755_v62 = vld [vmem:[%s15158_s17 + $0x17b] sm:$0x1]  ;;  %v1786_v63 = vrot.slane %v1749_v51, 7  ;;  %v1788_v0 = vrot.slane %v1750_v52, 6 }
  0xdf   : > { %1734 = vrot.lane.b32.xlu1 %v1731_v58, %s18395_s30  ;;  %v1711_v1 = vsel %vm469_vm3, %v1710_v43, %v1709_v59  ;;  %v1790_v3 = vrot.slane %v1751_v55, 5  ;;  %v1792_v4 = vrot.slane %v1752_v56, 4  ;;  %v1794_v5 = vrot.slane %v1753_v57, 3  ;;  %v1740_v6 = vld [vmem:[%s15158_s17 + $0x13] sm:$0x1]  ;;  %1262 = vst.msk [vmem:[#allocation2 + $0x10] sm:$0xff] %vm1261_vm10, %v15815_v7 }
  0xe0   : > { %v1713_v8 = vsel %vm472_vm4, %v1712_v44, %v1711_v1  ;;  %v1787_v10 = vsel %vm460_vm0, %v1786_v63, %v1748_v45  ;;  %v1796_v11 = vrot.slane %v1754_v61, 2  ;;  %v1798_v12 = vrot.slane %v1755_v62, 1  ;;  %v1741_v13 = vld [vmem:[%s15158_s17 + $0x2b] sm:$0x1]  ;;  %v1742_v14 = vld [vmem:[%s15158_s17 + $0x43] sm:$0x1] }
  0xe1   : > { %v1715_v15 = vsel %vm475_vm5, %v1714_v49, %v1713_v8  ;;  %v1789_v16 = vsel %vm463_vm1, %v1788_v0, %v1787_v10  ;;  %v1743_v17 = vld [vmem:[%s15158_s17 + $0x5b] sm:$0x1]  ;;  %v1744_v18 = vld [vmem:[%s15158_s17 + $0x73] sm:$0x1]  ;;  %v1745_v19 = vld [vmem:[%s15158_s17 + $0x8b] sm:$0x1]  ;;  %v15853_v59 = vpop.permute.xlu1 %978 }
  0xe2   : > { %v1717_v21 = vsel %vm478_vm6, %v1716_v50, %v1715_v15  ;;  %v1791_v22 = vsel %vm466_vm2, %v1790_v3, %v1789_v16  ;;  %v1746_v23 = vld [vmem:[%s15158_s17 + $0xa3] sm:$0x1]  ;;  %v1747_v24 = vld [vmem:[%s15158_s17 + $0xbb] sm:$0x1]  ;;  %v1772_v26 = vrot.slane %v1741_v13, 7  ;;  %v1774_v27 = vrot.slane %v1742_v14, 6 }
  0xe3   : > { %1732 = vrot.lane.b32.xlu0 %v1717_v21, %s18395_s30  ;;  %v1793_v28 = vsel %vm469_vm3, %v1792_v4, %v1791_v22  ;;  %v1776_v29 = vrot.slane %v1743_v17, 5  ;;  %v1778_v30 = vrot.slane %v1744_v18, 4  ;;  %v1780_v31 = vrot.slane %v1745_v19, 3  ;;  %v1816_v32 = vld [vmem:[%s15158_s17 + $0xd4] sm:$0x1]  ;;  %984 = vst.msk [vmem:[#allocation2 + $0x30] sm:$0xff] %vm982_vm13, %v15853_v59 }
  0xe4   : > { %v1795_v34 = vsel %vm472_vm4, %v1794_v5, %v1793_v28  ;;  %v1773_v35 = vsel %vm460_vm0, %v1772_v26, %v1740_v6  ;;  %v1782_v36 = vrot.slane %v1746_v23, 2  ;;  %v1784_v38 = vrot.slane %v1747_v24, 1  ;;  %v1817_v39 = vld [vmem:[%s15158_s17 + $0xec] sm:$0x1]  ;;  %v1818_v40 = vld [vmem:[%s15158_s17 + $0x104] sm:$0x1] }
  0xe5   : > { %v1797_v41 = vsel %vm475_vm5, %v1796_v11, %v1795_v34  ;;  %v1775_v42 = vsel %vm463_vm1, %v1774_v27, %v1773_v35  ;;  %v1819_v43 = vld [vmem:[%s15158_s17 + $0x11c] sm:$0x1]  ;;  %v1820_v44 = vld [vmem:[%s15158_s17 + $0x134] sm:$0x1]  ;;  %v1821_v45 = vld [vmem:[%s15158_s17 + $0x14c] sm:$0x1]  ;;  %v15870_v22 = vpop.permute.xlu0 %976 }
  0xe6   : > { %v1799_v48 = vsel %vm478_vm6, %v1798_v12, %v1797_v41  ;;  %v1777_v49 = vsel %vm466_vm2, %v1776_v29, %v1775_v42  ;;  %v1822_v50 = vld [vmem:[%s15158_s17 + $0x164] sm:$0x1]  ;;  %v1823_v51 = vld [vmem:[%s15158_s17 + $0x17c] sm:$0x1]  ;;  %v1854_v52 = vrot.slane %v1817_v39, 7  ;;  %v1856_v53 = vrot.slane %v1818_v40, 6 }
  0xe7   : > { %1802 = vrot.lane.b32.xlu1 %v1799_v48, %s18393_s26  ;;  %v1779_v54 = vsel %vm469_vm3, %v1778_v30, %v1777_v49  ;;  %v1858_v55 = vrot.slane %v1819_v43, 5  ;;  %v1860_v56 = vrot.slane %v1820_v44, 4  ;;  %v1862_v57 = vrot.slane %v1821_v45, 3  ;;  %v1808_v58 = vld [vmem:[%s15158_s17 + $0x14] sm:$0x1]  ;;  %983 = vst.msk [vmem:[#allocation2 + $0x8] sm:$0xff] %vm982_vm13, %v15870_v22 }
  0xe8   : > { %v1781_v61 = vsel %vm472_vm4, %v1780_v31, %v1779_v54  ;;  %v1855_v62 = vsel %vm460_vm0, %v1854_v52, %v1816_v32  ;;  %v1864_v63 = vrot.slane %v1822_v50, 2  ;;  %v1866_v0 = vrot.slane %v1823_v51, 1  ;;  %v1809_v1 = vld [vmem:[%s15158_s17 + $0x2c] sm:$0x1]  ;;  %v1810_v3 = vld [vmem:[%s15158_s17 + $0x44] sm:$0x1] }
  0xe9   : > { %v1783_v4 = vsel %vm475_vm5, %v1782_v36, %v1781_v61  ;;  %v1857_v5 = vsel %vm463_vm1, %v1856_v53, %v1855_v62  ;;  %v1811_v6 = vld [vmem:[%s15158_s17 + $0x5c] sm:$0x1]  ;;  %v1812_v8 = vld [vmem:[%s15158_s17 + $0x74] sm:$0x1]  ;;  %v1813_v10 = vld [vmem:[%s15158_s17 + $0x8c] sm:$0x1]  ;;  %v15880_v35 = vpop.permute.xlu1 %1326 }
  0xea   : > { %v1785_v11 = vsel %vm478_vm6, %v1784_v38, %v1783_v4  ;;  %v1859_v12 = vsel %vm466_vm2, %v1858_v55, %v1857_v5  ;;  %v1814_v13 = vld [vmem:[%s15158_s17 + $0xa4] sm:$0x1]  ;;  %v1815_v14 = vld [vmem:[%s15158_s17 + $0xbc] sm:$0x1]  ;;  %v1840_v15 = vrot.slane %v1809_v1, 7  ;;  %v1842_v16 = vrot.slane %v1810_v3, 6 }
  0xeb   : > { %1800 = vrot.lane.b32.xlu0 %v1785_v11, %s18393_s26  ;;  %v1861_v17 = vsel %vm469_vm3, %v1860_v56, %v1859_v12  ;;  %v1844_v18 = vrot.slane %v1811_v6, 5  ;;  %v1846_v19 = vrot.slane %v1812_v8, 4  ;;  %v1848_v21 = vrot.slane %v1813_v10, 3  ;;  %v436_v28 = vld [vmem:[%s15158_s17 + $0xd8] sm:$0x1]  ;;  %1332 = vst.msk [vmem:[#allocation2 + $0x38] sm:$0xff] %vm1330_vm14, %v15880_v35 }
  0xec   : > { %v1863_v23 = vsel %vm472_vm4, %v1862_v57, %v1861_v17  ;;  %v1841_v24 = vsel %vm460_vm0, %v1840_v15, %v1808_v58  ;;  %v1850_v26 = vrot.slane %v1814_v13, 2  ;;  %v1852_v27 = vrot.slane %v1815_v14, 1  ;;  %v437_v29 = vld [vmem:[%s15158_s17 + $0xf0] sm:$0x1]  ;;  %v438_v32 = vld [vmem:[%s15158_s17 + $0x108] sm:$0x1] }
  0xed   : > { %v1865_v30 = vsel %vm475_vm5, %v1864_v63, %v1863_v23  ;;  %v1843_v31 = vsel %vm463_vm1, %v1842_v16, %v1841_v24  ;;  %v439_v34 = vld [vmem:[%s15158_s17 + $0x120] sm:$0x1]  ;;  %v440_v40 = vld [vmem:[%s15158_s17 + $0x138] sm:$0x1]  ;;  %v441_v42 = vld [vmem:[%s15158_s17 + $0x150] sm:$0x1]  ;;  %v1325_v53 = vpop.permute.xlu0 %1324 }
  0xee   : > { %v1867_v36 = vsel %vm478_vm6, %v1866_v0, %v1865_v30  ;;  %v1845_v38 = vsel %vm466_vm2, %v1844_v18, %v1843_v31  ;;  %v435_v39 = vld [vmem:[%s15158_s17 + $0xc0] sm:$0x1]  ;;  %v442_v43 = vld [vmem:[%s15158_s17 + $0x168] sm:$0x1]  ;;  %v480_v44 = vrot.slane %v436_v28, 7  ;;  %v482_v48 = vrot.slane %v437_v29, 6 }
  0xef   : > { %1870 = vrot.lane.b32.xlu1 %v1867_v36, %s18397_s18  ;;  %v1847_v41 = vsel %vm469_vm3, %v1846_v19, %v1845_v38  ;;  %v484_v49 = vrot.slane %v438_v32, 5  ;;  %v486_v50 = vrot.slane %v439_v34, 4  ;;  %v427_v51 = vld [vmem:[%s15158_s17] sm:$0x1]  ;;  %v488_v46 = vrot.slane %v440_v40, 3  ;;  %1331 = vst.msk [vmem:[#allocation2 + $0x10] sm:$0xff] %vm1330_vm14, %v1325_v53 }
  0xf0   : > { %v1849_v45 = vsel %vm472_vm4, %v1848_v21, %v1847_v41  ;;  %v481_v33 = vsel %vm460_vm0, %v480_v44, %v435_v39  ;;  %v428_v52 = vld [vmem:[%s15158_s17 + $0x18] sm:$0x1]  ;;  %v429_v7 = vld [vmem:[%s15158_s17 + $0x30] sm:$0x1]  ;;  %v490_v56 = vrot.slane %v441_v42, 2  ;;  %v492_v63 = vrot.slane %v442_v43, 1 }
  0xf1   : > { %v1851_v9 = vsel %vm475_vm5, %v1850_v26, %v1849_v45  ;;  %v483_v55 = vsel %vm463_vm1, %v482_v48, %v481_v33  ;;  %v430_v57 = vld [vmem:[%s15158_s17 + $0x48] sm:$0x1]  ;;  %v431_v58 = vld [vmem:[%s15158_s17 + $0x60] sm:$0x1]  ;;  %v459_v61 = vrot.slane %v428_v52, 7  ;;  %v631_v3 = vpop.permute.xlu1 %630  ;;  %v462_v8 = vrot.slane %v429_v7, 6 }
  0xf2   : > { %v1853_v54 = vsel %vm478_vm6, %v1852_v27, %v1851_v9  ;;  %v485_v62 = vsel %vm466_vm2, %v484_v49, %v483_v55  ;;  %v432_v0 = vld [vmem:[%s15158_s17 + $0x78] sm:$0x1]  ;;  %v433_v1 = vld [vmem:[%s15158_s17 + $0x90] sm:$0x1]  ;;  %v434_v5 = vld [vmem:[%s15158_s17 + $0xa8] sm:$0x1] }
  0xf3   : > { %1868 = vrot.lane.b32.xlu0 %v1853_v54, %s18397_s18  ;;  %v487_v4 = vsel %vm469_vm3, %v486_v50, %v485_v62  ;;  %v461_v6 = vsel %vm460_vm0, %v459_v61, %v427_v51  ;;  %v465_v10 = vrot.slane %v430_v57, 5  ;;  %v468_v12 = vrot.slane %v431_v58, 4  ;;  %v1548_v24 = vld [vmem:[%s15158_s17 + $0xd0] sm:$0x1]  ;;  %v1549_v26 = vld [vmem:[%s15158_s17 + $0xe8] sm:$0x1] }
  0xf4   : > { %v489_v11 = vsel %vm472_vm4, %v488_v46, %v487_v4  ;;  %v471_v13 = vrot.slane %v432_v0, 3  ;;  %v464_v15 = vsel %vm463_vm1, %v462_v8, %v461_v6  ;;  %v474_v16 = vrot.slane %v433_v1, 2  ;;  %v1550_v59 = vld [vmem:[%s15158_s17 + $0x100] sm:$0x1]  ;;  %v1551_v28 = vld [vmem:[%s15158_s17 + $0x118] sm:$0x1] }
  0xf5   : > { %v491_v14 = vsel %vm475_vm5, %v490_v56, %v489_v11  ;;  %v467_v18 = vsel %vm466_vm2, %v465_v10, %v464_v15  ;;  %v477_v19 = vrot.slane %v434_v5, 1  ;;  %v629_v21 = vpop.permute.xlu0 %628  ;;  %vm1051_vm7 = vcmask 720384   ;;  %v1552_v29 = vld [vmem:[%s15158_s17 + $0x130] sm:$0x1]  ;;  %v1553_v31 = vld [vmem:[%s15158_s17 + $0x148] sm:$0x1] }
  0xf6   : > { %v493_v17 = vsel %vm478_vm6, %v492_v63, %v491_v14  ;;  %v470_v23 = vsel %vm469_vm3, %v468_v12, %v467_v18  ;;  %v1554_v32 = vld [vmem:[%s15158_s17 + $0x160] sm:$0x1]  ;;  %v1555_v34 = vld [vmem:[%s15158_s17 + $0x178] sm:$0x1]  ;;  %v1586_v35 = vrot.slane %v1549_v26, 7  ;;  %v1588_v40 = vrot.slane %v1550_v59, 6 }
  0xf7   : > { %498 = vst.msk [vmem:[#allocation2 + $0x28] sm:$0xff] %vm496_vm11, %v493_v17  ;;  %v473_v22 = vsel %vm472_vm4, %v471_v13, %v470_v23  ;;  %v1540_v36 = vld [vmem:[%s15158_s17 + $0x10] sm:$0x1]  ;;  %v1541_v38 = vld [vmem:[%s15158_s17 + $0x28] sm:$0x1]  ;;  %v1590_v41 = vrot.slane %v1551_v28, 5 }
  0xf8   : > { %567 = vst.msk [vmem:[#allocation2 + $0x28] sm:$0xff] %vm565_vm12, %v15826_v20  ;;  %v476_v30 = vsel %vm475_vm5, %v474_v16, %v473_v22  ;;  %v1542_v39 = vld [vmem:[%s15158_s17 + $0x40] sm:$0x1]  ;;  %v1592_v42 = vrot.slane %v1552_v29, 4  ;;  %v1543_v43 = vld [vmem:[%s15158_s17 + $0x58] sm:$0x1]  ;;  %v1587_v48 = vsel %vm460_vm0, %v1586_v35, %v1548_v24 }
  0xf9   : > { %v1048_v27 = vpop.permute.xlu1 %1047  ;;  %636 = vst.msk [vmem:[#allocation2 + $0x28] sm:$0xff] %vm634_vm15, %v631_v3  ;;  %v479_v20 = vsel %vm478_vm6, %v477_v19, %v476_v30  ;;  %v14972_v44 = vmov 0.0   ;;  %v1594_v49 = vrot.slane %v1553_v31, 3  ;;  %v1544_v50 = vld [vmem:[%s15158_s17 + $0x70] sm:$0x1]  ;;  %v1589_v9 = vsel %vm463_vm1, %v1588_v40, %v1587_v48  ;;  %s14974_s16 = smov 126  }
  0xfa   : > { %1053 = vst.msk [vmem:[#allocation2 + $0x30] sm:$0xff] %vm1051_vm7, %v1048_v27  ;;  %2229 = vmatprep.mubr.f32.mxu0 %v14972_v44  ;;  %2318 = vmatprep.mubr.f32.mxu1 %v14972_v44  ;;  %v1545_v51 = vld [vmem:[%s15158_s17 + $0x88] sm:$0x1]  ;;  %v1596_v33 = vrot.slane %v1554_v32, 2  ;;  %v1546_v46 = vld [vmem:[%s15158_s17 + $0xa0] sm:$0x1]  ;;  %v1591_v53 = vsel %vm466_vm2, %v1590_v41, %v1589_v9 }
  0xfb   : > { %497 = vst.msk [vmem:[#allocation2] sm:$0xff] %vm496_vm11, %v479_v20  ;;  %v1572_v52 = vrot.slane %v1541_v38, 7  ;;  %v1574_v7 = vrot.slane %v1542_v39, 6  ;;  %v1598_v54 = vrot.slane %v1555_v34, 1  ;;  %v1576_v55 = vrot.slane %v1543_v43, 5  ;;  %s14975_s28 = smov 103  }
  0xfc   : > { %566 = vst.msk [vmem:[#allocation2] sm:$0xff] %vm565_vm12, %v15844_v47  ;;  %v1547_v47 = vld [vmem:[%s15158_s17 + $0xb8] sm:$0x1]  ;;  %v1578_v56 = vrot.slane %v1544_v50, 4  ;;  %v1593_v57 = vsel %vm469_vm3, %v1592_v42, %v1591_v53  ;;  %v1580_v61 = vrot.slane %v1545_v51, 3  ;;  %vm1399_vm10 = vcmask 654784  }
  0xfd   : > { %v1046_v45 = vpop.permute.xlu0 %1045  ;;  %635 = vst.msk [vmem:[#allocation2] sm:$0xff] %vm634_vm15, %v629_v21  ;;  %v1573_v58 = vsel %vm460_vm0, %v1572_v52, %v1540_v36  ;;  %v1595_v63 = vsel %vm472_vm4, %v1594_v49, %v1593_v57  ;;  %v1582_v1 = vrot.slane %v1546_v46, 2  ;;  %v1584_v5 = vrot.slane %v1547_v47, 1  ;;  %s14973_s17 = smov 127   ;;  %s14976_s29 = smov 102  }
  0xfe   : > { %1052 = vst.msk [vmem:[#allocation2 + $0x8] sm:$0xff] %vm1051_vm7, %v1046_v45  ;;  %v1575_v0 = vsel %vm463_vm1, %v1574_v7, %v1573_v58  ;;  %v1597_v3 = vsel %vm475_vm5, %v1596_v33, %v1595_v63  ;;  %vm703_vm0 = vcmask 785984   ;;  %vm1120_vm1 = vcmask 917184   ;;  %s14978_s26 = smov 78   ;;  %s14980_s19 = smov 124  }
  0xff   : > { %v1577_v4 = vsel %vm466_vm2, %v1576_v55, %v1575_v0  ;;  %v1599_v6 = vsel %vm478_vm6, %v1598_v54, %v1597_v3  ;;  %vm1189_vm2 = vcmask 1048448   ;;  %vm2082_vm14 = vcmask 589312   ;;  %s14983_s30 = smov 28   ;;  %s14987_s18 = smov 36  }
 0x100   : > { %v1579_v8 = vsel %vm469_vm3, %v1578_v56, %v1577_v4  ;;  %1603 = vst.msk [vmem:[#allocation2 + $0x40] sm:$0xff] %vm496_vm11, %v1599_v6  ;;  %vm1468_vm3 = vcmask 851584   ;;  %vm3745_vm7 = vcmask 834560  }
 0x101   : > { %v1396_v62 = vpop.permute.xlu1 %1395  ;;  %v1581_v10 = vsel %vm472_vm4, %v1580_v61, %v1579_v8  ;;  %vm772_vm4 = vcmask 982784  }
 0x102   : > { %1401 = vst.msk [vmem:[#allocation2 + $0x38] sm:$0xff] %vm1399_vm10, %v1396_v62  ;;  %v1583_v12 = vsel %vm475_vm5, %v1582_v1, %v1581_v10  ;;  %vm841_vm5 = vcmask 1048512  }
 0x103   : > { %v1585_v13 = vsel %vm478_vm6, %v1584_v5, %v1583_v12  ;;  %vm1537_vm6 = vcmask 1048384  }
 0x104   : > { %1602 = vst.msk [vmem:[#allocation2 + $0x18] sm:$0xff] %vm496_vm11, %v1585_v13  ;;  %v16115_v13 = vld [vmem:[%s18372_s1 + $0x20] sm:$0xff] }
 0x105   : > { %v1394_v11 = vpop.permute.xlu0 %1393 }
 0x106   : > { %1400 = vst.msk [vmem:[#allocation2 + $0x10] sm:$0xff] %vm1399_vm10, %v1394_v11  ;;  %vm4084_vm10 = vcmask 654336  }
 0x109   : > { %v700_v14 = vpop.permute.xlu1 %699 }
 0x10a   : > { %705 = vst.msk [vmem:[#allocation2 + $0x28] sm:$0xff] %vm703_vm0, %v700_v14  ;;  %v16123_v14 = vld [vmem:[%s18372_s1 + $0x28] sm:$0xff] }
 0x10d   : > { %v698_v15 = vpop.permute.xlu0 %697 }
 0x10e   : > { %704 = vst.msk [vmem:[#allocation2] sm:$0xff] %vm703_vm0, %v698_v15  ;;  %v16131_v15 = vld [vmem:[%s18372_s1 + $0x30] sm:$0xff] }
 0x111   : > { %v1117_v16 = vpop.permute.xlu1 %1116 }
 0x112   : > { %1122 = vst.msk [vmem:[#allocation2 + $0x30] sm:$0xff] %vm1120_vm1, %v1117_v16  ;;  %v16139_v16 = vld [vmem:[%s18372_s1 + $0x38] sm:$0xff] }
 0x113   : > { %1193 = vst.msk [vmem:[#allocation2 + $0x30] sm:$0xff] %vm1189_vm2, %v15741_v37 }
 0x115   : > { %v1115_v17 = vpop.permute.xlu0 %1114 }
 0x116   : > { %1121 = vst.msk [vmem:[#allocation2 + $0x8] sm:$0xff] %vm1120_vm1, %v1115_v17  ;;  %vm4762_vm1 = vcmask 637952  }
 0x117   : > { %1190 = vst.msk [vmem:[#allocation2 + $0x8] sm:$0xff] %vm1189_vm2, %v15714_v2  ;;  %vm5160_vm2 = vcmask 195712  }
 0x119   : > { %v1465_v18 = vpop.permute.xlu1 %1464 }
 0x11a   : > { %1470 = vst.msk [vmem:[#allocation2 + $0x38] sm:$0xff] %vm1468_vm3, %v1465_v18  ;;  %v15981_v19 = vld [vmem:[#allocation2 + $0x30] sm:$0xff] }
 0x11d   : > { %v1463_v21 = vpop.permute.xlu0 %1462 }
 0x11e   : > { %1469 = vst.msk [vmem:[#allocation2 + $0x10] sm:$0xff] %vm1468_vm3, %v1463_v21  ;;  %v15983_v23 = vld [vmem:[#allocation2 + $0x8] sm:$0xff]  ;;  %vm5266_vm3 = vcmask 261120  }
 0x11f   : > { %v13448_v24 = vpack.c.bf16 %v15981_v19, %v15983_v23 }
 0x121   : > { %v769_v26 = vpop.permute.xlu1 %768 }
 0x122   : > { %774 = vst.msk [vmem:[#allocation2 + $0x28] sm:$0xff] %vm772_vm4, %v769_v26 }
 0x123   : > { %845 = vst.msk [vmem:[#allocation2 + $0x28] sm:$0xff] %vm841_vm5, %v15759_v60 }
 0x125   : > { %v767_v2 = vpop.permute.xlu0 %766 }
 0x126   : > { %773 = vst.msk [vmem:[#allocation2] sm:$0xff] %vm772_vm4, %v767_v2 }
 0x127   : > { %842 = vst.msk [vmem:[#allocation2] sm:$0xff] %vm841_vm5, %v15732_v25 }
 0x129   : > { %v1534_v37 = vpop.permute.xlu1 %1533 }
 0x12a   : > { %1539 = vst.msk [vmem:[#allocation2 + $0x38] sm:$0xff] %vm1537_vm6, %v1534_v37  ;;  %v16011_v31 = vld [vmem:[#allocation2 + $0x28] sm:$0xff] }
 0x12d   : > { %v1532_v59 = vpop.permute.xlu0 %1531 }
 0x12e   : > { %1538 = vst.msk [vmem:[#allocation2 + $0x10] sm:$0xff] %vm1537_vm6, %v1532_v59  ;;  %v16009_v30 = vld [vmem:[#allocation2] sm:$0xff]  ;;  %vm7101_vm6 = vcmask 244736  }
 0x12f   : > { %v16020_v20 = vpack.i.bf16 %v16011_v31, %v16009_v30  ;;  %v13450_v37 = vpack.c.bf16 %v16011_v31, %v16009_v30 }
 0x131   : > { %v1939_v22 = vpop.permute.xlu1 %1938  ;;  %v15993_v27 = vld [vmem:[#allocation2 + $0x38] sm:$0xff] }
 0x132   : > { %1945 = vst.msk [vmem:[#allocation2 + $0x48] sm:$0xff] %vm843_vm8, %v1939_v22  ;;  %v15998_v28 = vpack.i.bf16 %v15993_v27, %v15981_v19 }
 0x134   : > { %14232 = vrot.lane.b32.xlu1 %v15998_v28, %s14973_s17 }
 0x135   : > { %v1937_v60 = vpop.permute.xlu0 %1936  ;;  %v16002_v25 = vld [vmem:[#allocation2 + $0x10] sm:$0xff] }
 0x136   : > { %1943 = vst.msk [vmem:[#allocation2 + $0x20] sm:$0xff] %vm843_vm8, %v1937_v60  ;;  %v16007_v29 = vpack.i.bf16 %v16002_v25, %v15983_v23  ;;  %v13454_v32 = vpack.c.bf16 %v15993_v27, %v16002_v25  ;;  %v16283_v27 = vld [vmem:[%s18372_s1 + $0x50] sm:$0xff] }
 0x138   : > { %14227 = vrot.lane.b32.xlu0 %v16007_v29, %s14973_s17 }
 0x139   : > { %v2009_v34 = vpop.permute.xlu1 %2008 }
 0x13a   : > { %2013 = vst.msk [vmem:[#allocation2 + $0x48] sm:$0xff] %vm913_vm9, %v2009_v34  ;;  %v16184_v34 = vld [vmem:[%s18372_s1 + $0x8] sm:$0xff] }
 0x13c   : > { %14237 = vrot.lane.b32.xlu0 %v16020_v20, %s14973_s17 }
 0x13d   : > { %v2007_v35 = vpop.permute.xlu0 %2006 }
 0x13e   : > { %2012 = vst.msk [vmem:[#allocation2 + $0x20] sm:$0xff] %vm913_vm9, %v2007_v35  ;;  %vm2134_vm9 = vcmask 1039360   ;;  %v16194_v35 = vld [vmem:[%s18372_s1 + $0x10] sm:$0xff] }
 0x140   : > { %14247 = vrot.lane.b32.xlu0 %v16007_v29, %s14974_s16 }
 0x141   : > { %v2077_v36 = vpop.permute.xlu1 %2076 }
 0x142   : > { %2081 = vst.msk [vmem:[#allocation2 + $0x48] sm:$0xff] %vm982_vm13, %v2077_v36  ;;  %v16202_v36 = vld [vmem:[%s18372_s1 + $0x18] sm:$0xff] }
 0x143   : > { %2084 = vst.msk [vmem:[#allocation2 + $0x48] sm:$0xff] %vm2082_vm14, %v14972_v44 }
 0x144   : > { %14257 = vrot.lane.b32.xlu0 %v16020_v20, %s14974_s16 }
 0x145   : > { %v2075_v38 = vpop.permute.xlu0 %2074 }
 0x146   : > { %2080 = vst.msk [vmem:[#allocation2 + $0x20] sm:$0xff] %vm982_vm13, %v2075_v38  ;;  %vm3067_vm13 = vcmask 850944  }
 0x147   : > { %2083 = vst.msk [vmem:[#allocation2 + $0x20] sm:$0xff] %vm2082_vm14, %v14972_v44  ;;  %vm7385_vm14 = vcmask 228352  }
 0x149   : > { %v1667_v39 = vpop.permute.xlu1 %1666 }
 0x14a   : > { %1671 = vst.msk [vmem:[#allocation2 + $0x40] sm:$0xff] %vm565_vm12, %v1667_v39  ;;  %v2094_v40 = vld [vmem:[#allocation2 + $0x48] sm:$0xff] }
 0x14d   : > { %v1665_v41 = vpop.permute.xlu0 %1664 }
 0x14e   : > { %1670 = vst.msk [vmem:[#allocation2 + $0x18] sm:$0xff] %vm565_vm12, %v1665_v41  ;;  %v2089_v42 = vld [vmem:[#allocation2 + $0x20] sm:$0xff]  ;;  %vm2728_vm12 = vcmask 1031168  }
 0x14f   : > { %v14241_v43 = vpack.i.bf16 %v2094_v40, %v2089_v42  ;;  %v14416_v45 = vpack.i.bf16 %v16011_v31, %v2089_v42  ;;  %v16054_v46 = vpack.c.bf16 %v2094_v40, %v2089_v42 }
 0x151   : > { %v1735_v48 = vpop.permute.xlu1 %1734  ;;  %14242 = vrot.lane.b32.xlu1 %v14241_v43, %s14973_s17  ;;  %14267 = vrot.lane.b32.xlu0 %v14241_v43, %s14974_s16 }
 0x152   : > { %1739 = vst.msk [vmem:[#allocation2 + $0x40] sm:$0xff] %vm634_vm15, %v1735_v48 }
 0x155   : > { %v1733_v49 = vpop.permute.xlu0 %1732  ;;  %14252 = vrot.lane.b32.xlu1 %v15998_v28, %s14974_s16  ;;  %14277 = vrot.lane.b32.xlu0 %v15998_v28, %s14971_s15 }
 0x156   : > { %1738 = vst.msk [vmem:[#allocation2 + $0x18] sm:$0xff] %vm634_vm15, %v1733_v49  ;;  %vm3406_vm15 = vcmask 842752  }
 0x159   : > { %v1803_v50 = vpop.permute.xlu1 %1802  ;;  %14287 = vrot.lane.b32.xlu0 %v14241_v43, %s14971_s15 }
 0x15a   : > { %1807 = vst.msk [vmem:[#allocation2 + $0x40] sm:$0xff] %vm703_vm0, %v1803_v50 }
 0x15d   : > { %v1801_v51 = vpop.permute.xlu0 %1800  ;;  %14302 = vrot.lane.b32.xlu0 %v15998_v28, %s14975_s28 }
 0x15e   : > { %1806 = vst.msk [vmem:[#allocation2 + $0x18] sm:$0xff] %vm703_vm0, %v1801_v51  ;;  %vm4423_vm0 = vcmask 646144  }
 0x161   : > { %v1871_v9 = vpop.permute.xlu1 %1870  ;;  %14307 = vrot.lane.b32.xlu0 %v16020_v20, %s14975_s28 }
 0x162   : > { %1875 = vst.msk [vmem:[#allocation2 + $0x40] sm:$0xff] %vm772_vm4, %v1871_v9 }
 0x163   : > { %1944 = vst.msk [vmem:[#allocation2 + $0x40] sm:$0xff] %vm841_vm5, %v1939_v22 }
 0x165   : > { %v1869_v33 = vpop.permute.xlu0 %1868  ;;  %14317 = vrot.lane.b32.xlu0 %v14241_v43, %s14975_s28 }
 0x166   : > { %1874 = vst.msk [vmem:[#allocation2 + $0x18] sm:$0xff] %vm772_vm4, %v1869_v33  ;;  %vm5684_vm4 = vcmask 1014784  }
 0x167   : > { %1942 = vst.msk [vmem:[#allocation2 + $0x18] sm:$0xff] %vm841_vm5, %v1937_v60  ;;  %vm6498_vm5 = vcmask 621568  }
 0x169   : > { %14327 = vrot.lane.b32.xlu0 %v15998_v28, %s14976_s29 }
 0x16a   : > { %v16056_v52 = vld [vmem:[#allocation2 + $0x40] sm:$0xff] }
 0x16b   : > { %v14421_v7 = vpack.i.bf16 %v2094_v40, %v16056_v52 }
 0x16e   : > { %v16059_v53 = vld [vmem:[#allocation2 + $0x18] sm:$0xff] }
 0x16f   : > { %v14261_v54 = vpack.i.bf16 %v16056_v52, %v16059_v53  ;;  %v13452_v47 = vpack.c.bf16 %v16056_v52, %v16059_v53  ;;  %v14366_v55 = vpack.i.bf16 %v2089_v42, %v16059_v53  ;;  %v14411_v62 = vpack.i.bf16 %v16059_v53, %v16009_v30 }
 0x171   : > { %14262 = vrot.lane.b32.xlu1 %v14261_v54, %s14973_s17  ;;  %14337 = vrot.lane.b32.xlu0 %v14261_v54, %s14975_s28  ;;  %s14977_s17 = smov 79  }
 0x175   : > { %14272 = vrot.lane.b32.xlu1 %v16007_v29, %s14971_s15  ;;  %14347 = vrot.lane.b32.xlu0 %v16007_v29, %s14969_s20 }
 0x179   : > { %14282 = vrot.lane.b32.xlu1 %v16020_v20, %s14971_s15  ;;  %14352 = vrot.lane.b32.xlu0 %v14261_v54, %s14976_s29 }
 0x17d   : > { %14292 = vrot.lane.b32.xlu1 %v16007_v29, %s14975_s28  ;;  %14367 = vrot.lane.b32.xlu0 %v14366_v55, %s14969_s20  ;;  %s18412_s28 = smov 16  }
 0x181   : > { %14297 = vrot.lane.b32.xlu1 %v14261_v54, %s14974_s16  ;;  %14377 = vrot.lane.b32.xlu0 %v16007_v29, %s14977_s17 }
 0x185   : > { %14312 = vrot.lane.b32.xlu1 %v14261_v54, %s14971_s15  ;;  %14387 = vrot.lane.b32.xlu0 %v16020_v20, %s14977_s17 }
 0x189   : > { %14322 = vrot.lane.b32.xlu1 %v16007_v29, %s14976_s29  ;;  %14397 = vrot.lane.b32.xlu0 %v14421_v7, %s14977_s17 }
 0x18d   : > { %14332 = vrot.lane.b32.xlu1 %v16020_v20, %s14976_s29  ;;  %14407 = vrot.lane.b32.xlu0 %v15998_v28, %s14978_s26 }
 0x191   : > { %14342 = vrot.lane.b32.xlu1 %v14241_v43, %s14976_s29  ;;  %14417 = vrot.lane.b32.xlu0 %v14416_v45, %s14978_s26  ;;  %s14991_s29 = smov 125  }
 0x195   : > { %14357 = vrot.lane.b32.xlu1 %v15998_v28, %s14969_s20 }
 0x199   : > { %14362 = vrot.lane.b32.xlu1 %v16020_v20, %s14969_s20 }
 0x19d   : > { %14372 = vrot.lane.b32.xlu1 %v14421_v7, %s14969_s20 }
 0x1a1   : > { %14382 = vrot.lane.b32.xlu1 %v15998_v28, %s14977_s17 }
 0x1a5   : > { %14392 = vrot.lane.b32.xlu1 %v14366_v55, %s14977_s17  ;;  %s14988_s17 = smov 45  }
 0x1a6   : > { %v16090_v56 = vpop.permute.xlu1 %14232 }
 0x1a7   : > { %v14235_v57 = vunpack.i.h.bf16 %v16090_v56  ;;  %v14234_v58 = vunpack.i.l.bf16 %v16090_v56  ;;  %v16244_v56 = vld [vmem:[%s18372_s1 + $0x40] sm:$0xff] }
 0x1a9   : > { %14402 = vrot.lane.b32.xlu1 %v16007_v29, %s14978_s26  ;;  %v2140_v1 = vsel %vm2134_vm9, %v14234_v58, %v14235_v57 }
 0x1aa   : > { %v16096_v61 = vpop.permute.xlu0 %14227 }
 0x1ab   : > { %v14230_v63 = vunpack.i.h.bf16 %v16096_v61  ;;  %v14229_v0 = vunpack.i.l.bf16 %v16096_v61 }
 0x1ad   : > { %14412 = vrot.lane.b32.xlu1 %v14411_v62, %s14978_s26  ;;  %v2136_v3 = vsel %vm2134_vm9, %v14229_v0, %v14230_v63 }
 0x1ae   : > { %v14238_v4 = vpop.permute.xlu0 %14237  ;;  %v13436_v5 = vpack.c.bf16 %v2140_v1, %v2136_v3 }
 0x1af   : > { %v14240_v6 = vunpack.i.h.bf16 %v14238_v4  ;;  %v14239_v8 = vunpack.i.l.bf16 %v14238_v4 }
 0x1b0   : > { %13437 = vmatprep.subr.bf16.mxu0 %v13436_v5 }
 0x1b1   : > { %14422 = vrot.lane.b32.xlu1 %v14421_v7, %s14978_s26  ;;  %v2135_v10 = vsel %vm2134_vm9, %v14239_v8, %v14229_v0  ;;  %v2139_v11 = vsel %vm2134_vm9, %v14240_v6, %v14234_v58 }
 0x1b2   : > { %v13438_v12 = vpack.c.bf16 %v2139_v11, %v2135_v10  ;;  %v16152_v59 = vpop.permute.xlu0 %14247  ;;  %v16264_v10 = vld [vmem:[%s18372_s1 + $0x48] sm:$0xff] }
 0x1b3   : > { %v14250_v19 = vunpack.i.h.bf16 %v16152_v59  ;;  %v14249_v23 = vunpack.i.l.bf16 %v16152_v59 }
 0x1b4   : > { %13439 = vmatpush1.bf16.msra.mxu0 %v13438_v12 }
 0x1b5   : > { %v2730_v30 = vsel %vm2728_vm12, %v14249_v23, %v14250_v19 }
 0x1b6   : > { %v14258_v29 = vpop.permute.xlu0 %14257 }
 0x1b7   : > { %12214 = vmatmul.mubr.msk.f32.vlgmr.msra.gmra.mrb[0].mxu0 %vm843_vm8, %v16115_v13  ;;  %v14260_v38 = vunpack.i.h.bf16 %v14258_v29  ;;  %v14259_v39 = vunpack.i.l.bf16 %v14258_v29 }
 0x1b8   : > { %2235 = vmatprep.mubr.f32.mxu0 %v14972_v44 }
 0x1b9   : > { %v2729_v45 = vsel %vm2728_vm12, %v14259_v39, %v14249_v23 }
 0x1bb   : > { %12215 = vmatmul.mubr.msk.f32.gmra.mrb[2].mxu0 %vm843_vm8, %v16123_v14 }
 0x1bc   : > { %2241 = vmatprep.mubr.f32.mxu0 %v14972_v44 }
 0x1bf   : > { %12216 = vmatmul.mubr.msk.f32.gmra.mrb[4].mxu0 %vm843_vm8, %v16131_v15 }
 0x1c0   : > { %2247 = vmatprep.mubr.f32.mxu0 %v14972_v44 }
 0x1c3   : > { %v14243_v17 = vpop.permute.xlu1 %14242  ;;  %12217 = vmatmul.mubr.msk.f32.gmra.mrb[6].mxu0 %vm843_vm8, %v16139_v16  ;;  %v16188_v20 = vpop.permute.xlu0 %14267 }
 0x1c4   : > { %v14245_v18 = vunpack.i.h.bf16 %v14243_v17  ;;  %v14244_v21 = vunpack.i.l.bf16 %v14243_v17  ;;  %12907 = vmatprep.mubr.msk.f32.mxu0 %vm843_vm8, %v16115_v13  ;;  %v14270_v41 = vunpack.i.h.bf16 %v16188_v20  ;;  %v14269_v42 = vunpack.i.l.bf16 %v16188_v20 }
 0x1c6   : > { %v13444_v26 = vpack.c.bf16 %v14245_v18, %v14244_v21  ;;  %v13468_v48 = vpack.c.bf16 %v14270_v41, %v14269_v42 }
 0x1c7   : > { %v16145_v2 = vpop.permute.xlu1 %14252  ;;  %v16204_v40 = vpop.permute.xlu0 %14277 }
 0x1c8   : > { %13445 = vmatprep.subr.bf16.mxu0 %v13444_v26  ;;  %v14255_v22 = vunpack.i.h.bf16 %v16145_v2  ;;  %v14254_v28 = vunpack.i.l.bf16 %v16145_v2  ;;  %v14280_v1 = vunpack.i.h.bf16 %v16204_v40  ;;  %v14279_v3 = vunpack.i.l.bf16 %v16204_v40 }
 0x1c9   : > { %13447 = vmatpush3.bf16.msra.mxu0 %v13444_v26 }
 0x1ca   : > { %13449 = vmatprep.subr.bf16.mxu0 %v13448_v24  ;;  %v16169_v24 = vld [vmem:[%s18372_s1] sm:$0xff]  ;;  %v2734_v60 = vsel %vm2728_vm12, %v14254_v28, %v14255_v22  ;;  %v2733_v43 = vsel %vm2728_vm12, %v14260_v38, %v14254_v28  ;;  %v3073_v6 = vsel %vm3067_vm13, %v14279_v3, %v14280_v1 }
 0x1cb   : > { %v13460_v31 = vpack.c.bf16 %v2734_v60, %v2730_v30  ;;  %v13462_v50 = vpack.c.bf16 %v2733_v43, %v2729_v45  ;;  %v16220_v33 = vpop.permute.xlu0 %14287 }
 0x1cc   : > { %12908 = vmatmul.mubr.msk.f32.vlgmr.msra.gmra.mrb[8].mxu0 %vm843_vm8, %v16123_v14  ;;  %v14289_v17 = vunpack.i.l.bf16 %v16220_v33 }
 0x1cd   : > { %13451 = vmatpush1.bf16.msra.mxu0 %v13450_v37  ;;  %12910 = vmatprep.mubr.msk.f32.mxu0 %vm843_vm8, %v16131_v15 }
 0x1ce   : > { %13457 = vmatprep.subr.bf16.mxu0 %v16054_v46 }
 0x1cf   : > { %v16249_v61 = vpop.permute.xlu0 %14302 }
 0x1d0   : > { %12911 = vmatmul.mubr.msk.f32.gmra.mrb[10].mxu0 %vm843_vm8, %v16139_v16  ;;  %v14304_v43 = vunpack.i.l.bf16 %v16249_v61 }
 0x1d1   : > { %2504 = vmatprep.mubr.f32.mxu0 %v14972_v44 }
 0x1d3   : > { %v16275_v53 = vpop.permute.xlu0 %14307 }
 0x1d4   : > { %12226 = vmatmul.mubr.msk.f32.vlgmr.msra.gmra.mrb[0].mxu0 %vm843_vm8, %v16169_v24 }
 0x1d5   : > { %13459 = vmatpush3.bf16.msra.mxu0 %v16054_v46  ;;  %2510 = vmatprep.mubr.f32.mxu0 %v14972_v44 }
 0x1d6   : > { %13461 = vmatprep.subr.bf16.mxu0 %v13460_v31 }
 0x1d8   : > { %12227 = vmatmul.mubr.msk.f32.gmra.mrb[2].mxu0 %vm843_vm8, %v16184_v34 }
 0x1d9   : > { %2516 = vmatprep.mubr.f32.mxu0 %v14972_v44 }
 0x1dc   : > { %12228 = vmatmul.mubr.msk.f32.gmra.mrb[4].mxu0 %vm843_vm8, %v16194_v35 }
 0x1dd   : > { %2522 = vmatprep.mubr.f32.mxu0 %v14972_v44 }
 0x1e0   : > { %12229 = vmatmul.mubr.msk.f32.gmra.mrb[6].mxu0 %vm843_vm8, %v16202_v36 }
 0x1e1   : > { %12917 = vmatprep.mubr.msk.f32.mxu0 %vm843_vm8, %v16169_v24 }
 0x1e3   : > { %v14263_v49 = vpop.permute.xlu1 %14262 }
 0x1e4   : > { %v14265_v51 = vunpack.i.h.bf16 %v14263_v49  ;;  %v14264_v9 = vunpack.i.l.bf16 %v14263_v49  ;;  %12918 = vmatmul.mubr.msk.f32.vlgmr.msra.gmra.mrb[8].mxu0 %vm843_vm8, %v16184_v34 }
 0x1e5   : > { %13463 = vmatpush1.bf16.msra.mxu0 %v13462_v50  ;;  %12920 = vmatprep.mubr.msk.f32.mxu0 %vm843_vm8, %v16194_v35 }
 0x1e6   : > { %v2138_v46 = vsel %vm2134_vm9, %v14264_v9, %v14244_v21  ;;  %v2142_v7 = vsel %vm2134_vm9, %v14265_v51, %v14245_v18  ;;  %v2137_v54 = vsel %vm2134_vm9, %v14230_v63, %v14264_v9  ;;  %v2141_v55 = vsel %vm2134_vm9, %v14235_v57, %v14265_v51  ;;  %13469 = vmatprep.subr.bf16.mxu0 %v13468_v48  ;;  %v16305_v21 = vpop.permute.xlu0 %14317  ;;  %v16365_v51 = vld [vmem:[%s18372_s1 + $0x68] sm:$0xff] }
 0x1e7   : > { %v16232_v58 = vpop.permute.xlu1 %14272  ;;  %v13440_v62 = vpack.c.bf16 %v2142_v7, %v2138_v46  ;;  %v13442_v0 = vpack.c.bf16 %v2141_v55, %v2137_v54  ;;  %v14320_v9 = vunpack.i.h.bf16 %v16305_v21  ;;  %v16387_v55 = vld [vmem:[%s18372_s1 + $0x70] sm:$0xff]  ;;  %vm7683_vm9 = vcmask 392192  }
 0x1e8   : > { %v14275_v4 = vunpack.i.h.bf16 %v16232_v58  ;;  %v14274_v5 = vunpack.i.l.bf16 %v16232_v58  ;;  %12921 = vmatmul.mubr.msk.f32.gmra.mrb[10].mxu0 %vm843_vm8, %v16202_v36 }
 0x1e9   : > { %13441 = vmatprep.subr.bf16.mxu1 %v13440_v62  ;;  %2823 = vmatprep.mubr.f32.mxu0 %v14972_v44 }
 0x1ea   : > { %13443 = vmatpush1.bf16.msra.mxu1 %v13442_v0  ;;  %v3069_v57 = vsel %vm3067_vm13, %v14274_v5, %v14275_v4 }
 0x1eb   : > { %13453 = vmatprep.subr.bf16.mxu1 %v13452_v47  ;;  %v14283_v63 = vpop.permute.xlu1 %14282  ;;  %v13472_v8 = vpack.c.bf16 %v3073_v6, %v3069_v57  ;;  %v5077_v6 = vld [vmem:[%s18373_s2 + $0x8] sm:$0xff] }
 0x1ec   : > { %12242 = vmatmul.mubr.msk.f32.vlgmr.msra.gmra.mrb[0].mxu0 %vm843_vm8, %v16244_v56  ;;  %v14284_v47 = vunpack.i.l.bf16 %v14283_v63 }
 0x1ed   : > { %12218 = vmatmul.mubr.msk.f32.vlgmr.msra.gmra.mrb[0].mxu1 %vm843_vm8, %v16115_v13  ;;  %13471 = vmatpush3.bf16.msra.mxu0 %v13468_v48  ;;  %v16294_v13 = vld [vmem:[%s18372_s1 + $0x58] sm:$0xff] }
 0x1ee   : > { %13455 = vmatpush1.bf16.msra.mxu1 %v13454_v32  ;;  %2324 = vmatprep.mubr.f32.mxu1 %v14972_v44  ;;  %v14285_v32 = vunpack.i.h.bf16 %v14283_v63  ;;  %v3068_v28 = vsel %vm3067_vm13, %v14284_v47, %v14274_v5  ;;  %v5076_v63 = vld [vmem:[%s18373_s2] sm:$0xff] }
 0x1ef   : > { %v16270_v52 = vpop.permute.xlu1 %14292  ;;  %13473 = vmatprep.subr.bf16.mxu0 %v13472_v8  ;;  %2829 = vmatprep.mubr.f32.mxu0 %v14972_v44 }
 0x1f0   : > { %12243 = vmatmul.mubr.msk.f32.gmra.mrb[2].mxu0 %vm843_vm8, %v16264_v10  ;;  %v3072_v23 = vsel %vm3067_vm13, %v14285_v32, %v14279_v3  ;;  %v14310_v3 = vunpack.i.h.bf16 %v16275_v53 }
 0x1f1   : > { %12219 = vmatmul.mubr.msk.f32.gmra.mrb[2].mxu1 %vm843_vm8, %v16123_v14  ;;  %2835 = vmatprep.mubr.f32.mxu0 %v14972_v44  ;;  %v14290_v14 = vunpack.i.h.bf16 %v16220_v33  ;;  %v13474_v2 = vpack.c.bf16 %v3072_v23, %v3068_v28  ;;  %v14319_v33 = vunpack.i.l.bf16 %v16305_v21 }
 0x1f2   : > { %2330 = vmatprep.mubr.f32.mxu1 %v14972_v44  ;;  %v3411_v8 = vsel %vm3406_vm15, %v14310_v3, %v14304_v43 }
 0x1f3   : > { %v14298_v25 = vpop.permute.xlu1 %14297  ;;  %v13480_v59 = vpack.c.bf16 %v14290_v14, %v14289_v17  ;;  %v13492_v32 = vpack.c.bf16 %v14320_v9, %v14319_v33 }
 0x1f4   : > { %v14300_v11 = vunpack.i.h.bf16 %v14298_v25  ;;  %v14299_v12 = vunpack.i.l.bf16 %v14298_v25  ;;  %12244 = vmatmul.mubr.msk.f32.gmra.mrb[4].mxu0 %vm843_vm8, %v16283_v27 }
 0x1f5   : > { %12220 = vmatmul.mubr.msk.f32.gmra.mrb[4].mxu1 %vm843_vm8, %v16131_v15  ;;  %2841 = vmatprep.mubr.f32.mxu0 %v14972_v44 }
 0x1f6   : > { %2336 = vmatprep.mubr.f32.mxu1 %v14972_v44  ;;  %v2732_v18 = vsel %vm2728_vm12, %v14299_v12, %v14269_v42  ;;  %v2736_v15 = vsel %vm2728_vm12, %v14300_v11, %v14270_v41  ;;  %v2735_v30 = vsel %vm2728_vm12, %v14255_v22, %v14300_v11  ;;  %v2731_v31 = vsel %vm2728_vm12, %v14250_v19, %v14299_v12  ;;  %v16326_v19 = vpop.permute.xlu0 %14327  ;;  %v5078_v11 = vld [vmem:[%s18373_s2 + $0x10] sm:$0xff] }
 0x1f7   : > { %v14313_v26 = vpop.permute.xlu1 %14312  ;;  %v13464_v37 = vpack.c.bf16 %v2736_v15, %v2732_v18  ;;  %v13466_v22 = vpack.c.bf16 %v2735_v30, %v2731_v31  ;;  %v14294_v41 = vunpack.i.l.bf16 %v16270_v52  ;;  %v14305_v42 = vunpack.i.h.bf16 %v16249_v61 }
 0x1f8   : > { %v14315_v60 = vunpack.i.h.bf16 %v14313_v26  ;;  %v14314_v29 = vunpack.i.l.bf16 %v14313_v26  ;;  %12245 = vmatmul.mubr.msk.f32.gmra.mrb[6].mxu0 %vm843_vm8, %v16294_v13  ;;  %v14329_v21 = vunpack.i.l.bf16 %v16326_v19 }
 0x1f9   : > { %12221 = vmatmul.mubr.msk.f32.gmra.mrb[6].mxu1 %vm843_vm8, %v16139_v16  ;;  %13465 = vmatprep.subr.bf16.mxu1 %v13464_v37  ;;  %v14295_v16 = vunpack.i.h.bf16 %v16270_v52  ;;  %v3412_v49 = vsel %vm3406_vm15, %v14304_v43, %v14305_v42 }
 0x1fa   : > { %2593 = vmatprep.mubr.f32.mxu1 %v14972_v44  ;;  %v3071_v20 = vsel %vm3067_vm13, %v14314_v29, %v14289_v17  ;;  %v3075_v38 = vsel %vm3067_vm13, %v14315_v60, %v14290_v14  ;;  %12927 = vmatprep.mubr.msk.f32.mxu0 %vm843_vm8, %v16244_v56  ;;  %v16351_v48 = vpop.permute.xlu0 %14337  ;;  %v3074_v54 = vsel %vm3067_vm13, %v14280_v1, %v14315_v60  ;;  %v16406_v1 = vld [vmem:[%s18372_s1 + $0x78] sm:$0xff] }
 0x1fb   : > { %v13476_v39 = vpack.c.bf16 %v3075_v38, %v3071_v20  ;;  %v3408_v45 = vsel %vm3406_vm15, %v14294_v41, %v14295_v16  ;;  %v16358_v50 = vpop.permute.xlu1 %14322  ;;  %v14340_v46 = vunpack.i.h.bf16 %v16351_v48  ;;  %v14339_v7 = vunpack.i.l.bf16 %v16351_v48 }
 0x1fc   : > { %12928 = vmatmul.mubr.msk.f32.vlgmr.msra.gmra.mrb[8].mxu0 %vm843_vm8, %v16264_v10  ;;  %v14325_v12 = vunpack.i.h.bf16 %v16358_v50  ;;  %v14324_v14 = vunpack.i.l.bf16 %v16358_v50 }
 0x1fd   : > { %12230 = vmatmul.mubr.msk.f32.vlgmr.msra.gmra.mrb[0].mxu1 %vm843_vm8, %v16169_v24  ;;  %13475 = vmatpush1.bf16.msra.mxu0 %v13474_v2  ;;  %v16345_v24 = vld [vmem:[%s18372_s1 + $0x60] sm:$0xff]  ;;  %v3410_v58 = vsel %vm3406_vm15, %v14339_v7, %v14319_v33  ;;  %v3414_v40 = vsel %vm3406_vm15, %v14340_v46, %v14320_v9  ;;  %v3409_v28 = vsel %vm3406_vm15, %v14295_v16, %v14339_v7 }
 0x1fe   : > { %13467 = vmatpush1.bf16.msra.mxu1 %v13466_v22  ;;  %2599 = vmatprep.mubr.f32.mxu1 %v14972_v44  ;;  %v13488_v0 = vpack.c.bf16 %v3414_v40, %v3410_v58  ;;  %v16411_v5 = vpop.permute.xlu0 %14347  ;;  %v3413_v23 = vsel %vm3406_vm15, %v14305_v42, %v14340_v46  ;;  %v3747_v61 = vsel %vm3745_vm7, %v14324_v14, %v14325_v12 }
 0x1ff   : > { %13477 = vmatprep.subr.bf16.mxu1 %v13476_v39  ;;  %12930 = vmatprep.mubr.msk.f32.mxu0 %vm843_vm8, %v16283_v27  ;;  %v16396_v62 = vpop.permute.xlu1 %14332  ;;  %v12271_v39 = vld [vmem:[%s18372_s1 + $0x88] sm:$0xff] }
 0x200   : > { %12931 = vmatmul.mubr.msk.f32.gmra.mrb[10].mxu0 %vm843_vm8, %v16294_v13  ;;  %13481 = vmatprep.subr.bf16.mxu0 %v13480_v59  ;;  %v14334_v16 = vunpack.i.l.bf16 %v16396_v62 }
 0x201   : > { %12231 = vmatmul.mubr.msk.f32.gmra.mrb[2].mxu1 %vm843_vm8, %v16184_v34  ;;  %3162 = vmatprep.mubr.f32.mxu0 %v14972_v44  ;;  %v13484_v34 = vpack.c.bf16 %v3412_v49, %v3408_v45  ;;  %v12273_v45 = vld [vmem:[%s18372_s1 + $0x98] sm:$0xff] }
 0x202   : > { %2605 = vmatprep.mubr.f32.mxu1 %v14972_v44  ;;  %v16435_v47 = vpop.permute.xlu0 %14352 }
 0x203   : > { %v16416_v57 = vpop.permute.xlu1 %14342  ;;  %v14355_v26 = vunpack.i.h.bf16 %v16435_v47  ;;  %v14354_v37 = vunpack.i.l.bf16 %v16435_v47 }
 0x204   : > { %12258 = vmatmul.mubr.msk.f32.vlgmr.msra.gmra.mrb[0].mxu0 %vm843_vm8, %v16345_v24  ;;  %v14345_v17 = vunpack.i.h.bf16 %v16416_v57  ;;  %v14344_v18 = vunpack.i.l.bf16 %v16416_v57 }
 0x205   : > { %12232 = vmatmul.mubr.msk.f32.gmra.mrb[4].mxu1 %vm843_vm8, %v16194_v35  ;;  %13483 = vmatpush3.bf16.msra.mxu0 %v13480_v59  ;;  %v3070_v35 = vsel %vm3067_vm13, %v14275_v4, %v14314_v29  ;;  %v14309_v4 = vunpack.i.l.bf16 %v16275_v53  ;;  %v14979_v53 = vmov 0   ;;  %v13490_v29 = vpack.c.bf16 %v3413_v23, %v3409_v28  ;;  %v12272_v59 = vld [vmem:[%s18372_s1 + $0x90] sm:$0xff] }
 0x206   : > { %2611 = vmatprep.mubr.f32.mxu1 %v14972_v44  ;;  %13485 = vmatprep.subr.bf16.mxu0 %v13484_v34  ;;  %v3749_v52 = vsel %vm3745_vm7, %v14354_v37, %v14344_v18  ;;  %v3753_v60 = vsel %vm3745_vm7, %v14355_v26, %v14345_v17  ;;  %v16499_v2 = vpop.permute.xlu0 %14367  ;;  %v3748_v49 = vsel %vm3745_vm7, %v14325_v12, %v14354_v37 }
 0x207   : > { %3168 = vmatprep.mubr.f32.mxu0 %v14972_v44  ;;  %14426 = vset.pattern.permute.xlu0 %v14979_v53  ;;  %v16449_v15 = vpop.permute.xlu1 %14357  ;;  %v13500_v20 = vpack.c.bf16 %v3753_v60, %v3749_v52  ;;  %v14370_v43 = vunpack.i.h.bf16 %v16499_v2  ;;  %v13504_v50 = vpack.c.bf16 %v14345_v17, %v14344_v18  ;;  %v12288_v17 = vld [vmem:[%s18372_s1 + $0xb0] sm:$0xff] }
 0x208   : > { %12259 = vmatmul.mubr.msk.f32.gmra.mrb[2].mxu0 %vm843_vm8, %v16365_v51  ;;  %5082 = vperm.xlu0 %14426, %v5076_v63   ;;  %v14360_v58 = vunpack.i.h.bf16 %v16449_v15  ;;  %v14359_v40 = vunpack.i.l.bf16 %v16449_v15 }
 0x209   : > { %12233 = vmatmul.mubr.msk.f32.gmra.mrb[6].mxu1 %vm843_vm8, %v16202_v36  ;;  %3174 = vmatprep.mubr.f32.mxu0 %v14972_v44  ;;  %v13478_v36 = vpack.c.bf16 %v3074_v54, %v3070_v35 }
 0x20a   : > { %2912 = vmatprep.mubr.f32.mxu1 %v14972_v44  ;;  %14427 = vset.pattern.permute.xlu1 %v14979_v53  ;;  %v16522_v34 = vpop.permute.xlu0 %14377  ;;  %v4090_v3 = vsel %vm4084_vm10, %v14359_v40, %v14360_v58 }
 0x20b   : > { %5087 = vperm.xlu1 %14427, %v5077_v6   ;;  %v16485_v31 = vpop.permute.xlu1 %14362 }
 0x20c   : > { %12260 = vmatmul.mubr.msk.f32.gmra.mrb[4].mxu0 %vm843_vm8, %v16387_v55  ;;  %v14365_v18 = vunpack.i.h.bf16 %v16485_v31  ;;  %v14364_v15 = vunpack.i.l.bf16 %v16485_v31 }
 0x20d   : > { %12246 = vmatmul.mubr.msk.f32.vlgmr.msra.gmra.mrb[0].mxu1 %vm843_vm8, %v16244_v56  ;;  %3180 = vmatprep.mubr.f32.mxu0 %v14972_v44  ;;  %v3407_v56 = vsel %vm3406_vm15, %v14309_v4, %v14294_v41  ;;  %v12286_v4 = vld [vmem:[%s18372_s1 + $0xa0] sm:$0xff]  ;;  %vm7724_vm15 = vcmask 146432  }
 0x20e   : > { %13479 = vmatpush1.bf16.msra.mxu1 %v13478_v36  ;;  %2918 = vmatprep.mubr.f32.mxu1 %v14972_v44  ;;  %v13486_v25 = vpack.c.bf16 %v3411_v8, %v3407_v56  ;;  %v14350_v36 = vunpack.i.h.bf16 %v16411_v5  ;;  %v4089_v28 = vsel %vm4084_vm10, %v14365_v18, %v14359_v40 }
 0x20f   : > { %13489 = vmatprep.subr.bf16.mxu1 %v13488_v0  ;;  %5092 = vperm.xlu1 %14427, %v5078_v11   ;;  %v16501_v22 = vpop.permute.xlu1 %14372  ;;  %v14349_v0 = vunpack.i.l.bf16 %v16411_v5 }
 0x210   : > { %12261 = vmatmul.mubr.msk.f32.gmra.mrb[6].mxu0 %vm843_vm8, %v16406_v1  ;;  %v14375_v41 = vunpack.i.h.bf16 %v16501_v22  ;;  %v14374_v42 = vunpack.i.l.bf16 %v16501_v22 }
 0x211   : > { %12247 = vmatmul.mubr.msk.f32.gmra.mrb[2].mxu1 %vm843_vm8, %v16264_v10  ;;  %12937 = vmatprep.mubr.msk.f32.mxu0 %vm843_vm8, %v16345_v24  ;;  %v5079_v10 = vld [vmem:[%s18373_s2 + $0x18] sm:$0xff]  ;;  %v4086_v5 = vsel %vm4084_vm10, %v14349_v0, %v14350_v36  ;;  %v4085_v37 = vsel %vm4084_vm10, %v14364_v15, %v14349_v0 }
 0x212   : > { %2924 = vmatprep.mubr.f32.mxu1 %v14972_v44  ;;  %5097 = vperm.xlu0 %14426, %v5079_v10   ;;  %v4092_v33 = vsel %vm4084_vm10, %v14374_v42, %v14375_v41  ;;  %v13508_v57 = vpack.c.bf16 %v4090_v3, %v4086_v5  ;;  %v4091_v10 = vsel %vm4084_vm10, %v14360_v58, %v14374_v42  ;;  %v12319_v3 = vld [vmem:[%s18372_s1 + $0xe8] sm:$0xff] }
 0x213   : > { %v16536_v46 = vpop.permute.xlu1 %14382  ;;  %v13510_v60 = vpack.c.bf16 %v4089_v28, %v4085_v37 }
 0x214   : > { %12938 = vmatmul.mubr.msk.f32.vlgmr.msra.gmra.mrb[8].mxu0 %vm843_vm8, %v16365_v51 }
 0x215   : > { %12248 = vmatmul.mubr.msk.f32.gmra.mrb[4].mxu1 %vm843_vm8, %v16283_v27  ;;  %13487 = vmatpush1.bf16.msra.mxu0 %v13486_v25  ;;  %v14330_v27 = vunpack.i.h.bf16 %v16326_v19  ;;  %v14335_v19 = vunpack.i.h.bf16 %v16396_v62  ;;  %v16550_v62 = vpop.permute.xlu0 %14387 }
 0x216   : > { %2930 = vmatprep.mubr.f32.mxu1 %v14972_v44  ;;  %12940 = vmatprep.mubr.msk.f32.mxu0 %vm843_vm8, %v16387_v55 }
 0x217   : > { %13493 = vmatprep.subr.bf16.mxu0 %v13492_v32  ;;  %v3751_v30 = vsel %vm3745_vm7, %v14329_v21, %v14330_v27  ;;  %v3752_v48 = vsel %vm3745_vm7, %v14330_v27, %v14355_v26  ;;  %v3750_v9 = vsel %vm3745_vm7, %v14335_v19, %v14329_v21  ;;  %v12289_v26 = vld [vmem:[%s18372_s1 + $0xb8] sm:$0xff]  ;;  %v12302_v19 = vld [vmem:[%s18372_s1 + $0xc0] sm:$0xff] }
 0x218   : > { %12941 = vmatmul.mubr.msk.f32.gmra.mrb[10].mxu0 %vm843_vm8, %v16406_v1  ;;  %v13496_v38 = vpack.c.bf16 %v3751_v30, %v3747_v61  ;;  %v13502_v7 = vpack.c.bf16 %v3752_v48, %v3748_v49  ;;  %v13516_v61 = vpack.c.bf16 %v14375_v41, %v14370_v43  ;;  %v14380_v30 = vunpack.i.h.bf16 %v16522_v34  ;;  %v12303_v49 = vld [vmem:[%s18372_s1 + $0xc8] sm:$0xff] }
 0x219   : > { %12249 = vmatmul.mubr.msk.f32.gmra.mrb[6].mxu1 %vm843_vm8, %v16294_v13  ;;  %3501 = vmatprep.mubr.f32.mxu0 %v14972_v44  ;;  %v12270_v13 = vld [vmem:[%s18372_s1 + $0x80] sm:$0xff]  ;;  %v16566_v56 = vpop.permute.xlu0 %14397 }
 0x21a   : > { %3251 = vmatprep.mubr.f32.mxu1 %v14972_v44  ;;  %v14400_v53 = vunpack.i.h.bf16 %v16566_v56  ;;  %v14399_v25 = vunpack.i.l.bf16 %v16566_v56 }
 0x21c   : > { %12274 = vmatmul.mubr.msk.f32.vlgmr.msra.gmra.mrb[0].mxu0 %vm843_vm8, %v12270_v13 }
 0x21d   : > { %12262 = vmatmul.mubr.msk.f32.vlgmr.msra.gmra.mrb[0].mxu1 %vm843_vm8, %v16345_v24  ;;  %13495 = vmatpush3.bf16.msra.mxu0 %v13492_v32  ;;  %v14369_v24 = vunpack.i.l.bf16 %v16499_v2  ;;  %v12287_v32 = vld [vmem:[%s18372_s1 + $0xa8] sm:$0xff]  ;;  %v16609_v23 = vpop.permute.xlu0 %14407  ;;  %v14379_v2 = vunpack.i.l.bf16 %v16522_v34 }
 0x21e   : > { %13491 = vmatpush1.bf16.msra.mxu1 %v13490_v29  ;;  %3257 = vmatprep.mubr.f32.mxu1 %v14972_v44  ;;  %v14409_v5 = vunpack.i.l.bf16 %v16609_v23 }
 0x21f   : > { %13501 = vmatprep.subr.bf16.mxu1 %v13500_v20  ;;  %13497 = vmatprep.subr.bf16.mxu0 %v13496_v38  ;;  %v4088_v35 = vsel %vm4084_vm10, %v14369_v24, %v14370_v43  ;;  %v4087_v11 = vsel %vm4084_vm10, %v14350_v36, %v14369_v24  ;;  %v14385_v20 = vunpack.i.h.bf16 %v16536_v46  ;;  %v14384_v38 = vunpack.i.l.bf16 %v16536_v46 }
 0x220   : > { %3507 = vmatprep.mubr.f32.mxu0 %v14972_v44  ;;  %v13512_v54 = vpack.c.bf16 %v4092_v33, %v4088_v35  ;;  %v13514_v12 = vpack.c.bf16 %v4091_v10, %v4087_v11  ;;  %v4425_v48 = vsel %vm4423_vm0, %v14379_v2, %v14380_v30  ;;  %v14410_v33 = vunpack.i.h.bf16 %v16609_v23 }
 0x221   : > { %12263 = vmatmul.mubr.msk.f32.gmra.mrb[2].mxu1 %vm843_vm8, %v16365_v51  ;;  %12275 = vmatmul.mubr.msk.f32.gmra.mrb[2].mxu0 %vm843_vm8, %v12271_v39  ;;  %v3746_v51 = vsel %vm3745_vm7, %v14334_v16, %v14324_v14  ;;  %v4431_v14 = vsel %vm4423_vm0, %v14399_v25, %v14400_v53  ;;  %v16627_v31 = vpop.permute.xlu0 %14417  ;;  %v4430_v41 = vsel %vm4423_vm0, %v14385_v20, %v14399_v25  ;;  %v14390_v46 = vunpack.i.h.bf16 %v16550_v62  ;;  %v12335_v25 = vld [vmem:[%s18372_s1 + $0x108] sm:$0xff] }
 0x222   : > { %3263 = vmatprep.mubr.f32.mxu1 %v14972_v44  ;;  %3513 = vmatprep.mubr.f32.mxu0 %v14972_v44  ;;  %v4429_v42 = vsel %vm4423_vm0, %v14384_v38, %v14385_v20  ;;  %v4768_v56 = vsel %vm4762_vm1, %v14409_v5, %v14410_v33  ;;  %vm8158_vm7 = vcmask 220304  }
 0x223   : > { %v13520_v34 = vpack.c.bf16 %v4429_v42, %v4425_v48 }
 0x225   : > { %12264 = vmatmul.mubr.msk.f32.gmra.mrb[4].mxu1 %vm843_vm8, %v16387_v55  ;;  %12276 = vmatmul.mubr.msk.f32.gmra.mrb[4].mxu0 %vm843_vm8, %v12272_v59  ;;  %v13498_v55 = vpack.c.bf16 %v3750_v9, %v3746_v51  ;;  %v12304_v51 = vld [vmem:[%s18372_s1 + $0xd0] sm:$0xff]  ;;  %v12305_v9 = vld [vmem:[%s18372_s1 + $0xd8] sm:$0xff] }
 0x226   : > { %3269 = vmatprep.mubr.f32.mxu1 %v14972_v44  ;;  %3519 = vmatprep.mubr.f32.mxu0 %v14972_v44 }
 0x229   : > { %12265 = vmatmul.mubr.msk.f32.gmra.mrb[6].mxu1 %vm843_vm8, %v16406_v1  ;;  %12277 = vmatmul.mubr.msk.f32.gmra.mrb[6].mxu0 %vm843_vm8, %v12273_v45  ;;  %v16555_v1 = vpop.permute.xlu1 %14392 }
 0x22a   : > { %3590 = vmatprep.mubr.f32.mxu1 %v14972_v44  ;;  %12947 = vmatprep.mubr.msk.f32.mxu0 %vm843_vm8, %v12270_v13  ;;  %v14395_v63 = vunpack.i.h.bf16 %v16555_v1  ;;  %v14394_v6 = vunpack.i.l.bf16 %v16555_v1 }
 0x22c   : > { %v4427_v47 = vsel %vm4423_vm0, %v14394_v6, %v14395_v63  ;;  %v4426_v22 = vsel %vm4423_vm0, %v14380_v30, %v14394_v6  ;;  %v12321_v6 = vld [vmem:[%s18372_s1 + $0xf8] sm:$0xff] }
 0x22d   : > { %12278 = vmatmul.mubr.msk.f32.vlgmr.msra.gmra.mrb[0].mxu1 %vm843_vm8, %v12270_v13  ;;  %12948 = vmatmul.mubr.msk.f32.vlgmr.msra.gmra.mrb[8].mxu0 %vm843_vm8, %v12271_v39  ;;  %v16573_v8 = vpop.permute.xlu1 %14402  ;;  %v13524_v21 = vpack.c.bf16 %v4431_v14, %v4427_v47  ;;  %v13526_v43 = vpack.c.bf16 %v4430_v41, %v4426_v22  ;;  %v12336_v47 = vld [vmem:[%s18372_s1 + $0x110] sm:$0xff] }
 0x22e   : > { %13503 = vmatpush1.bf16.msra.mxu1 %v13502_v7  ;;  %3596 = vmatprep.mubr.f32.mxu1 %v14972_v44  ;;  %v14389_v7 = vunpack.i.l.bf16 %v16550_v62  ;;  %v14405_v35 = vunpack.i.h.bf16 %v16573_v8  ;;  %v14404_v0 = vunpack.i.l.bf16 %v16573_v8  ;;  %v12334_v8 = vld [vmem:[%s18372_s1 + $0x100] sm:$0xff] }
 0x22f   : > { %13513 = vmatprep.subr.bf16.mxu1 %v13512_v54  ;;  %13499 = vmatpush1.bf16.msra.mxu0 %v13498_v55  ;;  %v4428_v54 = vsel %vm4423_vm0, %v14390_v46, %v14384_v38  ;;  %v12318_v55 = vld [vmem:[%s18372_s1 + $0xe0] sm:$0xff] }
 0x230   : > { %12950 = vmatprep.mubr.msk.f32.mxu0 %vm843_vm8, %v12272_v59  ;;  %13505 = vmatprep.subr.bf16.mxu0 %v13504_v50  ;;  %v4424_v40 = vsel %vm4423_vm0, %v14389_v7, %v14379_v2  ;;  %v4764_v1 = vsel %vm4762_vm1, %v14404_v0, %v14405_v35  ;;  %vm8470_vm0 = vcmask 367904  }
 0x231   : > { %12279 = vmatmul.mubr.msk.f32.gmra.mrb[2].mxu1 %vm843_vm8, %v12271_v39  ;;  %12951 = vmatmul.mubr.msk.f32.gmra.mrb[10].mxu0 %vm843_vm8, %v12273_v45  ;;  %v16598_v27 = vpop.permute.xlu1 %14412  ;;  %v13522_v36 = vpack.c.bf16 %v4428_v54, %v4424_v40 }
 0x232   : > { %3602 = vmatprep.mubr.f32.mxu1 %v14972_v44  ;;  %3840 = vmatprep.mubr.f32.mxu0 %v14972_v44  ;;  %v14415_v39 = vunpack.i.h.bf16 %v16598_v27 }
 0x234   : > { %v4765_v58 = vsel %vm4762_vm1, %v14405_v35, %v14415_v39 }
 0x235   : > { %12280 = vmatmul.mubr.msk.f32.gmra.mrb[4].mxu1 %vm843_vm8, %v12272_v59  ;;  %12290 = vmatmul.mubr.msk.f32.vlgmr.msra.gmra.mrb[0].mxu0 %vm843_vm8, %v12286_v4  ;;  %v16615_v52 = vpop.permute.xlu1 %14422  ;;  %v14419_v59 = vunpack.i.l.bf16 %v16627_v31 }
 0x236   : > { %3608 = vmatprep.mubr.f32.mxu1 %v14972_v44  ;;  %13507 = vmatpush3.bf16.msra.mxu0 %v13504_v50  ;;  %v14425_v13 = vunpack.i.h.bf16 %v16615_v52  ;;  %v14424_v29 = vunpack.i.l.bf16 %v16615_v52 }
 0x237   : > { %13509 = vmatprep.subr.bf16.mxu0 %v13508_v57  ;;  %3846 = vmatprep.mubr.f32.mxu0 %v14972_v44  ;;  %v4766_v24 = vsel %vm4762_vm1, %v14415_v39, %v14419_v59  ;;  %v12320_v57 = vld [vmem:[%s18372_s1 + $0xf0] sm:$0xff] }
 0x238   : > { %v4770_v16 = vsel %vm4762_vm1, %v14424_v29, %v14425_v13  ;;  %v4769_v50 = vsel %vm4762_vm1, %v14410_v33, %v14424_v29  ;;  %v13540_v14 = vpack.c.bf16 %v14425_v13, %v14419_v59 }
 0x239   : > { %12281 = vmatmul.mubr.msk.f32.gmra.mrb[6].mxu1 %vm843_vm8, %v12273_v45  ;;  %12291 = vmatmul.mubr.msk.f32.gmra.mrb[2].mxu0 %vm843_vm8, %v12287_v32  ;;  %v13536_v45 = vpack.c.bf16 %v4770_v16, %v4766_v24  ;;  %v13538_v62 = vpack.c.bf16 %v4769_v50, %v4765_v58 }
 0x23a   : > { %3929 = vmatprep.mubr.f32.mxu1 %v14972_v44  ;;  %3852 = vmatprep.mubr.f32.mxu0 %v14972_v44 }
 0x23d   : > { %12294 = vmatmul.mubr.msk.f32.vlgmr.msra.gmra.mrb[0].mxu1 %vm843_vm8, %v12286_v4  ;;  %12292 = vmatmul.mubr.msk.f32.gmra.mrb[4].mxu0 %vm843_vm8, %v12288_v17 }
 0x23e   : > { %13515 = vmatpush1.bf16.msra.mxu1 %v13514_v12  ;;  %3935 = vmatprep.mubr.f32.mxu1 %v14972_v44 }
 0x23f   : > { %13525 = vmatprep.subr.bf16.mxu1 %v13524_v21  ;;  %3858 = vmatprep.mubr.f32.mxu0 %v14972_v44 }
 0x241   : > { %12295 = vmatmul.mubr.msk.f32.gmra.mrb[2].mxu1 %vm843_vm8, %v12287_v32  ;;  %12293 = vmatmul.mubr.msk.f32.gmra.mrb[6].mxu0 %vm843_vm8, %v12289_v26 }
 0x242   : > { %3941 = vmatprep.mubr.f32.mxu1 %v14972_v44  ;;  %12957 = vmatprep.mubr.msk.f32.mxu0 %vm843_vm8, %v12286_v4  ;;  %v13528_v4 = vpack.c.bf16 %v14400_v53, %v14395_v63  ;;  %v13532_v63 = vpack.c.bf16 %v4768_v56, %v4764_v1  ;;  %v14414_v53 = vunpack.i.l.bf16 %v16598_v27 }
 0x244   : > { %v4763_v10 = vsel %vm4762_vm1, %v14414_v53, %v14404_v0 }
 0x245   : > { %12296 = vmatmul.mubr.msk.f32.gmra.mrb[4].mxu1 %vm843_vm8, %v12288_v17  ;;  %12958 = vmatmul.mubr.msk.f32.vlgmr.msra.gmra.mrb[8].mxu0 %vm843_vm8, %v12287_v32  ;;  %v14420_v32 = vunpack.i.h.bf16 %v16627_v31 }
 0x246   : > { %3947 = vmatprep.mubr.f32.mxu1 %v14972_v44  ;;  %13511 = vmatpush1.bf16.msra.mxu0 %v13510_v60 }
 0x247   : > { %13517 = vmatprep.subr.bf16.mxu0 %v13516_v61  ;;  %12960 = vmatprep.mubr.msk.f32.mxu0 %vm843_vm8, %v12288_v17  ;;  %v4767_v11 = vsel %vm4762_vm1, %v14420_v32, %v14409_v5  ;;  %v12337_v17 = vld [vmem:[%s18372_s1 + $0x118] sm:$0xff] }
 0x248   : > { %v13534_v12 = vpack.c.bf16 %v4767_v11, %v4763_v10 }
 0x249   : > { %12297 = vmatmul.mubr.msk.f32.gmra.mrb[6].mxu1 %vm843_vm8, %v12289_v26  ;;  %12961 = vmatmul.mubr.msk.f32.gmra.mrb[10].mxu0 %vm843_vm8, %v12289_v26 }
 0x24a   : > { %4268 = vmatprep.mubr.f32.mxu1 %v14972_v44  ;;  %4179 = vmatprep.mubr.f32.mxu0 %v14972_v44 }
 0x24d   : > { %12310 = vmatmul.mubr.msk.f32.vlgmr.msra.gmra.mrb[0].mxu1 %vm843_vm8, %v12302_v19  ;;  %12306 = vmatmul.mubr.msk.f32.vlgmr.msra.gmra.mrb[0].mxu0 %vm843_vm8, %v12302_v19 }
 0x24e   : > { %13527 = vmatpush1.bf16.msra.mxu1 %v13526_v43  ;;  %4274 = vmatprep.mubr.f32.mxu1 %v14972_v44 }
 0x24f   : > { %13537 = vmatprep.subr.bf16.mxu1 %v13536_v45  ;;  %13519 = vmatpush3.bf16.msra.mxu0 %v13516_v61 }
 0x250   : > { %13521 = vmatprep.subr.bf16.mxu0 %v13520_v34  ;;  %4185 = vmatprep.mubr.f32.mxu0 %v14972_v44 }
 0x251   : > { %12311 = vmatmul.mubr.msk.f32.gmra.mrb[2].mxu1 %vm843_vm8, %v12303_v49  ;;  %12307 = vmatmul.mubr.msk.f32.gmra.mrb[2].mxu0 %vm843_vm8, %v12303_v49 }
 0x252   : > { %4280 = vmatprep.mubr.f32.mxu1 %v14972_v44  ;;  %4191 = vmatprep.mubr.f32.mxu0 %v14972_v44 }
 0x255   : > { %12312 = vmatmul.mubr.msk.f32.gmra.mrb[4].mxu1 %vm843_vm8, %v12304_v51  ;;  %12308 = vmatmul.mubr.msk.f32.gmra.mrb[4].mxu0 %vm843_vm8, %v12304_v51 }
 0x256   : > { %4286 = vmatprep.mubr.f32.mxu1 %v14972_v44  ;;  %4197 = vmatprep.mubr.f32.mxu0 %v14972_v44 }
 0x259   : > { %12313 = vmatmul.mubr.msk.f32.gmra.mrb[6].mxu1 %vm843_vm8, %v12305_v9  ;;  %12309 = vmatmul.mubr.msk.f32.gmra.mrb[6].mxu0 %vm843_vm8, %v12305_v9 }
 0x25a   : > { %4607 = vmatprep.mubr.f32.mxu1 %v14972_v44  ;;  %12967 = vmatprep.mubr.msk.f32.mxu0 %vm843_vm8, %v12302_v19 }
 0x25d   : > { %12326 = vmatmul.mubr.msk.f32.vlgmr.msra.gmra.mrb[0].mxu1 %vm843_vm8, %v12318_v55  ;;  %12968 = vmatmul.mubr.msk.f32.vlgmr.msra.gmra.mrb[8].mxu0 %vm843_vm8, %v12303_v49 }
 0x25e   : > { %13539 = vmatpush1.bf16.msra.mxu1 %v13538_v62  ;;  %4613 = vmatprep.mubr.f32.mxu1 %v14972_v44 }
 0x25f   : > { %13523 = vmatpush1.bf16.msra.mxu0 %v13522_v36  ;;  %12970 = vmatprep.mubr.msk.f32.mxu0 %vm843_vm8, %v12304_v51 }
 0x260   : > { %13529 = vmatprep.subr.bf16.mxu0 %v13528_v4 }
 0x261   : > { %12327 = vmatmul.mubr.msk.f32.gmra.mrb[2].mxu1 %vm843_vm8, %v12319_v3  ;;  %12971 = vmatmul.mubr.msk.f32.gmra.mrb[10].mxu0 %vm843_vm8, %v12305_v9 }
 0x262   : > { %4619 = vmatprep.mubr.f32.mxu1 %v14972_v44  ;;  %4518 = vmatprep.mubr.f32.mxu0 %v14972_v44 }
 0x265   : > { %12328 = vmatmul.mubr.msk.f32.gmra.mrb[4].mxu1 %vm843_vm8, %v12320_v57  ;;  %12322 = vmatmul.mubr.msk.f32.vlgmr.msra.gmra.mrb[0].mxu0 %vm843_vm8, %v12318_v55 }
 0x266   : > { %4625 = vmatprep.mubr.f32.mxu1 %v14972_v44  ;;  %13531 = vmatpush3.bf16.msra.mxu0 %v13528_v4 }
 0x267   : > { %13533 = vmatprep.subr.bf16.mxu0 %v13532_v63  ;;  %4524 = vmatprep.mubr.f32.mxu0 %v14972_v44 }
 0x269   : > { %12329 = vmatmul.mubr.msk.f32.gmra.mrb[6].mxu1 %vm843_vm8, %v12321_v6  ;;  %12323 = vmatmul.mubr.msk.f32.gmra.mrb[2].mxu0 %vm843_vm8, %v12319_v3 }
 0x26a   : > { %4946 = vmatprep.mubr.f32.mxu1 %v14972_v44  ;;  %4530 = vmatprep.mubr.f32.mxu0 %v14972_v44 }
 0x26d   : > { %12342 = vmatmul.mubr.msk.f32.vlgmr.msra.gmra.mrb[0].mxu1 %vm843_vm8, %v12334_v8  ;;  %12324 = vmatmul.mubr.msk.f32.gmra.mrb[4].mxu0 %vm843_vm8, %v12320_v57 }
 0x26e   : > { %4952 = vmatprep.mubr.f32.mxu1 %v14972_v44  ;;  %4536 = vmatprep.mubr.f32.mxu0 %v14972_v44 }
 0x271   : > { %12343 = vmatmul.mubr.msk.f32.gmra.mrb[2].mxu1 %vm843_vm8, %v12335_v25  ;;  %12325 = vmatmul.mubr.msk.f32.gmra.mrb[6].mxu0 %vm843_vm8, %v12321_v6 }
 0x272   : > { %4958 = vmatprep.mubr.f32.mxu1 %v14972_v44  ;;  %12977 = vmatprep.mubr.msk.f32.mxu0 %vm843_vm8, %v12318_v55 }
 0x275   : > { %12344 = vmatmul.mubr.msk.f32.gmra.mrb[4].mxu1 %vm843_vm8, %v12336_v47  ;;  %12978 = vmatmul.mubr.msk.f32.vlgmr.msra.gmra.mrb[8].mxu0 %vm843_vm8, %v12319_v3 }
 0x276   : > { %4964 = vmatprep.mubr.f32.mxu1 %v14972_v44  ;;  %13535 = vmatpush1.bf16.msra.mxu0 %v13534_v12 }
 0x277   : > { %13541 = vmatprep.subr.bf16.mxu0 %v13540_v14  ;;  %12980 = vmatprep.mubr.msk.f32.mxu0 %vm843_vm8, %v12320_v57 }
 0x279   : > { %12345 = vmatmul.mubr.msk.f32.gmra.mrb[6].mxu1 %vm843_vm8, %v12337_v17  ;;  %12981 = vmatmul.mubr.msk.f32.gmra.mrb[10].mxu0 %vm843_vm8, %v12321_v6 }
 0x27a   : > { %4857 = vmatprep.mubr.f32.mxu0 %v14972_v44  ;;  %5343 = vmatprep.mubr.f32.mxu1 %v14972_v44 }
 0x27d   : > { %12338 = vmatmul.mubr.msk.f32.vlgmr.msra.gmra.mrb[0].mxu0 %vm843_vm8, %v12334_v8 }
 0x27e   : > { %13543 = vmatpush3.bf16.msra.mxu0 %v13540_v14  ;;  %4863 = vmatprep.mubr.f32.mxu0 %v14972_v44 }
 0x281   : > { %12339 = vmatmul.mubr.msk.f32.gmra.mrb[2].mxu0 %vm843_vm8, %v12335_v25 }
 0x282   : > { %4869 = vmatprep.mubr.f32.mxu0 %v14972_v44 }
 0x285   : > { %12340 = vmatmul.mubr.msk.f32.gmra.mrb[4].mxu0 %vm843_vm8, %v12336_v47 }
 0x286   : > { %4875 = vmatprep.mubr.f32.mxu0 %v14972_v44 }
 0x287   : > { %v16768_v18 = vpop.permute.xlu0 %5082 }
 0x289   : > { %12341 = vmatmul.mubr.msk.f32.gmra.mrb[6].mxu0 %vm843_vm8, %v12337_v17 }
 0x28a   : > { %12987 = vmatprep.mubr.msk.f32.mxu0 %vm843_vm8, %v12334_v8  ;;  %v16770_v27 = vpop.permute.xlu1 %5087 }
 0x28d   : > { %12988 = vmatmul.mubr.msk.f32.vlgmr.msra.gmra.mrb[8].mxu0 %vm843_vm8, %v12335_v25 }
 0x28e   : > { %12990 = vmatprep.mubr.msk.f32.mxu0 %vm843_vm8, %v12336_v47  ;;  %v16778_v29 = vpop.permute.xlu1 %5092 }
 0x291   : > { %12991 = vmatmul.mubr.msk.f32.gmra.mrb[10].mxu0 %vm843_vm8, %v12337_v17  ;;  %v16786_v59 = vpop.permute.xlu0 %5097 }
 0x340   : > { %v4948_v15 = vpop.f32.mrb[0].mxu1 }
 0x341   : > { %v5102_v21 = vadd.f32 %v16768_v18, %v4948_v15  ;;  %v4950_v26 = vpop.f32.mrb[1].mxu1 }
 0x342   : > { %v5103_v37 = vadd.f32 %v16768_v18, %v4950_v26 }
 0x343   : > { %v5122_v28 = vmax.f32 %v5102_v21, 0.0 }
 0x344   : > { %v16774_v23 = vmax.f32 %v5103_v37, 0.0  ;;  %v4954_v52 = vpop.f32.mrb[2].mxu1 }
 0x345   : > { %v5107_v60 = vadd.f32 %v16770_v27, %v4954_v52  ;;  %v4956_v61 = vpop.f32.mrb[3].mxu1 }
 0x346   : > { %v5108_v13 = vadd.f32 %v16770_v27, %v4956_v61 }
 0x347   : > { %v5127_v30 = vmax.f32 %v5107_v60, 0.0 }
 0x348   : > { %v16780_v31 = vmax.f32 %v5108_v13, 0.0  ;;  %v4960_v20 = vpop.f32.mrb[4].mxu1 }
 0x349   : > { %v5112_v38 = vadd.f32 %v16778_v29, %v4960_v20  ;;  %v4962_v39 = vpop.f32.mrb[5].mxu1  ;;  %v16783_v2 = vpack.c.bf16 %v5127_v30, %v5122_v28 }
 0x34a   : > { %v5113_v22 = vadd.f32 %v16778_v29, %v4962_v39  ;;  %v16790_v19 = vpack.i.bf16 %v16780_v31, %v16774_v23  ;;  %v13568_v16 = vpack.c.bf16 %v16780_v31, %v16774_v23 }
 0x34b   : > { %v5132_v41 = vmax.f32 %v5112_v38, 0.0 }
 0x34c   : > { %v16794_v42 = vmax.f32 %v5113_v22, 0.0  ;;  %v4966_v43 = vpop.f32.mrb[6].mxu1 }
 0x34d   : > { %v5117_v24 = vadd.f32 %v16786_v59, %v4966_v43  ;;  %v4968_v45 = vpop.f32.mrb[7].mxu1 }
 0x34e   : > { %v5118_v48 = vadd.f32 %v16786_v59, %v4968_v45 }
 0x34f   : > { %v5137_v49 = vmax.f32 %v5117_v24, 0.0 }
 0x350   : > { %v16798_v34 = vmax.f32 %v5118_v48, 0.0  ;;  %v4859_v51 = vpop.f32.mrb[0].mxu0 }
 0x351   : > { %v5100_v9 = vadd.f32 %v16768_v18, %v4859_v51  ;;  %v4861_v33 = vpop.f32.mrb[1].mxu0  ;;  %v16801_v46 = vpack.c.bf16 %v5137_v49, %v5132_v41 }
 0x352   : > { %v5101_v7 = vadd.f32 %v16768_v18, %v4861_v33  ;;  %v16806_v35 = vpack.i.bf16 %v16798_v34, %v16794_v42  ;;  %v13572_v50 = vpack.c.bf16 %v16798_v34, %v16794_v42 }
 0x353   : > { %v5120_v54 = vmax.f32 %v5100_v9, 0.0 }
 0x354   : > { %v5121_v55 = vmax.f32 %v5101_v7, 0.0  ;;  %v4865_v58 = vpop.f32.mrb[2].mxu0 }
 0x355   : > { %v5105_v40 = vadd.f32 %v16770_v27, %v4865_v58  ;;  %v4867_v62 = vpop.f32.mrb[3].mxu0 }
 0x356   : > { %v5106_v36 = vadd.f32 %v16770_v27, %v4867_v62  ;;  %v16812_v0 = vpack.i.bf16 %v5122_v28, %v5121_v55 }
 0x357   : > { %v5125_v3 = vmax.f32 %v5105_v40, 0.0 }
 0x358   : > { %v5126_v4 = vmax.f32 %v5106_v36, 0.0  ;;  %v4871_v5 = vpop.f32.mrb[4].mxu0  ;;  %14429 = vrot.lane.b32.xlu1 %v16812_v0, %s14974_s16 }
 0x359   : > { %v5110_v57 = vadd.f32 %v16778_v29, %v4871_v5  ;;  %v4873_v1 = vpop.f32.mrb[5].mxu0  ;;  %v16817_v56 = vpack.i.bf16 %v5125_v3, %v5120_v54  ;;  %v16819_v63 = vpack.c.bf16 %v5125_v3, %v5120_v54 }
 0x35a   : > { %v5111_v6 = vadd.f32 %v16778_v29, %v4873_v1  ;;  %v16822_v8 = vpack.i.bf16 %v5127_v30, %v5126_v4  ;;  %v16824_v53 = vpack.c.bf16 %v5126_v4, %v5121_v55 }
 0x35b   : > { %v5130_v25 = vmax.f32 %v5110_v57, 0.0 }
 0x35c   : > { %v5131_v32 = vmax.f32 %v5111_v6, 0.0  ;;  %v4877_v10 = vpop.f32.mrb[6].mxu0  ;;  %14434 = vrot.lane.b32.xlu1 %v16817_v56, %s14974_s16  ;;  %14439 = vrot.lane.b32.xlu0 %v16822_v8, %s14974_s16 }
 0x35d   : > { %v5115_v47 = vadd.f32 %v16786_v59, %v4877_v10  ;;  %v4879_v11 = vpop.f32.mrb[7].mxu0 }
 0x35e   : > { %v5116_v12 = vadd.f32 %v16786_v59, %v4879_v11  ;;  %v16832_v14 = vpack.i.bf16 %v5132_v41, %v5131_v32 }
 0x35f   : > { %v5135_v17 = vmax.f32 %v5115_v47, 0.0 }
 0x360   : > { %v5136_v15 = vmax.f32 %v5116_v12, 0.0  ;;  %v12989_v21 = vpop.f32.mrb[8].mxu0  ;;  %14444 = vrot.lane.b32.xlu0 %v16832_v14, %s14974_s16 }
 0x361   : > { %v5109_v26 = vadd.f32 %v12989_v21, %v16770_v27  ;;  %v5037_v37 = vpop.f32.mrb[9].mxu0  ;;  %v16837_v28 = vpack.i.bf16 %v5135_v17, %v5130_v25  ;;  %v16839_v52 = vpack.c.bf16 %v5135_v17, %v5130_v25 }
 0x362   : > { %v5104_v60 = vadd.f32 %v16768_v18, %v5037_v37  ;;  %v16842_v61 = vpack.i.bf16 %v5137_v49, %v5136_v15  ;;  %v16844_v13 = vpack.c.bf16 %v5136_v15, %v5131_v32 }
 0x363   : > { %v5129_v30 = vmax.f32 %v5109_v26, 0.0 }
 0x364   : > { %v5124_v20 = vmax.f32 %v5104_v60, 0.0  ;;  %v12992_v38 = vpop.f32.mrb[10].mxu0  ;;  %14454 = vrot.lane.b32.xlu0 %v16837_v28, %s14974_s16  ;;  %14449 = vrot.lane.b32.xlu1 %v16842_v61, %s14974_s16 }
 0x365   : > { %5149 = vst.msk [vmem:[#allocation3 + $0x48] sm:$0xff] %vm843_vm8, %v5129_v30  ;;  %v5119_v27 = vadd.f32 %v12992_v38, %v16786_v59  ;;  %v5047_v39 = vpop.f32.mrb[11].mxu0 }
 0x366   : > { %5162 = vst.msk [vmem:[#allocation3 + $0x48] sm:$0xff] %vm5160_vm2, %v14972_v44  ;;  %v5114_v18 = vadd.f32 %v16778_v29, %v5047_v39 }
 0x367   : > { %5144 = vst.msk [vmem:[#allocation3 + $0x20] sm:$0xff] %vm843_vm8, %v5124_v20  ;;  %v5139_v22 = vmax.f32 %v5119_v27, 0.0 }
 0x368   : > { %5161 = vst.msk [vmem:[#allocation3 + $0x20] sm:$0xff] %vm5160_vm2, %v14972_v44  ;;  %v5134_v41 = vmax.f32 %v5114_v18, 0.0  ;;  %14464 = vrot.lane.b32.xlu0 %v16806_v35, %s14974_s16  ;;  %14459 = vrot.lane.b32.xlu1 %v16790_v19, %s14974_s16  ;;  %s14981_s16 = smov 76  }
 0x369   : > { %5159 = vst.msk [vmem:[#allocation3 + $0x98] sm:$0xff] %vm843_vm8, %v5139_v22  ;;  %v12350_v22 = vld [vmem:[%s18374_s3 + $0x20] sm:$0xff] }
 0x36a   : > { %5164 = vst.msk [vmem:[#allocation3 + $0x98] sm:$0xff] %vm5160_vm2, %v14972_v44 }
 0x36b   : > { %5154 = vst.msk [vmem:[#allocation3 + $0x70] sm:$0xff] %vm843_vm8, %v5134_v41 }
 0x36c   : > { %5163 = vst.msk [vmem:[#allocation3 + $0x70] sm:$0xff] %vm5160_vm2, %v14972_v44  ;;  %14474 = vrot.lane.b32.xlu0 %v16822_v8, %s14980_s19  ;;  %14469 = vrot.lane.b32.xlu1 %v16812_v0, %s14980_s19  ;;  %vm8806_vm2 = vcmask 515504  }
 0x36d   : > { %v6742_v29 = vld [vmem:[#allocation3 + $0x48] sm:$0xff] }
 0x36f   : > { %v6737_v59 = vld [vmem:[#allocation3 + $0x20] sm:$0xff] }
 0x370   : > { %14484 = vrot.lane.b32.xlu0 %v16832_v14, %s14980_s19  ;;  %14479 = vrot.lane.b32.xlu1 %v16817_v56, %s14980_s19  ;;  %v16932_v43 = vpack.i.bf16 %v6737_v59, %v16774_v23  ;;  %v12351_v59 = vld [vmem:[%s18374_s3 + $0x28] sm:$0xff]  ;;  %v5181_v23 = vld [vmem:[%s18374_s3] sm:$0xff] }
 0x371   : > { %v6752_v24 = vld [vmem:[#allocation3 + $0x98] sm:$0xff] }
 0x372   : > { %v16939_v48 = vpack.i.bf16 %v6752_v24, %v16798_v34  ;;  %v12352_v24 = vld [vmem:[%s18374_s3 + $0x30] sm:$0xff] }
 0x373   : > { %v6747_v45 = vld [vmem:[#allocation3 + $0x70] sm:$0xff] }
 0x374   : > { %14494 = vrot.lane.b32.xlu0 %v16837_v28, %s14980_s19  ;;  %14489 = vrot.lane.b32.xlu1 %v16842_v61, %s14980_s19  ;;  %v16942_v49 = vpack.i.bf16 %v6747_v45, %v16794_v42  ;;  %v7624_v45 = vld [vmem:[%s18375_s4] sm:$0xff] }
 0x378   : > { %14504 = vrot.lane.b32.xlu0 %v16806_v35, %s14980_s19  ;;  %14499 = vrot.lane.b32.xlu1 %v16790_v19, %s14980_s19  ;;  %s14992_s19 = smov 122  }
 0x37c   : > { %14514 = vrot.lane.b32.xlu0 %v16822_v8, %s14969_s20  ;;  %14509 = vrot.lane.b32.xlu1 %v16812_v0, %s14969_s20 }
 0x380   : > { %14524 = vrot.lane.b32.xlu0 %v16832_v14, %s14969_s20  ;;  %14519 = vrot.lane.b32.xlu1 %v16817_v56, %s14969_s20 }
 0x384   : > { %14534 = vrot.lane.b32.xlu0 %v16837_v28, %s14969_s20  ;;  %14529 = vrot.lane.b32.xlu1 %v16842_v61, %s14969_s20 }
 0x388   : > { %14544 = vrot.lane.b32.xlu0 %v16806_v35, %s14969_s20  ;;  %14539 = vrot.lane.b32.xlu1 %v16790_v19, %s14969_s20 }
 0x38c   : > { %14554 = vrot.lane.b32.xlu0 %v16822_v8, %s14978_s26  ;;  %14549 = vrot.lane.b32.xlu1 %v16812_v0, %s14978_s26 }
 0x390   : > { %14564 = vrot.lane.b32.xlu0 %v16832_v14, %s14978_s26  ;;  %14559 = vrot.lane.b32.xlu1 %v16817_v56, %s14978_s26 }
 0x394   : > { %14574 = vrot.lane.b32.xlu0 %v16837_v28, %s14978_s26  ;;  %14569 = vrot.lane.b32.xlu1 %v16842_v61, %s14978_s26 }
 0x398   : > { %14584 = vrot.lane.b32.xlu0 %v16806_v35, %s14978_s26  ;;  %14579 = vrot.lane.b32.xlu1 %v16790_v19, %s14978_s26  ;;  %s14982_s26 = smov 30  }
 0x39c   : > { %14594 = vrot.lane.b32.xlu0 %v16822_v8, %s14981_s16  ;;  %14589 = vrot.lane.b32.xlu1 %v16812_v0, %s14981_s16 }
 0x3a0   : > { %14604 = vrot.lane.b32.xlu0 %v16832_v14, %s14981_s16  ;;  %14599 = vrot.lane.b32.xlu1 %v16817_v56, %s14981_s16 }
 0x3a4   : > { %14614 = vrot.lane.b32.xlu0 %v16837_v28, %s14981_s16  ;;  %14609 = vrot.lane.b32.xlu1 %v16842_v61, %s14981_s16 }
 0x3a8   : > { %14624 = vrot.lane.b32.xlu0 %v16806_v35, %s14981_s16  ;;  %14619 = vrot.lane.b32.xlu1 %v16790_v19, %s14981_s16  ;;  %v16929_v19 = vpack.i.bf16 %v6742_v29, %v16780_v31  ;;  %s14984_s16 = smov 9  }
 0x3ac   : > { %14634 = vrot.lane.b32.xlu0 %v16822_v8, %s14963_s23  ;;  %14629 = vrot.lane.b32.xlu1 %v16812_v0, %s14963_s23 }
 0x3b0   : > { %14644 = vrot.lane.b32.xlu0 %v16832_v14, %s14963_s23  ;;  %14639 = vrot.lane.b32.xlu1 %v16817_v56, %s14963_s23 }
 0x3b4   : > { %14654 = vrot.lane.b32.xlu0 %v16837_v28, %s14963_s23  ;;  %14649 = vrot.lane.b32.xlu1 %v16842_v61, %s14963_s23 }
 0x3b8   : > { %14659 = vrot.lane.b32.xlu0 %v16929_v19, %s14963_s23  ;;  %14664 = vrot.lane.b32.xlu1 %v16932_v43, %s14963_s23 }
 0x3bc   : > { %14674 = vrot.lane.b32.xlu0 %v16939_v48, %s14963_s23  ;;  %14669 = vrot.lane.b32.xlu1 %v16942_v49, %s14963_s23 }
 0x3c0   : > { %14684 = vrot.lane.b32.xlu0 %v16822_v8, %s14982_s26  ;;  %14679 = vrot.lane.b32.xlu1 %v16812_v0, %s14982_s26 }
 0x3c4   : > { %14694 = vrot.lane.b32.xlu0 %v16832_v14, %s14982_s26  ;;  %14689 = vrot.lane.b32.xlu1 %v16817_v56, %s14982_s26 }
 0x3c8   : > { %14704 = vrot.lane.b32.xlu0 %v16837_v28, %s14982_s26  ;;  %14699 = vrot.lane.b32.xlu1 %v16842_v61, %s14982_s26 }
 0x3ca   : > { %v14430_v51 = vpop.permute.xlu1 %14429 }
 0x3cb   : > { %v14432_v9 = vunpack.i.h.bf16 %v14430_v51  ;;  %v14431_v33 = vunpack.i.l.bf16 %v14430_v51  ;;  %v7626_v51 = vld [vmem:[%s18375_s4 + $0x10] sm:$0xff] }
 0x3cc   : > { %14714 = vrot.lane.b32.xlu0 %v16929_v19, %s14982_s26  ;;  %14709 = vrot.lane.b32.xlu1 %v16932_v43, %s14982_s26 }
 0x3cd   : > { %v5239_v3 = vsel %vm2728_vm12, %v14431_v33, %v14432_v9 }
 0x3ce   : > { %v14435_v7 = vpop.permute.xlu1 %14434  ;;  %v14440_v35 = vpop.permute.xlu0 %14439 }
 0x3cf   : > { %v14437_v54 = vunpack.i.h.bf16 %v14435_v7  ;;  %v14436_v55 = vunpack.i.l.bf16 %v14435_v7  ;;  %v14442_v58 = vunpack.i.h.bf16 %v14440_v35  ;;  %v14441_v40 = vunpack.i.l.bf16 %v14440_v35 }
 0x3d0   : > { %14724 = vrot.lane.b32.xlu0 %v16939_v48, %s14982_s26  ;;  %14719 = vrot.lane.b32.xlu1 %v16942_v49, %s14982_s26  ;;  %s18410_s26 = smov 112  }
 0x3d1   : > { %v5238_v62 = vsel %vm2728_vm12, %v14436_v55, %v14431_v33  ;;  %v5241_v36 = vsel %vm2728_vm12, %v14437_v54, %v14441_v40  ;;  %v5242_v4 = vsel %vm2728_vm12, %v14441_v40, %v14442_v58  ;;  %v5183_v55 = vld [vmem:[%s18374_s3 + $0x10] sm:$0xff] }
 0x3d2   : > { %v14445_v5 = vpop.permute.xlu0 %14444  ;;  %v13544_v57 = vpack.c.bf16 %v5242_v4, %v5239_v3  ;;  %v13546_v1 = vpack.c.bf16 %v5241_v36, %v5238_v62 }
 0x3d3   : > { %v14447_v6 = vunpack.i.h.bf16 %v14445_v5  ;;  %v14446_v25 = vunpack.i.l.bf16 %v14445_v5 }
 0x3d4   : > { %13545 = vmatprep.subr.bf16.mxu1 %v13544_v57  ;;  %14734 = vrot.lane.b32.xlu0 %v16822_v8, %s14983_s30 }
 0x3d5   : > { %14729 = vrot.lane.b32.xlu1 %v16812_v0, %s14983_s30  ;;  %13547 = vmatpush1.bf16.msra.mxu1 %v13546_v1  ;;  %v5245_v8 = vsel %vm2728_vm12, %v14446_v25, %v14447_v6 }
 0x3d6   : > { %v14455_v32 = vpop.permute.xlu0 %14454  ;;  %v14450_v10 = vpop.permute.xlu1 %14449 }
 0x3d7   : > { %v14457_v47 = vunpack.i.h.bf16 %v14455_v32  ;;  %v14456_v11 = vunpack.i.l.bf16 %v14455_v32  ;;  %v14452_v12 = vunpack.i.h.bf16 %v14450_v10  ;;  %v14451_v17 = vunpack.i.l.bf16 %v14450_v10 }
 0x3d8   : > { %14744 = vrot.lane.b32.xlu0 %v16832_v14, %s14983_s30 }
 0x3d9   : > { %v5244_v15 = vsel %vm2728_vm12, %v14456_v11, %v14446_v25  ;;  %v5247_v21 = vsel %vm2728_vm12, %v14457_v47, %v14451_v17  ;;  %14739 = vrot.lane.b32.xlu1 %v16817_v56, %s14983_s30  ;;  %v5248_v0 = vsel %vm2728_vm12, %v14451_v17, %v14452_v12 }
 0x3da   : > { %v14465_v26 = vpop.permute.xlu0 %14464  ;;  %v14460_v37 = vpop.permute.xlu1 %14459  ;;  %v13548_v60 = vpack.c.bf16 %v5248_v0, %v5245_v8  ;;  %v13550_v30 = vpack.c.bf16 %v5247_v21, %v5244_v15 }
 0x3db   : > { %v14462_v20 = vunpack.i.h.bf16 %v14460_v37  ;;  %v14461_v38 = vunpack.i.l.bf16 %v14460_v37  ;;  %v14467_v14 = vunpack.i.h.bf16 %v14465_v26  ;;  %v14466_v27 = vunpack.i.l.bf16 %v14465_v26 }
 0x3dc   : > { %13549 = vmatprep.subr.bf16.mxu1 %v13548_v60  ;;  %14754 = vrot.lane.b32.xlu0 %v16837_v28, %s14983_s30 }
 0x3dd   : > { %v5243_v39 = vsel %vm2728_vm12, %v14442_v58, %v14462_v20  ;;  %v5240_v56 = vsel %vm2728_vm12, %v14432_v9, %v14461_v38  ;;  %14749 = vrot.lane.b32.xlu1 %v16842_v61, %s14983_s30  ;;  %13551 = vmatpush1.bf16.msra.mxu1 %v13550_v30  ;;  %v13552_v18 = vpack.c.bf16 %v14462_v20, %v14461_v38 }
 0x3de   : > { %v13554_v41 = vpack.c.bf16 %v5243_v39, %v5240_v56  ;;  %v5246_v28 = vsel %vm2728_vm12, %v14447_v6, %v14466_v27  ;;  %v5249_v29 = vsel %vm2728_vm12, %v14452_v12, %v14467_v14  ;;  %v13556_v61 = vpack.c.bf16 %v14467_v14, %v14466_v27 }
 0x3df   : > { %13553 = vmatprep.subr.bf16.mxu1 %v13552_v18  ;;  %v12370_v18 = vld [vmem:[%s18374_s3 + $0x40] sm:$0xff]  ;;  %vm7737_vm12 = vcmask 1041408  }
 0x3e0   : > { %14764 = vrot.lane.b32.xlu0 %v16929_v19, %s14983_s30  ;;  %12354 = vmatmul.mubr.msk.f32.vlgmr.msra.gmra.mrb[8].mxu1 %vm5266_vm3, %v12350_v22  ;;  %v13558_v19 = vpack.c.bf16 %v5249_v29, %v5246_v28 }
 0x3e1   : > { %14759 = vrot.lane.b32.xlu1 %v16932_v43, %s14983_s30  ;;  %13555 = vmatpush1.bf16.msra.mxu1 %v13554_v41  ;;  %v7625_v43 = vld [vmem:[%s18375_s4 + $0x8] sm:$0xff] }
 0x3e2   : > { %5349 = vmatprep.mubr.f32.mxu1 %v14972_v44  ;;  %13557 = vmatprep.subr.bf16.mxu1 %v13556_v61 }
 0x3e4   : > { %14774 = vrot.lane.b32.xlu0 %v16939_v48, %s14983_s30  ;;  %12355 = vmatmul.mubr.msk.f32.gmra.mrb[10].mxu1 %vm5266_vm3, %v12351_v59  ;;  %v7627_v48 = vld [vmem:[%s18375_s4 + $0x18] sm:$0xff] }
 0x3e5   : > { %14769 = vrot.lane.b32.xlu1 %v16942_v49, %s14983_s30  ;;  %13559 = vmatpush1.bf16.msra.mxu1 %v13558_v19  ;;  %v12353_v49 = vld [vmem:[%s18374_s3 + $0x38] sm:$0xff]  ;;  %s18414_s30 = smov 48  }
 0x3e6   : > { %5355 = vmatprep.mubr.f32.mxu1 %v14972_v44  ;;  %13561 = vmatprep.subr.bf16.mxu1 %v16824_v53  ;;  %v17035_v53 = vpop.permute.xlu0 %14474 }
 0x3e8   : > { %7635 = vperm.xlu0 %14426, %v7625_v43   ;;  %12356 = vmatmul.mubr.msk.f32.gmra.mrb[12].mxu1 %vm5266_vm3, %v12352_v24 }
 0x3e9   : > { %7630 = vperm.xlu1 %14427, %v7624_v45   ;;  %5361 = vmatprep.mubr.f32.mxu1 %v14972_v44 }
 0x3ea   : > { %v17060_v54 = vpop.permute.xlu0 %14484 }
 0x3eb   : > { %v14486_v3 = vunpack.i.l.bf16 %v17060_v54 }
 0x3ec   : > { %7645 = vperm.xlu0 %14426, %v7627_v48   ;;  %12357 = vmatmul.mubr.msk.f32.gmra.mrb[14].mxu1 %vm5266_vm3, %v12353_v49 }
 0x3ed   : > { %7640 = vperm.xlu1 %14427, %v7626_v51   ;;  %5432 = vmatprep.mubr.f32.mxu1 %v14972_v44 }
 0x3ee   : > { %v14495_v36 = vpop.permute.xlu0 %14494 }
 0x3ef   : > { %v14496_v4 = vunpack.i.l.bf16 %v14495_v36  ;;  %v14497_v1 = vunpack.i.h.bf16 %v14495_v36 }
 0x3f0   : > { %12358 = vmatmul.mubr.msk.f32.vlgmr.msra.gmra.mrb[16].mxu1 %vm5266_vm3, %v12350_v22 }
 0x3f1   : > { %13563 = vmatpush1.bf16.msra.mxu1 %v16819_v63  ;;  %5438 = vmatprep.mubr.f32.mxu1 %v14972_v44  ;;  %v17037_v63 = vpop.permute.xlu1 %14469  ;;  %v5691_v32 = vsel %vm5684_vm4, %v14496_v4, %v14486_v3 }
 0x3f2   : > { %13565 = vmatprep.subr.bf16.mxu1 %v16844_v13  ;;  %v14477_v13 = vunpack.i.h.bf16 %v17035_v53  ;;  %v14472_v9 = vunpack.i.h.bf16 %v17037_v63  ;;  %v14471_v33 = vunpack.i.l.bf16 %v17037_v63  ;;  %v14505_v8 = vpop.permute.xlu0 %14504 }
 0x3f3   : > { %v14507_v60 = vunpack.i.h.bf16 %v14505_v8  ;;  %v14506_v30 = vunpack.i.l.bf16 %v14505_v8 }
 0x3f4   : > { %12359 = vmatmul.mubr.msk.f32.gmra.mrb[18].mxu1 %vm5266_vm3, %v12351_v59  ;;  %v5686_v7 = vsel %vm5684_vm4, %v14471_v33, %v14472_v9  ;;  %v12371_v59 = vld [vmem:[%s18374_s3 + $0x48] sm:$0xff] }
 0x3f5   : > { %13567 = vmatpush1.bf16.msra.mxu1 %v16839_v52  ;;  %5444 = vmatprep.mubr.f32.mxu1 %v14972_v44  ;;  %v14476_v52 = vunpack.i.l.bf16 %v17035_v53  ;;  %v14480_v31 = vpop.permute.xlu1 %14479  ;;  %v13588_v61 = vpack.c.bf16 %v14507_v60, %v14506_v30 }
 0x3f6   : > { %13569 = vmatprep.subr.bf16.mxu1 %v13568_v16  ;;  %v5182_v16 = vld [vmem:[%s18374_s3 + $0x8] sm:$0xff]  ;;  %v14482_v40 = vunpack.i.h.bf16 %v14480_v31  ;;  %v14481_v62 = vunpack.i.l.bf16 %v14480_v31  ;;  %v17092_v26 = vpop.permute.xlu0 %14514 }
 0x3f7   : > { %v5689_v35 = vsel %vm5684_vm4, %v14476_v52, %v14477_v13  ;;  %v14517_v14 = vunpack.i.h.bf16 %v17092_v26  ;;  %v14516_v27 = vunpack.i.l.bf16 %v17092_v26 }
 0x3f8   : > { %12360 = vmatmul.mubr.msk.f32.gmra.mrb[20].mxu1 %vm5266_vm3, %v12352_v24  ;;  %v5688_v5 = vsel %vm5684_vm4, %v14482_v40, %v14476_v52  ;;  %v5685_v57 = vsel %vm5684_vm4, %v14481_v62, %v14471_v33  ;;  %v12373_v33 = vld [vmem:[%s18374_s3 + $0x58] sm:$0xff] }
 0x3f9   : > { %5450 = vmatprep.mubr.f32.mxu1 %v14972_v44  ;;  %v14490_v58 = vpop.permute.xlu1 %14489  ;;  %v13578_v10 = vpack.c.bf16 %v5688_v5, %v5685_v57  ;;  %v5960_v43 = vsel %vm4084_vm10, %v14516_v27, %v14517_v14 }
 0x3fa   : > { %v14492_v42 = vunpack.i.h.bf16 %v14490_v58  ;;  %v14491_v34 = vunpack.i.l.bf16 %v14490_v58  ;;  %v17124_v24 = vpop.permute.xlu0 %14524 }
 0x3fb   : > { %v14526_v31 = vunpack.i.l.bf16 %v17124_v24 }
 0x3fc   : > { %12361 = vmatmul.mubr.msk.f32.gmra.mrb[22].mxu1 %vm5266_vm3, %v12353_v49  ;;  %v5695_v25 = vsel %vm5684_vm4, %v14491_v34, %v14492_v42  ;;  %v5694_v11 = vsel %vm5684_vm4, %v14497_v1, %v14491_v34  ;;  %v5696_v28 = vsel %vm5684_vm4, %v14492_v42, %v14507_v60  ;;  %v12372_v49 = vld [vmem:[%s18374_s3 + $0x50] sm:$0xff] }
 0x3fd   : > { %5533 = vmatprep.mubr.f32.mxu1 %v14972_v44  ;;  %v14500_v6 = vpop.permute.xlu1 %14499  ;;  %v13582_v21 = vpack.c.bf16 %v5694_v11, %v5691_v32 }
 0x3fe   : > { %v14502_v12 = vunpack.i.h.bf16 %v14500_v6  ;;  %v14501_v17 = vunpack.i.l.bf16 %v14500_v6 }
 0x400   : > { %12362 = vmatmul.mubr.msk.f32.vlgmr.msra.gmra.mrb[8].mxu1 %vm5266_vm3, %v5181_v23  ;;  %v13584_v0 = vpack.c.bf16 %v14502_v12, %v14501_v17  ;;  %v5690_v20 = vsel %vm5684_vm4, %v14477_v13, %v14502_v12  ;;  %v5687_v38 = vsel %vm5684_vm4, %v14472_v9, %v14501_v17  ;;  %v14535_v13 = vpop.permute.xlu0 %14534  ;;  %v12382_v17 = vld [vmem:[%s18374_s3 + $0x60] sm:$0xff] }
 0x401   : > { %13571 = vmatpush1.bf16.msra.mxu1 %v16783_v2  ;;  %5539 = vmatprep.mubr.f32.mxu1 %v14972_v44  ;;  %v13576_v2 = vpack.c.bf16 %v5689_v35, %v5686_v7  ;;  %v17094_v37 = vpop.permute.xlu1 %14509  ;;  %v13586_v22 = vpack.c.bf16 %v5690_v20, %v5687_v38 }
 0x402   : > { %13573 = vmatprep.subr.bf16.mxu1 %v13572_v50  ;;  %v14487_v50 = vunpack.i.h.bf16 %v17060_v54  ;;  %v14512_v39 = vunpack.i.h.bf16 %v17094_v37  ;;  %v14511_v56 = vunpack.i.l.bf16 %v17094_v37  ;;  %v14537_v54 = vunpack.i.h.bf16 %v14535_v13  ;;  %v12383_v37 = vld [vmem:[%s18374_s3 + $0x68] sm:$0xff] }
 0x404   : > { %12363 = vmatmul.mubr.msk.f32.gmra.mrb[10].mxu1 %vm5266_vm3, %v5182_v16  ;;  %v5692_v47 = vsel %vm5684_vm4, %v14486_v3, %v14487_v50  ;;  %v5693_v41 = vsel %vm5684_vm4, %v14487_v50, %v14506_v30  ;;  %v5957_v19 = vsel %vm4084_vm10, %v14511_v56, %v14512_v39  ;;  %v14545_v3 = vpop.permute.xlu0 %14544  ;;  %vm8962_vm4 = vcmask 589304  }
 0x405   : > { %13575 = vmatpush1.bf16.msra.mxu1 %v16801_v46  ;;  %5545 = vmatprep.mubr.f32.mxu1 %v14972_v44  ;;  %v5184_v46 = vld [vmem:[%s18374_s3 + $0x18] sm:$0xff]  ;;  %v13580_v15 = vpack.c.bf16 %v5695_v25, %v5692_v47  ;;  %v14520_v29 = vpop.permute.xlu1 %14519  ;;  %v13590_v45 = vpack.c.bf16 %v5696_v28, %v5693_v41  ;;  %v13592_v48 = vpack.c.bf16 %v5960_v43, %v5957_v19  ;;  %v14547_v1 = vunpack.i.h.bf16 %v14545_v3 }
 0x406   : > { %13577 = vmatprep.subr.bf16.mxu1 %v13576_v2  ;;  %v14522_v53 = vunpack.i.h.bf16 %v14520_v29  ;;  %v14521_v63 = vunpack.i.l.bf16 %v14520_v29  ;;  %v14546_v6 = vunpack.i.l.bf16 %v14545_v3  ;;  %v12385_v29 = vld [vmem:[%s18374_s3 + $0x78] sm:$0xff] }
 0x408   : > { %12364 = vmatmul.mubr.msk.f32.gmra.mrb[12].mxu1 %vm5266_vm3, %v5183_v55  ;;  %v5959_v7 = vsel %vm4084_vm10, %v14522_v53, %v14516_v27  ;;  %v5956_v35 = vsel %vm4084_vm10, %v14521_v63, %v14511_v56  ;;  %v17152_v5 = vpop.permute.xlu0 %14554  ;;  %v13604_v26 = vpack.c.bf16 %v14547_v1, %v14546_v6  ;;  %v12384_v27 = vld [vmem:[%s18374_s3 + $0x70] sm:$0xff] }
 0x409   : > { %5551 = vmatprep.mubr.f32.mxu1 %v14972_v44  ;;  %v14530_v51 = vpop.permute.xlu1 %14529  ;;  %v13594_v40 = vpack.c.bf16 %v5959_v7, %v5956_v35  ;;  %v14556_v47 = vunpack.i.l.bf16 %v17152_v5 }
 0x40a   : > { %v14532_v52 = vunpack.i.h.bf16 %v14530_v51  ;;  %v14531_v9 = vunpack.i.l.bf16 %v14530_v51 }
 0x40c   : > { %12365 = vmatmul.mubr.msk.f32.gmra.mrb[14].mxu1 %vm5266_vm3, %v5184_v46  ;;  %v5965_v36 = vsel %vm4084_vm10, %v14537_v54, %v14531_v9  ;;  %v5967_v8 = vsel %vm4084_vm10, %v14532_v52, %v14547_v1  ;;  %v17184_v20 = vpop.permute.xlu0 %14564 }
 0x40d   : > { %5622 = vmatprep.mubr.f32.mxu1 %v14972_v44  ;;  %v14540_v2 = vpop.permute.xlu1 %14539 }
 0x40e   : > { %v14542_v42 = vunpack.i.h.bf16 %v14540_v2  ;;  %v14541_v34 = vunpack.i.l.bf16 %v14540_v2 }
 0x410   : > { %12366 = vmatmul.mubr.msk.f32.vlgmr.msra.gmra.mrb[16].mxu1 %vm5266_vm3, %v5181_v23  ;;  %v14527_v23 = vunpack.i.h.bf16 %v17124_v24  ;;  %v13600_v4 = vpack.c.bf16 %v14542_v42, %v14541_v34  ;;  %v5961_v25 = vsel %vm4084_vm10, %v14517_v14, %v14542_v42  ;;  %v5958_v32 = vsel %vm4084_vm10, %v14512_v39, %v14541_v34  ;;  %v12394_v34 = vld [vmem:[%s18374_s3 + $0x80] sm:$0xff] }
 0x411   : > { %13579 = vmatpush1.bf16.msra.mxu1 %v13578_v10  ;;  %5628 = vmatprep.mubr.f32.mxu1 %v14972_v44  ;;  %v17154_v57 = vpop.permute.xlu1 %14549  ;;  %v14557_v10 = vunpack.i.h.bf16 %v17152_v5 }
 0x412   : > { %13581 = vmatprep.subr.bf16.mxu1 %v13580_v15  ;;  %v5963_v62 = vsel %vm4084_vm10, %v14526_v31, %v14527_v23  ;;  %v14552_v11 = vunpack.i.h.bf16 %v17154_v57  ;;  %v14551_v12 = vunpack.i.l.bf16 %v17154_v57  ;;  %v13602_v15 = vpack.c.bf16 %v5961_v25, %v5958_v32  ;;  %v12395_v57 = vld [vmem:[%s18374_s3 + $0x88] sm:$0xff] }
 0x413   : > { %v6231_v30 = vsel %vm4762_vm1, %v14556_v47, %v14557_v10 }
 0x414   : > { %12367 = vmatmul.mubr.msk.f32.gmra.mrb[18].mxu1 %vm5266_vm3, %v5182_v16  ;;  %v14536_v16 = vunpack.i.l.bf16 %v14535_v13  ;;  %v6228_v60 = vsel %vm4762_vm1, %v14551_v12, %v14552_v11 }
 0x415   : > { %13583 = vmatpush1.bf16.msra.mxu1 %v13582_v21  ;;  %5634 = vmatprep.mubr.f32.mxu1 %v14972_v44  ;;  %v5964_v21 = vsel %vm4084_vm10, %v14527_v23, %v14546_v6  ;;  %v13608_v14 = vpack.c.bf16 %v6231_v30, %v6228_v60 }
 0x416   : > { %13585 = vmatprep.subr.bf16.mxu1 %v13584_v0  ;;  %v5962_v58 = vsel %vm4084_vm10, %v14536_v16, %v14526_v31  ;;  %v14560_v0 = vpop.permute.xlu1 %14559  ;;  %v13606_v38 = vpack.c.bf16 %v5967_v8, %v5964_v21 }
 0x417   : > { %v13598_v50 = vpack.c.bf16 %v5965_v36, %v5962_v58  ;;  %v14562_v56 = vunpack.i.h.bf16 %v14560_v0 }
 0x418   : > { %12368 = vmatmul.mubr.msk.f32.gmra.mrb[20].mxu1 %vm5266_vm3, %v5183_v55  ;;  %v5966_v55 = vsel %vm4084_vm10, %v14531_v9, %v14532_v52  ;;  %vm8314_vm10 = vcmask 294104  }
 0x419   : > { %5640 = vmatprep.mubr.f32.mxu1 %v14972_v44  ;;  %v6230_v43 = vsel %vm4762_vm1, %v14562_v56, %v14556_v47  ;;  %v12396_v47 = vld [vmem:[%s18374_s3 + $0x90] sm:$0xff] }
 0x41a   : > { %v14570_v39 = vpop.permute.xlu1 %14569 }
 0x41b   : > { %v14572_v41 = vunpack.i.h.bf16 %v14570_v39  ;;  %v14571_v28 = vunpack.i.l.bf16 %v14570_v39 }
 0x41c   : > { %12369 = vmatmul.mubr.msk.f32.gmra.mrb[22].mxu1 %vm5266_vm3, %v5184_v46  ;;  %v13596_v46 = vpack.c.bf16 %v5966_v55, %v5963_v62 }
 0x41d   : > { %5789 = vmatprep.mubr.f32.mxu1 %v14972_v44 }
 0x420   : > { %12374 = vmatmul.mubr.msk.f32.vlgmr.msra.gmra.mrb[8].mxu1 %vm5266_vm3, %v12370_v18 }
 0x421   : > { %13587 = vmatpush1.bf16.msra.mxu1 %v13586_v22  ;;  %5795 = vmatprep.mubr.f32.mxu1 %v14972_v44  ;;  %v14575_v22 = vpop.permute.xlu0 %14574 }
 0x422   : > { %13589 = vmatprep.subr.bf16.mxu1 %v13588_v61  ;;  %v14567_v61 = vunpack.i.h.bf16 %v17184_v20  ;;  %v14576_v19 = vunpack.i.l.bf16 %v14575_v22 }
 0x424   : > { %12375 = vmatmul.mubr.msk.f32.gmra.mrb[10].mxu1 %vm5266_vm3, %v12371_v59 }
 0x425   : > { %13591 = vmatpush1.bf16.msra.mxu1 %v13590_v45  ;;  %5801 = vmatprep.mubr.f32.mxu1 %v14972_v44  ;;  %v14577_v45 = vunpack.i.h.bf16 %v14575_v22  ;;  %v14585_v31 = vpop.permute.xlu0 %14584 }
 0x426   : > { %13593 = vmatprep.subr.bf16.mxu1 %v13592_v48  ;;  %v14580_v48 = vpop.permute.xlu1 %14579  ;;  %v14587_v54 = vunpack.i.h.bf16 %v14585_v31  ;;  %v14586_v2 = vunpack.i.l.bf16 %v14585_v31 }
 0x427   : > { %v6236_v13 = vsel %vm4762_vm1, %v14577_v45, %v14571_v28  ;;  %v14582_v52 = vunpack.i.h.bf16 %v14580_v48  ;;  %v14581_v9 = vunpack.i.l.bf16 %v14580_v48 }
 0x428   : > { %12376 = vmatmul.mubr.msk.f32.gmra.mrb[12].mxu1 %vm5266_vm3, %v12372_v49  ;;  %v6238_v3 = vsel %vm4762_vm1, %v14572_v41, %v14587_v54  ;;  %v13620_v5 = vpack.c.bf16 %v14587_v54, %v14586_v2  ;;  %v12407_v54 = vld [vmem:[%s18374_s3 + $0xa8] sm:$0xff] }
 0x429   : > { %5807 = vmatprep.mubr.f32.mxu1 %v14972_v44  ;;  %v13616_v16 = vpack.c.bf16 %v14582_v52, %v14581_v9  ;;  %v17212_v7 = vpop.permute.xlu0 %14594  ;;  %v6232_v55 = vsel %vm4762_vm1, %v14557_v10, %v14582_v52  ;;  %v6229_v58 = vsel %vm4762_vm1, %v14552_v11, %v14581_v9  ;;  %v12406_v9 = vld [vmem:[%s18374_s3 + $0xa0] sm:$0xff] }
 0x42a   : > { %v17214_v35 = vpop.permute.xlu1 %14589  ;;  %v14596_v62 = vunpack.i.l.bf16 %v17212_v7 }
 0x42b   : > { %v14592_v36 = vunpack.i.h.bf16 %v17214_v35  ;;  %v14591_v42 = vunpack.i.l.bf16 %v17214_v35 }
 0x42c   : > { %12377 = vmatmul.mubr.msk.f32.gmra.mrb[14].mxu1 %vm5266_vm3, %v12373_v33 }
 0x42d   : > { %5878 = vmatprep.mubr.f32.mxu1 %v14972_v44  ;;  %v6500_v1 = vsel %vm6498_vm5, %v14591_v42, %v14592_v36  ;;  %v17244_v25 = vpop.permute.xlu0 %14604 }
 0x430   : > { %12378 = vmatmul.mubr.msk.f32.vlgmr.msra.gmra.mrb[16].mxu1 %vm5266_vm3, %v12370_v18  ;;  %v14561_v18 = vunpack.i.l.bf16 %v14560_v0  ;;  %v12397_v0 = vld [vmem:[%s18374_s3 + $0x98] sm:$0xff] }
 0x431   : > { %13595 = vmatpush1.bf16.msra.mxu1 %v13594_v40  ;;  %5884 = vmatprep.mubr.f32.mxu1 %v14972_v44  ;;  %v14597_v40 = vunpack.i.h.bf16 %v17212_v7 }
 0x432   : > { %13597 = vmatprep.subr.bf16.mxu1 %v13596_v46  ;;  %v6227_v24 = vsel %vm4762_vm1, %v14561_v18, %v14551_v12  ;;  %v13618_v46 = vpack.c.bf16 %v6232_v55, %v6229_v58 }
 0x433   : > { %v13610_v53 = vpack.c.bf16 %v6230_v43, %v6227_v24  ;;  %v6503_v6 = vsel %vm6498_vm5, %v14596_v62, %v14597_v40 }
 0x434   : > { %12379 = vmatmul.mubr.msk.f32.gmra.mrb[18].mxu1 %vm5266_vm3, %v12371_v59  ;;  %v14566_v59 = vunpack.i.l.bf16 %v17184_v20  ;;  %v13624_v10 = vpack.c.bf16 %v6503_v6, %v6500_v1 }
 0x435   : > { %13599 = vmatpush1.bf16.msra.mxu1 %v13598_v50  ;;  %5890 = vmatprep.mubr.f32.mxu1 %v14972_v44  ;;  %v6235_v50 = vsel %vm4762_vm1, %v14567_v61, %v14586_v2 }
 0x436   : > { %13601 = vmatprep.subr.bf16.mxu1 %v13600_v4  ;;  %v6233_v51 = vsel %vm4762_vm1, %v14576_v19, %v14566_v59  ;;  %v6234_v63 = vsel %vm4762_vm1, %v14566_v59, %v14567_v61  ;;  %v14600_v4 = vpop.permute.xlu1 %14599  ;;  %v13622_v32 = vpack.c.bf16 %v6238_v3, %v6235_v50 }
 0x437   : > { %v13614_v23 = vpack.c.bf16 %v6236_v13, %v6233_v51  ;;  %v14602_v12 = vunpack.i.h.bf16 %v14600_v4 }
 0x438   : > { %12380 = vmatmul.mubr.msk.f32.gmra.mrb[20].mxu1 %vm5266_vm3, %v12372_v49  ;;  %v6237_v49 = vsel %vm4762_vm1, %v14571_v28, %v14572_v41  ;;  %vm8650_vm1 = vcmask 441704  }
 0x439   : > { %5896 = vmatprep.mubr.f32.mxu1 %v14972_v44  ;;  %v6502_v30 = vsel %vm6498_vm5, %v14602_v12, %v14596_v62 }
 0x43a   : > { %v14610_v11 = vpop.permute.xlu1 %14609 }
 0x43b   : > { %v14612_v21 = vunpack.i.h.bf16 %v14610_v11  ;;  %v14611_v8 = vunpack.i.l.bf16 %v14610_v11 }
 0x43c   : > { %12381 = vmatmul.mubr.msk.f32.gmra.mrb[22].mxu1 %vm5266_vm3, %v12373_v33  ;;  %v13612_v33 = vpack.c.bf16 %v6237_v49, %v6234_v63 }
 0x43d   : > { %6060 = vmatprep.mubr.f32.mxu1 %v14972_v44 }
 0x440   : > { %12386 = vmatmul.mubr.msk.f32.vlgmr.msra.gmra.mrb[8].mxu1 %vm5266_vm3, %v12382_v17 }
 0x441   : > { %13603 = vmatpush1.bf16.msra.mxu1 %v13602_v15  ;;  %6066 = vmatprep.mubr.f32.mxu1 %v14972_v44  ;;  %v14615_v15 = vpop.permute.xlu0 %14614 }
 0x442   : > { %13605 = vmatprep.subr.bf16.mxu1 %v13604_v26  ;;  %v14607_v26 = vunpack.i.h.bf16 %v17244_v25  ;;  %v14616_v60 = vunpack.i.l.bf16 %v14615_v15 }
 0x444   : > { %12387 = vmatmul.mubr.msk.f32.gmra.mrb[10].mxu1 %vm5266_vm3, %v12383_v37 }
 0x445   : > { %13607 = vmatpush1.bf16.msra.mxu1 %v13606_v38  ;;  %6072 = vmatprep.mubr.f32.mxu1 %v14972_v44  ;;  %v14617_v38 = vunpack.i.h.bf16 %v14615_v15  ;;  %v14625_v61 = vpop.permute.xlu0 %14624 }
 0x446   : > { %13609 = vmatprep.subr.bf16.mxu1 %v13608_v14  ;;  %v14620_v14 = vpop.permute.xlu1 %14619  ;;  %v14627_v45 = vunpack.i.h.bf16 %v14625_v61  ;;  %v14626_v48 = vunpack.i.l.bf16 %v14625_v61 }
 0x447   : > { %v6508_v22 = vsel %vm6498_vm5, %v14617_v38, %v14611_v8  ;;  %v14622_v41 = vunpack.i.h.bf16 %v14620_v14  ;;  %v14621_v28 = vunpack.i.l.bf16 %v14620_v14 }
 0x448   : > { %12388 = vmatmul.mubr.msk.f32.gmra.mrb[12].mxu1 %vm5266_vm3, %v12384_v27  ;;  %v6510_v7 = vsel %vm6498_vm5, %v14612_v21, %v14627_v45  ;;  %v13636_v35 = vpack.c.bf16 %v14627_v45, %v14626_v48 }
 0x449   : > { %6078 = vmatprep.mubr.f32.mxu1 %v14972_v44  ;;  %v13632_v19 = vpack.c.bf16 %v14622_v41, %v14621_v28  ;;  %v17270_v43 = vpop.permute.xlu0 %14634  ;;  %v6504_v49 = vsel %vm6498_vm5, %v14597_v40, %v14622_v41  ;;  %v6501_v51 = vsel %vm6498_vm5, %v14592_v36, %v14621_v28 }
 0x44a   : > { %v17272_v24 = vpop.permute.xlu1 %14629  ;;  %v14636_v63 = vunpack.i.l.bf16 %v17270_v43  ;;  %v13634_v31 = vpack.c.bf16 %v6504_v49, %v6501_v51 }
 0x44b   : > { %v14632_v13 = vunpack.i.h.bf16 %v17272_v24  ;;  %v14631_v52 = vunpack.i.l.bf16 %v17272_v24  ;;  %v12418_v24 = vld [vmem:[%s18374_s3 + $0xc0] sm:$0xff] }
 0x44c   : > { %12389 = vmatmul.mubr.msk.f32.gmra.mrb[14].mxu1 %vm5266_vm3, %v12385_v29 }
 0x44d   : > { %6149 = vmatprep.mubr.f32.mxu1 %v14972_v44  ;;  %v6819_v2 = vsel %vm5266_vm3, %v14631_v52, %v14632_v13 }
 0x450   : > { %12390 = vmatmul.mubr.msk.f32.vlgmr.msra.gmra.mrb[16].mxu1 %vm5266_vm3, %v12382_v17  ;;  %v14601_v17 = vunpack.i.l.bf16 %v14600_v4  ;;  %v12409_v4 = vld [vmem:[%s18374_s3 + $0xb8] sm:$0xff] }
 0x451   : > { %13611 = vmatpush1.bf16.msra.mxu1 %v13610_v53  ;;  %6155 = vmatprep.mubr.f32.mxu1 %v14972_v44  ;;  %v14637_v53 = vunpack.i.h.bf16 %v17270_v43 }
 0x452   : > { %13613 = vmatprep.subr.bf16.mxu1 %v13612_v33  ;;  %v6499_v20 = vsel %vm6498_vm5, %v14601_v17, %v14591_v42  ;;  %v17291_v33 = vpop.permute.xlu0 %14644  ;;  %v12408_v42 = vld [vmem:[%s18374_s3 + $0xb0] sm:$0xff] }
 0x453   : > { %v13626_v56 = vpack.c.bf16 %v6502_v30, %v6499_v20  ;;  %v6823_v55 = vsel %vm5266_vm3, %v14636_v63, %v14637_v53  ;;  %v14647_v1 = vunpack.i.h.bf16 %v17291_v33  ;;  %v14646_v6 = vunpack.i.l.bf16 %v17291_v33 }
 0x454   : > { %12391 = vmatmul.mubr.msk.f32.gmra.mrb[18].mxu1 %vm5266_vm3, %v12383_v37  ;;  %v14606_v37 = vunpack.i.l.bf16 %v17244_v25  ;;  %v13640_v36 = vpack.c.bf16 %v6823_v55, %v6819_v2  ;;  %v12420_v55 = vld [vmem:[%s18374_s3 + $0xd0] sm:$0xff] }
 0x455   : > { %13615 = vmatpush1.bf16.msra.mxu1 %v13614_v23  ;;  %6161 = vmatprep.mubr.f32.mxu1 %v14972_v44  ;;  %v14640_v23 = vpop.permute.xlu1 %14639 }
 0x456   : > { %13617 = vmatprep.subr.bf16.mxu1 %v13616_v16  ;;  %v6505_v39 = vsel %vm6498_vm5, %v14616_v60, %v14606_v37  ;;  %v6506_v18 = vsel %vm6498_vm5, %v14606_v37, %v14607_v26  ;;  %v6507_v16 = vsel %vm6498_vm5, %v14607_v26, %v14626_v48  ;;  %v14655_v40 = vpop.permute.xlu0 %14654 }
 0x457   : > { %v13630_v59 = vpack.c.bf16 %v6508_v22, %v6505_v39  ;;  %v13638_v58 = vpack.c.bf16 %v6510_v7, %v6507_v16 }
 0x458   : > { %12392 = vmatmul.mubr.msk.f32.gmra.mrb[20].mxu1 %vm5266_vm3, %v12384_v27  ;;  %v6509_v27 = vsel %vm6498_vm5, %v14611_v8, %v14612_v21  ;;  %vm9110_vm5 = vcmask 663104  }
 0x459   : > { %6167 = vmatprep.mubr.f32.mxu1 %v14972_v44  ;;  %v17306_v62 = vpop.permute.xlu1 %14649 }
 0x45a   : > { %v14652_v50 = vunpack.i.h.bf16 %v17306_v62  ;;  %v14651_v3 = vunpack.i.l.bf16 %v17306_v62 }
 0x45c   : > { %12393 = vmatmul.mubr.msk.f32.gmra.mrb[22].mxu1 %vm5266_vm3, %v12385_v29  ;;  %v13628_v29 = vpack.c.bf16 %v6509_v27, %v6506_v18  ;;  %v6831_v11 = vsel %vm5266_vm3, %v14651_v3, %v14652_v50 }
 0x45d   : > { %6331 = vmatprep.mubr.f32.mxu1 %v14972_v44 }
 0x460   : > { %12398 = vmatmul.mubr.msk.f32.vlgmr.msra.gmra.mrb[8].mxu1 %vm5266_vm3, %v12394_v34 }
 0x461   : > { %13619 = vmatpush1.bf16.msra.mxu1 %v13618_v46  ;;  %6337 = vmatprep.mubr.f32.mxu1 %v14972_v44  ;;  %v14641_v46 = vunpack.i.l.bf16 %v14640_v23 }
 0x462   : > { %13621 = vmatprep.subr.bf16.mxu1 %v13620_v5  ;;  %v14660_v5 = vpop.permute.xlu0 %14659 }
 0x463   : > { %v14662_v12 = vunpack.i.h.bf16 %v14660_v5  ;;  %v14661_v17 = vunpack.i.l.bf16 %v14660_v5 }
 0x464   : > { %12399 = vmatmul.mubr.msk.f32.gmra.mrb[10].mxu1 %vm5266_vm3, %v12395_v57 }
 0x465   : > { %13623 = vmatpush1.bf16.msra.mxu1 %v13622_v32  ;;  %6343 = vmatprep.mubr.f32.mxu1 %v14972_v44  ;;  %v6818_v32 = vsel %vm5266_vm3, %v14641_v46, %v14631_v52  ;;  %v6825_v20 = vsel %vm5266_vm3, %v14661_v17, %v14662_v12  ;;  %v6824_v61 = vsel %vm5266_vm3, %v14637_v53, %v14661_v17 }
 0x466   : > { %13625 = vmatprep.subr.bf16.mxu1 %v13624_v10  ;;  %v14657_v10 = vunpack.i.h.bf16 %v14655_v40  ;;  %v14675_v38 = vpop.permute.xlu0 %14674 }
 0x467   : > { %v14676_v18 = vunpack.i.l.bf16 %v14675_v38 }
 0x468   : > { %12400 = vmatmul.mubr.msk.f32.gmra.mrb[12].mxu1 %vm5266_vm3, %v12396_v47  ;;  %v6830_v37 = vsel %vm5266_vm3, %v14657_v10, %v14651_v3 }
 0x469   : > { %6349 = vmatprep.mubr.f32.mxu1 %v14972_v44  ;;  %v6832_v52 = vsel %vm5266_vm3, %v14652_v50, %v14676_v18 }
 0x46a   : > { %v17338_v28 = vpop.permute.xlu0 %14684 }
 0x46b   : > { %v14687_v48 = vunpack.i.h.bf16 %v17338_v28  ;;  %v14686_v49 = vunpack.i.l.bf16 %v17338_v28 }
 0x46c   : > { %12401 = vmatmul.mubr.msk.f32.gmra.mrb[14].mxu1 %vm5266_vm3, %v12397_v0 }
 0x46d   : > { %6420 = vmatprep.mubr.f32.mxu1 %v14972_v44  ;;  %v7107_v16 = vsel %vm7101_vm6, %v14686_v49, %v14687_v48 }
 0x46e   : > { %v17361_v53 = vpop.permute.xlu0 %14694 }
 0x46f   : > { %v14697_v50 = vunpack.i.h.bf16 %v17361_v53  ;;  %v14696_v3 = vunpack.i.l.bf16 %v17361_v53 }
 0x470   : > { %12402 = vmatmul.mubr.msk.f32.vlgmr.msra.gmra.mrb[16].mxu1 %vm5266_vm3, %v12394_v34  ;;  %v14642_v34 = vunpack.i.h.bf16 %v14640_v23  ;;  %v12419_v23 = vld [vmem:[%s18374_s3 + $0xc8] sm:$0xff] }
 0x471   : > { %13627 = vmatpush1.bf16.msra.mxu1 %v13626_v56  ;;  %6426 = vmatprep.mubr.f32.mxu1 %v14972_v44  ;;  %v14677_v56 = vunpack.i.h.bf16 %v14675_v38  ;;  %v7111_v12 = vsel %vm7101_vm6, %v14696_v3, %v14697_v50 }
 0x472   : > { %13629 = vmatprep.subr.bf16.mxu1 %v13628_v29  ;;  %v6822_v25 = vsel %vm5266_vm3, %v14642_v34, %v14636_v63 }
 0x473   : > { %v13642_v8 = vpack.c.bf16 %v6822_v25, %v6818_v32  ;;  %v6833_v45 = vsel %vm5266_vm3, %v14676_v18, %v14677_v56 }
 0x474   : > { %12403 = vmatmul.mubr.msk.f32.gmra.mrb[18].mxu1 %vm5266_vm3, %v12395_v57  ;;  %v14665_v57 = vpop.permute.xlu1 %14664 }
 0x475   : > { %13631 = vmatpush1.bf16.msra.mxu1 %v13630_v59  ;;  %6432 = vmatprep.mubr.f32.mxu1 %v14972_v44  ;;  %v14667_v15 = vunpack.i.h.bf16 %v14665_v57  ;;  %v14666_v21 = vunpack.i.l.bf16 %v14665_v57 }
 0x476   : > { %13633 = vmatprep.subr.bf16.mxu1 %v13632_v19 }
 0x477   : > { %v6821_v30 = vsel %vm5266_vm3, %v14666_v21, %v14667_v15  ;;  %v6820_v59 = vsel %vm5266_vm3, %v14632_v13, %v14666_v21 }
 0x478   : > { %12404 = vmatmul.mubr.msk.f32.gmra.mrb[20].mxu1 %vm5266_vm3, %v12396_v47  ;;  %v14656_v47 = vunpack.i.l.bf16 %v14655_v40  ;;  %v14670_v14 = vpop.permute.xlu1 %14669  ;;  %v13648_v39 = vpack.c.bf16 %v6825_v20, %v6821_v30  ;;  %v13650_v13 = vpack.c.bf16 %v6824_v61, %v6820_v59 }
 0x479   : > { %6438 = vmatprep.mubr.f32.mxu1 %v14972_v44  ;;  %v14672_v22 = vunpack.i.h.bf16 %v14670_v14  ;;  %v14671_v41 = vunpack.i.l.bf16 %v14670_v14 }
 0x47a   : > { %v6826_v26 = vsel %vm5266_vm3, %v14656_v47, %v14646_v6 }
 0x47b   : > { %v13646_v27 = vpack.c.bf16 %v6830_v37, %v6826_v26  ;;  %v6829_v19 = vsel %vm5266_vm3, %v14671_v41, %v14672_v22 }
 0x47c   : > { %12405 = vmatmul.mubr.msk.f32.gmra.mrb[22].mxu1 %vm5266_vm3, %v12397_v0  ;;  %v6827_v0 = vsel %vm5266_vm3, %v14646_v6, %v14647_v1  ;;  %v17340_v29 = vpop.permute.xlu1 %14679  ;;  %v13652_v33 = vpack.c.bf16 %v6833_v45, %v6829_v19 }
 0x47d   : > { %6603 = vmatprep.mubr.f32.mxu1 %v14972_v44  ;;  %v13644_v60 = vpack.c.bf16 %v6831_v11, %v6827_v0  ;;  %v14682_v51 = vunpack.i.h.bf16 %v17340_v29  ;;  %v14681_v43 = vunpack.i.l.bf16 %v17340_v29  ;;  %v12430_v29 = vld [vmem:[%s18374_s3 + $0xe0] sm:$0xff] }
 0x480   : > { %12410 = vmatmul.mubr.msk.f32.vlgmr.msra.gmra.mrb[8].mxu1 %vm5266_vm3, %v12406_v9  ;;  %v14690_v63 = vpop.permute.xlu1 %14689 }
 0x481   : > { %13635 = vmatpush1.bf16.msra.mxu1 %v13634_v31  ;;  %6609 = vmatprep.mubr.f32.mxu1 %v14972_v44  ;;  %v7103_v31 = vsel %vm7101_vm6, %v14681_v43, %v14682_v51  ;;  %v14691_v40 = vunpack.i.l.bf16 %v14690_v63 }
 0x482   : > { %13637 = vmatprep.subr.bf16.mxu1 %v13636_v35  ;;  %v14705_v35 = vpop.permute.xlu0 %14704  ;;  %v13656_v2 = vpack.c.bf16 %v7107_v16, %v7103_v31  ;;  %v12432_v16 = vld [vmem:[%s18374_s3 + $0xf0] sm:$0xff] }
 0x483   : > { %v7102_v5 = vsel %vm7101_vm6, %v14691_v40, %v14681_v43  ;;  %v14707_v57 = vunpack.i.h.bf16 %v14705_v35 }
 0x484   : > { %12411 = vmatmul.mubr.msk.f32.gmra.mrb[10].mxu1 %vm5266_vm3, %v12407_v54 }
 0x485   : > { %13639 = vmatpush1.bf16.msra.mxu1 %v13638_v58  ;;  %6615 = vmatprep.mubr.f32.mxu1 %v14972_v44  ;;  %v14692_v58 = vunpack.i.h.bf16 %v14690_v63  ;;  %v12431_v63 = vld [vmem:[%s18374_s3 + $0xe8] sm:$0xff] }
 0x486   : > { %13641 = vmatprep.subr.bf16.mxu1 %v13640_v36  ;;  %v14715_v34 = vpop.permute.xlu0 %14714 }
 0x487   : > { %v14717_v25 = vunpack.i.h.bf16 %v14715_v34  ;;  %v14716_v32 = vunpack.i.l.bf16 %v14715_v34 }
 0x488   : > { %12412 = vmatmul.mubr.msk.f32.gmra.mrb[12].mxu1 %vm5266_vm3, %v12408_v42 }
 0x489   : > { %6621 = vmatprep.mubr.f32.mxu1 %v14972_v44  ;;  %v7109_v0 = vsel %vm7101_vm6, %v14716_v32, %v14717_v25  ;;  %v7108_v18 = vsel %vm7101_vm6, %v14687_v48, %v14716_v32 }
 0x48a   : > { %v14725_v26 = vpop.permute.xlu0 %14724 }
 0x48b   : > { %v14727_v20 = vunpack.i.h.bf16 %v14725_v26  ;;  %v14726_v38 = vunpack.i.l.bf16 %v14725_v26 }
 0x48c   : > { %12413 = vmatmul.mubr.msk.f32.gmra.mrb[14].mxu1 %vm5266_vm3, %v12409_v4 }
 0x48d   : > { %6692 = vmatprep.mubr.f32.mxu1 %v14972_v44  ;;  %v7117_v61 = vsel %vm7101_vm6, %v14726_v38, %v14727_v20 }
 0x490   : > { %12414 = vmatmul.mubr.msk.f32.vlgmr.msra.gmra.mrb[16].mxu1 %vm5266_vm3, %v12406_v9  ;;  %v6828_v9 = vsel %vm5266_vm3, %v14647_v1, %v14671_v41  ;;  %v14706_v1 = vunpack.i.l.bf16 %v14705_v35 }
 0x491   : > { %13643 = vmatpush1.bf16.msra.mxu1 %v13642_v8  ;;  %6698 = vmatprep.mubr.f32.mxu1 %v14972_v44  ;;  %v13654_v7 = vpack.c.bf16 %v6832_v52, %v6828_v9 }
 0x492   : > { %13645 = vmatprep.subr.bf16.mxu1 %v13644_v60  ;;  %v7110_v17 = vsel %vm7101_vm6, %v14706_v1, %v14696_v3 }
 0x494   : > { %12415 = vmatmul.mubr.msk.f32.gmra.mrb[18].mxu1 %vm5266_vm3, %v12407_v54  ;;  %v17378_v54 = vpop.permute.xlu1 %14699 }
 0x495   : > { %13647 = vmatpush1.bf16.msra.mxu1 %v13646_v27  ;;  %6704 = vmatprep.mubr.f32.mxu1 %v14972_v44  ;;  %v14702_v62 = vunpack.i.h.bf16 %v17378_v54  ;;  %v14701_v36 = vunpack.i.l.bf16 %v17378_v54 }
 0x496   : > { %13649 = vmatprep.subr.bf16.mxu1 %v13648_v39  ;;  %v17410_v39 = vpop.permute.xlu0 %14734 }
 0x497   : > { %v7115_v6 = vsel %vm7101_vm6, %v14701_v36, %v14702_v62  ;;  %v7114_v15 = vsel %vm7101_vm6, %v14707_v57, %v14701_v36  ;;  %v14737_v59 = vunpack.i.h.bf16 %v17410_v39  ;;  %v14736_v19 = vunpack.i.l.bf16 %v17410_v39 }
 0x498   : > { %12416 = vmatmul.mubr.msk.f32.gmra.mrb[20].mxu1 %vm5266_vm3, %v12408_v42  ;;  %v12421_v42 = vld [vmem:[%s18374_s3 + $0xd8] sm:$0xff]  ;;  %v14710_v46 = vpop.permute.xlu1 %14709  ;;  %v13660_v21 = vpack.c.bf16 %v7115_v6, %v7111_v12  ;;  %v13662_v60 = vpack.c.bf16 %v7114_v15, %v7110_v17  ;;  %v7116_v43 = vsel %vm7101_vm6, %v14702_v62, %v14726_v38  ;;  %v12442_v38 = vld [vmem:[%s18374_s3 + $0x100] sm:$0xff] }
 0x499   : > { %6710 = vmatprep.mubr.f32.mxu1 %v14972_v44  ;;  %v14712_v10 = vunpack.i.h.bf16 %v14710_v46  ;;  %v14711_v47 = vunpack.i.l.bf16 %v14710_v46  ;;  %v7391_v52 = vsel %vm7385_vm14, %v14736_v19, %v14737_v59 }
 0x49a   : > { %v17433_v48 = vpop.permute.xlu0 %14744 }
 0x49b   : > { %v7105_v8 = vsel %vm7101_vm6, %v14711_v47, %v14712_v10  ;;  %v7104_v22 = vsel %vm7101_vm6, %v14682_v51, %v14711_v47  ;;  %v14747_v62 = vunpack.i.h.bf16 %v17433_v48  ;;  %v14746_v36 = vunpack.i.l.bf16 %v17433_v48 }
 0x49c   : > { %12417 = vmatmul.mubr.msk.f32.gmra.mrb[22].mxu1 %vm5266_vm3, %v12409_v4  ;;  %v7106_v4 = vsel %vm7101_vm6, %v14692_v58, %v14686_v49  ;;  %v14720_v37 = vpop.permute.xlu1 %14719  ;;  %v13664_v30 = vpack.c.bf16 %v7109_v0, %v7105_v8  ;;  %v13666_v51 = vpack.c.bf16 %v7108_v18, %v7104_v22 }
 0x49d   : > { %6926 = vmatprep.mubr.f32.mxu1 %v14972_v44  ;;  %v13658_v11 = vpack.c.bf16 %v7106_v4, %v7102_v5  ;;  %v14722_v14 = vunpack.i.h.bf16 %v14720_v37  ;;  %v14721_v27 = vunpack.i.l.bf16 %v14720_v37  ;;  %v7395_v25 = vsel %vm7385_vm14, %v14746_v36, %v14747_v62 }
 0x49f   : > { %v7113_v41 = vsel %vm7101_vm6, %v14721_v27, %v14722_v14 }
 0x4a0   : > { %12422 = vmatmul.mubr.msk.f32.vlgmr.msra.gmra.mrb[8].mxu1 %vm5266_vm3, %v12418_v24  ;;  %v17412_v56 = vpop.permute.xlu1 %14729  ;;  %v13668_v53 = vpack.c.bf16 %v7117_v61, %v7113_v41  ;;  %v12443_v41 = vld [vmem:[%s18374_s3 + $0x108] sm:$0xff] }
 0x4a1   : > { %13651 = vmatpush1.bf16.msra.mxu1 %v13650_v13  ;;  %6932 = vmatprep.mubr.f32.mxu1 %v14972_v44  ;;  %v14732_v45 = vunpack.i.h.bf16 %v17412_v56  ;;  %v14731_v28 = vunpack.i.l.bf16 %v17412_v56 }
 0x4a2   : > { %13653 = vmatprep.subr.bf16.mxu1 %v13652_v33  ;;  %v14755_v33 = vpop.permute.xlu0 %14754 }
 0x4a3   : > { %v7387_v13 = vsel %vm7385_vm14, %v14731_v28, %v14732_v45  ;;  %v14757_v46 = vunpack.i.h.bf16 %v14755_v33 }
 0x4a4   : > { %12423 = vmatmul.mubr.msk.f32.gmra.mrb[10].mxu1 %vm5266_vm3, %v12419_v23  ;;  %v14740_v49 = vpop.permute.xlu1 %14739  ;;  %v13672_v31 = vpack.c.bf16 %v7391_v52, %v7387_v13 }
 0x4a5   : > { %13655 = vmatpush1.bf16.msra.mxu1 %v13654_v7  ;;  %6938 = vmatprep.mubr.f32.mxu1 %v14972_v44  ;;  %v14742_v7 = vunpack.i.h.bf16 %v14740_v49  ;;  %v14741_v35 = vunpack.i.l.bf16 %v14740_v49 }
 0x4a6   : > { %13657 = vmatprep.subr.bf16.mxu1 %v13656_v2  ;;  %v14765_v58 = vpop.permute.xlu0 %14764 }
 0x4a7   : > { %v7386_v34 = vsel %vm7385_vm14, %v14741_v35, %v14731_v28  ;;  %v14767_v4 = vunpack.i.h.bf16 %v14765_v58  ;;  %v14766_v5 = vunpack.i.l.bf16 %v14765_v58 }
 0x4a8   : > { %12424 = vmatmul.mubr.msk.f32.gmra.mrb[12].mxu1 %vm5266_vm3, %v12420_v55 }
 0x4a9   : > { %6944 = vmatprep.mubr.f32.mxu1 %v14972_v44  ;;  %v7393_v12 = vsel %vm7385_vm14, %v14766_v5, %v14767_v4 }
 0x4ac   : > { %12425 = vmatmul.mubr.msk.f32.gmra.mrb[14].mxu1 %vm5266_vm3, %v12421_v42 }
 0x4ad   : > { %7015 = vmatprep.mubr.f32.mxu1 %v14972_v44 }
 0x4b0   : > { %12426 = vmatmul.mubr.msk.f32.vlgmr.msra.gmra.mrb[16].mxu1 %vm5266_vm3, %v12418_v24  ;;  %v7112_v24 = vsel %vm7101_vm6, %v14697_v50, %v14721_v27  ;;  %v14756_v50 = vunpack.i.l.bf16 %v14755_v33  ;;  %vm9115_vm6 = vcmask 728712  }
 0x4b1   : > { %13659 = vmatpush1.bf16.msra.mxu1 %v13658_v11  ;;  %7021 = vmatprep.mubr.f32.mxu1 %v14972_v44  ;;  %v13670_v9 = vpack.c.bf16 %v7116_v43, %v7112_v24 }
 0x4b2   : > { %13661 = vmatprep.subr.bf16.mxu1 %v13660_v21  ;;  %v7394_v32 = vsel %vm7385_vm14, %v14756_v50, %v14746_v36  ;;  %v14775_v21 = vpop.permute.xlu0 %14774 }
 0x4b3   : > { %v14777_v0 = vunpack.i.h.bf16 %v14775_v21  ;;  %v14776_v26 = vunpack.i.l.bf16 %v14775_v21 }
 0x4b4   : > { %12427 = vmatmul.mubr.msk.f32.gmra.mrb[18].mxu1 %vm5266_vm3, %v12419_v23  ;;  %v17450_v23 = vpop.permute.xlu1 %14749 }
 0x4b5   : > { %13663 = vmatpush1.bf16.msra.mxu1 %v13662_v60  ;;  %7027 = vmatprep.mubr.f32.mxu1 %v14972_v44  ;;  %v14752_v54 = vunpack.i.h.bf16 %v17450_v23  ;;  %v14751_v2 = vunpack.i.l.bf16 %v17450_v23  ;;  %v7401_v27 = vsel %vm7385_vm14, %v14776_v26, %v14777_v0 }
 0x4b6   : > { %13665 = vmatprep.subr.bf16.mxu1 %v13664_v30  ;;  %v7392_v30 = vsel %vm7385_vm14, %v14737_v59, %v14766_v5  ;;  %v12444_v59 = vld [vmem:[%s18374_s3 + $0x110] sm:$0xff]  ;;  %v7636_v43 = vpop.permute.xlu0 %7635 }
 0x4b7   : > { %v7399_v3 = vsel %vm7385_vm14, %v14751_v2, %v14752_v54  ;;  %v7398_v10 = vsel %vm7385_vm14, %v14757_v46, %v14751_v2  ;;  %v7400_v39 = vsel %vm7385_vm14, %v14752_v54, %v14776_v26 }
 0x4b8   : > { %12428 = vmatmul.mubr.msk.f32.gmra.mrb[20].mxu1 %vm5266_vm3, %v12420_v55  ;;  %v12433_v55 = vld [vmem:[%s18374_s3 + $0xf8] sm:$0xff]  ;;  %v14760_v40 = vpop.permute.xlu1 %14759  ;;  %v13676_v47 = vpack.c.bf16 %v7399_v3, %v7395_v25  ;;  %v13678_v17 = vpack.c.bf16 %v7398_v10, %v7394_v32 }
 0x4b9   : > { %7033 = vmatprep.mubr.f32.mxu1 %v14972_v44  ;;  %v14762_v57 = vunpack.i.h.bf16 %v14760_v40  ;;  %v14761_v1 = vunpack.i.l.bf16 %v14760_v40 }
 0x4ba   : > { %v7646_v2 = vpop.permute.xlu0 %7645 }
 0x4bb   : > { %v7389_v11 = vsel %vm7385_vm14, %v14761_v1, %v14762_v57  ;;  %v7388_v20 = vsel %vm7385_vm14, %v14732_v45, %v14761_v1 }
 0x4bc   : > { %12429 = vmatmul.mubr.msk.f32.gmra.mrb[22].mxu1 %vm5266_vm3, %v12421_v42  ;;  %v7390_v42 = vsel %vm7385_vm14, %v14742_v7, %v14736_v19  ;;  %v13680_v15 = vpack.c.bf16 %v7393_v12, %v7389_v11  ;;  %v14770_v8 = vpop.permute.xlu1 %14769  ;;  %v13682_v18 = vpack.c.bf16 %v7392_v30, %v7388_v20  ;;  %v12445_v19 = vld [vmem:[%s18374_s3 + $0x118] sm:$0xff]  ;;  %v7722_v30 = vld [vmem:[%s18380_s9 + $0x8] sm:$0xff] }
 0x4bd   : > { %7210 = vmatprep.mubr.f32.mxu1 %v14972_v44  ;;  %v13674_v6 = vpack.c.bf16 %v7390_v42, %v7386_v34  ;;  %v14772_v37 = vunpack.i.h.bf16 %v14770_v8  ;;  %v14771_v60 = vunpack.i.l.bf16 %v14770_v8 }
 0x4bf   : > { %v7397_v14 = vsel %vm7385_vm14, %v14771_v60, %v14772_v37  ;;  %v7396_v22 = vsel %vm7385_vm14, %v14747_v62, %v14771_v60  ;;  %v7721_v60 = vld [vmem:[%s18380_s9] sm:$0xff]  ;;  %vm10201_vm14 = vcmask 220160  }
 0x4c0   : > { %12434 = vmatmul.mubr.msk.f32.vlgmr.msra.gmra.mrb[8].mxu1 %vm5266_vm3, %v12430_v29  ;;  %v13684_v56 = vpack.c.bf16 %v7401_v27, %v7397_v14  ;;  %v13686_v61 = vpack.c.bf16 %v7400_v39, %v7396_v22  ;;  %v7631_v45 = vpop.permute.xlu1 %7630 }
 0x4c1   : > { %13667 = vmatpush1.bf16.msra.mxu1 %v13666_v51  ;;  %7216 = vmatprep.mubr.f32.mxu1 %v14972_v44 }
 0x4c2   : > { %13669 = vmatprep.subr.bf16.mxu1 %v13668_v53 }
 0x4c4   : > { %12435 = vmatmul.mubr.msk.f32.gmra.mrb[10].mxu1 %vm5266_vm3, %v12431_v63  ;;  %v7641_v33 = vpop.permute.xlu1 %7640 }
 0x4c5   : > { %13671 = vmatpush1.bf16.msra.mxu1 %v13670_v9  ;;  %7222 = vmatprep.mubr.f32.mxu1 %v14972_v44 }
 0x4c6   : > { %13673 = vmatprep.subr.bf16.mxu1 %v13672_v31 }
 0x4c8   : > { %12436 = vmatmul.mubr.msk.f32.gmra.mrb[12].mxu1 %vm5266_vm3, %v12432_v16 }
 0x4c9   : > { %7228 = vmatprep.mubr.f32.mxu1 %v14972_v44 }
 0x4cc   : > { %12437 = vmatmul.mubr.msk.f32.gmra.mrb[14].mxu1 %vm5266_vm3, %v12433_v55 }
 0x4cd   : > { %7299 = vmatprep.mubr.f32.mxu1 %v14972_v44 }
 0x4d0   : > { %12438 = vmatmul.mubr.msk.f32.vlgmr.msra.gmra.mrb[16].mxu1 %vm5266_vm3, %v12430_v29 }
 0x4d1   : > { %13675 = vmatpush1.bf16.msra.mxu1 %v13674_v6  ;;  %7305 = vmatprep.mubr.f32.mxu1 %v14972_v44 }
 0x4d2   : > { %13677 = vmatprep.subr.bf16.mxu1 %v13676_v47 }
 0x4d4   : > { %12439 = vmatmul.mubr.msk.f32.gmra.mrb[18].mxu1 %vm5266_vm3, %v12431_v63 }
 0x4d5   : > { %13679 = vmatpush1.bf16.msra.mxu1 %v13678_v17  ;;  %7311 = vmatprep.mubr.f32.mxu1 %v14972_v44 }
 0x4d6   : > { %13681 = vmatprep.subr.bf16.mxu1 %v13680_v15 }
 0x4d8   : > { %12440 = vmatmul.mubr.msk.f32.gmra.mrb[20].mxu1 %vm5266_vm3, %v12432_v16 }
 0x4d9   : > { %7317 = vmatprep.mubr.f32.mxu1 %v14972_v44 }
 0x4dc   : > { %12441 = vmatmul.mubr.msk.f32.gmra.mrb[22].mxu1 %vm5266_vm3, %v12433_v55 }
 0x4dd   : > { %7494 = vmatprep.mubr.f32.mxu1 %v14972_v44 }
 0x4e0   : > { %12446 = vmatmul.mubr.msk.f32.vlgmr.msra.gmra.mrb[8].mxu1 %vm5266_vm3, %v12442_v38 }
 0x4e1   : > { %13683 = vmatpush1.bf16.msra.mxu1 %v13682_v18  ;;  %7500 = vmatprep.mubr.f32.mxu1 %v14972_v44  ;;  %v7723_v18 = vld [vmem:[%s18380_s9 + $0x10] sm:$0x3] }
 0x4e2   : > { %13685 = vmatprep.subr.bf16.mxu1 %v13684_v56 }
 0x4e4   : > { %12447 = vmatmul.mubr.msk.f32.gmra.mrb[10].mxu1 %vm5266_vm3, %v12443_v41 }
 0x4e5   : > { %13687 = vmatpush1.bf16.msra.mxu1 %v13686_v61  ;;  %7506 = vmatprep.mubr.f32.mxu1 %v14972_v44 }
 0x4e6   : > { %13304 = vmatprep.subr.mxu1 %v14972_v44 }
 0x4e8   : > { %12448 = vmatmul.mubr.msk.f32.gmra.mrb[12].mxu1 %vm5266_vm3, %v12444_v59 }
 0x4e9   : > { %7512 = vmatprep.mubr.f32.mxu1 %v14972_v44 }
 0x4ec   : > { %12449 = vmatmul.mubr.msk.f32.gmra.mrb[14].mxu1 %vm5266_vm3, %v12445_v19 }
 0x4ed   : > { %7583 = vmatprep.mubr.f32.mxu1 %v14972_v44 }
 0x4f0   : > { %12450 = vmatmul.mubr.msk.f32.vlgmr.msra.gmra.mrb[16].mxu1 %vm5266_vm3, %v12442_v38  ;;  %v17581_v38 = vpack.c.bf16 %v7722_v30, %v7721_v60 }
 0x4f1   : > { %7589 = vmatprep.mubr.f32.mxu1 %v14972_v44 }
 0x4f2   : > { %13689 = vmatprep.subr.bf16.mxu0 %v17581_v38 }
 0x4f3   : > { %13691 = vmatpush3.bf16.msra.mxu0 %v17581_v38 }
 0x4f4   : > { %12451 = vmatmul.mubr.msk.f32.gmra.mrb[18].mxu1 %vm5266_vm3, %v12443_v41  ;;  %12997 = vmatprep.subr.msk.mxu0 %vm7737_vm12, %v7723_v18 }
 0x4f5   : > { %7595 = vmatprep.mubr.f32.mxu1 %v14972_v44 }
 0x4f7   : > { %12998 = vmatpush3.msk.msra.mxu0 %vm7737_vm12, %v7723_v18 }
 0x4f8   : > { %12452 = vmatmul.mubr.msk.f32.gmra.mrb[20].mxu1 %vm5266_vm3, %v12444_v59  ;;  %13693 = vmatprep.subr.bf16.mxu0 %v17581_v38 }
 0x4f9   : > { %7601 = vmatprep.mubr.f32.mxu1 %v14972_v44 }
 0x4fc   : > { %12453 = vmatmul.mubr.msk.f32.gmra.mrb[22].mxu1 %vm5266_vm3, %v12445_v19 }
 0x5b3   : > { %v7496_v28 = vpop.f32.mrb[8].mxu1 }
 0x5b4   : > { %v7648_v29 = vadd.f32 %v7631_v45, %v7496_v28  ;;  %v7498_v48 = vpop.f32.mrb[9].mxu1 }
 0x5b5   : > { %v7649_v49 = vadd.f32 %v7631_v45, %v7498_v48 }
 0x5b6   : > { %v17522_v51 = vmax.f32 %v7648_v29, 0.0 }
 0x5b7   : > { %v17524_v24 = vmax.f32 %v7649_v49, 0.0  ;;  %v7502_v53 = vpop.f32.mrb[10].mxu1 }
 0x5b8   : > { %v7652_v63 = vadd.f32 %v7636_v43, %v7502_v53  ;;  %v7504_v13 = vpop.f32.mrb[11].mxu1  ;;  %7839 = vrot.lane.b32.xlu1 %v17522_v51, %s14971_s15 }
 0x5b9   : > { %v7653_v52 = vadd.f32 %v7636_v43, %v7504_v13  ;;  %8005 = vrot.lane.b32.xlu0 %v17524_v24, %s14971_s15 }
 0x5ba   : > { %v17530_v9 = vmax.f32 %v7652_v63, 0.0 }
 0x5bb   : > { %v17532_v23 = vmax.f32 %v7653_v52, 0.0  ;;  %v7508_v31 = vpop.f32.mrb[12].mxu1 }
 0x5bc   : > { %v7656_v16 = vadd.f32 %v7641_v33, %v7508_v31  ;;  %v7510_v7 = vpop.f32.mrb[13].mxu1  ;;  %8003 = vrot.lane.b32.xlu1 %v17522_v51, %s14971_s15 }
 0x5bd   : > { %v7657_v35 = vadd.f32 %v7641_v33, %v7510_v7  ;;  %7841 = vrot.lane.b32.xlu0 %v17530_v9, %s14971_s15 }
 0x5be   : > { %v17538_v54 = vmax.f32 %v7656_v16, 0.0 }
 0x5bf   : > { %v17540_v55 = vmax.f32 %v7657_v35, 0.0  ;;  %v7514_v58 = vpop.f32.mrb[14].mxu1 }
 0x5c0   : > { %v7660_v40 = vadd.f32 %v7646_v2, %v7514_v58  ;;  %v7516_v62 = vpop.f32.mrb[15].mxu1  ;;  %8171 = vrot.lane.b32.xlu1 %v17524_v24, %s14971_s15 }
 0x5c1   : > { %v7661_v36 = vadd.f32 %v7646_v2, %v7516_v62  ;;  %8009 = vrot.lane.b32.xlu0 %v17532_v23, %s14971_s15 }
 0x5c2   : > { %v17546_v42 = vmax.f32 %v7660_v40, 0.0 }
 0x5c3   : > { %v17548_v34 = vmax.f32 %v7661_v36, 0.0  ;;  %v7585_v46 = vpop.f32.mrb[16].mxu1 }
 0x5c4   : > { %v7650_v50 = vadd.f32 %v7631_v45, %v7585_v46  ;;  %v7587_v3 = vpop.f32.mrb[17].mxu1  ;;  %8327 = vrot.lane.b32.xlu1 %v17524_v24, %s14971_s15 }
 0x5c5   : > { %v7651_v4 = vadd.f32 %v7631_v45, %v7587_v3  ;;  %8173 = vrot.lane.b32.xlu0 %v17532_v23, %s14971_s15 }
 0x5c6   : > { %v17554_v5 = vmax.f32 %v7650_v50, 0.0 }
 0x5c7   : > { %v7667_v57 = vmax.f32 %v7651_v4, 0.0  ;;  %v7591_v1 = vpop.f32.mrb[18].mxu1 }
 0x5c8   : > { %v7654_v6 = vadd.f32 %v7636_v43, %v7591_v1  ;;  %v7593_v25 = vpop.f32.mrb[19].mxu1  ;;  %8007 = vrot.lane.b32.xlu1 %v17530_v9, %s14971_s15 }
 0x5c9   : > { %7684 = vst.msk [vmem:[#allocation4 + $0x18] sm:$0xff] %vm7683_vm9, %v7667_v57  ;;  %v7655_v32 = vadd.f32 %v7636_v43, %v7593_v25  ;;  %8329 = vrot.lane.b32.xlu0 %v17532_v23, %s14971_s15 }
 0x5ca   : > { %v17561_v10 = vmax.f32 %v7654_v6, 0.0 }
 0x5cb   : > { %v7671_v47 = vmax.f32 %v7655_v32, 0.0  ;;  %v7597_v11 = vpop.f32.mrb[20].mxu1 }
 0x5cc   : > { %v7658_v12 = vadd.f32 %v7641_v33, %v7597_v11  ;;  %v7599_v17 = vpop.f32.mrb[21].mxu1  ;;  %7843 = vrot.lane.b32.xlu1 %v17538_v54, %s14971_s15 }
 0x5cd   : > { %7688 = vst.msk [vmem:[#allocation4 + $0x38] sm:$0xff] %vm7683_vm9, %v7671_v47  ;;  %v7659_v15 = vadd.f32 %v7641_v33, %v7599_v17  ;;  %8013 = vrot.lane.b32.xlu0 %v17540_v55, %s14971_s15 }
 0x5ce   : > { %v17568_v21 = vmax.f32 %v7658_v12, 0.0 }
 0x5cf   : > { %v7675_v8 = vmax.f32 %v7659_v15, 0.0  ;;  %v7603_v0 = vpop.f32.mrb[22].mxu1 }
 0x5d0   : > { %v7662_v26 = vadd.f32 %v7646_v2, %v7603_v0  ;;  %v7605_v37 = vpop.f32.mrb[23].mxu1  ;;  %8011 = vrot.lane.b32.xlu1 %v17538_v54, %s14971_s15  ;;  %v7857_v0 = vld [vmem:[%s18380_s9 + $0x10] sm:$0x3] }
 0x5d1   : > { %7692 = vst.msk [vmem:[#allocation4 + $0x58] sm:$0xff] %vm7683_vm9, %v7675_v8  ;;  %v7663_v20 = vadd.f32 %v7646_v2, %v7605_v37  ;;  %7845 = vrot.lane.b32.xlu0 %v17546_v42, %s14971_s15 }
 0x5d2   : > { %v17583_v14 = vmax.f32 %v7662_v26, 0.0 }
 0x5d3   : > { %v7679_v27 = vmax.f32 %v7663_v20, 0.0 }
 0x5d4   : > { %8175 = vrot.lane.b32.xlu1 %v17540_v55, %s14971_s15 }
 0x5d5   : > { %7696 = vst.msk [vmem:[#allocation4 + $0x78] sm:$0xff] %vm7683_vm9, %v7679_v27  ;;  %7707 = vrot.lane.b32.xlu0 %v17530_v9, %s14971_s15  ;;  %vm10379_vm9 = vcmask 16384  }
 0x5d8   : > { %8015 = vrot.lane.b32.xlu1 %v17546_v42, %s14971_s15 }
 0x5d9   : > { %8017 = vrot.lane.b32.xlu0 %v17548_v34, %s14971_s15 }
 0x5dc   : > { %8331 = vrot.lane.b32.xlu1 %v17540_v55, %s14971_s15 }
 0x5dd   : > { %8177 = vrot.lane.b32.xlu0 %v17548_v34, %s14971_s15 }
 0x5e0   : > { %7705 = vrot.lane.b32.xlu1 %v17522_v51, %s14971_s15 }
 0x5e1   : > { %8333 = vrot.lane.b32.xlu0 %v17548_v34, %s14971_s15 }
 0x5e4   : > { %8487 = vrot.lane.b32.xlu1 %v17554_v5, %s14971_s15 }
 0x5e5   : > { %8489 = vrot.lane.b32.xlu0 %v17561_v10, %s14971_s15 }
 0x5e8   : > { %8663 = vrot.lane.b32.xlu1 %v17554_v5, %s14971_s15 }
 0x5e9   : > { %8665 = vrot.lane.b32.xlu0 %v17561_v10, %s14971_s15 }
 0x5ec   : > { %8819 = vrot.lane.b32.xlu1 %v17554_v5, %s14971_s15 }
 0x5ed   : > { %8821 = vrot.lane.b32.xlu0 %v17561_v10, %s14971_s15 }
 0x5f0   : > { %8491 = vrot.lane.b32.xlu1 %v17568_v21, %s14971_s15 }
 0x5f1   : > { %8493 = vrot.lane.b32.xlu0 %v17583_v14, %s14971_s15 }
 0x5f4   : > { %7709 = vrot.lane.b32.xlu1 %v17538_v54, %s14971_s15 }
 0x5f5   : > { %7711 = vrot.lane.b32.xlu0 %v17546_v42, %s14971_s15 }
 0x5f8   : > { %8667 = vrot.lane.b32.xlu1 %v17568_v21, %s14971_s15 }
 0x5f9   : > { %8669 = vrot.lane.b32.xlu0 %v17583_v14, %s14971_s15 }
 0x5fc   : > { %8823 = vrot.lane.b32.xlu1 %v17568_v21, %s14971_s15 }
 0x5fd   : > { %8825 = vrot.lane.b32.xlu0 %v17583_v14, %s14971_s15 }
 0x62a   : > { %v7840_v39 = vpop.permute.xlu1 %7839 }
 0x62b   : > { %v7851_v22 = vadd.f32 %v7840_v39, %v17522_v51  ;;  %v8006_v56 = vpop.permute.xlu0 %8005 }
 0x62d   : > { %7862 = vrot.lane.b32.xlu1 %v7851_v22, %s14969_s20 }
 0x62e   : > { %v8004_v41 = vpop.permute.xlu1 %8003 }
 0x62f   : > { %v7842_v61 = vpop.permute.xlu0 %7841  ;;  %v8019_v29 = vsel %vm3067_vm13, %v8004_v41, %v8006_v56 }
 0x630   : > { %v7852_v59 = vadd.f32 %v7842_v61, %v17530_v9  ;;  %v8027_v49 = vadd.f32 %v8019_v29, %v17522_v51 }
 0x632   : > { %v8172_v19 = vpop.permute.xlu1 %8171  ;;  %7864 = vrot.lane.b32.xlu0 %v7852_v59, %s14969_s20 }
 0x633   : > { %v8183_v45 = vadd.f32 %v8172_v19, %v17524_v24  ;;  %v8010_v28 = vpop.permute.xlu0 %8009 }
 0x635   : > { %8194 = vrot.lane.b32.xlu1 %v8183_v45, %s18410_s26 }
 0x636   : > { %v8328_v48 = vpop.permute.xlu1 %8327 }
 0x637   : > { %v8174_v43 = vpop.permute.xlu0 %8173  ;;  %v8339_v1 = vadd.f32 %v8328_v48, %v17524_v24 }
 0x638   : > { %v8184_v53 = vadd.f32 %v8174_v43, %v17532_v23 }
 0x639   : > { %8038 = vrot.lane.b32.xlu1 %v8027_v49, %s14963_s23 }
 0x63a   : > { %v8008_v63 = vpop.permute.xlu1 %8007  ;;  %8196 = vrot.lane.b32.xlu0 %v8184_v53, %s18410_s26 }
 0x63b   : > { %v8020_v13 = vsel %vm3067_vm13, %v8008_v63, %v8010_v28  ;;  %v8330_v52 = vpop.permute.xlu0 %8329 }
 0x63c   : > { %v8028_v33 = vadd.f32 %v8020_v13, %v17530_v9 }
 0x63e   : > { %v7844_v31 = vpop.permute.xlu1 %7843  ;;  %8040 = vrot.lane.b32.xlu0 %v8028_v33, %s14963_s23 }
 0x63f   : > { %v7853_v16 = vadd.f32 %v7844_v31, %v17538_v54  ;;  %v8014_v7 = vpop.permute.xlu0 %8013 }
 0x641   : > { %7866 = vrot.lane.b32.xlu1 %v7853_v16, %s14969_s20  ;;  %v17720_v16 = vld [vmem:[#allocation4 + $0x18] sm:$0xff] }
 0x642   : > { %v8012_v35 = vpop.permute.xlu1 %8011 }
 0x643   : > { %v7846_v2 = vpop.permute.xlu0 %7845  ;;  %v8021_v46 = vsel %vm3067_vm13, %v8012_v35, %v8014_v7  ;;  %v8033_v35 = vld [vmem:[%s18380_s9 + $0x10] sm:$0x3] }
 0x644   : > { %v7854_v58 = vadd.f32 %v7846_v2, %v17546_v42  ;;  %v8029_v3 = vadd.f32 %v8021_v46, %v17538_v54 }
 0x646   : > { %v8176_v40 = vpop.permute.xlu1 %8175  ;;  %7868 = vrot.lane.b32.xlu0 %v7854_v58, %s14969_s20  ;;  %s18411_s20 = smov 64  }
 0x647   : > { %v8185_v62 = vadd.f32 %v8176_v40, %v17540_v55  ;;  %v7708_v36 = vpop.permute.xlu0 %7707 }
 0x648   : > { %v7718_v15 = vadd.f32 %v7708_v36, %v17530_v9  ;;  %v8340_v9 = vadd.f32 %v8330_v52, %v17532_v23 }
 0x649   : > { %8198 = vrot.lane.b32.xlu1 %v8185_v62, %s18410_s26 }
 0x64a   : > { %v8016_v50 = vpop.permute.xlu1 %8015 }
 0x64b   : > { %v8018_v4 = vpop.permute.xlu0 %8017 }
 0x64c   : > { %v8022_v32 = vsel %vm3067_vm13, %v8016_v50, %v8018_v4  ;;  %vm7982_vm13 = vcmask 146504  }
 0x64d   : > { %8042 = vrot.lane.b32.xlu1 %v8029_v3, %s14963_s23  ;;  %v8030_v8 = vadd.f32 %v8022_v32, %v17546_v42  ;;  %v8189_v3 = vld [vmem:[%s18380_s9 + $0x10] sm:$0x3] }
 0x64e   : > { %v8332_v57 = vpop.permute.xlu1 %8331 }
 0x64f   : > { %v8178_v6 = vpop.permute.xlu0 %8177  ;;  %v8341_v11 = vadd.f32 %v8332_v57, %v17540_v55 }
 0x650   : > { %v8186_v25 = vadd.f32 %v8178_v6, %v17548_v34 }
 0x651   : > { %8350 = vrot.lane.b32.xlu1 %v8339_v1, %s18411_s20 }
 0x652   : > { %v7706_v47 = vpop.permute.xlu1 %7705  ;;  %8200 = vrot.lane.b32.xlu0 %v8186_v25, %s18410_s26  ;;  %s14985_s26 = smov 18  }
 0x653   : > { %v7717_v12 = vadd.f32 %v7706_v47, %v17522_v51  ;;  %v8334_v17 = vpop.permute.xlu0 %8333  ;;  %v8345_v47 = vld [vmem:[%s18380_s9 + $0x10] sm:$0x3] }
 0x654   : > { %v8342_v27 = vadd.f32 %v8334_v17, %v17548_v34 }
 0x655   : > { %12999 = vmatprep.mubr.msk.f32.mxu0 %vm7724_vm15, %v7717_v12  ;;  %8354 = vrot.lane.b32.xlu1 %v8341_v11, %s18411_s20 }
 0x656   : > { %13000 = vmatmul.mubr.msk.f32.vlgmr.msra.gmra.mrb[12].mxu0 %vm7724_vm15, %v7718_v15  ;;  %v8488_v26 = vpop.permute.xlu1 %8487  ;;  %8044 = vrot.lane.b32.xlu0 %v8030_v8, %s14963_s23  ;;  %s18413_s23 = smov 96   ;;  %v8509_v8 = vld [vmem:[%s18380_s9 + $0x10] sm:$0x3] }
 0x657   : > { %v8499_v51 = vadd.f32 %v8488_v26, %v17524_v24  ;;  %v8490_v37 = vpop.permute.xlu0 %8489  ;;  %13695 = vmatpush3.bf16.msra.mxu0 %v17581_v38  ;;  %v8500_v39 = vadd.f32 %v8488_v26, %v17554_v5 }
 0x658   : > { %13009 = vmatprep.subr.msk.mxu0 %vm7737_vm12, %v7857_v0  ;;  %v8501_v30 = vadd.f32 %v8490_v37, %v17532_v23  ;;  %v8502_v41 = vadd.f32 %v8490_v37, %v17561_v10 }
 0x659   : > { %8518 = vrot.lane.b32.xlu1 %v8499_v51, %s18412_s28 }
 0x65a   : > { %v8664_v60 = vpop.permute.xlu1 %8663  ;;  %8352 = vrot.lane.b32.xlu0 %v8340_v9, %s18411_s20 }
 0x65b   : > { %v8666_v20 = vpop.permute.xlu0 %8665  ;;  %13010 = vmatpush3.msk.msra.mxu0 %vm7737_vm12, %v7857_v0 }
 0x65c   : > { %13697 = vmatprep.subr.bf16.mxu0 %v17581_v38 }
 0x65d   : > { %8522 = vrot.lane.b32.xlu1 %v8501_v30, %s18412_s28  ;;  %v8681_v30 = vld [vmem:[%s18380_s9 + $0x10] sm:$0x3] }
 0x65e   : > { %v8820_v24 = vpop.permute.xlu1 %8819  ;;  %8356 = vrot.lane.b32.xlu0 %v8342_v27, %s18411_s20  ;;  %s14986_s20 = smov 27  }
 0x65f   : > { %v8822_v18 = vpop.permute.xlu0 %8821  ;;  %v8831_v43 = vadd.f32 %v8820_v24, %v17554_v5 }
 0x660   : > { %v8832_v52 = vadd.f32 %v8822_v18, %v17561_v10 }
 0x662   : > { %v8492_v22 = vpop.permute.xlu1 %8491  ;;  %8520 = vrot.lane.b32.xlu0 %v8500_v39, %s18412_s28 }
 0x663   : > { %v8503_v23 = vadd.f32 %v8492_v22, %v17540_v55  ;;  %v8494_v56 = vpop.permute.xlu0 %8493  ;;  %v8504_v28 = vadd.f32 %v8492_v22, %v17568_v21  ;;  %v8675_v55 = vadd.f32 %v8664_v60, %v17554_v5  ;;  %v17725_v5 = vld [vmem:[#allocation4 + $0x58] sm:$0xff] }
 0x664   : > { %v8505_v59 = vadd.f32 %v8494_v56, %v17548_v34  ;;  %v8506_v48 = vadd.f32 %v8494_v56, %v17583_v14 }
 0x665   : > { %8526 = vrot.lane.b32.xlu1 %v8503_v23, %s18412_s28  ;;  %v8837_v23 = vld [vmem:[%s18380_s9 + $0x10] sm:$0x3] }
 0x666   : > { %v7710_v61 = vpop.permute.xlu1 %7709  ;;  %8524 = vrot.lane.b32.xlu0 %v8502_v41, %s18412_s28 }
 0x667   : > { %v7719_v19 = vadd.f32 %v7710_v61, %v17538_v54  ;;  %v7712_v45 = vpop.permute.xlu0 %7711 }
 0x668   : > { %v7720_v29 = vadd.f32 %v7712_v45, %v17546_v42  ;;  %v8676_v42 = vadd.f32 %v8666_v20, %v17561_v10  ;;  %v17729_v10 = vld [vmem:[#allocation4 + $0x38] sm:$0xff] }
 0x669   : > { %13002 = vmatprep.mubr.msk.f32.mxu0 %vm7724_vm15, %v7719_v19  ;;  %8530 = vrot.lane.b32.xlu1 %v8505_v59, %s18412_s28  ;;  %v8993_v19 = vld [vmem:[%s18380_s9 + $0x10] sm:$0x3] }
 0x66a   : > { %8528 = vrot.lane.b32.xlu0 %v8504_v28, %s18412_s28  ;;  %13003 = vmatmul.mubr.msk.f32.gmra.mrb[14].mxu0 %vm7724_vm15, %v7720_v29  ;;  %v8668_v34 = vpop.permute.xlu1 %8667 }
 0x66b   : > { %v8677_v54 = vadd.f32 %v8668_v34, %v17568_v21  ;;  %v8670_v49 = vpop.permute.xlu0 %8669 }
 0x66c   : > { %v8678_v53 = vadd.f32 %v8670_v49, %v17583_v14 }
 0x66d   : > { %8686 = vrot.lane.b32.xlu1 %v8675_v55, %s18413_s23 }
 0x66e   : > { %8532 = vrot.lane.b32.xlu0 %v8506_v48, %s18412_s28  ;;  %v8824_v63 = vpop.permute.xlu1 %8823  ;;  %s14989_s28 = smov 54  }
 0x66f   : > { %v8833_v13 = vadd.f32 %v8824_v63, %v17568_v21  ;;  %v8826_v33 = vpop.permute.xlu0 %8825  ;;  %v17733_v21 = vld [vmem:[#allocation4 + $0x78] sm:$0xff] }
 0x670   : > { %v8834_v31 = vadd.f32 %v8826_v33, %v17583_v14 }
 0x671   : > { %8690 = vrot.lane.b32.xlu1 %v8677_v54, %s18413_s23 }
 0x672   : > { %8688 = vrot.lane.b32.xlu0 %v8676_v42, %s18413_s23 }
 0x675   : > { %8842 = vrot.lane.b32.xlu1 %v8831_v43, %s18414_s30 }
 0x676   : > { %8692 = vrot.lane.b32.xlu0 %v8678_v53, %s18413_s23  ;;  %s14990_s23 = smov 63  }
 0x679   : > { %8846 = vrot.lane.b32.xlu1 %v8833_v13, %s18414_s30 }
 0x67a   : > { %8844 = vrot.lane.b32.xlu0 %v8832_v52, %s18414_s30 }
 0x67d   : > { %8975 = vrot.lane.b32.xlu1 %v17720_v16, %s14971_s15 }
 0x67e   : > { %8848 = vrot.lane.b32.xlu0 %v8834_v31, %s18414_s30  ;;  %s18415_s30 = smov 72  }
 0x681   : > { %8979 = vrot.lane.b32.xlu1 %v17725_v5, %s14971_s15 }
 0x682   : > { %8977 = vrot.lane.b32.xlu0 %v17729_v10, %s14971_s15 }
 0x686   : > { %8981 = vrot.lane.b32.xlu0 %v17733_v21, %s14971_s15  ;;  %s14993_s15 = smov 101  }
 0x69f   : > { %v7863_v14 = vpop.permute.xlu1 %7862 }
 0x6a0   : > { %13011 = vmatprep.mubr.msk.f32.mxu0 %vm7724_vm15, %v7863_v14 }
 0x6a4   : > { %v7865_v7 = vpop.permute.xlu0 %7864 }
 0x6a5   : > { %13012 = vmatmul.mubr.msk.f32.vlgmr.msra.gmra.mrb[16].mxu0 %vm7724_vm15, %v7865_v7 }
 0x6a6   : > { %13699 = vmatpush3.bf16.msra.mxu0 %v17581_v38 }
 0x6a7   : > { %13021 = vmatprep.subr.msk.mxu0 %vm7737_vm12, %v8033_v35  ;;  %v8195_v2 = vpop.permute.xlu1 %8194 }
 0x6aa   : > { %13022 = vmatpush3.msk.msra.mxu0 %vm7737_vm12, %v8033_v35 }
 0x6ab   : > { %13701 = vmatprep.subr.bf16.mxu0 %v17581_v38  ;;  %v8039_v40 = vpop.permute.xlu1 %8038 }
 0x6ac   : > { %v8197_v58 = vpop.permute.xlu0 %8196 }
 0x6b0   : > { %v8041_v36 = vpop.permute.xlu0 %8040 }
 0x6b3   : > { %v7867_v62 = vpop.permute.xlu1 %7866 }
 0x6b4   : > { %13014 = vmatprep.mubr.msk.f32.mxu0 %vm7724_vm15, %v7867_v62 }
 0x6b8   : > { %v7869_v46 = vpop.permute.xlu0 %7868 }
 0x6b9   : > { %13015 = vmatmul.mubr.msk.f32.gmra.mrb[18].mxu0 %vm7724_vm15, %v7869_v46 }
 0x6ba   : > { %13023 = vmatprep.mubr.msk.f32.mxu0 %vm7724_vm15, %v8039_v40 }
 0x6bb   : > { %v8199_v50 = vpop.permute.xlu1 %8198 }
 0x6bd   : > { %13024 = vmatmul.mubr.msk.f32.vlgmr.msra.gmra.mrb[20].mxu0 %vm7724_vm15, %v8041_v36 }
 0x6be   : > { %13703 = vmatpush3.bf16.msra.mxu0 %v17581_v38 }
 0x6bf   : > { %v8043_v4 = vpop.permute.xlu1 %8042  ;;  %13033 = vmatprep.subr.msk.mxu0 %vm7737_vm12, %v8189_v3 }
 0x6c0   : > { %13026 = vmatprep.mubr.msk.f32.mxu0 %vm7724_vm15, %v8043_v4 }
 0x6c2   : > { %13034 = vmatpush3.msk.msra.mxu0 %vm7737_vm12, %v8189_v3 }
 0x6c3   : > { %v8351_v57 = vpop.permute.xlu1 %8350  ;;  %13705 = vmatprep.subr.bf16.mxu0 %v17581_v38 }
 0x6c4   : > { %v8201_v1 = vpop.permute.xlu0 %8200 }
 0x6c7   : > { %v8355_v6 = vpop.permute.xlu1 %8354 }
 0x6c8   : > { %v8045_v25 = vpop.permute.xlu0 %8044 }
 0x6c9   : > { %13027 = vmatmul.mubr.msk.f32.gmra.mrb[22].mxu0 %vm7724_vm15, %v8045_v25 }
 0x6ca   : > { %13035 = vmatprep.mubr.msk.f32.mxu0 %vm7724_vm15, %v8195_v2 }
 0x6cb   : > { %v8519_v11 = vpop.permute.xlu1 %8518 }
 0x6cc   : > { %v8353_v32 = vpop.permute.xlu0 %8352 }
 0x6cd   : > { %13036 = vmatmul.mubr.msk.f32.vlgmr.msra.gmra.mrb[24].mxu0 %vm7724_vm15, %v8197_v58 }
 0x6ce   : > { %13038 = vmatprep.mubr.msk.f32.mxu0 %vm7724_vm15, %v8199_v50  ;;  %13707 = vmatpush3.bf16.msra.mxu0 %v17581_v38 }
 0x6cf   : > { %13045 = vmatprep.subr.msk.mxu0 %vm7737_vm12, %v8345_v47  ;;  %v8523_v17 = vpop.permute.xlu1 %8522 }
 0x6d0   : > { %v8357_v12 = vpop.permute.xlu0 %8356 }
 0x6d1   : > { %13039 = vmatmul.mubr.msk.f32.gmra.mrb[26].mxu0 %vm7724_vm15, %v8201_v1 }
 0x6d2   : > { %13047 = vmatprep.mubr.msk.f32.mxu0 %vm7724_vm15, %v8351_v57  ;;  %13046 = vmatpush3.msk.msra.mxu0 %vm7737_vm12, %v8345_v47 }
 0x6d3   : > { %13709 = vmatprep.subr.bf16.mxu0 %v17581_v38 }
 0x6d4   : > { %v8521_v15 = vpop.permute.xlu0 %8520 }
 0x6d5   : > { %13048 = vmatmul.mubr.msk.f32.vlgmr.msra.gmra.mrb[28].mxu0 %vm7724_vm15, %v8353_v32  ;;  %v8534_v51 = vsel %vm843_vm8, %v8519_v11, %v8521_v15 }
 0x6d6   : > { %13050 = vmatprep.mubr.msk.f32.mxu0 %vm7724_vm15, %v8355_v6  ;;  %13711 = vmatpush3.bf16.msra.mxu0 %v17581_v38 }
 0x6d7   : > { %v8527_v0 = vpop.permute.xlu1 %8526  ;;  %13057 = vmatprep.subr.msk.mxu0 %vm7737_vm12, %v8509_v8 }
 0x6d8   : > { %v8525_v26 = vpop.permute.xlu0 %8524 }
 0x6d9   : > { %13051 = vmatmul.mubr.msk.f32.gmra.mrb[30].mxu0 %vm7724_vm15, %v8357_v12  ;;  %v8535_v9 = vsel %vm843_vm8, %v8523_v17, %v8525_v26 }
 0x6da   : > { %13059 = vmatprep.mubr.msk.f32.mxu0 %vm7724_vm15, %v8534_v51  ;;  %13058 = vmatpush3.msk.msra.mxu0 %vm7737_vm12, %v8509_v8 }
 0x6db   : > { %v8531_v37 = vpop.permute.xlu1 %8530  ;;  %13713 = vmatprep.subr.bf16.mxu0 %v17581_v38 }
 0x6dc   : > { %v8529_v60 = vpop.permute.xlu0 %8528 }
 0x6dd   : > { %v8536_v20 = vsel %vm843_vm8, %v8527_v0, %v8529_v60  ;;  %13060 = vmatmul.mubr.msk.f32.vlgmr.msra.gmra.mrb[32].mxu0 %vm7724_vm15, %v8535_v9 }
 0x6de   : > { %13062 = vmatprep.mubr.msk.f32.mxu0 %vm7724_vm15, %v8536_v20  ;;  %13715 = vmatpush3.bf16.msra.mxu0 %v17581_v38 }
 0x6df   : > { %v8687_v27 = vpop.permute.xlu1 %8686  ;;  %13069 = vmatprep.subr.msk.mxu0 %vm7737_vm12, %v8681_v30 }
 0x6e0   : > { %v8533_v24 = vpop.permute.xlu0 %8532 }
 0x6e1   : > { %v8537_v18 = vsel %vm843_vm8, %v8531_v37, %v8533_v24  ;;  %vm7826_vm8 = vcmask 72704  }
 0x6e2   : > { %13063 = vmatmul.mubr.msk.f32.gmra.mrb[34].mxu0 %vm7724_vm15, %v8537_v18 }
 0x6e3   : > { %v8691_v39 = vpop.permute.xlu1 %8690  ;;  %13071 = vmatprep.mubr.msk.f32.mxu0 %vm7724_vm15, %v8687_v27  ;;  %13070 = vmatpush3.msk.msra.mxu0 %vm7737_vm12, %v8681_v30 }
 0x6e4   : > { %v8689_v22 = vpop.permute.xlu0 %8688  ;;  %13717 = vmatprep.subr.bf16.mxu0 %v17581_v38 }
 0x6e6   : > { %13072 = vmatmul.mubr.msk.f32.vlgmr.msra.gmra.mrb[36].mxu0 %vm7724_vm15, %v8689_v22 }
 0x6e7   : > { %v8843_v56 = vpop.permute.xlu1 %8842  ;;  %13074 = vmatprep.mubr.msk.f32.mxu0 %vm7724_vm15, %v8691_v39  ;;  %13719 = vmatpush3.bf16.msra.mxu0 %v17581_v38 }
 0x6e8   : > { %v8693_v41 = vpop.permute.xlu0 %8692  ;;  %13081 = vmatprep.subr.msk.mxu0 %vm7737_vm12, %v8837_v23 }
 0x6ea   : > { %13075 = vmatmul.mubr.msk.f32.gmra.mrb[38].mxu0 %vm7724_vm15, %v8693_v41 }
 0x6eb   : > { %v8847_v61 = vpop.permute.xlu1 %8846  ;;  %13083 = vmatprep.mubr.msk.f32.mxu0 %vm7724_vm15, %v8843_v56  ;;  %13082 = vmatpush3.msk.msra.mxu0 %vm7737_vm12, %v8837_v23 }
 0x6ec   : > { %v8845_v59 = vpop.permute.xlu0 %8844  ;;  %13721 = vmatprep.subr.bf16.mxu0 %v17581_v38 }
 0x6ee   : > { %13084 = vmatmul.mubr.msk.f32.vlgmr.msra.gmra.mrb[40].mxu0 %vm7724_vm15, %v8845_v59 }
 0x6ef   : > { %v8976_v45 = vpop.permute.xlu1 %8975  ;;  %13086 = vmatprep.mubr.msk.f32.mxu0 %vm7724_vm15, %v8847_v61  ;;  %13723 = vmatpush3.bf16.msra.mxu0 %v17581_v38 }
 0x6f0   : > { %v8987_v28 = vadd.f32 %v8976_v45, %v17720_v16  ;;  %v8849_v29 = vpop.permute.xlu0 %8848  ;;  %13093 = vmatprep.subr.msk.mxu0 %vm7737_vm12, %v8993_v19 }
 0x6f2   : > { %13087 = vmatmul.mubr.msk.f32.gmra.mrb[42].mxu0 %vm7724_vm15, %v8849_v29 }
 0x6f3   : > { %v8980_v55 = vpop.permute.xlu1 %8979  ;;  %13095 = vmatprep.mubr.msk.f32.mxu0 %vm7724_vm15, %v8987_v28  ;;  %13094 = vmatpush3.msk.msra.mxu0 %vm7737_vm12, %v8993_v19  ;;  %vm10512_vm12 = vcmask 1042432  }
 0x6f4   : > { %v8978_v48 = vpop.permute.xlu0 %8977  ;;  %v8989_v54 = vadd.f32 %v8980_v55, %v17725_v5 }
 0x6f5   : > { %v8988_v34 = vadd.f32 %v8978_v48, %v17729_v10 }
 0x6f7   : > { %13096 = vmatmul.mubr.msk.f32.vlgmr.msra.gmra.mrb[44].mxu0 %vm7724_vm15, %v8988_v34 }
 0x6f8   : > { %13098 = vmatprep.mubr.msk.f32.mxu0 %vm7724_vm15, %v8989_v54  ;;  %v8982_v38 = vpop.permute.xlu0 %8981 }
 0x6f9   : > { %v8990_v42 = vadd.f32 %v8982_v38, %v17733_v21 }
 0x6fb   : > { %13099 = vmatmul.mubr.msk.f32.gmra.mrb[46].mxu0 %vm7724_vm15, %v8990_v42  ;;  %vm10502_vm15 = vcmask 23552  }
 0x729   : > { %v13001_v49 = vpop.f32.mrb[12].mxu0 }
 0x72a   : > { %7828 = vst.msk [vmem:[#allocation5 + $0x8] sm:$0xff] %vm7826_vm8, %v13001_v49  ;;  %v7807_v43 = vpop.f32.mrb[13].mxu0 }
 0x72b   : > { %7827 = vst.msk [vmem:[#allocation5] sm:$0xff] %vm7826_vm8, %v7807_v43 }
 0x73d   : > { %v13004_v53 = vpop.f32.mrb[14].mxu0 }
 0x73e   : > { %7830 = vst.msk [vmem:[#allocation5 + $0x18] sm:$0xff] %vm7826_vm8, %v13004_v53  ;;  %v7817_v63 = vpop.f32.mrb[15].mxu0 }
 0x73f   : > { %7829 = vst.msk [vmem:[#allocation5 + $0x10] sm:$0xff] %vm7826_vm8, %v7817_v63 }
 0x778   : > { %v13013_v13 = vpop.f32.mrb[16].mxu0 }
 0x779   : > { %v7947_v52 = vpop.f32.mrb[17].mxu0  ;;  %7972 = vrot.lane.b32.xlu0 %v13013_v13, %s14984_s16 }
 0x77a   : > { %7970 = vrot.lane.b32.xlu1 %v7947_v52, %s14984_s16 }
 0x78c   : > { %v13016_v33 = vpop.f32.mrb[18].mxu0 }
 0x78d   : > { %v7957_v31 = vpop.f32.mrb[19].mxu0  ;;  %7976 = vrot.lane.b32.xlu0 %v13016_v33, %s14984_s16  ;;  %v9129_v33 = vld [vmem:[#allocation8 + $0x20] sm:$0xff] }
 0x78e   : > { %7974 = vrot.lane.b32.xlu1 %v7957_v31, %s14984_s16  ;;  %13109 = vmatprep.mubr.msk.f32.mxu0 %vm5266_vm3, %v9129_v33  ;;  %s14994_s16 = smov 98   ;;  %v9465_v33 = vld [vmem:[#allocation8 + $0x78] sm:$0xff] }
 0x790   : > { %v13025_v16 = vpop.f32.mrb[20].mxu0 }
 0x791   : > { %v8123_v5 = vpop.f32.mrb[21].mxu0  ;;  %8148 = vrot.lane.b32.xlu0 %v13025_v16, %s14985_s26 }
 0x792   : > { %8146 = vrot.lane.b32.xlu1 %v8123_v5, %s14985_s26 }
 0x79c   : > { %v13028_v10 = vpop.f32.mrb[22].mxu0 }
 0x79d   : > { %v8133_v21 = vpop.f32.mrb[23].mxu0  ;;  %8152 = vrot.lane.b32.xlu0 %v13028_v10, %s14985_s26 }
 0x79e   : > { %8150 = vrot.lane.b32.xlu1 %v8133_v21, %s14985_s26  ;;  %s14995_s26 = smov 95  }
 0x7a0   : > { %v13037_v14 = vpop.f32.mrb[24].mxu0 }
 0x7a1   : > { %v8279_v7 = vpop.f32.mrb[25].mxu0  ;;  %8304 = vrot.lane.b32.xlu0 %v13037_v14, %s14986_s20 }
 0x7a2   : > { %8302 = vrot.lane.b32.xlu1 %v8279_v7, %s14986_s20 }
 0x7a4   : > { %v13040_v35 = vpop.f32.mrb[26].mxu0 }
 0x7a5   : > { %v8289_v2 = vpop.f32.mrb[27].mxu0  ;;  %8308 = vrot.lane.b32.xlu0 %v13040_v35, %s14986_s20  ;;  %v10169_v35 = vld [vmem:[%s18377_s6] sm:$0xff] }
 0x7a6   : > { %8306 = vrot.lane.b32.xlu1 %v8289_v2, %s14986_s20  ;;  %s14996_s20 = smov 74   ;;  %v10171_v2 = vld [vmem:[%s18377_s6 + $0x10] sm:$0xff] }
 0x7a8   : > { %v13049_v58 = vpop.f32.mrb[28].mxu0 }
 0x7a9   : > { %v8435_v40 = vpop.f32.mrb[29].mxu0  ;;  %8460 = vrot.lane.b32.xlu0 %v13049_v58, %s14987_s18  ;;  %v10170_v58 = vld [vmem:[%s18377_s6 + $0x8] sm:$0xff] }
 0x7aa   : > { %8458 = vrot.lane.b32.xlu1 %v8435_v40, %s14987_s18  ;;  %v10212_v40 = vld [vmem:[%s18379_s8] sm:$0xff] }
 0x7ac   : > { %v13052_v62 = vpop.f32.mrb[30].mxu0 }
 0x7ad   : > { %v8445_v36 = vpop.f32.mrb[31].mxu0  ;;  %8464 = vrot.lane.b32.xlu0 %v13052_v62, %s14987_s18  ;;  %v10172_v62 = vld [vmem:[%s18377_s6 + $0x18] sm:$0xff] }
 0x7ae   : > { %8462 = vrot.lane.b32.xlu1 %v8445_v36, %s14987_s18  ;;  %s14997_s18 = smov 71  }
 0x7b0   : > { %v13061_v46 = vpop.f32.mrb[32].mxu0 }
 0x7b1   : > { %v8615_v50 = vpop.f32.mrb[33].mxu0  ;;  %8640 = vrot.lane.b32.xlu0 %v13061_v46, %s14988_s17 }
 0x7b2   : > { %8638 = vrot.lane.b32.xlu1 %v8615_v50, %s14988_s17 }
 0x7b5   : > { %v13064_v3 = vpop.f32.mrb[34].mxu0 }
 0x7b6   : > { %v8625_v4 = vpop.f32.mrb[35].mxu0  ;;  %8644 = vrot.lane.b32.xlu0 %v13064_v3, %s14988_s17 }
 0x7b7   : > { %8642 = vrot.lane.b32.xlu1 %v8625_v4, %s14988_s17  ;;  %s14998_s17 = smov 68  }
 0x7b9   : > { %v13073_v57 = vpop.f32.mrb[36].mxu0 }
 0x7ba   : > { %v8771_v1 = vpop.f32.mrb[37].mxu0  ;;  %8796 = vrot.lane.b32.xlu0 %v13073_v57, %s14989_s28 }
 0x7bb   : > { %8794 = vrot.lane.b32.xlu1 %v8771_v1, %s14989_s28 }
 0x7bd   : > { %v13076_v6 = vpop.f32.mrb[38].mxu0 }
 0x7be   : > { %v8781_v25 = vpop.f32.mrb[39].mxu0  ;;  %8800 = vrot.lane.b32.xlu0 %v13076_v6, %s14989_s28 }
 0x7bf   : > { %8798 = vrot.lane.b32.xlu1 %v8781_v25, %s14989_s28 }
 0x7c1   : > { %v13085_v32 = vpop.f32.mrb[40].mxu0 }
 0x7c2   : > { %v8927_v47 = vpop.f32.mrb[41].mxu0  ;;  %8952 = vrot.lane.b32.xlu0 %v13085_v32, %s14990_s23  ;;  %v9130_v32 = vld [vmem:[#allocation8 + $0x28] sm:$0xff] }
 0x7c3   : > { %8950 = vrot.lane.b32.xlu1 %v8927_v47, %s14990_s23 }
 0x7c5   : > { %v13088_v11 = vpop.f32.mrb[42].mxu0 }
 0x7c6   : > { %v8937_v12 = vpop.f32.mrb[43].mxu0  ;;  %8956 = vrot.lane.b32.xlu0 %v13088_v11, %s14990_s23 }
 0x7c7   : > { %8954 = vrot.lane.b32.xlu1 %v8937_v12, %s14990_s23  ;;  %v9131_v12 = vld [vmem:[#allocation8 + $0x30] sm:$0xff] }
 0x7ca   : > { %v13097_v17 = vpop.f32.mrb[44].mxu0 }
 0x7cb   : > { %v9075_v15 = vpop.f32.mrb[45].mxu0  ;;  %9100 = vrot.lane.b32.xlu0 %v13097_v17, %s18415_s30 }
 0x7cc   : > { %9098 = vrot.lane.b32.xlu1 %v9075_v15, %s18415_s30  ;;  %v9132_v15 = vld [vmem:[#allocation8 + $0x38] sm:$0xff] }
 0x7ce   : > { %v13100_v8 = vpop.f32.mrb[46].mxu0 }
 0x7cf   : > { %9104 = vrot.lane.b32.xlu0 %v13100_v8, %s18415_s30  ;;  %v9085_v0 = vpop.f32.mrb[47].mxu0 }
 0x7d0   : > { %9102 = vrot.lane.b32.xlu1 %v9085_v0, %s18415_s30  ;;  %s15003_s30 = smov [#allocation11]  }
 0x7eb   : > { %v7973_v26 = vpop.permute.xlu0 %7972 }
 0x7ec   : > { %7984 = vst.msk [vmem:[#allocation5 + $0x8] sm:$0xff] %vm7982_vm13, %v7973_v26  ;;  %v7971_v51 = vpop.permute.xlu1 %7970 }
 0x7ed   : > { %7983 = vst.msk [vmem:[#allocation5] sm:$0xff] %vm7982_vm13, %v7971_v51  ;;  %v9124_v51 = vld [vmem:[#allocation8] sm:$0xff] }
 0x7ff   : > { %v7977_v37 = vpop.permute.xlu0 %7976 }
 0x800   : > { %7986 = vst.msk [vmem:[#allocation5 + $0x18] sm:$0xff] %vm7982_vm13, %v7977_v37  ;;  %v7975_v9 = vpop.permute.xlu1 %7974 }
 0x801   : > { %7985 = vst.msk [vmem:[#allocation5 + $0x10] sm:$0xff] %vm7982_vm13, %v7975_v9  ;;  %v9125_v9 = vld [vmem:[#allocation8 + $0x8] sm:$0xff] }
 0x803   : > { %v8149_v60 = vpop.permute.xlu0 %8148 }
 0x804   : > { %8160 = vst.msk [vmem:[#allocation5 + $0x8] sm:$0xff] %vm8158_vm7, %v8149_v60  ;;  %v8147_v30 = vpop.permute.xlu1 %8146 }
 0x805   : > { %8159 = vst.msk [vmem:[#allocation5] sm:$0xff] %vm8158_vm7, %v8147_v30 }
 0x80f   : > { %v8153_v20 = vpop.permute.xlu0 %8152 }
 0x810   : > { %8162 = vst.msk [vmem:[#allocation5 + $0x18] sm:$0xff] %vm8158_vm7, %v8153_v20  ;;  %v8151_v27 = vpop.permute.xlu1 %8150 }
 0x811   : > { %8161 = vst.msk [vmem:[#allocation5 + $0x10] sm:$0xff] %vm8158_vm7, %v8151_v27  ;;  %v9126_v27 = vld [vmem:[#allocation8 + $0x10] sm:$0xff] }
 0x813   : > { %v8305_v24 = vpop.permute.xlu0 %8304 }
 0x814   : > { %8316 = vst.msk [vmem:[#allocation5 + $0x8] sm:$0xff] %vm8314_vm10, %v8305_v24  ;;  %v8303_v18 = vpop.permute.xlu1 %8302 }
 0x815   : > { %8315 = vst.msk [vmem:[#allocation5] sm:$0xff] %vm8314_vm10, %v8303_v18  ;;  %v9127_v18 = vld [vmem:[#allocation8 + $0x18] sm:$0xff] }
 0x817   : > { %v8309_v39 = vpop.permute.xlu0 %8308 }
 0x818   : > { %8318 = vst.msk [vmem:[#allocation5 + $0x18] sm:$0xff] %vm8314_vm10, %v8309_v39  ;;  %v8307_v22 = vpop.permute.xlu1 %8306 }
 0x819   : > { %8317 = vst.msk [vmem:[#allocation5 + $0x10] sm:$0xff] %vm8314_vm10, %v8307_v22 }
 0x81b   : > { %v8461_v23 = vpop.permute.xlu0 %8460 }
 0x81c   : > { %8472 = vst.msk [vmem:[#allocation5 + $0x8] sm:$0xff] %vm8470_vm0, %v8461_v23  ;;  %v8459_v56 = vpop.permute.xlu1 %8458 }
 0x81d   : > { %8471 = vst.msk [vmem:[#allocation5] sm:$0xff] %vm8470_vm0, %v8459_v56  ;;  %v9344_v56 = vld [vmem:[#allocation8 + $0x40] sm:$0xff] }
 0x81f   : > { %v8465_v41 = vpop.permute.xlu0 %8464 }
 0x820   : > { %8474 = vst.msk [vmem:[#allocation5 + $0x18] sm:$0xff] %vm8470_vm0, %v8465_v41  ;;  %v8463_v61 = vpop.permute.xlu1 %8462 }
 0x821   : > { %8473 = vst.msk [vmem:[#allocation5 + $0x10] sm:$0xff] %vm8470_vm0, %v8463_v61  ;;  %v9345_v61 = vld [vmem:[#allocation8 + $0x48] sm:$0xff] }
 0x823   : > { %v8641_v59 = vpop.permute.xlu0 %8640 }
 0x824   : > { %8652 = vst.msk [vmem:[#allocation5 + $0x8] sm:$0xff] %vm8650_vm1, %v8641_v59  ;;  %v8639_v19 = vpop.permute.xlu1 %8638 }
 0x825   : > { %8651 = vst.msk [vmem:[#allocation5] sm:$0xff] %vm8650_vm1, %v8639_v19 }
 0x828   : > { %v8645_v45 = vpop.permute.xlu0 %8644 }
 0x829   : > { %8654 = vst.msk [vmem:[#allocation5 + $0x18] sm:$0xff] %vm8650_vm1, %v8645_v45  ;;  %v8643_v28 = vpop.permute.xlu1 %8642 }
 0x82a   : > { %8653 = vst.msk [vmem:[#allocation5 + $0x10] sm:$0xff] %vm8650_vm1, %v8643_v28  ;;  %v9346_v28 = vld [vmem:[#allocation8 + $0x50] sm:$0xff] }
 0x82c   : > { %v8797_v29 = vpop.permute.xlu0 %8796 }
 0x82d   : > { %8808 = vst.msk [vmem:[#allocation5 + $0x8] sm:$0xff] %vm8806_vm2, %v8797_v29  ;;  %v8795_v55 = vpop.permute.xlu1 %8794 }
 0x82e   : > { %8807 = vst.msk [vmem:[#allocation5] sm:$0xff] %vm8806_vm2, %v8795_v55  ;;  %v9347_v55 = vld [vmem:[#allocation8 + $0x58] sm:$0xff] }
 0x830   : > { %v8801_v48 = vpop.permute.xlu0 %8800 }
 0x831   : > { %8810 = vst.msk [vmem:[#allocation5 + $0x18] sm:$0xff] %vm8806_vm2, %v8801_v48  ;;  %v8799_v34 = vpop.permute.xlu1 %8798 }
 0x832   : > { %8809 = vst.msk [vmem:[#allocation5 + $0x10] sm:$0xff] %vm8806_vm2, %v8799_v34 }
 0x834   : > { %v8953_v54 = vpop.permute.xlu0 %8952 }
 0x835   : > { %8964 = vst.msk [vmem:[#allocation5 + $0x8] sm:$0xff] %vm8962_vm4, %v8953_v54  ;;  %v8951_v38 = vpop.permute.xlu1 %8950 }
 0x836   : > { %8963 = vst.msk [vmem:[#allocation5] sm:$0xff] %vm8962_vm4, %v8951_v38  ;;  %v9462_v38 = vld [vmem:[#allocation8 + $0x60] sm:$0xff] }
 0x838   : > { %v8957_v42 = vpop.permute.xlu0 %8956 }
 0x839   : > { %8966 = vst.msk [vmem:[#allocation5 + $0x18] sm:$0xff] %vm8962_vm4, %v8957_v42  ;;  %v8955_v49 = vpop.permute.xlu1 %8954 }
 0x83a   : > { %8965 = vst.msk [vmem:[#allocation5 + $0x10] sm:$0xff] %vm8962_vm4, %v8955_v49  ;;  %v9463_v49 = vld [vmem:[#allocation8 + $0x68] sm:$0xff] }
 0x83d   : > { %v9101_v43 = vpop.permute.xlu0 %9100 }
 0x83e   : > { %9112 = vst.msk [vmem:[#allocation5 + $0x8] sm:$0xff] %vm9110_vm5, %v9101_v43  ;;  %v9099_v53 = vpop.permute.xlu1 %9098 }
 0x83f   : > { %9117 = vst.msk [vmem:[#allocation5 + $0x8] sm:$0xff] %vm9115_vm6, %v14972_v44 }
 0x840   : > { %9111 = vst.msk [vmem:[#allocation5] sm:$0xff] %vm9110_vm5, %v9099_v53 }
 0x841   : > { %9116 = vst.msk [vmem:[#allocation5] sm:$0xff] %vm9115_vm6, %v14972_v44  ;;  %v9105_v63 = vpop.permute.xlu0 %9104 }
 0x842   : > { %9114 = vst.msk [vmem:[#allocation5 + $0x18] sm:$0xff] %vm9110_vm5, %v9105_v63  ;;  %v9103_v13 = vpop.permute.xlu1 %9102 }
 0x843   : > { %9119 = vst.msk [vmem:[#allocation5 + $0x18] sm:$0xff] %vm9115_vm6, %v14972_v44 }
 0x844   : > { %9113 = vst.msk [vmem:[#allocation5 + $0x10] sm:$0xff] %vm9110_vm5, %v9103_v13  ;;  %v9464_v13 = vld [vmem:[#allocation8 + $0x70] sm:$0xff] }
 0x845   : > { %9118 = vst.msk [vmem:[#allocation5 + $0x10] sm:$0xff] %vm9115_vm6, %v14972_v44 }
 0x846   : > { %v9121_v52 = vld [vmem:[#allocation5 + $0x8] sm:$0xff] }
 0x848   : > { %v9120_v31 = vld [vmem:[#allocation5] sm:$0xff] }
 0x849   : > { %v14778_v16 = vpack.i.bf16 %v9121_v52, %v9120_v31  ;;  %v13732_v10 = vpack.c.bf16 %v9121_v52, %v9120_v31 }
 0x84a   : > { %v9123_v5 = vld [vmem:[#allocation5 + $0x18] sm:$0xff] }
 0x84b   : > { %14779 = vrot.lane.b32.xlu1 %v14778_v16, %s14991_s29 }
 0x84c   : > { %v9122_v21 = vld [vmem:[#allocation5 + $0x10] sm:$0xff] }
 0x84d   : > { %v14783_v14 = vpack.i.bf16 %v9123_v5, %v9122_v21  ;;  %v13736_v7 = vpack.c.bf16 %v9123_v5, %v9122_v21 }
 0x84f   : > { %14789 = vrot.lane.b32.xlu1 %v14778_v16, %s14992_s19  ;;  %14784 = vrot.lane.b32.xlu0 %v14783_v14, %s14991_s29  ;;  %s15001_s29 = smov 110  }
 0x853   : > { %14799 = vrot.lane.b32.xlu1 %v14778_v16, %s14993_s15  ;;  %14794 = vrot.lane.b32.xlu0 %v14783_v14, %s14992_s19  ;;  %s15002_s19 = smov 119  }
 0x857   : > { %14809 = vrot.lane.b32.xlu1 %v14778_v16, %s14994_s16  ;;  %14804 = vrot.lane.b32.xlu0 %v14783_v14, %s14993_s15  ;;  %s14890_s15 = sshll.u32 %s15003_s30, 4  ;;  %s14891_s15 = int_to_ptr.vmem [resolvable:$false] %s14890_s15 }
 0x85b   : > { %14819 = vrot.lane.b32.xlu1 %v14778_v16, %s14995_s26  ;;  %14814 = vrot.lane.b32.xlu0 %v14783_v14, %s14994_s16 }
 0x85f   : > { %14829 = vrot.lane.b32.xlu1 %v14778_v16, %s14996_s20  ;;  %14824 = vrot.lane.b32.xlu0 %v14783_v14, %s14995_s26  ;;  %s14126_s26 = smul.u32 3456, %s15091_s25 }
 0x861   : > { %s18323_s28 = scalar_lea.hbm %s18383_s12, %s14126_s26 }
 0x863   : > { %14839 = vrot.lane.b32.xlu1 %v14778_v16, %s14997_s18  ;;  %14834 = vrot.lane.b32.xlu0 %v14783_v14, %s14996_s20 }
 0x867   : > { %14849 = vrot.lane.b32.xlu1 %v14778_v16, %s14998_s17  ;;  %14844 = vrot.lane.b32.xlu0 %v14783_v14, %s14997_s18 }
 0x86b   : > { %10175 = vperm.xlu1 %14427, %v10169_v35   ;;  %14854 = vrot.lane.b32.xlu0 %v14783_v14, %s14998_s17  ;;  %v9581_v14 = vld [vmem:[#allocation8 + $0x88] sm:$0xff] }
 0x86f   : > { %10185 = vperm.xlu1 %14427, %v10171_v2   ;;  %10180 = vperm.xlu0 %14426, %v10170_v58   ;;  %v9582_v58 = vld [vmem:[#allocation8 + $0x90] sm:$0xff] }
 0x873   : > { %10216 = vperm.xlu1 %14427, %v10212_v40   ;;  %10190 = vperm.xlu0 %14426, %v10172_v62   ;;  %v9583_v62 = vld [vmem:[#allocation8 + $0x98] sm:$0xff] }
 0x8bd   : > { %v14780_v36 = vpop.permute.xlu1 %14779 }
 0x8be   : > { %v14782_v46 = vunpack.i.h.bf16 %v14780_v36  ;;  %v14781_v50 = vunpack.i.l.bf16 %v14780_v36 }
 0x8c0   : > { %v13724_v3 = vpack.c.bf16 %v14782_v46, %v14781_v50 }
 0x8c1   : > { %v14785_v4 = vpop.permute.xlu0 %14784  ;;  %v14790_v25 = vpop.permute.xlu1 %14789 }
 0x8c2   : > { %v14787_v57 = vunpack.i.h.bf16 %v14785_v4  ;;  %v14786_v1 = vunpack.i.l.bf16 %v14785_v4  ;;  %13725 = vmatprep.subr.bf16.mxu0 %v13724_v3  ;;  %v14792_v47 = vunpack.i.h.bf16 %v14790_v25  ;;  %v14791_v11 = vunpack.i.l.bf16 %v14790_v25 }
 0x8c3   : > { %13727 = vmatpush3.bf16.msra.mxu0 %v13724_v3  ;;  %v9698_v3 = vld [vmem:[#allocation8 + $0xa0] sm:$0xff] }
 0x8c4   : > { %v13728_v6 = vpack.c.bf16 %v14787_v57, %v14786_v1  ;;  %v13740_v8 = vpack.c.bf16 %v14792_v47, %v14791_v11  ;;  %v9699_v57 = vld [vmem:[#allocation8 + $0xa8] sm:$0xff]  ;;  %v9701_v11 = vld [vmem:[#allocation8 + $0xb8] sm:$0xff] }
 0x8c5   : > { %v14795_v17 = vpop.permute.xlu0 %14794  ;;  %v14800_v37 = vpop.permute.xlu1 %14799 }
 0x8c6   : > { %13729 = vmatprep.subr.bf16.mxu0 %v13728_v6  ;;  %v14797_v0 = vunpack.i.h.bf16 %v14795_v17  ;;  %v14796_v26 = vunpack.i.l.bf16 %v14795_v17  ;;  %v14802_v30 = vunpack.i.h.bf16 %v14800_v37  ;;  %v14801_v20 = vunpack.i.l.bf16 %v14800_v37 }
 0x8c7   : > { %13731 = vmatpush3.bf16.msra.mxu0 %v13728_v6 }
 0x8c8   : > { %13733 = vmatprep.subr.bf16.mxu0 %v13732_v10  ;;  %v13744_v60 = vpack.c.bf16 %v14797_v0, %v14796_v26  ;;  %v13748_v39 = vpack.c.bf16 %v14802_v30, %v14801_v20  ;;  %v9817_v26 = vld [vmem:[#allocation8 + $0xc8] sm:$0xff]  ;;  %v9819_v20 = vld [vmem:[#allocation8 + $0xd8] sm:$0xff] }
 0x8c9   : > { %v14805_v24 = vpop.permute.xlu0 %14804  ;;  %v14810_v41 = vpop.permute.xlu1 %14809 }
 0x8ca   : > { %13110 = vmatmul.mubr.msk.f32.vlgmr.msra.gmra.mrb[48].mxu0 %vm5266_vm3, %v9130_v32  ;;  %v14807_v22 = vunpack.i.h.bf16 %v14805_v24  ;;  %v14806_v23 = vunpack.i.l.bf16 %v14805_v24  ;;  %v14812_v59 = vunpack.i.h.bf16 %v14810_v41  ;;  %v14811_v19 = vunpack.i.l.bf16 %v14810_v41  ;;  %v9700_v32 = vld [vmem:[#allocation8 + $0xb0] sm:$0xff]  ;;  %v9937_v41 = vld [vmem:[#allocation8 + $0xf8] sm:$0xff] }
 0x8cb   : > { %13735 = vmatpush3.bf16.msra.mxu0 %v13732_v10  ;;  %13112 = vmatprep.mubr.msk.f32.mxu0 %vm5266_vm3, %v9131_v12  ;;  %v9580_v10 = vld [vmem:[#allocation8 + $0x80] sm:$0xff] }
 0x8cc   : > { %13737 = vmatprep.subr.bf16.mxu0 %v13736_v7  ;;  %v13752_v45 = vpack.c.bf16 %v14807_v22, %v14806_v23  ;;  %v13756_v48 = vpack.c.bf16 %v14812_v59, %v14811_v19  ;;  %v9935_v22 = vld [vmem:[#allocation8 + $0xe8] sm:$0xff]  ;;  %v10054_v19 = vld [vmem:[#allocation8 + $0x110] sm:$0xff] }
 0x8cd   : > { %v14815_v29 = vpop.permute.xlu0 %14814  ;;  %v14820_v42 = vpop.permute.xlu1 %14819  ;;  %v10053_v59 = vld [vmem:[#allocation8 + $0x108] sm:$0xff] }
 0x8ce   : > { %13113 = vmatmul.mubr.msk.f32.gmra.mrb[50].mxu0 %vm5266_vm3, %v9132_v15  ;;  %v14817_v34 = vunpack.i.h.bf16 %v14815_v29  ;;  %v14816_v54 = vunpack.i.l.bf16 %v14815_v29  ;;  %v14822_v43 = vunpack.i.h.bf16 %v14820_v42  ;;  %v14821_v53 = vunpack.i.l.bf16 %v14820_v42 }
 0x8cf   : > { %13739 = vmatpush3.bf16.msra.mxu0 %v13736_v7  ;;  %13123 = vmatprep.mubr.msk.f32.mxu0 %vm5266_vm3, %v9124_v51 }
 0x8d0   : > { %13741 = vmatprep.subr.bf16.mxu0 %v13740_v8  ;;  %v13760_v63 = vpack.c.bf16 %v14817_v34, %v14816_v54  ;;  %v13764_v31 = vpack.c.bf16 %v14822_v43, %v14821_v53 }
 0x8d1   : > { %v14825_v52 = vpop.permute.xlu0 %14824  ;;  %v14830_v21 = vpop.permute.xlu1 %14829 }
 0x8d2   : > { %13124 = vmatmul.mubr.msk.f32.vlgmr.msra.gmra.mrb[48].mxu0 %vm5266_vm3, %v9125_v9  ;;  %v14827_v16 = vunpack.i.h.bf16 %v14825_v52  ;;  %v14826_v5 = vunpack.i.l.bf16 %v14825_v52  ;;  %v14832_v7 = vunpack.i.h.bf16 %v14830_v21  ;;  %v14831_v35 = vunpack.i.l.bf16 %v14830_v21 }
 0x8d3   : > { %13743 = vmatpush3.bf16.msra.mxu0 %v13740_v8  ;;  %13126 = vmatprep.mubr.msk.f32.mxu0 %vm5266_vm3, %v9126_v27  ;;  %v9816_v8 = vld [vmem:[#allocation8 + $0xc0] sm:$0xff] }
 0x8d4   : > { %13745 = vmatprep.subr.bf16.mxu0 %v13744_v60  ;;  %v13768_v2 = vpack.c.bf16 %v14827_v16, %v14826_v5  ;;  %v13772_v36 = vpack.c.bf16 %v14832_v7, %v14831_v35 }
 0x8d5   : > { %v14835_v40 = vpop.permute.xlu0 %14834  ;;  %v14840_v4 = vpop.permute.xlu1 %14839 }
 0x8d6   : > { %13127 = vmatmul.mubr.msk.f32.gmra.mrb[50].mxu0 %vm5266_vm3, %v9127_v18  ;;  %v14837_v46 = vunpack.i.h.bf16 %v14835_v40  ;;  %v14836_v50 = vunpack.i.l.bf16 %v14835_v40  ;;  %v14842_v1 = vunpack.i.h.bf16 %v14840_v4  ;;  %v14841_v6 = vunpack.i.l.bf16 %v14840_v4 }
 0x8d7   : > { %13747 = vmatpush3.bf16.msra.mxu0 %v13744_v60  ;;  %13137 = vmatprep.mubr.msk.f32.mxu0 %vm5266_vm3, %v9344_v56  ;;  %v9818_v60 = vld [vmem:[#allocation8 + $0xd0] sm:$0xff] }
 0x8d8   : > { %13749 = vmatprep.subr.bf16.mxu0 %v13748_v39  ;;  %v13776_v25 = vpack.c.bf16 %v14837_v46, %v14836_v50  ;;  %v13780_v12 = vpack.c.bf16 %v14842_v1, %v14841_v6  ;;  %v9936_v56 = vld [vmem:[#allocation8 + $0xf0] sm:$0xff] }
 0x8d9   : > { %v14845_v47 = vpop.permute.xlu0 %14844  ;;  %v14850_v0 = vpop.permute.xlu1 %14849 }
 0x8da   : > { %13138 = vmatmul.mubr.msk.f32.vlgmr.msra.gmra.mrb[48].mxu0 %vm5266_vm3, %v9345_v61  ;;  %v14847_v17 = vunpack.i.h.bf16 %v14845_v47  ;;  %v14846_v15 = vunpack.i.l.bf16 %v14845_v47  ;;  %v14852_v51 = vunpack.i.h.bf16 %v14850_v0  ;;  %v14851_v37 = vunpack.i.l.bf16 %v14850_v0  ;;  %v10052_v61 = vld [vmem:[#allocation8 + $0x100] sm:$0xff] }
 0x8db   : > { %13751 = vmatpush3.bf16.msra.mxu0 %v13748_v39  ;;  %13140 = vmatprep.mubr.msk.f32.mxu0 %vm5266_vm3, %v9346_v28  ;;  %v9934_v39 = vld [vmem:[#allocation8 + $0xe0] sm:$0xff]  ;;  %v10206_v28 = vld [vmem:[%s18378_s7] sm:$0xff] }
 0x8dc   : > { %13753 = vmatprep.subr.bf16.mxu0 %v13752_v45  ;;  %v13784_v9 = vpack.c.bf16 %v14847_v17, %v14846_v15  ;;  %v13788_v27 = vpack.c.bf16 %v14852_v51, %v14851_v37 }
 0x8dd   : > { %v14855_v30 = vpop.permute.xlu0 %14854 }
 0x8de   : > { %13141 = vmatmul.mubr.msk.f32.gmra.mrb[50].mxu0 %vm5266_vm3, %v9347_v55  ;;  %v14857_v24 = vunpack.i.h.bf16 %v14855_v30  ;;  %v14856_v18 = vunpack.i.l.bf16 %v14855_v30 }
 0x8df   : > { %13755 = vmatpush3.bf16.msra.mxu0 %v13752_v45  ;;  %13151 = vmatprep.mubr.msk.f32.mxu0 %vm5266_vm3, %v9462_v38  ;;  %v10055_v45 = vld [vmem:[#allocation8 + $0x118] sm:$0xff] }
 0x8e0   : > { %13757 = vmatprep.subr.bf16.mxu0 %v13756_v48  ;;  %v13792_v23 = vpack.c.bf16 %v14857_v24, %v14856_v18 }
 0x8e2   : > { %13152 = vmatmul.mubr.msk.f32.vlgmr.msra.gmra.mrb[48].mxu0 %vm5266_vm3, %v9463_v49 }
 0x8e3   : > { %13759 = vmatpush3.bf16.msra.mxu0 %v13756_v48  ;;  %13154 = vmatprep.mubr.msk.f32.mxu0 %vm5266_vm3, %v9464_v13 }
 0x8e4   : > { %13761 = vmatprep.subr.bf16.mxu0 %v13760_v63 }
 0x8e6   : > { %13155 = vmatmul.mubr.msk.f32.gmra.mrb[50].mxu0 %vm5266_vm3, %v9465_v33 }
 0x8e7   : > { %13763 = vmatpush3.bf16.msra.mxu0 %v13760_v63  ;;  %13165 = vmatprep.mubr.msk.f32.mxu0 %vm5266_vm3, %v9580_v10 }
 0x8e8   : > { %13765 = vmatprep.subr.bf16.mxu0 %v13764_v31 }
 0x8ea   : > { %13166 = vmatmul.mubr.msk.f32.vlgmr.msra.gmra.mrb[48].mxu0 %vm5266_vm3, %v9581_v14  ;;  %v10176_v55 = vpop.permute.xlu1 %10175 }
 0x8eb   : > { %13767 = vmatpush3.bf16.msra.mxu0 %v13764_v31  ;;  %13168 = vmatprep.mubr.msk.f32.mxu0 %vm5266_vm3, %v9582_v58  ;;  %v14999_v58 = vmov 1966171168  }
 0x8ec   : > { %13769 = vmatprep.subr.bf16.mxu0 %v13768_v2  ;;  %v10309_v40 = vunpack.c.l.s4 %v14999_v58 }
 0x8ee   : > { %13169 = vmatmul.mubr.msk.f32.gmra.mrb[50].mxu0 %vm5266_vm3, %v9583_v62  ;;  %v10181_v29 = vpop.permute.xlu0 %10180  ;;  %v10186_v63 = vpop.permute.xlu1 %10185  ;;  %v10311_v62 = vlaneseq }
 0x8ef   : > { %13771 = vmatpush3.bf16.msra.mxu0 %v13768_v2  ;;  %13179 = vmatprep.mubr.msk.f32.mxu0 %vm5266_vm3, %v9698_v3  ;;  %v10207_v2 = vld [vmem:[%s18378_s7 + $0x8] sm:$0x1] }
 0x8f0   : > { %13773 = vmatprep.subr.bf16.mxu0 %v13772_v36  ;;  %v10312_v46 = vshrl.u32 %v10311_v62, 7 }
 0x8f2   : > { %13180 = vmatmul.mubr.msk.f32.vlgmr.msra.gmra.mrb[48].mxu0 %vm5266_vm3, %v9699_v57  ;;  %v10191_v49 = vpop.permute.xlu0 %10190  ;;  %v10217_v4 = vpop.permute.xlu1 %10216 }
 0x8f3   : > { %13775 = vmatpush3.bf16.msra.mxu0 %v13772_v36  ;;  %13182 = vmatprep.mubr.msk.f32.mxu0 %vm5266_vm3, %v9700_v32  ;;  %v10310_v36 = vunpack.c.0.s8 %v10309_v40  ;;  %v17898_v32 = vsub.s32 0, %v10312_v46 }
 0x8f4   : > { %13777 = vmatprep.subr.bf16.mxu0 %v13776_v25 }
 0x8f5   : > { %v17895_v3 = vsub.s32 %v10310_v36, %v10312_v46 }
 0x8f6   : > { %13183 = vmatmul.mubr.msk.f32.gmra.mrb[50].mxu0 %vm5266_vm3, %v9701_v11 }
 0x8f7   : > { %13779 = vmatpush3.bf16.msra.mxu0 %v13776_v25  ;;  %13193 = vmatprep.mubr.msk.f32.mxu0 %vm5266_vm3, %v9816_v8 }
 0x8f8   : > { %13781 = vmatprep.subr.bf16.mxu0 %v13780_v12 }
 0x8fa   : > { %13194 = vmatmul.mubr.msk.f32.vlgmr.msra.gmra.mrb[48].mxu0 %vm5266_vm3, %v9817_v26 }
 0x8fb   : > { %13783 = vmatpush3.bf16.msra.mxu0 %v13780_v12  ;;  %13196 = vmatprep.mubr.msk.f32.mxu0 %vm5266_vm3, %v9818_v60 }
 0x8fc   : > { %13785 = vmatprep.subr.bf16.mxu0 %v13784_v9 }
 0x8fe   : > { %13197 = vmatmul.mubr.msk.f32.gmra.mrb[50].mxu0 %vm5266_vm3, %v9819_v20  ;;  %v10213_v20 = vld [vmem:[%s18379_s8 + $0x8] sm:$0x1] }
 0x8ff   : > { %13787 = vmatpush3.bf16.msra.mxu0 %v13784_v9  ;;  %13207 = vmatprep.mubr.msk.f32.mxu0 %vm5266_vm3, %v9934_v39 }
 0x900   : > { %13789 = vmatprep.subr.bf16.mxu0 %v13788_v27 }
 0x902   : > { %13208 = vmatmul.mubr.msk.f32.vlgmr.msra.gmra.mrb[48].mxu0 %vm5266_vm3, %v9935_v22 }
 0x903   : > { %13791 = vmatpush3.bf16.msra.mxu0 %v13788_v27  ;;  %13210 = vmatprep.mubr.msk.f32.mxu0 %vm5266_vm3, %v9936_v56 }
 0x904   : > { %13793 = vmatprep.subr.bf16.mxu0 %v13792_v23 }
 0x906   : > { %13211 = vmatmul.mubr.msk.f32.gmra.mrb[50].mxu0 %vm5266_vm3, %v9937_v41 }
 0x907   : > { %13795 = vmatpush3.bf16.msra.mxu0 %v13792_v23  ;;  %13221 = vmatprep.mubr.msk.f32.mxu0 %vm5266_vm3, %v10052_v61 }
 0x90a   : > { %13222 = vmatmul.mubr.msk.f32.vlgmr.msra.gmra.mrb[48].mxu0 %vm5266_vm3, %v10053_v59 }
 0x90b   : > { %13224 = vmatprep.mubr.msk.f32.mxu0 %vm5266_vm3, %v10054_v19  ;;  %v17951_v19 = vld [vmem:[%s18381_s10] sm:$0xff] }
 0x90e   : > { %13225 = vmatmul.mubr.msk.f32.gmra.mrb[50].mxu0 %vm5266_vm3, %v10055_v45 }
 0x90f   : > { %13235 = vmatprep.mubr.msk.f32.mxu0 %vm5266_vm3, %v10206_v28 }
 0x9dd   : > { %v13223_v48 = vpop.f32.mrb[48].mxu0 }
 0x9de   : > { %v10194_v34 = vadd.f32 %v13223_v48, %v10181_v29  ;;  %v10146_v54 = vpop.f32.mrb[49].mxu0  ;;  %v17963_v29 = vld [vmem:[%s18381_s10 + $0x8] sm:$0xff]  ;;  %v17973_v48 = vld [vmem:[%s18381_s10 + $0x10] sm:$0xff] }
 0x9df   : > { %v10193_v38 = vadd.f32 %v10176_v55, %v10146_v54 }
 0x9e0   : > { %v10198_v42 = vmax.f32 %v10194_v34, 0.0 }
 0x9e1   : > { %v10197_v43 = vmax.f32 %v10193_v38, 0.0  ;;  %v13226_v53 = vpop.f32.mrb[50].mxu0 }
 0x9e2   : > { %10203 = vst.msk [vmem:[#allocation6 + $0x8] sm:$0xff] %vm10201_vm14, %v10198_v42  ;;  %v10196_v13 = vadd.f32 %v13226_v53, %v10191_v49  ;;  %v10156_v52 = vpop.f32.mrb[51].mxu0 }
 0x9e3   : > { %10202 = vst.msk [vmem:[#allocation6] sm:$0xff] %vm10201_vm14, %v10197_v43  ;;  %v10195_v33 = vadd.f32 %v10186_v63, %v10156_v52  ;;  %v17987_v63 = vld [vmem:[%s18382_s11] sm:$0x7] }
 0x9e4   : > { %v10200_v31 = vmax.f32 %v10196_v13, 0.0 }
 0x9e5   : > { %v10199_v16 = vmax.f32 %v10195_v33, 0.0 }
 0x9e6   : > { %10205 = vst.msk [vmem:[#allocation6 + $0x18] sm:$0xff] %vm10201_vm14, %v10200_v31 }
 0x9e7   : > { %10204 = vst.msk [vmem:[#allocation6 + $0x10] sm:$0xff] %vm10201_vm14, %v10199_v16 }
 0x9e9   : > { %v10209_v5 = vld [vmem:[#allocation6 + $0x8] sm:$0xff] }
 0x9ea   : > { %v10208_v10 = vld [vmem:[#allocation6] sm:$0xff] }
 0x9eb   : > { %v13796_v21 = vpack.c.bf16 %v10209_v5, %v10208_v10 }
 0x9ed   : > { %13797 = vmatprep.subr.bf16.mxu0 %v13796_v21  ;;  %v10211_v14 = vld [vmem:[#allocation6 + $0x18] sm:$0xff] }
 0x9ee   : > { %13799 = vmatpush3.bf16.msra.mxu0 %v13796_v21  ;;  %v10210_v7 = vld [vmem:[#allocation6 + $0x10] sm:$0xff] }
 0x9ef   : > { %v13800_v35 = vpack.c.bf16 %v10211_v14, %v10210_v7 }
 0x9f1   : > { %13801 = vmatprep.subr.bf16.mxu0 %v13800_v35 }
 0x9f2   : > { %13803 = vmatpush3.bf16.msra.mxu0 %v13800_v35 }
 0x9f3   : > { %13238 = vmatprep.subr.mxu0 %v14972_v44 }
 0x9f5   : > { %13236 = vmatmul.mubr.msk.f32.vlgmr.msra.gmra.mrb[52].mxu0 %vm5266_vm3, %v10207_v2  ;;  %vm15000_vm3 = vmmov 0  }
 0x9f6   : > { %13240 = vmatprep.mubr.msk.f32.mxu0 %vm15000_vm3, %v14972_v44  ;;  %13306 = vmatprep.mubr.msk.f32.mxu1 %vm15000_vm3, %v14972_v44 }
 0xac8   : > { %v17893_v50 = vpop.f32.mrb[52].mxu0 }
 0xac9   : > { %v10296_v57 = vpop.f32.mrb[53].mxu0 }
 0xaca   : > { %v10297_v1 = vadd.f32 %v10296_v57, %v10217_v4 }
 0xacc   : > { %v10307_v6 = vcombine.high %v10297_v1, %v10297_v1  ;;  %v10314_v25 = vrot.slane %v10297_v1, %v17895_v3 }
 0xace   : > { %v10321_v47 = vrot.slane %v10307_v6, %v17895_v3  ;;  %v10322_v11 = vcombine.high %v10314_v25, %v10314_v25  ;;  %v10330_v12 = vrot.slane %v10314_v25, %v17895_v3 }
 0xad0   : > { %v10323_v17 = vcombine.high %v10321_v47, %v10321_v47  ;;  %v10337_v15 = vrot.slane %v10321_v47, %v17895_v3  ;;  %v10344_v8 = vrot.slane %v10322_v11, %v17895_v3  ;;  %v10352_v0 = vcombine.high %v10330_v12, %v10330_v12  ;;  %10380 = vst.msk [vmem:[#allocation7] sm:$0x1] %vm10379_vm9, %v10330_v12 }
 0xad1   : > { %v10392_v26 = vrot.slane %v10330_v12, %v17898_v32 }
 0xad2   : > { %v10351_v51 = vrot.slane %v10323_v17, %v17895_v3  ;;  %10381 = vst.msk [vmem:[#allocation7 + $0x4] sm:$0x1] %vm10379_vm9, %v10344_v8  ;;  %10382 = vst.msk [vmem:[#allocation7 + $0x8] sm:$0x1] %vm10379_vm9, %v10352_v0  ;;  %v10354_v37 = vcombine.high %v10344_v8, %v10344_v8  ;;  %v10353_v9 = vcombine.high %v10337_v15, %v10337_v15 }
 0xad3   : > { %10384 = vst.msk [vmem:[#allocation7 + $0x10] sm:$0x1] %vm10379_vm9, %v10337_v15  ;;  %10461 = vrot.lane.b32.xlu1 %v10392_v26, %s15001_s29  ;;  %10425 = vrot.lane.b32.xlu0 %v10392_v26, %s15002_s19  ;;  %v10396_v30 = vrot.slane %v10344_v8, %v17898_v32  ;;  %v10400_v27 = vrot.slane %v10352_v0, %v17898_v32 }
 0xad4   : > { %10385 = vst.msk [vmem:[#allocation7 + $0x14] sm:$0x1] %vm10379_vm9, %v10351_v51  ;;  %10383 = vst.msk [vmem:[#allocation7 + $0xc] sm:$0x1] %vm10379_vm9, %v10354_v37  ;;  %v10355_v60 = vcombine.high %v10351_v51, %v10351_v51  ;;  %v10404_v24 = vrot.slane %v10354_v37, %v17898_v32  ;;  %v10408_v18 = vrot.slane %v10337_v15, %v17898_v32 }
 0xad5   : > { %10386 = vst.msk [vmem:[#allocation7 + $0x18] sm:$0x1] %vm10379_vm9, %v10353_v9  ;;  %v10412_v39 = vrot.slane %v10351_v51, %v17898_v32  ;;  %v10416_v22 = vrot.slane %v10353_v9, %v17898_v32 }
 0xad6   : > { %10387 = vst.msk [vmem:[#allocation7 + $0x1c] sm:$0x1] %vm10379_vm9, %v10355_v60  ;;  %v10420_v23 = vrot.slane %v10355_v60, %v17898_v32 }
 0xad7   : > { %10463 = vrot.lane.b32.xlu1 %v10396_v30, %s15001_s29  ;;  %10427 = vrot.lane.b32.xlu0 %v10396_v30, %s15002_s19 }
 0xadb   : > { %10429 = vrot.lane.b32.xlu1 %v10400_v27, %s15002_s19  ;;  %10221 = vperm.xlu0 %14426, %v10213_v20  }
 0xadf   : > { %10465 = vrot.lane.b32.xlu0 %v10400_v27, %s15001_s29  ;;  %10431 = vrot.lane.b32.xlu1 %v10404_v24, %s15002_s19 }
 0xae3   : > { %10467 = vrot.lane.b32.xlu0 %v10404_v24, %s15001_s29  ;;  %10433 = vrot.lane.b32.xlu1 %v10408_v18, %s15002_s19 }
 0xae7   : > { %10469 = vrot.lane.b32.xlu0 %v10408_v18, %s15001_s29  ;;  %10435 = vrot.lane.b32.xlu1 %v10412_v39, %s15002_s19 }
 0xaeb   : > { %10471 = vrot.lane.b32.xlu0 %v10412_v39, %s15001_s29  ;;  %10437 = vrot.lane.b32.xlu1 %v10416_v22, %s15002_s19 }
 0xaef   : > { %10473 = vrot.lane.b32.xlu0 %v10416_v22, %s15001_s29  ;;  %10439 = vrot.lane.b32.xlu1 %v10420_v23, %s15002_s19 }
 0xaf3   : > { %10475 = vrot.lane.b32.xlu0 %v10420_v23, %s15001_s29 }
 0xb45   : > { %v10462_v56 = vpop.permute.xlu1 %10461  ;;  %v10426_v41 = vpop.permute.xlu0 %10425 }
 0xb46   : > { %10488 = vst.msk [vmem:[#allocation7 + $0x2] sm:$0x1] %vm10379_vm9, %v10462_v56  ;;  %10452 = vst.msk [vmem:[#allocation7 + $0x1] sm:$0x1] %vm10379_vm9, %v10426_v41 }
 0xb49   : > { %v10464_v61 = vpop.permute.xlu1 %10463  ;;  %v10428_v59 = vpop.permute.xlu0 %10427 }
 0xb4a   : > { %10489 = vst.msk [vmem:[#allocation7 + $0x6] sm:$0x1] %vm10379_vm9, %v10464_v61  ;;  %10453 = vst.msk [vmem:[#allocation7 + $0x5] sm:$0x1] %vm10379_vm9, %v10428_v59 }
 0xb4d   : > { %v10430_v45 = vpop.permute.xlu1 %10429  ;;  %v10501_v28 = vld [vmem:[#allocation7] sm:$0x7] }
 0xb4e   : > { %10454 = vst.msk [vmem:[#allocation7 + $0x9] sm:$0x1] %vm10379_vm9, %v10430_v45  ;;  %13239 = vmatpush3.msk.msra.mxu0 %vm10512_vm12, %v10501_v28 }
 0xb4f   : > { %13241 = vmatmul.mubr.msk.f32.vlgmr.msra.gmra.mrb[54].mxu0 %vm10502_vm15, %v17951_v19  ;;  %13249 = vmatprep.subr.mxu0 %v14972_v44 }
 0xb50   : > { %13243 = vmatprep.mubr.msk.f32.mxu0 %vm15000_vm3, %v14972_v44  ;;  %13250 = vmatpush3.msk.msra.mxu0 %vm10512_vm12, %v17987_v63 }
 0xb51   : > { %v10432_v55 = vpop.permute.xlu1 %10431  ;;  %13260 = vmatprep.subr.mxu0 %v14972_v44 }
 0xb52   : > { %10455 = vst.msk [vmem:[#allocation7 + $0xd] sm:$0x1] %vm10379_vm9, %v10432_v55 }
 0xb53   : > { %13244 = vmatmul.mubr.msk.f32.gmra.mrb[56].mxu0 %vm10502_vm15, %v17963_v29 }
 0xb54   : > { %13246 = vmatprep.mubr.msk.f32.mxu0 %vm15000_vm3, %v14972_v44 }
 0xb55   : > { %v10434_v34 = vpop.permute.xlu1 %10433 }
 0xb56   : > { %10456 = vst.msk [vmem:[#allocation7 + $0x11] sm:$0x1] %vm10379_vm9, %v10434_v34 }
 0xb57   : > { %13247 = vmatmul.mubr.msk.f32.gmra.mrb[58].mxu0 %vm10502_vm15, %v17973_v48 }
 0xb58   : > { %13251 = vmatprep.mubr.msk.f32.mxu0 %vm15000_vm3, %v14972_v44 }
 0xb59   : > { %v10436_v54 = vpop.permute.xlu1 %10435 }
 0xb5a   : > { %10457 = vst.msk [vmem:[#allocation7 + $0x15] sm:$0x1] %vm10379_vm9, %v10436_v54  ;;  %v10222_v38 = vpop.permute.xlu0 %10221 }
 0xb5b   : > { %v10302_v42 = vadd.f32 %v17893_v50, %v10222_v38  ;;  %v10692_v50 = vld [vmem:[#allocation7 + $0x4] sm:$0x7] }
 0xb5d   : > { %v10362_v49 = vrot.slane %v10302_v42, %v17895_v3  ;;  %v10438_v43 = vpop.permute.xlu1 %10437 }
 0xb5e   : > { %10458 = vst.msk [vmem:[#allocation7 + $0x19] sm:$0x1] %vm10379_vm9, %v10438_v43  ;;  %v10466_v53 = vpop.permute.xlu0 %10465 }
 0xb5f   : > { %v10369_v13 = vrot.slane %v10362_v49, %v17895_v3  ;;  %10490 = vst.msk [vmem:[#allocation7 + $0xa] sm:$0x1] %vm10379_vm9, %v10466_v53 }
 0xb61   : > { %10388 = vst.msk [vmem:[#allocation7 + $0x20] sm:$0x1] %vm10379_vm9, %v10369_v13  ;;  %v10424_v52 = vrot.slane %v10369_v13, %v17898_v32  ;;  %v10440_v33 = vpop.permute.xlu1 %10439 }
 0xb62   : > { %10459 = vst.msk [vmem:[#allocation7 + $0x1d] sm:$0x1] %vm10379_vm9, %v10440_v33  ;;  %v10468_v31 = vpop.permute.xlu0 %10467 }
 0xb63   : > { %10491 = vst.msk [vmem:[#allocation7 + $0xe] sm:$0x1] %vm10379_vm9, %v10468_v31  ;;  %10477 = vrot.lane.b32.xlu0 %v10424_v52, %s15001_s29  ;;  %10441 = vrot.lane.b32.xlu1 %v10424_v52, %s15002_s19  ;;  %s419_s29 = sand.u32 1, %s14944_s22  }
 0xb64   : > { %s14124_s19 = smul.u32 216, %s419_s29  ;;  %s18329_s25 = scalar_lea.sflag [#allocation10], %s419_s29 }
 0xb66   : > { %v10470_v16 = vpop.permute.xlu0 %10469  ;;  %s18116_s16 = scalar_lea.vmem [#allocation11], %s14124_s19  ;;  %v10870_v8 = vld [vmem:[#allocation7 + $0x8] sm:$0x7]  ;;  %s14892_s19 = scalar_lea.vmem %s14891_s15, 6912 }
 0xb67   : > { %10492 = vst.msk [vmem:[#allocation7 + $0x12] sm:$0x1] %vm10379_vm9, %v10470_v16  ;;  %s12129_s20 = sshll.u32 %s18116_s16, 4  ;;  %s18318_s20 = int_to_ptr.vmem [resolvable:$true] %s12129_s20 }
 0xb68   : > { %s14886_s23 = scalar_lea.vmem %s18318_s20, 3456  ;;  %p14893_p2 = scmp.lt.s32.totalorder %s18318_s20, %s14891_s15 }
 0xb69   : > { %p14887_p6 = scmp.ne.s32.totalorder %s18318_s20, %s14886_s23  ;;  %p14894_p3 = scmp.lt.s32.totalorder %s14892_s19, %s14886_s23 }
 0xb6a   : > { %v10472_v5 = vpop.permute.xlu0 %10471  ;;  %v11048_v10 = vld [vmem:[#allocation7 + $0xc] sm:$0x7] }
 0xb6b   : > { %10493 = vst.msk [vmem:[#allocation7 + $0x16] sm:$0x1] %vm10379_vm9, %v10472_v5  ;;  %13305 = vmatpush3.msk.msra.mxu1 %vm10512_vm12, %v11048_v10  ;;  %p14888_p10 = pnand %p14887_p6, %p18416_p9  ;;  %p14895_p4 = por %p14894_p3, %p14893_p2 }
 0xb6c   : > { %13307 = vmatmul.mubr.msk.f32.vlgmr.msra.gmra.mrb[24].mxu1 %vm10502_vm15, %v17951_v19  ;;  %13326 = vmatprep.subr.mxu1 %v14972_v44 }
 0xb6d   : > { %13309 = vmatprep.mubr.msk.f32.mxu1 %vm15000_vm3, %v14972_v44  ;;  %p14889_p12 = pneg %p14888_p10 }
 0xb6e   : > { %v10474_v21 = vpop.permute.xlu0 %10473  ;;  %v11226_v14 = vld [vmem:[#allocation7 + $0x10] sm:$0x7] }
 0xb6f   : > { %10494 = vst.msk [vmem:[#allocation7 + $0x1a] sm:$0x1] %vm10379_vm9, %v10474_v21  ;;  %13327 = vmatpush3.msk.msra.mxu1 %vm10512_vm12, %v11226_v14  ;;  %p14896_p7 = pnand %p14895_p4, %p14889_p12 }
 0xb70   : > { %13310 = vmatmul.mubr.msk.f32.gmra.mrb[26].mxu1 %vm10502_vm15, %v17963_v29  ;;  %13348 = vmatprep.subr.mxu1 %v14972_v44 }
 0xb71   : > { %13312 = vmatprep.mubr.msk.f32.mxu1 %vm15000_vm3, %v14972_v44 }
 0xb72   : > { %v10476_v7 = vpop.permute.xlu0 %10475  ;;  %v11404_v35 = vld [vmem:[#allocation7 + $0x14] sm:$0x7] }
 0xb73   : > { %10495 = vst.msk [vmem:[#allocation7 + $0x1e] sm:$0x1] %vm10379_vm9, %v10476_v7 }
 0xb74   : > { %13313 = vmatmul.mubr.msk.f32.gmra.mrb[28].mxu1 %vm10502_vm15, %v17973_v48 }
 0xb75   : > { %13328 = vmatprep.mubr.msk.f32.mxu1 %vm15000_vm3, %v14972_v44 }
 0xb76   : > { %v11582_v2 = vld [vmem:[#allocation7 + $0x18] sm:$0x7] }
 0xb78   : > { %13329 = vmatmul.mubr.msk.f32.vlgmr.msra.gmra.mrb[30].mxu1 %vm10502_vm15, %v17951_v19 }
 0xb79   : > { %13349 = vmatpush3.msk.msra.mxu1 %vm10512_vm12, %v11404_v35  ;;  %13331 = vmatprep.mubr.msk.f32.mxu1 %vm15000_vm3, %v14972_v44 }
 0xb7a   : > { %13370 = vmatprep.subr.mxu1 %v14972_v44  ;;  %v11760_v58 = vld [vmem:[#allocation7 + $0x1c] sm:$0x7] }
 0xb7c   : > { %13332 = vmatmul.mubr.msk.f32.gmra.mrb[32].mxu1 %vm10502_vm15, %v17963_v29 }
 0xb7d   : > { %13334 = vmatprep.mubr.msk.f32.mxu1 %vm15000_vm3, %v14972_v44 }
 0xb80   : > { %13335 = vmatmul.mubr.msk.f32.gmra.mrb[34].mxu1 %vm10502_vm15, %v17973_v48 }
 0xb81   : > { %13350 = vmatprep.mubr.msk.f32.mxu1 %vm15000_vm3, %v14972_v44 }
 0xb84   : > { %13351 = vmatmul.mubr.msk.f32.vlgmr.msra.gmra.mrb[36].mxu1 %vm10502_vm15, %v17951_v19 }
 0xb85   : > { %13371 = vmatpush3.msk.msra.mxu1 %vm10512_vm12, %v11582_v2  ;;  %13353 = vmatprep.mubr.msk.f32.mxu1 %vm15000_vm3, %v14972_v44 }
 0xb86   : > { %13392 = vmatprep.subr.mxu1 %v14972_v44 }
 0xb88   : > { %13354 = vmatmul.mubr.msk.f32.gmra.mrb[38].mxu1 %vm10502_vm15, %v17963_v29 }
 0xb89   : > { %13356 = vmatprep.mubr.msk.f32.mxu1 %vm15000_vm3, %v14972_v44 }
 0xb8c   : > { %13357 = vmatmul.mubr.msk.f32.gmra.mrb[40].mxu1 %vm10502_vm15, %v17973_v48 }
 0xb8d   : > { %13372 = vmatprep.mubr.msk.f32.mxu1 %vm15000_vm3, %v14972_v44 }
 0xb90   : > { %13373 = vmatmul.mubr.msk.f32.vlgmr.msra.gmra.mrb[42].mxu1 %vm10502_vm15, %v17951_v19 }
 0xb91   : > { %13393 = vmatpush3.msk.msra.mxu1 %vm10512_vm12, %v11760_v58  ;;  %13375 = vmatprep.mubr.msk.f32.mxu1 %vm15000_vm3, %v14972_v44 }
 0xb92   : > { %13414 = vmatprep.subr.mxu1 %v14972_v44 }
 0xb94   : > { %13376 = vmatmul.mubr.msk.f32.gmra.mrb[44].mxu1 %vm10502_vm15, %v17963_v29 }
 0xb95   : > { %13378 = vmatprep.mubr.msk.f32.mxu1 %vm15000_vm3, %v14972_v44 }
 0xb98   : > { %13379 = vmatmul.mubr.msk.f32.gmra.mrb[46].mxu1 %vm10502_vm15, %v17973_v48 }
 0xb99   : > { %13394 = vmatprep.mubr.msk.f32.mxu1 %vm15000_vm3, %v14972_v44 }
 0xb9c   : > { %13395 = vmatmul.mubr.msk.f32.vlgmr.msra.gmra.mrb[48].mxu1 %vm10502_vm15, %v17951_v19 }
 0xb9d   : > { %13397 = vmatprep.mubr.msk.f32.mxu1 %vm15000_vm3, %v14972_v44 }
 0xba0   : > { %13398 = vmatmul.mubr.msk.f32.gmra.mrb[50].mxu1 %vm10502_vm15, %v17963_v29 }
 0xba1   : > { %13400 = vmatprep.mubr.msk.f32.mxu1 %vm15000_vm3, %v14972_v44 }
 0xba4   : > { %13401 = vmatmul.mubr.msk.f32.gmra.mrb[52].mxu1 %vm10502_vm15, %v17973_v48 }
 0xba5   : > { %13416 = vmatprep.mubr.msk.f32.mxu1 %vm15000_vm3, %v14972_v44 }
 0xbd5   : > { %v10478_v40 = vpop.permute.xlu0 %10477  ;;  %v10442_v62 = vpop.permute.xlu1 %10441 }
 0xbd6   : > { %10496 = vst.msk [vmem:[#allocation7 + $0x22] sm:$0x1] %vm10379_vm9, %v10478_v40  ;;  %10460 = vst.msk [vmem:[#allocation7 + $0x21] sm:$0x1] %vm10379_vm9, %v10442_v62 }
 0xbdd   : > { %v11938_v36 = vld [vmem:[#allocation7 + $0x20] sm:$0x7] }
 0xbde   : > { %13415 = vmatpush3.msk.msra.mxu1 %vm10512_vm12, %v11938_v36 }
 0xbdf   : > { %13417 = vmatmul.mubr.msk.f32.vlgmr.msra.gmra.mrb[54].mxu1 %vm10502_vm15, %v17951_v19 }
 0xbe0   : > { %13419 = vmatprep.mubr.msk.f32.mxu1 %vm15000_vm3, %v14972_v44 }
 0xbe3   : > { %13420 = vmatmul.mubr.msk.f32.gmra.mrb[56].mxu1 %vm10502_vm15, %v17963_v29 }
 0xbe4   : > { %13422 = vmatprep.mubr.msk.f32.mxu1 %vm15000_vm3, %v14972_v44 }
 0xbe7   : > { %13423 = vmatmul.mubr.msk.f32.gmra.mrb[58].mxu1 %vm10502_vm15, %v17973_v48 }
 0xc22   : > { %v10582_v46 = vpop.f32.mrb[54].mxu0 }
 0xc23   : > { %13252 = vmatmul.mubr.msk.f32.vlgmr.msra.gmra.mrb[60].mxu0 %vm10502_vm15, %v10582_v46  ;;  %v13242_v3 = vpop.f32.mrb[55].mxu0 }
 0xc24   : > { %13261 = vmatpush3.msk.msra.mxu0 %vm10512_vm12, %v10692_v50  ;;  %13254 = vmatprep.mubr.msk.f32.mxu0 %vm15000_vm3, %v14972_v44 }
 0xc25   : > { %13271 = vmatprep.subr.mxu0 %v14972_v44 }
 0xc26   : > { %v10587_v4 = vpop.f32.mrb[56].mxu0 }
 0xc27   : > { %13255 = vmatmul.mubr.msk.f32.gmra.mrb[62].mxu0 %vm10502_vm15, %v10587_v4  ;;  %v13245_v57 = vpop.f32.mrb[57].mxu0 }
 0xc28   : > { %13257 = vmatprep.mubr.msk.f32.mxu0 %vm15000_vm3, %v14972_v44 }
 0xc2a   : > { %v10592_v1 = vpop.f32.mrb[58].mxu0 }
 0xc2b   : > { %13258 = vmatmul.mubr.msk.f32.gmra.mrb[64].mxu0 %vm10502_vm15, %v10592_v1  ;;  %v13248_v6 = vpop.f32.mrb[59].mxu0 }
 0xc2c   : > { %13262 = vmatprep.mubr.msk.f32.mxu0 %vm15000_vm3, %v14972_v44 }
 0xc2f   : > { %13263 = vmatmul.mubr.msk.f32.vlgmr.msra.gmra.mrb[66].mxu0 %vm10502_vm15, %v17951_v19 }
 0xc30   : > { %13265 = vmatprep.mubr.msk.f32.mxu0 %vm15000_vm3, %v14972_v44  ;;  %13272 = vmatpush3.msk.msra.mxu0 %vm10512_vm12, %v17987_v63 }
 0xc31   : > { %13282 = vmatprep.subr.mxu0 %v14972_v44 }
 0xc33   : > { %13266 = vmatmul.mubr.msk.f32.gmra.mrb[68].mxu0 %vm10502_vm15, %v17963_v29 }
 0xc34   : > { %13268 = vmatprep.mubr.msk.f32.mxu0 %vm15000_vm3, %v14972_v44 }
 0xc37   : > { %13269 = vmatmul.mubr.msk.f32.gmra.mrb[70].mxu0 %vm10502_vm15, %v17973_v48 }
 0xc38   : > { %13273 = vmatprep.mubr.msk.f32.mxu0 %vm15000_vm3, %v14972_v44 }
 0xc3f   : > { %v11118_v60 = vpop.f32.mrb[24].mxu1 }
 0xc40   : > { %v13308_v30 = vpop.f32.mrb[25].mxu1 }
 0xc43   : > { %v11123_v20 = vpop.f32.mrb[26].mxu1 }
 0xc44   : > { %v13311_v27 = vpop.f32.mrb[27].mxu1 }
 0xc47   : > { %v11128_v24 = vpop.f32.mrb[28].mxu1 }
 0xc48   : > { %v13314_v18 = vpop.f32.mrb[29].mxu1 }
 0xc4b   : > { %v11296_v39 = vpop.f32.mrb[30].mxu1 }
 0xc4c   : > { %v13330_v22 = vpop.f32.mrb[31].mxu1 }
 0xc4f   : > { %v18150_v23 = vpop.f32.mrb[32].mxu1 }
 0xc50   : > { %v13333_v56 = vpop.f32.mrb[33].mxu1 }
 0xc53   : > { %v18152_v41 = vpop.f32.mrb[34].mxu1 }
 0xc54   : > { %v13336_v61 = vpop.f32.mrb[35].mxu1 }
 0xc57   : > { %v18154_v59 = vpop.f32.mrb[36].mxu1 }
 0xcf6   : > { %v10674_v25 = vpop.f32.mrb[60].mxu0 }
 0xcf7   : > { %10688 = vst.msk [vmem:[%s18116_s16] sm:$0xff] %vm496_vm11, %v10674_v25  ;;  %v13253_v32 = vpop.f32.mrb[61].mxu0 }
 0xcfa   : > { %v10679_v47 = vpop.f32.mrb[62].mxu0 }
 0xcfb   : > { %10689 = vst.msk [vmem:[%s18116_s16 + $0x8] sm:$0xff] %vm496_vm11, %v10679_v47  ;;  %v13256_v11 = vpop.f32.mrb[63].mxu0 }
 0xcfe   : > { %v10684_v12 = vpop.f32.mrb[64].mxu0 }
 0xcff   : > { %10690 = vst.msk [vmem:[%s18116_s16 + $0x10] sm:$0xff] %vm496_vm11, %v10684_v12  ;;  %v13259_v17 = vpop.f32.mrb[65].mxu0 }
 0xd02   : > { %v10762_v15 = vpop.f32.mrb[66].mxu0 }
 0xd03   : > { %13274 = vmatmul.mubr.msk.f32.vlgmr.msra.gmra.mrb[72].mxu0 %vm10502_vm15, %v10762_v15  ;;  %v13264_v0 = vpop.f32.mrb[67].mxu0 }
 0xd04   : > { %13283 = vmatpush3.msk.msra.mxu0 %vm10512_vm12, %v10870_v8  ;;  %13276 = vmatprep.mubr.msk.f32.mxu0 %vm15000_vm3, %v14972_v44 }
 0xd05   : > { %13293 = vmatprep.subr.mxu0 %v14972_v44 }
 0xd06   : > { %v10767_v26 = vpop.f32.mrb[68].mxu0 }
 0xd07   : > { %v13267_v51 = vpop.f32.mrb[69].mxu0  ;;  %13277 = vmatmul.mubr.msk.f32.gmra.mrb[74].mxu0 %vm10502_vm15, %v10767_v26 }
 0xd08   : > { %13279 = vmatprep.mubr.msk.f32.mxu0 %vm15000_vm3, %v14972_v44 }
 0xd0a   : > { %v10772_v37 = vpop.f32.mrb[70].mxu0 }
 0xd0b   : > { %v13270_v9 = vpop.f32.mrb[71].mxu0  ;;  %13280 = vmatmul.mubr.msk.f32.gmra.mrb[76].mxu0 %vm10502_vm15, %v10772_v37 }
 0xd0c   : > { %13284 = vmatprep.mubr.msk.f32.mxu0 %vm15000_vm3, %v14972_v44 }
 0xd0f   : > { %13285 = vmatmul.mubr.msk.f32.vlgmr.msra.gmra.mrb[78].mxu0 %vm10502_vm15, %v17951_v19  ;;  %v13352_v19 = vpop.f32.mrb[37].mxu1 }
 0xd10   : > { %13287 = vmatprep.mubr.msk.f32.mxu0 %vm15000_vm3, %v14972_v44  ;;  %13294 = vmatpush3.msk.msra.mxu0 %vm10512_vm12, %v17987_v63  ;;  %v18156_v45 = vpop.f32.mrb[38].mxu1 }
 0xd11   : > { %13315 = vmatprep.subr.mxu0 %v14972_v44  ;;  %v13355_v28 = vpop.f32.mrb[39].mxu1 }
 0xd13   : > { %13288 = vmatmul.mubr.msk.f32.gmra.mrb[80].mxu0 %vm10502_vm15, %v17963_v29  ;;  %v18158_v29 = vpop.f32.mrb[40].mxu1 }
 0xd14   : > { %13290 = vmatprep.mubr.msk.f32.mxu0 %vm15000_vm3, %v14972_v44  ;;  %v13358_v55 = vpop.f32.mrb[41].mxu1 }
 0xd17   : > { %13291 = vmatmul.mubr.msk.f32.gmra.mrb[82].mxu0 %vm10502_vm15, %v17973_v48  ;;  %v18160_v48 = vpop.f32.mrb[42].mxu1 }
 0xd18   : > { %13295 = vmatprep.mubr.msk.f32.mxu0 %vm15000_vm3, %v14972_v44  ;;  %v13374_v34 = vpop.f32.mrb[43].mxu1 }
 0xd19   : > { %v18162_v54 = vpop.f32.mrb[44].mxu1 }
 0xd1a   : > { %v13377_v38 = vpop.f32.mrb[45].mxu1 }
 0xd1b   : > { %v18164_v42 = vpop.f32.mrb[46].mxu1 }
 0xd1c   : > { %v13380_v49 = vpop.f32.mrb[47].mxu1 }
 0xd1d   : > { %v18166_v43 = vpop.f32.mrb[48].mxu1 }
 0xd1e   : > { %v13396_v53 = vpop.f32.mrb[49].mxu1 }
 0xd1f   : > { %v18168_v13 = vpop.f32.mrb[50].mxu1 }
 0xd20   : > { %v13399_v52 = vpop.f32.mrb[51].mxu1 }
 0xd21   : > { %v18170_v33 = vpop.f32.mrb[52].mxu1 }
 0xd22   : > { %v13402_v31 = vpop.f32.mrb[53].mxu1 }
 0xd23   : > { %v18172_v16 = vpop.f32.mrb[54].mxu1 }
 0xd24   : > { %v13418_v5 = vpop.f32.mrb[55].mxu1 }
 0xd25   : > { %v18174_v10 = vpop.f32.mrb[56].mxu1 }
 0xd26   : > { %v13421_v21 = vpop.f32.mrb[57].mxu1 }
 0xd27   : > { %v18176_v14 = vpop.f32.mrb[58].mxu1 }
 0xd28   : > { %v13424_v7 = vpop.f32.mrb[59].mxu1 }
 0xdd6   : > { %v10851_v35 = vpop.f32.mrb[72].mxu0 }
 0xdd7   : > { %12553 = vst.msk [vmem:[%s18116_s16 + $0x18] sm:$0xff] %vm496_vm11, %v10851_v35  ;;  %v13275_v2 = vpop.f32.mrb[73].mxu0 }
 0xdda   : > { %v10856_v58 = vpop.f32.mrb[74].mxu0 }
 0xddb   : > { %12554 = vst.msk [vmem:[%s18116_s16 + $0x20] sm:$0xff] %vm496_vm11, %v10856_v58  ;;  %v13278_v40 = vpop.f32.mrb[75].mxu0 }
 0xdde   : > { %v10861_v62 = vpop.f32.mrb[76].mxu0 }
 0xddf   : > { %12555 = vst.msk [vmem:[%s18116_s16 + $0x28] sm:$0xff] %vm496_vm11, %v10861_v62  ;;  %v13281_v36 = vpop.f32.mrb[77].mxu0 }
 0xde2   : > { %v10940_v46 = vpop.f32.mrb[78].mxu0 }
 0xde3   : > { %v13286_v50 = vpop.f32.mrb[79].mxu0  ;;  %13296 = vmatmul.mubr.msk.f32.vlgmr.msra.gmra.mrb[84].mxu0 %vm10502_vm15, %v10940_v46 }
 0xde4   : > { %13316 = vmatpush3.msk.msra.mxu0 %vm10512_vm12, %v17987_v63  ;;  %13298 = vmatprep.mubr.msk.f32.mxu0 %vm15000_vm3, %v14972_v44 }
 0xde5   : > { %13337 = vmatprep.subr.mxu0 %v14972_v44 }
 0xde6   : > { %v10945_v3 = vpop.f32.mrb[80].mxu0 }
 0xde7   : > { %v13289_v4 = vpop.f32.mrb[81].mxu0  ;;  %13299 = vmatmul.mubr.msk.f32.gmra.mrb[86].mxu0 %vm10502_vm15, %v10945_v3 }
 0xde8   : > { %13301 = vmatprep.mubr.msk.f32.mxu0 %vm15000_vm3, %v14972_v44 }
 0xdea   : > { %v10950_v57 = vpop.f32.mrb[82].mxu0 }
 0xdeb   : > { %v13292_v1 = vpop.f32.mrb[83].mxu0  ;;  %13302 = vmatmul.mubr.msk.f32.gmra.mrb[88].mxu0 %vm10502_vm15, %v10950_v57 }
 0xdec   : > { %13317 = vmatprep.mubr.msk.f32.mxu0 %vm15000_vm3, %v14972_v44 }
 0xdef   : > { %13318 = vmatmul.mubr.msk.f32.vlgmr.msra.gmra.mrb[90].mxu0 %vm10502_vm15, %v11118_v60 }
 0xdf0   : > { %13338 = vmatpush3.msk.msra.mxu0 %vm10512_vm12, %v17987_v63  ;;  %13320 = vmatprep.mubr.msk.f32.mxu0 %vm15000_vm3, %v14972_v44 }
 0xdf1   : > { %13359 = vmatprep.subr.mxu0 %v14972_v44 }
 0xdf3   : > { %13321 = vmatmul.mubr.msk.f32.gmra.mrb[92].mxu0 %vm10502_vm15, %v11123_v20 }
 0xdf4   : > { %13323 = vmatprep.mubr.msk.f32.mxu0 %vm15000_vm3, %v14972_v44 }
 0xdf7   : > { %13324 = vmatmul.mubr.msk.f32.gmra.mrb[94].mxu0 %vm10502_vm15, %v11128_v24 }
 0xdf8   : > { %13339 = vmatprep.mubr.msk.f32.mxu0 %vm15000_vm3, %v14972_v44 }
 0xdfb   : > { %13340 = vmatmul.mubr.msk.f32.vlgmr.msra.gmra.mrb[96].mxu0 %vm10502_vm15, %v11296_v39 }
 0xdfc   : > { %13360 = vmatpush3.msk.msra.mxu0 %vm10512_vm12, %v17987_v63  ;;  %13342 = vmatprep.mubr.msk.f32.mxu0 %vm15000_vm3, %v14972_v44 }
 0xdfd   : > { %13381 = vmatprep.subr.mxu0 %v14972_v44 }
 0xdff   : > { %13343 = vmatmul.mubr.msk.f32.gmra.mrb[98].mxu0 %vm10502_vm15, %v18150_v23 }
 0xe00   : > { %13345 = vmatprep.mubr.msk.f32.mxu0 %vm15000_vm3, %v14972_v44 }
 0xe03   : > { %13346 = vmatmul.mubr.msk.f32.gmra.mrb[100].mxu0 %vm10502_vm15, %v18152_v41 }
 0xe04   : > { %13361 = vmatprep.mubr.msk.f32.mxu0 %vm15000_vm3, %v14972_v44 }
 0xe07   : > { %13362 = vmatmul.mubr.msk.f32.vlgmr.msra.gmra.mrb[102].mxu0 %vm10502_vm15, %v18154_v59 }
 0xe08   : > { %13382 = vmatpush3.msk.msra.mxu0 %vm10512_vm12, %v17987_v63  ;;  %13364 = vmatprep.mubr.msk.f32.mxu0 %vm15000_vm3, %v14972_v44 }
 0xe09   : > { %13403 = vmatprep.subr.mxu0 %v14972_v44 }
 0xe0b   : > { %13365 = vmatmul.mubr.msk.f32.gmra.mrb[104].mxu0 %vm10502_vm15, %v18156_v45 }
 0xe0c   : > { %13367 = vmatprep.mubr.msk.f32.mxu0 %vm15000_vm3, %v14972_v44 }
 0xe0f   : > { %13368 = vmatmul.mubr.msk.f32.gmra.mrb[106].mxu0 %vm10502_vm15, %v18158_v29 }
 0xe10   : > { %13383 = vmatprep.mubr.msk.f32.mxu0 %vm15000_vm3, %v14972_v44 }
 0xe13   : > { %13384 = vmatmul.mubr.msk.f32.vlgmr.msra.gmra.mrb[108].mxu0 %vm10502_vm15, %v18160_v48 }
 0xe14   : > { %13404 = vmatpush3.msk.msra.mxu0 %vm10512_vm12, %v17987_v63  ;;  %13386 = vmatprep.mubr.msk.f32.mxu0 %vm15000_vm3, %v14972_v44 }
 0xe15   : > { %13425 = vmatprep.subr.mxu0 %v14972_v44 }
 0xe17   : > { %13387 = vmatmul.mubr.msk.f32.gmra.mrb[110].mxu0 %vm10502_vm15, %v18162_v54 }
 0xe18   : > { %13389 = vmatprep.mubr.msk.f32.mxu0 %vm15000_vm3, %v14972_v44 }
 0xe1b   : > { %13390 = vmatmul.mubr.msk.f32.gmra.mrb[112].mxu0 %vm10502_vm15, %v18164_v42 }
 0xe1c   : > { %13405 = vmatprep.mubr.msk.f32.mxu0 %vm15000_vm3, %v14972_v44 }
 0xe1f   : > { %13406 = vmatmul.mubr.msk.f32.vlgmr.msra.gmra.mrb[114].mxu0 %vm10502_vm15, %v18166_v43 }
 0xe20   : > { %13426 = vmatpush3.msk.msra.mxu0 %vm10512_vm12, %v17987_v63  ;;  %13408 = vmatprep.mubr.msk.f32.mxu0 %vm15000_vm3, %v14972_v44 }
 0xe23   : > { %13409 = vmatmul.mubr.msk.f32.gmra.mrb[116].mxu0 %vm10502_vm15, %v18168_v13 }
 0xe24   : > { %13411 = vmatprep.mubr.msk.f32.mxu0 %vm15000_vm3, %v14972_v44 }
 0xe27   : > { %13412 = vmatmul.mubr.msk.f32.gmra.mrb[118].mxu0 %vm10502_vm15, %v18170_v33 }
 0xe28   : > { %13427 = vmatprep.mubr.msk.f32.mxu0 %vm15000_vm3, %v14972_v44 }
 0xe2b   : > { %13428 = vmatmul.mubr.msk.f32.vlgmr.msra.gmra.mrb[120].mxu0 %vm10502_vm15, %v18172_v16 }
 0xe2c   : > { %13430 = vmatprep.mubr.msk.f32.mxu0 %vm15000_vm3, %v14972_v44 }
 0xe2f   : > { %13431 = vmatmul.mubr.msk.f32.gmra.mrb[122].mxu0 %vm10502_vm15, %v18174_v10 }
 0xe30   : > { %13433 = vmatprep.mubr.msk.f32.mxu0 %vm15000_vm3, %v14972_v44 }
 0xe33   : > { %13434 = vmatmul.mubr.msk.f32.gmra.mrb[124].mxu0 %vm10502_vm15, %v18176_v14 }
 0xeb6   : > { %v11029_v63 = vpop.f32.mrb[84].mxu0 }
 0xeb7   : > { %12564 = vst.msk [vmem:[%s18116_s16 + $0x30] sm:$0xff] %vm496_vm11, %v11029_v63  ;;  %v13297_v6 = vpop.f32.mrb[85].mxu0 }
 0xeba   : > { %v11034_v25 = vpop.f32.mrb[86].mxu0 }
 0xebb   : > { %12565 = vst.msk [vmem:[%s18116_s16 + $0x38] sm:$0xff] %vm496_vm11, %v11034_v25  ;;  %v13300_v32 = vpop.f32.mrb[87].mxu0 }
 0xebe   : > { %v11039_v47 = vpop.f32.mrb[88].mxu0 }
 0xebf   : > { %12566 = vst.msk [vmem:[%s18116_s16 + $0x40] sm:$0xff] %vm496_vm11, %v11039_v47  ;;  %v13303_v11 = vpop.f32.mrb[89].mxu0 }
 0xec2   : > { %v11207_v12 = vpop.f32.mrb[90].mxu0 }
 0xec3   : > { %12575 = vst.msk [vmem:[%s18116_s16 + $0x48] sm:$0xff] %vm496_vm11, %v11207_v12  ;;  %v13319_v44 = vpop.f32.mrb[91].mxu0 }
 0xec6   : > { %v11212_v17 = vpop.f32.mrb[92].mxu0 }
 0xec7   : > { %12576 = vst.msk [vmem:[%s18116_s16 + $0x50] sm:$0xff] %vm496_vm11, %v11212_v17  ;;  %v13322_v15 = vpop.f32.mrb[93].mxu0 }
 0xeca   : > { %v11217_v8 = vpop.f32.mrb[94].mxu0 }
 0xecb   : > { %12577 = vst.msk [vmem:[%s18116_s16 + $0x58] sm:$0xff] %vm496_vm11, %v11217_v8  ;;  %v13325_v0 = vpop.f32.mrb[95].mxu0 }
 0xece   : > { %v11385_v26 = vpop.f32.mrb[96].mxu0 }
 0xecf   : > { %12586 = vst.msk [vmem:[%s18116_s16 + $0x60] sm:$0xff] %vm496_vm11, %v11385_v26  ;;  %v13341_v51 = vpop.f32.mrb[97].mxu0 }
 0xed2   : > { %v11390_v37 = vpop.f32.mrb[98].mxu0 }
 0xed3   : > { %12587 = vst.msk [vmem:[%s18116_s16 + $0x68] sm:$0xff] %vm496_vm11, %v11390_v37  ;;  %v13344_v9 = vpop.f32.mrb[99].mxu0 }
 0xed6   : > { %v11395_v60 = vpop.f32.mrb[100].mxu0 }
 0xed7   : > { %12588 = vst.msk [vmem:[%s18116_s16 + $0x70] sm:$0xff] %vm496_vm11, %v11395_v60  ;;  %v13347_v30 = vpop.f32.mrb[101].mxu0 }
 0xeda   : > { %v11563_v20 = vpop.f32.mrb[102].mxu0 }
 0xedb   : > { %12597 = vst.msk [vmem:[%s18116_s16 + $0x78] sm:$0xff] %vm496_vm11, %v11563_v20  ;;  %v13363_v27 = vpop.f32.mrb[103].mxu0 }
 0xede   : > { %v11568_v24 = vpop.f32.mrb[104].mxu0 }
 0xedf   : > { %12598 = vst.msk [vmem:[%s18116_s16 + $0x80] sm:$0xff] %vm496_vm11, %v11568_v24  ;;  %v13366_v18 = vpop.f32.mrb[105].mxu0 }
 0xee2   : > { %v11573_v39 = vpop.f32.mrb[106].mxu0 }
 0xee3   : > { %12599 = vst.msk [vmem:[%s18116_s16 + $0x88] sm:$0xff] %vm496_vm11, %v11573_v39  ;;  %v13369_v22 = vpop.f32.mrb[107].mxu0 }
 0xee6   : > { %v11741_v23 = vpop.f32.mrb[108].mxu0 }
 0xee7   : > { %12608 = vst.msk [vmem:[%s18116_s16 + $0x90] sm:$0xff] %vm496_vm11, %v11741_v23  ;;  %v13385_v56 = vpop.f32.mrb[109].mxu0 }
 0xeea   : > { %v11746_v41 = vpop.f32.mrb[110].mxu0 }
 0xeeb   : > { %12609 = vst.msk [vmem:[%s18116_s16 + $0x98] sm:$0xff] %vm496_vm11, %v11746_v41  ;;  %v13388_v61 = vpop.f32.mrb[111].mxu0 }
 0xeee   : > { %v11751_v59 = vpop.f32.mrb[112].mxu0 }
 0xeef   : > { %12610 = vst.msk [vmem:[%s18116_s16 + $0xa0] sm:$0xff] %vm496_vm11, %v11751_v59  ;;  %v13391_v19 = vpop.f32.mrb[113].mxu0 }
 0xef2   : > { %v11919_v45 = vpop.f32.mrb[114].mxu0 }
 0xef3   : > { %12619 = vst.msk [vmem:[%s18116_s16 + $0xa8] sm:$0xff] %vm496_vm11, %v11919_v45  ;;  %v13407_v28 = vpop.f32.mrb[115].mxu0 }
 0xef6   : > { %v11924_v29 = vpop.f32.mrb[116].mxu0 }
 0xef7   : > { %12620 = vst.msk [vmem:[%s18116_s16 + $0xb0] sm:$0xff] %vm496_vm11, %v11924_v29  ;;  %v13410_v55 = vpop.f32.mrb[117].mxu0 }
 0xefa   : > { %v11929_v48 = vpop.f32.mrb[118].mxu0 }
 0xefb   : > { %12621 = vst.msk [vmem:[%s18116_s16 + $0xb8] sm:$0xff] %vm496_vm11, %v11929_v48  ;;  %v13413_v34 = vpop.f32.mrb[119].mxu0 }
 0xefe   : > { %v12097_v54 = vpop.f32.mrb[120].mxu0 }
 0xeff   : > { %12630 = vst.msk [vmem:[%s18116_s16 + $0xc0] sm:$0xff] %vm496_vm11, %v12097_v54  ;;  %v13429_v38 = vpop.f32.mrb[121].mxu0 }
 0xf02   : > { %v12102_v42 = vpop.f32.mrb[122].mxu0 }
 0xf03   : > { %12631 = vst.msk [vmem:[%s18116_s16 + $0xc8] sm:$0xff] %vm496_vm11, %v12102_v42  ;;  %v13432_v49 = vpop.f32.mrb[123].mxu0 }
 0xf06   : > { %v12107_v43 = vpop.f32.mrb[124].mxu0 }
 0xf07   : > { %12632 = vst.msk [vmem:[%s18116_s16 + $0xd0] sm:$0xff] %vm496_vm11, %v12107_v43  ;;  %v13435_v53 = vpop.f32.mrb[125].mxu0 }
 0xf08   : > { %14899 = shalt.err (!%p14896_p7)
}
 0xf09   : > { %s14900_s29 = scalar_lea.hbm %s18323_s28, 3456  ;;  %s14904_s18 = scalar_lea.hbm %s18383_s12, 6912 }
 0xf0a   : > { %p14901_p8 = scmp.ne.s32.totalorder %s18323_s28, %s14900_s29  ;;  %p14905_p1 = scmp.lt.u32.totalorder %s18323_s28, %s18383_s12 }
 0xf0b   : > { %p14906_p0 = scmp.lt.u32.totalorder %s14904_s18, %s14900_s29  ;;  %p14908_p6 = scmp.lt.u32.totalorder %s14900_s29, %s18323_s28 }
 0xf0c   : > { %p14902_p11 = pnand %p14901_p8, %p18416_p9 }
 0xf0d   : > { %p14907_p5 = por %p14906_p0, %p14905_p1 }
 0xf0e   : > { %p14903_p13 = pneg %p14902_p11 }
 0xf0f   : > { %p14909_p10 = por %p14908_p6, %p14907_p5 }
 0xf11   : > { %p14910_p12 = pnand %p14909_p10, %p14903_p13 }
 0xf13   : > { %14913 = shalt.err (!%p14910_p12)
}
 0xf14   : > { %s15004_s23 = smov 128   ;;  %s18417_s15 = smov 8  }
 0xf15   : > { %14131 = dma.vmem_to_hbm [thread:$0]  (%p18416_p9), %s18318_s20, 3456, %s18323_s28, %s18329_s25, %s15004_s23, %s15004_s23, %s18417_s15  }
 0xf16 PF: > { %p14143_p2 = scmp.ge.s32.totalorder %s14952_s24, 2  ;;  %s12144_s19 = sand.u32 1, %s14940_s21  }
 0xf17   : > { %p18418_p3 = scmp.ne.s32.totalorder %s18404_s14, 0  ;;  %s12145_s29 = scalar_lea.sflag [#allocation10], %s12144_s19 }
 0xf19   : > { %p14138_p4 = pnand %p14143_p2, %p18418_p3 }
 0xf1b   : > { %14935 = dma.done.wait (!%p14138_p4), %s12145_s29, 3456  }
 0xf1c   : > { %14937 = vsyncadd (!%p14138_p4), %s12145_s29, 4294963840  ;;  %s18419_s16 = sld [smem:[#allocation14_spill]]  ;;  %s18420_s23 = sld [smem:[#allocation15_spill]] }
 0xf1d   : > { %p23_p7 = scmp.ge.s32.totalorder %s15095_s27, 4   ;;  %s18421_s21 = smov %s14944_s22 }
 0xf1e   : > { %s18423_s24 = smov %s15095_s27 }
 0xf1f   :  { %25 = sbr.rel (!%p23_p7) target bundleno = 4 (0x4), region = 148 }
 0xf22   : > { %s18422_s22 = smov %s18419_s16 }
 0xf26   :  { %12150 = vsyncpa [#allocation9], 1 }
 0xf27   :  { %12152 = vsyncpa [#allocation9 + $0x1], 1 }
 0xf28   :  { %12153 = vsyncpa [#allocation10], 1 }
 0xf29   :  { %12155 = vsyncpa [#allocation10 + $0x1], 1 }

</bundles_post_ra>
